<compile_context>
chip_gen: v6e
topology: v6e:2x2x1
jax: 0.10.0
libtpu: 0.0.40
codegen_flags: <defaults>
</compile_context>

<pallas_src>
import math

import jax
import jax.numpy as jnp
from jax.experimental import pallas as pl
from jax.experimental.pallas import tpu as pltpu


# ----------------------------------------------------------------------------
# Glue: unfold / fold (pure data movement, kept in plain JAX)
# ----------------------------------------------------------------------------
def extract_image_patches(x, k):
    """torch.nn.Unfold(kernel=k, stride=1, dilation=1) with 'same' zero padding.
    x: (B, C, H, W) -> (B, C*k*k, H*W), patch features ordered (c, di, dj)."""
    B, C, H, W = x.shape
    pad = (k - 1) // 2
    xp = jnp.pad(x, ((0, 0), (0, 0), (pad, k - 1 - pad), (pad, k - 1 - pad)))
    cols = []
    for di in range(k):
        for dj in range(k):
            cols.append(xp[:, :, di:di + H, dj:dj + W])
    patches = jnp.stack(cols, axis=2)          # (B, C, k*k, H, W)
    return patches.reshape(B, C * k * k, H * W)


def reverse_patches(x, out_size, k, pad):
    """torch.nn.Fold(output_size=out_size, kernel=k, padding=pad, stride=1).
    x: (B, C*k*k, H*W) -> (B, C, H, W) with overlap summation."""
    H, W = out_size
    B, CK, _ = x.shape
    C = CK // (k * k)
    patches = x.reshape(B, C, k, k, H, W)
    out = jnp.zeros((B, C, H + 2 * pad, W + 2 * pad), x.dtype)
    for di in range(k):
        for dj in range(k):
            out = out.at[:, :, di:di + H, dj:dj + W].add(patches[:, :, di, dj])
    return out[:, :, pad:pad + H, pad:pad + W]


# ----------------------------------------------------------------------------
# Weight padding helpers (head_dim -> hd_pad, dh -> dh_pad) -- zeros, numerics
# are unchanged because padded q/k/v columns and proj rows are all zero.
# ----------------------------------------------------------------------------
def _pad_tail(w, axis, new_size):
    pad = [(0, 0)] * w.ndim
    pad[axis] = (0, new_size - w.shape[axis])
    return jnp.pad(w, pad)


def _pad_heads(w, axis, num_heads, hd, hd_pad):
    """Pad a head-structured axis (size num_heads*hd) to num_heads*hd_pad,
    zero-filling the extra per-head slots (head-major ordering preserved)."""
    shape = list(w.shape)
    shape[axis:axis + 1] = [num_heads, hd]
    w = w.reshape(shape)
    pad = [(0, 0)] * w.ndim
    pad[axis + 1] = (0, hd_pad - hd)
    w = jnp.pad(w, pad)
    shape2 = list(w.shape)
    shape2[axis:axis + 2] = [num_heads * hd_pad]
    return w.reshape(shape2)


# ----------------------------------------------------------------------------
# Pallas kernel: one grid step handles `tile_rows` token rows
# ----------------------------------------------------------------------------
def make_mhca_kernel(num_heads, hd_pad, chunk, seg_per_tile, eps=1e-5):
    f32, bf16 = jnp.float32, jnp.bfloat16
    R = seg_per_tile * chunk          # token rows per tile
    dh_pad = num_heads * hd_pad       # padded reduced width (lane-dense, 128-mult)

    def layer_norm(x, g, b):
        # single-pass: mean and mean-of-squares computed together
        m = jnp.mean(x, axis=-1, keepdims=True)
        m2 = jnp.mean(x * x, axis=-1, keepdims=True)
        var = jnp.maximum(m2 - m * m, 0.0)
        return (x - m) * jax.lax.rsqrt(var + eps) * g + b

    def split_heads(t):
        """(R, dh_pad) -> (num_heads*seg_per_tile, chunk, hd_pad), head-major batch.
        Per-head slices are 16-lane aligned; reshapes only split leading dims."""
        parts = [t[:, h * hd_pad:(h + 1) * hd_pad].reshape(1, seg_per_tile, chunk, hd_pad)
                 for h in range(num_heads)]
        return jnp.concatenate(parts, axis=0).reshape(num_heads * seg_per_tile, chunk, hd_pad)

    def merge_heads(o):
        """(num_heads*seg_per_tile, chunk, hd_pad) -> (R, dh_pad)."""
        o = o.reshape(num_heads, R, hd_pad)
        return jnp.concatenate([o[h] for h in range(num_heads)], axis=-1)

    def kernel(xq_ref, xkv_ref,
               ln1_g_ref, ln1_b_ref,
               wred_ref, wq_ref, wkv_ref,
               wproj_ref, bproj_ref,
               ln2_g_ref, ln2_b_ref,
               wfc1_ref, bfc1_ref, wfc2_ref, bfc2_ref,
               out_ref):
        xq = xq_ref[...].astype(f32)             # (R, dim) from bf16 stream
        xkv = xkv_ref[...].astype(f32)

        # norm1 + reduce on stacked [xq; xkv]: one LN pass, one matmul for both streams
        stacked = jnp.concatenate([xq, xkv], axis=0)                       # (2R, dim)
        sn = layer_norm(stacked, ln1_g_ref[...], ln1_b_ref[...]).astype(bf16)
        red = jnp.dot(sn, wred_ref[...], preferred_element_type=f32).astype(bf16)  # (2R, dh_pad)
        xq_r, xkv_r = red[:R], red[R:]

        # q (attention scale pre-folded into W_q), fused k|v projection
        q = jnp.dot(xq_r, wq_ref[...], preferred_element_type=f32).astype(bf16)    # (R, dh_pad)
        kv = jnp.dot(xkv_r, wkv_ref[...], preferred_element_type=f32)              # (R, 2*dh_pad)
        k = kv[:, :dh_pad].astype(bf16)
        v = kv[:, dh_pad:].astype(bf16)

        # segmented multi-head cross attention: all (head, segment) blocks batched
        # into ONE scores einsum + ONE wide softmax + ONE P@V einsum.
        qh, kh, vh = split_heads(q), split_heads(k), split_heads(v)   # (H*S, chunk, hd_pad)
        s = jnp.einsum('bqd,bkd->bqk', qh, kh, preferred_element_type=f32)
        s = s - jnp.max(s, axis=-1, keepdims=True)
        e = jnp.exp(s)
        p = e * pl.reciprocal(jnp.sum(e, axis=-1, keepdims=True), approx=True)
        o = jnp.einsum('bqk,bkd->bqd', p.astype(bf16), vh,
                       preferred_element_type=f32).astype(bf16)
        attn = merge_heads(o)                                          # (R, dh_pad) bf16

        # proj back to dim (padded rows of W_proj are zero), residual with raw x_kv
        proj = jnp.dot(attn, wproj_ref[...], preferred_element_type=f32) + bproj_ref[...]
        x = xkv + proj

        # MLP branch: norm2 -> fc1 -> ReLU -> fc2, residual
        x_n2 = layer_norm(x, ln2_g_ref[...], ln2_b_ref[...]).astype(bf16)
        h1 = jnp.maximum(
            jnp.dot(x_n2, wfc1_ref[...], preferred_element_type=f32) + bfc1_ref[...],
            0.0)
        h2 = jnp.dot(h1.astype(bf16), wfc2_ref[...],
                     preferred_element_type=f32) + bfc2_ref[...]
        out_ref[...] = x + h2

    return kernel


# ----------------------------------------------------------------------------
# Wrapper
# ----------------------------------------------------------------------------
def transformer_mhca_apply(x1, x2, params, *, num_heads=8, split_segment=4, ksize=3,
                           target_tile_rows=None, vmem_limit_bytes=None):
    B, C, H, W = x2.shape
    N = H * W
    dim = C * ksize * ksize
    dh = dim // 2
    head_dim = dh // num_heads
    hd_pad = max(16, 1 << (head_dim - 1).bit_length())   # per-head width padded to pow2 >= 16
    dh_pad = num_heads * hd_pad
    scale = (dim // num_heads) ** (-0.5)                  # reference scale uses pre-reduce dim
    chunk = math.ceil(N / split_segment)
    assert N % chunk == 0, "sequence length must split evenly into segments"
    BN = B * N
    num_seg_total = BN // chunk
    hid = params['w_fc1'].shape[0]

    # --- per-generation tile / VMEM selection -------------------------------
    kind = jax.devices()[0].device_kind.lower()
    if target_tile_rows is None:
        target_tile_rows = 2048 if 'v6' in kind else 1024
    if vmem_limit_bytes is None:
        if 'v6' in kind:
            vmem_limit_bytes = 96 * 1024 * 1024
        elif 'v5' in kind:
            vmem_limit_bytes = 64 * 1024 * 1024
        else:                                   # v7x (64 MiB physical) and default
            vmem_limit_bytes = 48 * 1024 * 1024

    seg_per_tile = num_seg_total
    for d in range(num_seg_total, 0, -1):
        if num_seg_total % d:
            continue
        rows = d * chunk
        if rows <= target_tile_rows and rows % 8 == 0:
            seg_per_tile = d
            break
    tile_rows = seg_per_tile * chunk
    assert tile_rows % chunk == 0 and BN % tile_rows == 0
    num_tiles = BN // tile_rows

    # --- inputs: unfold + permute(0,2,1), batch fused into the row dimension,
    #     streamed as bf16 (halves input HBM bytes) ----------------------------
    xq = jnp.transpose(extract_image_patches(x1, ksize), (0, 2, 1)
                       ).reshape(BN, dim).astype(jnp.bfloat16)
    xkv = jnp.transpose(extract_image_patches(x2, ksize), (0, 2, 1)
                        ).reshape(BN, dim).astype(jnp.bfloat16)

    # --- weight prep: pre-transpose (kernel computes x @ W), pad, fold scale,
    #     cast to bf16 once outside the kernel --------------------------------
    row = lambda v: jnp.asarray(v, jnp.float32).reshape(1, -1)
    f32w = lambda w: jnp.asarray(w, jnp.float32)
    bf16 = jnp.bfloat16

    wred = _pad_tail(f32w(params['w_reduce']).T, 1, dh_pad).astype(bf16)          # (dim, dh_pad)
    wq = _pad_tail(_pad_heads(f32w(params['w_q']).T * scale, 1,
                              num_heads, head_dim, hd_pad), 0, dh_pad).astype(bf16)  # (dh_pad, dh_pad)
    wk = _pad_tail(_pad_heads(f32w(params['w_k']).T, 1, num_heads, head_dim, hd_pad), 0, dh_pad)
    wv = _pad_tail(_pad_heads(f32w(params['w_v']).T, 1, num_heads, head_dim, hd_pad), 0, dh_pad)
    wkv = jnp.concatenate([wk, wv], axis=1).astype(bf16)                          # (dh_pad, 2*dh_pad)
    wproj = _pad_heads(f32w(params['w_proj']).T, 0, num_heads, head_dim, hd_pad).astype(bf16)  # (dh_pad, dim)
    wfc1 = f32w(params['w_fc1']).T.astype(bf16)                                   # (dim, hid)
    wfc2 = f32w(params['w_fc2']).T.astype(bf16)                                   # (hid, dim)

    weight_args = (
        row(params['ln1_g']), row(params['ln1_b']),
        wred, wq, wkv,
        wproj, row(params['b_proj']),
        row(params['ln2_g']), row(params['ln2_b']),
        wfc1, row(params['b_fc1']), wfc2, row(params['b_fc2']),
    )
    args = (xq, xkv) + weight_args

    # --- specs ---------------------------------------------------------------
    row_in = pl.BlockSpec((tile_rows, dim), lambda i: (i, 0))
    resident = lambda a: pl.BlockSpec(a.shape, lambda i: (0, 0))   # weights stay VMEM-resident
    in_specs = [row_in, row_in] + [resident(a) for a in weight_args]
    out_spec = pl.BlockSpec((tile_rows, dim), lambda i: (i, 0))

    # --- cost hint for XLA scheduling around the custom call ------------------
    weight_bytes = sum(int(a.size) * a.dtype.itemsize for a in weight_args)
    flops = 2 * BN * (2 * dim * dh_pad            # stacked reduce
                      + dh_pad * dh_pad           # q
                      + dh_pad * 2 * dh_pad       # fused k|v
                      + 2 * chunk * dh_pad        # scores + P@V
                      + dh_pad * dim              # proj
                      + 2 * dim * hid)            # fc1 + fc2
    cost = pl.CostEstimate(
        flops=int(flops),
        transcendentals=int(BN * num_heads * chunk),
        bytes_accessed=int(xq.size) * 2 + int(xkv.size) * 2 + BN * dim * 4 + weight_bytes)

    kernel = make_mhca_kernel(num_heads, hd_pad, chunk, seg_per_tile)

    out = pl.pallas_call(
        kernel,
        out_shape=jax.ShapeDtypeStruct((BN, dim), jnp.float32),
        grid=(num_tiles,),
        in_specs=in_specs,
        out_specs=out_spec,
        compiler_params=pltpu.CompilerParams(
            dimension_semantics=("parallel",),
            vmem_limit_bytes=vmem_limit_bytes),
        cost_estimate=cost,
    )(*args)

    # back to (B, dim, N) and fold to image
    x = jnp.transpose(out.reshape(B, N, dim), (0, 2, 1))
    return reverse_patches(x, (H, W), ksize, pad=1)


# ----------------------------------------------------------------------------
# Deterministic parameter init (shapes follow the module __init__;
# biases use the PyTorch Linear uniform(-1/sqrt(fan_in), 1/sqrt(fan_in)) init)
# ----------------------------------------------------------------------------
def init_params(key, dim, num_heads, mlp_ratio):
    dh = dim // 2
    hid = dim // mlp_ratio
    keys = jax.random.split(key, 10)

    def unif(k, shape, fan_in):
        bound = 1.0 / math.sqrt(fan_in)
        return jax.random.uniform(k, shape, jnp.float32, -bound, bound)

    return dict(
        ln1_g=jnp.ones((dim,), jnp.float32), ln1_b=jnp.zeros((dim,), jnp.float32),
        ln2_g=jnp.ones((dim,), jnp.float32), ln2_b=jnp.zeros((dim,), jnp.float32),
        w_reduce=unif(keys[0], (dh, dim), dim),   # reduce: Linear(dim, dim//2, bias=False)
        w_q=unif(keys[1], (dh, dh), dh),          # W_q:    Linear(dim//2, dim//2, bias=False)
        w_k=unif(keys[2], (dh, dh), dh),          # W_k
        w_v=unif(keys[3], (dh, dh), dh),          # W_v
        w_proj=unif(keys[4], (dim, dh), dh),      # proj:   Linear(dim//2, dim)
        b_proj=unif(keys[5], (dim,), dh),
        w_fc1=unif(keys[6], (hid, dim), dim),     # Mlp.fc1: Linear(dim, dim//mlp_ratio)
        b_fc1=unif(keys[7], (hid,), dim),
        w_fc2=unif(keys[8], (dim, hid), hid),     # Mlp.fc2: Linear(dim//mlp_ratio, dim)
        b_fc2=unif(keys[9], (dim,), hid),
    )


if __name__ == "__main__":
    key = jax.random.PRNGKey(0)
    k1, k2, kp = jax.random.split(key, 3)

    B, C, H, W = 2, 16, 8, 8          # n_feat = 16
    ksize = 3                         # see TODO(synk) about ksize=[7,7] default
    num_heads = 8
    mlp_ratio = 4
    split_segment = 4
    dim = C * ksize * ksize           # 144; dim//2 = 72; head_dim = 9 -> padded to 16

    x1 = jax.random.normal(k1, (B, C, H, W), jnp.float32)
    x2 = jax.random.normal(k2, (B, C, H, W), jnp.float32)
    params = init_params(kp, dim, num_heads, mlp_ratio)

    out = transformer_mhca_apply(x1, x2, params, num_heads=num_heads,
                                 split_segment=split_segment, ksize=ksize)
    out = jax.block_until_ready(out)
    assert out.shape == (B, C, H, W), out.shape
    print("KERNEL_OK")
</pallas_src>

<mosaic_0001>
module attributes {stable_mosaic.version = 11 : i64} {
  func.func @kernel(%arg0: i32, %arg1: memref<128x144xbf16, #tpu.memory_space<vmem>>, %arg2: memref<128x144xbf16, #tpu.memory_space<vmem>>, %arg3: memref<1x144xf32, #tpu.memory_space<vmem>>, %arg4: memref<1x144xf32, #tpu.memory_space<vmem>>, %arg5: memref<144x128xbf16, #tpu.memory_space<vmem>>, %arg6: memref<128x128xbf16, #tpu.memory_space<vmem>>, %arg7: memref<128x256xbf16, #tpu.memory_space<vmem>>, %arg8: memref<128x144xbf16, #tpu.memory_space<vmem>>, %arg9: memref<1x144xf32, #tpu.memory_space<vmem>>, %arg10: memref<1x144xf32, #tpu.memory_space<vmem>>, %arg11: memref<1x144xf32, #tpu.memory_space<vmem>>, %arg12: memref<144x36xbf16, #tpu.memory_space<vmem>>, %arg13: memref<1x36xf32, #tpu.memory_space<vmem>>, %arg14: memref<36x144xbf16, #tpu.memory_space<vmem>>, %arg15: memref<1x144xf32, #tpu.memory_space<vmem>>, %arg16: memref<128x144xf32, #tpu.memory_space<vmem>>) attributes {dimension_semantics = [#tpu.dimension_semantics<parallel>], iteration_bounds = array<i64: 1>, scalar_prefetch = 0 : i64, scratch_operands = 0 : i64, tpu.core_type = #tpu.core_type<tc>, window_params = [{transform_indices = @transform_0, window_bounds = array<i64: 128, 144>}, {transform_indices = @transform_1, window_bounds = array<i64: 128, 144>}, {pipeline_mode = #tpu.pipeline_mode<synchronous>, transform_indices = @transform_2, window_bounds = array<i64: 1, 144>}, {pipeline_mode = #tpu.pipeline_mode<synchronous>, transform_indices = @transform_3, window_bounds = array<i64: 1, 144>}, {pipeline_mode = #tpu.pipeline_mode<synchronous>, transform_indices = @transform_4, window_bounds = array<i64: 144, 128>}, {pipeline_mode = #tpu.pipeline_mode<synchronous>, transform_indices = @transform_5, window_bounds = array<i64: 128, 128>}, {pipeline_mode = #tpu.pipeline_mode<synchronous>, transform_indices = @transform_6, window_bounds = array<i64: 128, 256>}, {pipeline_mode = #tpu.pipeline_mode<synchronous>, transform_indices = @transform_7, window_bounds = array<i64: 128, 144>}, {pipeline_mode = #tpu.pipeline_mode<synchronous>, transform_indices = @transform_8, window_bounds = array<i64: 1, 144>}, {pipeline_mode = #tpu.pipeline_mode<synchronous>, transform_indices = @transform_9, window_bounds = array<i64: 1, 144>}, {pipeline_mode = #tpu.pipeline_mode<synchronous>, transform_indices = @transform_10, window_bounds = array<i64: 1, 144>}, {pipeline_mode = #tpu.pipeline_mode<synchronous>, transform_indices = @transform_11, window_bounds = array<i64: 144, 36>}, {pipeline_mode = #tpu.pipeline_mode<synchronous>, transform_indices = @transform_12, window_bounds = array<i64: 1, 36>}, {pipeline_mode = #tpu.pipeline_mode<synchronous>, transform_indices = @transform_13, window_bounds = array<i64: 36, 144>}, {pipeline_mode = #tpu.pipeline_mode<synchronous>, transform_indices = @transform_14, window_bounds = array<i64: 1, 144>}, {transform_indices = @transform_15, window_bounds = array<i64: 128, 144>}]} {
    %c0 = arith.constant 0 : index
    %c0_0 = arith.constant 0 : index
    %0 = vector.load %arg1[%c0, %c0_0] : memref<128x144xbf16, #tpu.memory_space<vmem>>, vector<128x144xbf16>
    %1 = arith.extf %0 : vector<128x144xbf16> to vector<128x144xf32>
    %c0_1 = arith.constant 0 : index
    %c0_2 = arith.constant 0 : index
    %2 = vector.load %arg2[%c0_1, %c0_2] : memref<128x144xbf16, #tpu.memory_space<vmem>>, vector<128x144xbf16>
    %3 = arith.extf %2 : vector<128x144xbf16> to vector<128x144xf32>
    %4 = tpu.concatenate %1, %3 in 0 : vector<128x144xf32>, vector<128x144xf32> -> vector<256x144xf32>
    %c0_3 = arith.constant 0 : index
    %c0_4 = arith.constant 0 : index
    %5 = vector.load %arg3[%c0_3, %c0_4] : memref<1x144xf32, #tpu.memory_space<vmem>>, vector<1x144xf32>
    %c0_5 = arith.constant 0 : index
    %c0_6 = arith.constant 0 : index
    %6 = vector.load %arg4[%c0_5, %c0_6] : memref<1x144xf32, #tpu.memory_space<vmem>>, vector<1x144xf32>
    %cst = arith.constant dense<0.000000e+00> : vector<256xf32>
    %7 = vector.multi_reduction <add>, %4, %cst [1] : vector<256x144xf32> to vector<256xf32>
    %8 = vector.shape_cast %7 : vector<256xf32> to vector<256x1xf32>
    %cst_7 = arith.constant 1.440000e+02 : f32
    %9 = vector.broadcast %cst_7 : f32 to vector<256x1xf32>
    %10 = arith.divf %8, %9 : vector<256x1xf32>
    %11 = arith.mulf %4, %4 : vector<256x144xf32>
    %cst_8 = arith.constant dense<0.000000e+00> : vector<256xf32>
    %12 = vector.multi_reduction <add>, %11, %cst_8 [1] : vector<256x144xf32> to vector<256xf32>
    %13 = vector.shape_cast %12 : vector<256xf32> to vector<256x1xf32>
    %cst_9 = arith.constant 1.440000e+02 : f32
    %14 = vector.broadcast %cst_9 : f32 to vector<256x1xf32>
    %15 = arith.divf %13, %14 : vector<256x1xf32>
    %16 = arith.mulf %10, %10 : vector<256x1xf32>
    %17 = arith.subf %15, %16 : vector<256x1xf32>
    %cst_10 = arith.constant 0.000000e+00 : f32
    %18 = vector.broadcast %cst_10 : f32 to vector<256x1xf32>
    %19 = arith.maximumf %17, %18 : vector<256x1xf32>
    %20 = vector.broadcast %10 : vector<256x1xf32> to vector<256x144xf32>
    %21 = arith.subf %4, %20 : vector<256x144xf32>
    %cst_11 = arith.constant 9.99999974E-6 : f32
    %22 = vector.broadcast %cst_11 : f32 to vector<256x1xf32>
    %23 = arith.addf %19, %22 : vector<256x1xf32>
    %24 = math.rsqrt %23 : vector<256x1xf32>
    %25 = vector.broadcast %24 : vector<256x1xf32> to vector<256x144xf32>
    %26 = arith.mulf %21, %25 : vector<256x144xf32>
    %27 = vector.broadcast %5 : vector<1x144xf32> to vector<256x144xf32>
    %28 = arith.mulf %26, %27 : vector<256x144xf32>
    %29 = vector.broadcast %6 : vector<1x144xf32> to vector<256x144xf32>
    %30 = arith.addf %28, %29 : vector<256x144xf32>
    %31 = arith.truncf %30 : vector<256x144xf32> to vector<256x144xbf16>
    %c0_12 = arith.constant 0 : index
    %c0_13 = arith.constant 0 : index
    %32 = vector.load %arg5[%c0_12, %c0_13] : memref<144x128xbf16, #tpu.memory_space<vmem>>, vector<144x128xbf16>
    %cst_14 = arith.constant dense<0.000000e+00> : vector<256x128xf32>
    %33 = tpu.matmul %31, %32, %cst_14 {dimension_numbers = #tpu.dot_dimension_numbers<[1], [0], [0], [1], [0, 0, 1, 1], [], []>} : vector<256x144xbf16>, vector<144x128xbf16>, vector<256x128xf32> -> vector<256x128xf32>
    %34 = arith.truncf %33 : vector<256x128xf32> to vector<256x128xbf16>
    %35 = vector.extract_strided_slice %34 {offsets = [0, 0], sizes = [128, 128], strides = [1, 1]} : vector<256x128xbf16> to vector<128x128xbf16>
    %36 = vector.extract_strided_slice %34 {offsets = [128, 0], sizes = [128, 128], strides = [1, 1]} : vector<256x128xbf16> to vector<128x128xbf16>
    %c0_15 = arith.constant 0 : index
    %c0_16 = arith.constant 0 : index
    %37 = vector.load %arg6[%c0_15, %c0_16] : memref<128x128xbf16, #tpu.memory_space<vmem>>, vector<128x128xbf16>
    %cst_17 = arith.constant dense<0.000000e+00> : vector<128x128xf32>
    %38 = tpu.matmul %35, %37, %cst_17 {dimension_numbers = #tpu.dot_dimension_numbers<[1], [0], [0], [1], [0, 0, 1, 1], [], []>} : vector<128x128xbf16>, vector<128x128xbf16>, vector<128x128xf32> -> vector<128x128xf32>
    %39 = arith.truncf %38 : vector<128x128xf32> to vector<128x128xbf16>
    %c0_18 = arith.constant 0 : index
    %c0_19 = arith.constant 0 : index
    %40 = vector.load %arg7[%c0_18, %c0_19] : memref<128x256xbf16, #tpu.memory_space<vmem>>, vector<128x256xbf16>
    %cst_20 = arith.constant dense<0.000000e+00> : vector<128x256xf32>
    %41 = tpu.matmul %36, %40, %cst_20 {dimension_numbers = #tpu.dot_dimension_numbers<[1], [0], [0], [1], [0, 0, 1, 1], [], []>} : vector<128x128xbf16>, vector<128x256xbf16>, vector<128x256xf32> -> vector<128x256xf32>
    %42 = vector.extract_strided_slice %41 {offsets = [0, 0], sizes = [128, 128], strides = [1, 1]} : vector<128x256xf32> to vector<128x128xf32>
    %43 = arith.truncf %42 : vector<128x128xf32> to vector<128x128xbf16>
    %44 = vector.extract_strided_slice %41 {offsets = [0, 128], sizes = [128, 128], strides = [1, 1]} : vector<128x256xf32> to vector<128x128xf32>
    %45 = arith.truncf %44 : vector<128x128xf32> to vector<128x128xbf16>
    %46 = vector.extract_strided_slice %39 {offsets = [0, 0], sizes = [128, 16], strides = [1, 1]} : vector<128x128xbf16> to vector<128x16xbf16>
    %47 = vector.shape_cast %46 : vector<128x16xbf16> to vector<1x8x16x16xbf16>
    %48 = vector.extract_strided_slice %39 {offsets = [0, 16], sizes = [128, 16], strides = [1, 1]} : vector<128x128xbf16> to vector<128x16xbf16>
    %49 = vector.shape_cast %48 : vector<128x16xbf16> to vector<1x8x16x16xbf16>
    %50 = vector.extract_strided_slice %39 {offsets = [0, 32], sizes = [128, 16], strides = [1, 1]} : vector<128x128xbf16> to vector<128x16xbf16>
    %51 = vector.shape_cast %50 : vector<128x16xbf16> to vector<1x8x16x16xbf16>
    %52 = vector.extract_strided_slice %39 {offsets = [0, 48], sizes = [128, 16], strides = [1, 1]} : vector<128x128xbf16> to vector<128x16xbf16>
    %53 = vector.shape_cast %52 : vector<128x16xbf16> to vector<1x8x16x16xbf16>
    %54 = vector.extract_strided_slice %39 {offsets = [0, 64], sizes = [128, 16], strides = [1, 1]} : vector<128x128xbf16> to vector<128x16xbf16>
    %55 = vector.shape_cast %54 : vector<128x16xbf16> to vector<1x8x16x16xbf16>
    %56 = vector.extract_strided_slice %39 {offsets = [0, 80], sizes = [128, 16], strides = [1, 1]} : vector<128x128xbf16> to vector<128x16xbf16>
    %57 = vector.shape_cast %56 : vector<128x16xbf16> to vector<1x8x16x16xbf16>
    %58 = vector.extract_strided_slice %39 {offsets = [0, 96], sizes = [128, 16], strides = [1, 1]} : vector<128x128xbf16> to vector<128x16xbf16>
    %59 = vector.shape_cast %58 : vector<128x16xbf16> to vector<1x8x16x16xbf16>
    %60 = vector.extract_strided_slice %39 {offsets = [0, 112], sizes = [128, 16], strides = [1, 1]} : vector<128x128xbf16> to vector<128x16xbf16>
    %61 = vector.shape_cast %60 : vector<128x16xbf16> to vector<1x8x16x16xbf16>
    %62 = tpu.concatenate %47, %49, %51, %53, %55, %57, %59, %61 in 0 : vector<1x8x16x16xbf16>, vector<1x8x16x16xbf16>, vector<1x8x16x16xbf16>, vector<1x8x16x16xbf16>, vector<1x8x16x16xbf16>, vector<1x8x16x16xbf16>, vector<1x8x16x16xbf16>, vector<1x8x16x16xbf16> -> vector<8x8x16x16xbf16>
    %63 = vector.shape_cast %62 : vector<8x8x16x16xbf16> to vector<64x16x16xbf16>
    %64 = vector.extract_strided_slice %43 {offsets = [0, 0], sizes = [128, 16], strides = [1, 1]} : vector<128x128xbf16> to vector<128x16xbf16>
    %65 = vector.shape_cast %64 : vector<128x16xbf16> to vector<1x8x16x16xbf16>
    %66 = vector.extract_strided_slice %43 {offsets = [0, 16], sizes = [128, 16], strides = [1, 1]} : vector<128x128xbf16> to vector<128x16xbf16>
    %67 = vector.shape_cast %66 : vector<128x16xbf16> to vector<1x8x16x16xbf16>
    %68 = vector.extract_strided_slice %43 {offsets = [0, 32], sizes = [128, 16], strides = [1, 1]} : vector<128x128xbf16> to vector<128x16xbf16>
    %69 = vector.shape_cast %68 : vector<128x16xbf16> to vector<1x8x16x16xbf16>
    %70 = vector.extract_strided_slice %43 {offsets = [0, 48], sizes = [128, 16], strides = [1, 1]} : vector<128x128xbf16> to vector<128x16xbf16>
    %71 = vector.shape_cast %70 : vector<128x16xbf16> to vector<1x8x16x16xbf16>
    %72 = vector.extract_strided_slice %43 {offsets = [0, 64], sizes = [128, 16], strides = [1, 1]} : vector<128x128xbf16> to vector<128x16xbf16>
    %73 = vector.shape_cast %72 : vector<128x16xbf16> to vector<1x8x16x16xbf16>
    %74 = vector.extract_strided_slice %43 {offsets = [0, 80], sizes = [128, 16], strides = [1, 1]} : vector<128x128xbf16> to vector<128x16xbf16>
    %75 = vector.shape_cast %74 : vector<128x16xbf16> to vector<1x8x16x16xbf16>
    %76 = vector.extract_strided_slice %43 {offsets = [0, 96], sizes = [128, 16], strides = [1, 1]} : vector<128x128xbf16> to vector<128x16xbf16>
    %77 = vector.shape_cast %76 : vector<128x16xbf16> to vector<1x8x16x16xbf16>
    %78 = vector.extract_strided_slice %43 {offsets = [0, 112], sizes = [128, 16], strides = [1, 1]} : vector<128x128xbf16> to vector<128x16xbf16>
    %79 = vector.shape_cast %78 : vector<128x16xbf16> to vector<1x8x16x16xbf16>
    %80 = tpu.concatenate %65, %67, %69, %71, %73, %75, %77, %79 in 0 : vector<1x8x16x16xbf16>, vector<1x8x16x16xbf16>, vector<1x8x16x16xbf16>, vector<1x8x16x16xbf16>, vector<1x8x16x16xbf16>, vector<1x8x16x16xbf16>, vector<1x8x16x16xbf16>, vector<1x8x16x16xbf16> -> vector<8x8x16x16xbf16>
    %81 = vector.shape_cast %80 : vector<8x8x16x16xbf16> to vector<64x16x16xbf16>
    %82 = vector.extract_strided_slice %45 {offsets = [0, 0], sizes = [128, 16], strides = [1, 1]} : vector<128x128xbf16> to vector<128x16xbf16>
    %83 = vector.shape_cast %82 : vector<128x16xbf16> to vector<1x8x16x16xbf16>
    %84 = vector.extract_strided_slice %45 {offsets = [0, 16], sizes = [128, 16], strides = [1, 1]} : vector<128x128xbf16> to vector<128x16xbf16>
    %85 = vector.shape_cast %84 : vector<128x16xbf16> to vector<1x8x16x16xbf16>
    %86 = vector.extract_strided_slice %45 {offsets = [0, 32], sizes = [128, 16], strides = [1, 1]} : vector<128x128xbf16> to vector<128x16xbf16>
    %87 = vector.shape_cast %86 : vector<128x16xbf16> to vector<1x8x16x16xbf16>
    %88 = vector.extract_strided_slice %45 {offsets = [0, 48], sizes = [128, 16], strides = [1, 1]} : vector<128x128xbf16> to vector<128x16xbf16>
    %89 = vector.shape_cast %88 : vector<128x16xbf16> to vector<1x8x16x16xbf16>
    %90 = vector.extract_strided_slice %45 {offsets = [0, 64], sizes = [128, 16], strides = [1, 1]} : vector<128x128xbf16> to vector<128x16xbf16>
    %91 = vector.shape_cast %90 : vector<128x16xbf16> to vector<1x8x16x16xbf16>
    %92 = vector.extract_strided_slice %45 {offsets = [0, 80], sizes = [128, 16], strides = [1, 1]} : vector<128x128xbf16> to vector<128x16xbf16>
    %93 = vector.shape_cast %92 : vector<128x16xbf16> to vector<1x8x16x16xbf16>
    %94 = vector.extract_strided_slice %45 {offsets = [0, 96], sizes = [128, 16], strides = [1, 1]} : vector<128x128xbf16> to vector<128x16xbf16>
    %95 = vector.shape_cast %94 : vector<128x16xbf16> to vector<1x8x16x16xbf16>
    %96 = vector.extract_strided_slice %45 {offsets = [0, 112], sizes = [128, 16], strides = [1, 1]} : vector<128x128xbf16> to vector<128x16xbf16>
    %97 = vector.shape_cast %96 : vector<128x16xbf16> to vector<1x8x16x16xbf16>
    %98 = tpu.concatenate %83, %85, %87, %89, %91, %93, %95, %97 in 0 : vector<1x8x16x16xbf16>, vector<1x8x16x16xbf16>, vector<1x8x16x16xbf16>, vector<1x8x16x16xbf16>, vector<1x8x16x16xbf16>, vector<1x8x16x16xbf16>, vector<1x8x16x16xbf16>, vector<1x8x16x16xbf16> -> vector<8x8x16x16xbf16>
    %99 = vector.shape_cast %98 : vector<8x8x16x16xbf16> to vector<64x16x16xbf16>
    "tpu.trace_start"() <{level = 10 : i32, message = "bqd,bkd->bqk"}> : () -> ()
    %cst_21 = arith.constant dense<0.000000e+00> : vector<64x16x16xf32>
    %100 = tpu.matmul %63, %81, %cst_21 {dimension_numbers = #tpu.dot_dimension_numbers<[2], [2], [1], [1], [0, 0, 0, 1, 1, 1], [0], [0]>} : vector<64x16x16xbf16>, vector<64x16x16xbf16>, vector<64x16x16xf32> -> vector<64x16x16xf32>
    "tpu.trace_stop"() : () -> ()
    %cst_22 = arith.constant dense<0xFF800000> : vector<64x16xf32>
    %101 = vector.multi_reduction <maximumf>, %100, %cst_22 [2] : vector<64x16x16xf32> to vector<64x16xf32>
    %102 = vector.shape_cast %101 : vector<64x16xf32> to vector<64x16x1xf32>
    %103 = vector.broadcast %102 : vector<64x16x1xf32> to vector<64x16x16xf32>
    %104 = arith.subf %100, %103 : vector<64x16x16xf32>
    %105 = math.exp %104 : vector<64x16x16xf32>
    %cst_23 = arith.constant dense<0.000000e+00> : vector<64x16xf32>
    %106 = vector.multi_reduction <add>, %105, %cst_23 [2] : vector<64x16x16xf32> to vector<64x16xf32>
    %107 = vector.shape_cast %106 : vector<64x16xf32> to vector<64x16x1xf32>
    %108 = tpu.reciprocal %107 {approx = true} : vector<64x16x1xf32> -> vector<64x16x1xf32>
    %109 = vector.broadcast %108 : vector<64x16x1xf32> to vector<64x16x16xf32>
    %110 = arith.mulf %105, %109 : vector<64x16x16xf32>
    %111 = arith.truncf %110 : vector<64x16x16xf32> to vector<64x16x16xbf16>
    "tpu.trace_start"() <{level = 10 : i32, message = "bqk,bkd->bqd"}> : () -> ()
    %cst_24 = arith.constant dense<0.000000e+00> : vector<64x16x16xf32>
    %112 = tpu.matmul %111, %99, %cst_24 {dimension_numbers = #tpu.dot_dimension_numbers<[2], [1], [1], [2], [0, 0, 0, 1, 1, 2], [0], [0]>} : vector<64x16x16xbf16>, vector<64x16x16xbf16>, vector<64x16x16xf32> -> vector<64x16x16xf32>
    "tpu.trace_stop"() : () -> ()
    %113 = arith.truncf %112 : vector<64x16x16xf32> to vector<64x16x16xbf16>
    %114 = vector.shape_cast %113 : vector<64x16x16xbf16> to vector<8x128x16xbf16>
    %115 = vector.extract_strided_slice %114 {offsets = [0, 0, 0], sizes = [1, 128, 16], strides = [1, 1, 1]} : vector<8x128x16xbf16> to vector<1x128x16xbf16>
    %116 = vector.shape_cast %115 : vector<1x128x16xbf16> to vector<128x16xbf16>
    %117 = vector.extract_strided_slice %114 {offsets = [1, 0, 0], sizes = [1, 128, 16], strides = [1, 1, 1]} : vector<8x128x16xbf16> to vector<1x128x16xbf16>
    %118 = vector.shape_cast %117 : vector<1x128x16xbf16> to vector<128x16xbf16>
    %119 = vector.extract_strided_slice %114 {offsets = [2, 0, 0], sizes = [1, 128, 16], strides = [1, 1, 1]} : vector<8x128x16xbf16> to vector<1x128x16xbf16>
    %120 = vector.shape_cast %119 : vector<1x128x16xbf16> to vector<128x16xbf16>
    %121 = vector.extract_strided_slice %114 {offsets = [3, 0, 0], sizes = [1, 128, 16], strides = [1, 1, 1]} : vector<8x128x16xbf16> to vector<1x128x16xbf16>
    %122 = vector.shape_cast %121 : vector<1x128x16xbf16> to vector<128x16xbf16>
    %123 = vector.extract_strided_slice %114 {offsets = [4, 0, 0], sizes = [1, 128, 16], strides = [1, 1, 1]} : vector<8x128x16xbf16> to vector<1x128x16xbf16>
    %124 = vector.shape_cast %123 : vector<1x128x16xbf16> to vector<128x16xbf16>
    %125 = vector.extract_strided_slice %114 {offsets = [5, 0, 0], sizes = [1, 128, 16], strides = [1, 1, 1]} : vector<8x128x16xbf16> to vector<1x128x16xbf16>
    %126 = vector.shape_cast %125 : vector<1x128x16xbf16> to vector<128x16xbf16>
    %127 = vector.extract_strided_slice %114 {offsets = [6, 0, 0], sizes = [1, 128, 16], strides = [1, 1, 1]} : vector<8x128x16xbf16> to vector<1x128x16xbf16>
    %128 = vector.shape_cast %127 : vector<1x128x16xbf16> to vector<128x16xbf16>
    %129 = vector.extract_strided_slice %114 {offsets = [7, 0, 0], sizes = [1, 128, 16], strides = [1, 1, 1]} : vector<8x128x16xbf16> to vector<1x128x16xbf16>
    %130 = vector.shape_cast %129 : vector<1x128x16xbf16> to vector<128x16xbf16>
    %131 = tpu.concatenate %116, %118, %120, %122, %124, %126, %128, %130 in 1 : vector<128x16xbf16>, vector<128x16xbf16>, vector<128x16xbf16>, vector<128x16xbf16>, vector<128x16xbf16>, vector<128x16xbf16>, vector<128x16xbf16>, vector<128x16xbf16> -> vector<128x128xbf16>
    %c0_25 = arith.constant 0 : index
    %c0_26 = arith.constant 0 : index
    %132 = vector.load %arg8[%c0_25, %c0_26] : memref<128x144xbf16, #tpu.memory_space<vmem>>, vector<128x144xbf16>
    %cst_27 = arith.constant dense<0.000000e+00> : vector<128x144xf32>
    %133 = tpu.matmul %131, %132, %cst_27 {dimension_numbers = #tpu.dot_dimension_numbers<[1], [0], [0], [1], [0, 0, 1, 1], [], []>} : vector<128x128xbf16>, vector<128x144xbf16>, vector<128x144xf32> -> vector<128x144xf32>
    %c0_28 = arith.constant 0 : index
    %c0_29 = arith.constant 0 : index
    %134 = vector.load %arg9[%c0_28, %c0_29] : memref<1x144xf32, #tpu.memory_space<vmem>>, vector<1x144xf32>
    %135 = vector.broadcast %134 : vector<1x144xf32> to vector<128x144xf32>
    %136 = arith.addf %133, %135 : vector<128x144xf32>
    %137 = arith.addf %3, %136 : vector<128x144xf32>
    %c0_30 = arith.constant 0 : index
    %c0_31 = arith.constant 0 : index
    %138 = vector.load %arg10[%c0_30, %c0_31] : memref<1x144xf32, #tpu.memory_space<vmem>>, vector<1x144xf32>
    %c0_32 = arith.constant 0 : index
    %c0_33 = arith.constant 0 : index
    %139 = vector.load %arg11[%c0_32, %c0_33] : memref<1x144xf32, #tpu.memory_space<vmem>>, vector<1x144xf32>
    %cst_34 = arith.constant dense<0.000000e+00> : vector<128xf32>
    %140 = vector.multi_reduction <add>, %137, %cst_34 [1] : vector<128x144xf32> to vector<128xf32>
    %141 = vector.shape_cast %140 : vector<128xf32> to vector<128x1xf32>
    %cst_35 = arith.constant 1.440000e+02 : f32
    %142 = vector.broadcast %cst_35 : f32 to vector<128x1xf32>
    %143 = arith.divf %141, %142 : vector<128x1xf32>
    %144 = arith.mulf %137, %137 : vector<128x144xf32>
    %cst_36 = arith.constant dense<0.000000e+00> : vector<128xf32>
    %145 = vector.multi_reduction <add>, %144, %cst_36 [1] : vector<128x144xf32> to vector<128xf32>
    %146 = vector.shape_cast %145 : vector<128xf32> to vector<128x1xf32>
    %cst_37 = arith.constant 1.440000e+02 : f32
    %147 = vector.broadcast %cst_37 : f32 to vector<128x1xf32>
    %148 = arith.divf %146, %147 : vector<128x1xf32>
    %149 = arith.mulf %143, %143 : vector<128x1xf32>
    %150 = arith.subf %148, %149 : vector<128x1xf32>
    %cst_38 = arith.constant 0.000000e+00 : f32
    %151 = vector.broadcast %cst_38 : f32 to vector<128x1xf32>
    %152 = arith.maximumf %150, %151 : vector<128x1xf32>
    %153 = vector.broadcast %143 : vector<128x1xf32> to vector<128x144xf32>
    %154 = arith.subf %137, %153 : vector<128x144xf32>
    %cst_39 = arith.constant 9.99999974E-6 : f32
    %155 = vector.broadcast %cst_39 : f32 to vector<128x1xf32>
    %156 = arith.addf %152, %155 : vector<128x1xf32>
    %157 = math.rsqrt %156 : vector<128x1xf32>
    %158 = vector.broadcast %157 : vector<128x1xf32> to vector<128x144xf32>
    %159 = arith.mulf %154, %158 : vector<128x144xf32>
    %160 = vector.broadcast %138 : vector<1x144xf32> to vector<128x144xf32>
    %161 = arith.mulf %159, %160 : vector<128x144xf32>
    %162 = vector.broadcast %139 : vector<1x144xf32> to vector<128x144xf32>
    %163 = arith.addf %161, %162 : vector<128x144xf32>
    %164 = arith.truncf %163 : vector<128x144xf32> to vector<128x144xbf16>
    %c0_40 = arith.constant 0 : index
    %c0_41 = arith.constant 0 : index
    %165 = vector.load %arg12[%c0_40, %c0_41] : memref<144x36xbf16, #tpu.memory_space<vmem>>, vector<144x36xbf16>
    %cst_42 = arith.constant dense<0.000000e+00> : vector<128x36xf32>
    %166 = tpu.matmul %164, %165, %cst_42 {dimension_numbers = #tpu.dot_dimension_numbers<[1], [0], [0], [1], [0, 0, 1, 1], [], []>} : vector<128x144xbf16>, vector<144x36xbf16>, vector<128x36xf32> -> vector<128x36xf32>
    %c0_43 = arith.constant 0 : index
    %c0_44 = arith.constant 0 : index
    %167 = vector.load %arg13[%c0_43, %c0_44] : memref<1x36xf32, #tpu.memory_space<vmem>>, vector<1x36xf32>
    %168 = vector.broadcast %167 : vector<1x36xf32> to vector<128x36xf32>
    %169 = arith.addf %166, %168 : vector<128x36xf32>
    %cst_45 = arith.constant 0.000000e+00 : f32
    %170 = vector.broadcast %cst_45 : f32 to vector<128x36xf32>
    %171 = arith.maximumf %169, %170 : vector<128x36xf32>
    %172 = arith.truncf %171 : vector<128x36xf32> to vector<128x36xbf16>
    %c0_46 = arith.constant 0 : index
    %c0_47 = arith.constant 0 : index
    %173 = vector.load %arg14[%c0_46, %c0_47] : memref<36x144xbf16, #tpu.memory_space<vmem>>, vector<36x144xbf16>
    %cst_48 = arith.constant dense<0.000000e+00> : vector<128x144xf32>
    %174 = tpu.matmul %172, %173, %cst_48 {dimension_numbers = #tpu.dot_dimension_numbers<[1], [0], [0], [1], [0, 0, 1, 1], [], []>} : vector<128x36xbf16>, vector<36x144xbf16>, vector<128x144xf32> -> vector<128x144xf32>
    %c0_49 = arith.constant 0 : index
    %c0_50 = arith.constant 0 : index
    %175 = vector.load %arg15[%c0_49, %c0_50] : memref<1x144xf32, #tpu.memory_space<vmem>>, vector<1x144xf32>
    %176 = vector.broadcast %175 : vector<1x144xf32> to vector<128x144xf32>
    %177 = arith.addf %174, %176 : vector<128x144xf32>
    %178 = arith.addf %137, %177 : vector<128x144xf32>
    %c0_51 = arith.constant 0 : index
    %c0_52 = arith.constant 0 : index
    %179 = vector.load %arg16[%c0_51, %c0_52] : memref<128x144xf32, #tpu.memory_space<vmem>>, vector<128x144xf32>
    tpu.vector_store %arg16[%c0_51, %c0_52], %178 {strides = array<i32>} : memref<128x144xf32, #tpu.memory_space<vmem>>, vector<128x144xf32>,
    return
  }
  func.func @transform_0(%arg0: i32) -> (i32, i32) {
    %c0_i32 = arith.constant 0 : i32
    %c0_i32_0 = arith.constant 0 : i32
    return %arg0, %c0_i32 : i32, i32
  }
  func.func @transform_1(%arg0: i32) -> (i32, i32) {
    %c0_i32 = arith.constant 0 : i32
    %c0_i32_0 = arith.constant 0 : i32
    return %arg0, %c0_i32 : i32, i32
  }
  func.func @transform_2(%arg0: i32) -> (i32, i32) {
    %c0_i32 = arith.constant 0 : i32
    %c0_i32_0 = arith.constant 0 : i32
    %c0_i32_1 = arith.constant 0 : i32
    return %c0_i32, %c0_i32_0 : i32, i32
  }
  func.func @transform_3(%arg0: i32) -> (i32, i32) {
    %c0_i32 = arith.constant 0 : i32
    %c0_i32_0 = arith.constant 0 : i32
    %c0_i32_1 = arith.constant 0 : i32
    return %c0_i32, %c0_i32_0 : i32, i32
  }
  func.func @transform_4(%arg0: i32) -> (i32, i32) {
    %c0_i32 = arith.constant 0 : i32
    %c0_i32_0 = arith.constant 0 : i32
    %c0_i32_1 = arith.constant 0 : i32
    return %c0_i32, %c0_i32_0 : i32, i32
  }
  func.func @transform_5(%arg0: i32) -> (i32, i32) {
    %c0_i32 = arith.constant 0 : i32
    %c0_i32_0 = arith.constant 0 : i32
    %c0_i32_1 = arith.constant 0 : i32
    return %c0_i32, %c0_i32_0 : i32, i32
  }
  func.func @transform_6(%arg0: i32) -> (i32, i32) {
    %c0_i32 = arith.constant 0 : i32
    %c0_i32_0 = arith.constant 0 : i32
    %c0_i32_1 = arith.constant 0 : i32
    return %c0_i32, %c0_i32_0 : i32, i32
  }
  func.func @transform_7(%arg0: i32) -> (i32, i32) {
    %c0_i32 = arith.constant 0 : i32
    %c0_i32_0 = arith.constant 0 : i32
    %c0_i32_1 = arith.constant 0 : i32
    return %c0_i32, %c0_i32_0 : i32, i32
  }
  func.func @transform_8(%arg0: i32) -> (i32, i32) {
    %c0_i32 = arith.constant 0 : i32
    %c0_i32_0 = arith.constant 0 : i32
    %c0_i32_1 = arith.constant 0 : i32
    return %c0_i32, %c0_i32_0 : i32, i32
  }
  func.func @transform_9(%arg0: i32) -> (i32, i32) {
    %c0_i32 = arith.constant 0 : i32
    %c0_i32_0 = arith.constant 0 : i32
    %c0_i32_1 = arith.constant 0 : i32
    return %c0_i32, %c0_i32_0 : i32, i32
  }
  func.func @transform_10(%arg0: i32) -> (i32, i32) {
    %c0_i32 = arith.constant 0 : i32
    %c0_i32_0 = arith.constant 0 : i32
    %c0_i32_1 = arith.constant 0 : i32
    return %c0_i32, %c0_i32_0 : i32, i32
  }
  func.func @transform_11(%arg0: i32) -> (i32, i32) {
    %c0_i32 = arith.constant 0 : i32
    %c0_i32_0 = arith.constant 0 : i32
    %c0_i32_1 = arith.constant 0 : i32
    return %c0_i32, %c0_i32_0 : i32, i32
  }
  func.func @transform_12(%arg0: i32) -> (i32, i32) {
    %c0_i32 = arith.constant 0 : i32
    %c0_i32_0 = arith.constant 0 : i32
    %c0_i32_1 = arith.constant 0 : i32
    return %c0_i32, %c0_i32_0 : i32, i32
  }
  func.func @transform_13(%arg0: i32) -> (i32, i32) {
    %c0_i32 = arith.constant 0 : i32
    %c0_i32_0 = arith.constant 0 : i32
    %c0_i32_1 = arith.constant 0 : i32
    return %c0_i32, %c0_i32_0 : i32, i32
  }
  func.func @transform_14(%arg0: i32) -> (i32, i32) {
    %c0_i32 = arith.constant 0 : i32
    %c0_i32_0 = arith.constant 0 : i32
    %c0_i32_1 = arith.constant 0 : i32
    return %c0_i32, %c0_i32_0 : i32, i32
  }
  func.func @transform_15(%arg0: i32) -> (i32, i32) {
    %c0_i32 = arith.constant 0 : i32
    %c0_i32_0 = arith.constant 0 : i32
    return %arg0, %c0_i32 : i32, i32
  }
}

</mosaic_0001>

<bundles_post_ra>
// kernel: tpu_custom_call.1
= control target key start
LH: loop header
LB: loop body
LE: loop exit
PB: predicated region body
PF: predicated region fallthrough
CT: control target
= control target key end

     0   :  { %vm149_vm0 = vcmask 130048   ;;  %vm12946_vm1 = vmmov 0   ;;  %s12948_s26 = smov 112   ;;  %s12949_s27 = smov 96   ;;  %vm9664_vm2 = vcmask 261120   ;;  %vm9681_vm3 = vcmask 392192   ;;  %s18645_s0 = inlined_call_operand.vmem [shape: bf16[128,144], index: 0, kind: input, shape index: {}]   ;;  %s18646_s4 = inlined_call_operand.vmem [shape: bf16[144,128], index: 4, kind: input, shape index: {}]   ;;  %s18647_s1 = inlined_call_operand.vmem [shape: bf16[128,144], index: 1, kind: input, shape index: {}]   ;;  %s18648_s5 = inlined_call_operand.vmem [shape: bf16[128,128], index: 5, kind: input, shape index: {}]   ;;  %s18649_s2 = inlined_call_operand.vmem [shape: f32[1,144], index: 2, kind: input, shape index: {}]   ;;  %s18650_s3 = inlined_call_operand.vmem [shape: f32[1,144], index: 3, kind: input, shape index: {}]   ;;  %s18651_s6 = inlined_call_operand.vmem [shape: bf16[128,256], index: 6, kind: input, shape index: {}]   ;;  %s18652_s7 = inlined_call_operand.vmem [shape: bf16[128,144], index: 7, kind: input, shape index: {}]   ;;  %s18653_s8 = inlined_call_operand.vmem [shape: f32[1,144], index: 8, kind: input, shape index: {}]   ;;  %s18654_s11 = inlined_call_operand.vmem [shape: bf16[144,36], index: 11, kind: input, shape index: {}]   ;;  %s18655_s9 = inlined_call_operand.vmem [shape: f32[1,144], index: 9, kind: input, shape index: {}]   ;;  %s18656_s10 = inlined_call_operand.vmem [shape: f32[1,144], index: 10, kind: input, shape index: {}]   ;;  %s18657_s13 = inlined_call_operand.vmem [shape: bf16[36,144], index: 13, kind: input, shape index: {}]   ;;  %s18658_s12 = inlined_call_operand.vmem [shape: f32[1,36], index: 12, kind: input, shape index: {}]   ;;  %s18659_s14 = inlined_call_operand.vmem [shape: f32[1,144], index: 14, kind: input, shape index: {}]   ;;  %s18660_s15 = inlined_call_operand.vmem [shape: f32[128,144], index: 15, kind: output, shape index: {}]  }
   0x1   :  { %v54_v0 = vld [vmem:[%s18645_s0 + $0x18] sm:$0xff]  ;;  %v51_v1 = vld [vmem:[%s18645_s0] sm:$0xff]  ;;  %v52_v2 = vld [vmem:[%s18645_s0 + $0x8] sm:$0xff]  ;;  %s12950_s28 = smov 80   ;;  %s12951_s29 = smov 64   ;;  %vm9698_vm4 = vcmask 523264  }
   0x2   :  { %v13043_v3 = vunpack.c.l.bf16 %v54_v0  ;;  %v13045_v4 = vunpack.c.h.bf16 %v54_v0  ;;  %v13047_v5 = vunpack.c.l.bf16 %v51_v1  ;;  %v13049_v6 = vunpack.c.h.bf16 %v51_v1  ;;  %v53_v7 = vld [vmem:[%s18645_s0 + $0x10] sm:$0xff]  ;;  %v56_v28 = vld [vmem:[%s18645_s0 + $0x28] sm:$0xff]  ;;  %v55_v29 = vld [vmem:[%s18645_s0 + $0x20] sm:$0xff]  ;;  %s12952_s30 = smov 48   ;;  %s12953_s16 = smov 32  }
   0x3   :  { %v13054_v8 = vunpack.c.l.bf16 %v52_v2  ;;  %v13056_v9 = vunpack.c.h.bf16 %v52_v2  ;;  %v13058_v10 = vunpack.c.h.bf16 %v53_v7  ;;  %v13075_v20 = vunpack.c.l.bf16 %v53_v7  ;;  %v58_v46 = vld [vmem:[%s18645_s0 + $0x38] sm:$0xff]  ;;  %v57_v47 = vld [vmem:[%s18645_s0 + $0x30] sm:$0xff]  ;;  %v60_v60 = vld [vmem:[%s18645_s0 + $0x48] sm:$0xff] }
   0x4   :  { %v162_v11 = vsel %vm149_vm0, %v13045_v4, 0.0  ;;  %v150_v12 = vsel %vm149_vm0, %v13049_v6, 0.0  ;;  %v311_v13 = vmul.f32 %v13047_v5, %v13047_v5  ;;  %v312_v14 = vmul.f32 %v13049_v6, %v13049_v6  ;;  %v59_v1 = vld [vmem:[%s18645_s0 + $0x40] sm:$0xff] }
   0x5   :  { %v163_v15 = vadd.f32 %v162_v11, %v13043_v3  ;;  %v151_v16 = vadd.f32 %v150_v12, %v13047_v5  ;;  %v154_v17 = vsel %vm149_vm0, %v13056_v9, 0.0  ;;  %v314_v19 = vmul.f32 %v13056_v9, %v13056_v9 }
   0x6   :  { %v375_v18 = vsel %vm149_vm0, %v312_v14, 0.0  ;;  %v155_v22 = vadd.f32 %v154_v17, %v13054_v8  ;;  %v313_v23 = vmul.f32 %v13054_v8, %v13054_v8  ;;  %v158_v24 = vsel %vm149_vm0, %v13058_v10, 0.0 }
   0x7   :  { %164 = vadd.xlane.f32.xlu1 %v163_v15  ;;  %152 = vadd.xlane.f32.xlu0 %v151_v16  ;;  %v376_v21 = vadd.f32 %v375_v18, %v311_v13  ;;  %v379_v25 = vsel %vm149_vm0, %v314_v19, 0.0  ;;  %v318_v26 = vmul.f32 %v13045_v4, %v13045_v4  ;;  %v316_v27 = vmul.f32 %v13058_v10, %v13058_v10 }
   0x8   :  { %v159_v30 = vadd.f32 %v158_v24, %v13075_v20  ;;  %v380_v31 = vadd.f32 %v379_v25, %v313_v23  ;;  %v317_v32 = vmul.f32 %v13043_v3, %v13043_v3  ;;  %v315_v33 = vmul.f32 %v13075_v20, %v13075_v20 }
   0x9   :  { %v387_v34 = vsel %vm149_vm0, %v318_v26, 0.0  ;;  %v383_v35 = vsel %vm149_vm0, %v316_v27, 0.0  ;;  %v13100_v36 = vunpack.c.h.bf16 %v56_v28  ;;  %v13102_v37 = vunpack.c.h.bf16 %v55_v29  ;;  %v62_v26 = vld [vmem:[%s18645_s0 + $0x58] sm:$0xff]  ;;  %v61_v27 = vld [vmem:[%s18645_s0 + $0x50] sm:$0xff] }
   0xa   :  { %v388_v38 = vadd.f32 %v387_v34, %v317_v32  ;;  %v384_v39 = vadd.f32 %v383_v35, %v315_v33  ;;  %v13104_v40 = vunpack.c.l.bf16 %v56_v28  ;;  %v13106_v41 = vunpack.c.l.bf16 %v55_v29 }
   0xb   :  { %377 = vadd.xlane.f32.xlu1 %v376_v21  ;;  %156 = vadd.xlane.f32.xlu0 %v155_v22  ;;  %v170_v42 = vsel %vm149_vm0, %v13100_v36, 0.0  ;;  %v166_v43 = vsel %vm149_vm0, %v13102_v37, 0.0  ;;  %v322_v44 = vmul.f32 %v13100_v36, %v13100_v36  ;;  %v320_v45 = vmul.f32 %v13102_v37, %v13102_v37 }
   0xc   :  { %v321_v48 = vmul.f32 %v13104_v40, %v13104_v40  ;;  %v171_v49 = vadd.f32 %v170_v42, %v13104_v40  ;;  %v167_v50 = vadd.f32 %v166_v43, %v13106_v41  ;;  %v319_v51 = vmul.f32 %v13106_v41, %v13106_v41 }
   0xd   :  { %v395_v52 = vsel %vm149_vm0, %v322_v44, 0.0  ;;  %v391_v53 = vsel %vm149_vm0, %v320_v45, 0.0  ;;  %v13130_v54 = vunpack.c.h.bf16 %v58_v46  ;;  %v13132_v55 = vunpack.c.h.bf16 %v57_v47 }
   0xe   :  { %v396_v56 = vadd.f32 %v395_v52, %v321_v48  ;;  %v392_v57 = vadd.f32 %v391_v53, %v319_v51  ;;  %v13134_v58 = vunpack.c.l.bf16 %v58_v46  ;;  %v13136_v59 = vunpack.c.l.bf16 %v57_v47  ;;  %v64_v48 = vld [vmem:[%s18645_s0 + $0x68] sm:$0xff] }
   0xf   :  { %381 = vadd.xlane.f32.xlu1 %v380_v31  ;;  %160 = vadd.xlane.f32.xlu0 %v159_v30  ;;  %v178_v61 = vsel %vm149_vm0, %v13130_v54, 0.0  ;;  %v174_v62 = vsel %vm149_vm0, %v13132_v55, 0.0  ;;  %v326_v63 = vmul.f32 %v13130_v54, %v13130_v54  ;;  %v324_v0 = vmul.f32 %v13132_v55, %v13132_v55 }
  0x10   :  { %v325_v2 = vmul.f32 %v13134_v58, %v13134_v58  ;;  %v179_v7 = vadd.f32 %v178_v61, %v13134_v58  ;;  %v175_v11 = vadd.f32 %v174_v62, %v13136_v59  ;;  %v323_v12 = vmul.f32 %v13136_v59, %v13136_v59 }
  0x11   :  { %v13158_v13 = vunpack.c.h.bf16 %v60_v60  ;;  %v403_v14 = vsel %vm149_vm0, %v326_v63, 0.0  ;;  %v399_v15 = vsel %vm149_vm0, %v324_v0, 0.0  ;;  %v13162_v16 = vunpack.c.h.bf16 %v59_v1 }
  0x12   :  { %v13164_v17 = vunpack.c.l.bf16 %v60_v60  ;;  %v404_v18 = vadd.f32 %v403_v14, %v325_v2  ;;  %v400_v19 = vadd.f32 %v399_v15, %v323_v12  ;;  %v13168_v22 = vunpack.c.l.bf16 %v59_v1  ;;  %v66_v14 = vld [vmem:[%s18645_s0 + $0x78] sm:$0xff]  ;;  %v65_v15 = vld [vmem:[%s18645_s0 + $0x70] sm:$0xff] }
  0x13   :  { %389 = vadd.xlane.f32.xlu1 %v388_v38  ;;  %385 = vadd.xlane.f32.xlu0 %v384_v39  ;;  %v186_v21 = vsel %vm149_vm0, %v13158_v13, 0.0  ;;  %v182_v23 = vsel %vm149_vm0, %v13162_v16, 0.0  ;;  %v330_v24 = vmul.f32 %v13158_v13, %v13158_v13  ;;  %v328_v25 = vmul.f32 %v13162_v16, %v13162_v16 }
  0x14   :  { %v187_v28 = vadd.f32 %v186_v21, %v13164_v17  ;;  %v183_v29 = vadd.f32 %v182_v23, %v13168_v22  ;;  %v329_v30 = vmul.f32 %v13164_v17, %v13164_v17  ;;  %v327_v31 = vmul.f32 %v13168_v22, %v13168_v22 }
  0x15   :  { %v411_v32 = vsel %vm149_vm0, %v330_v24, 0.0  ;;  %v407_v33 = vsel %vm149_vm0, %v328_v25, 0.0  ;;  %v13190_v34 = vunpack.c.h.bf16 %v62_v26  ;;  %v13192_v35 = vunpack.c.h.bf16 %v61_v27 }
  0x16   :  { %v412_v38 = vadd.f32 %v411_v32, %v329_v30  ;;  %v408_v39 = vadd.f32 %v407_v33, %v327_v31  ;;  %v13194_v42 = vunpack.c.l.bf16 %v62_v26  ;;  %v13196_v43 = vunpack.c.l.bf16 %v61_v27 }
  0x17   :  { %172 = vadd.xlane.f32.xlu1 %v171_v49  ;;  %168 = vadd.xlane.f32.xlu0 %v167_v50  ;;  %v194_v44 = vsel %vm149_vm0, %v13190_v34, 0.0  ;;  %v190_v45 = vsel %vm149_vm0, %v13192_v35, 0.0  ;;  %v334_v46 = vmul.f32 %v13190_v34, %v13190_v34  ;;  %v332_v47 = vmul.f32 %v13192_v35, %v13192_v35  ;;  %v63_v49 = vld [vmem:[%s18645_s0 + $0x60] sm:$0xff] }
  0x18   :  { %v333_v50 = vmul.f32 %v13194_v42, %v13194_v42  ;;  %v195_v51 = vadd.f32 %v194_v44, %v13194_v42  ;;  %v191_v52 = vadd.f32 %v190_v45, %v13196_v43  ;;  %v331_v53 = vmul.f32 %v13196_v43, %v13196_v43  ;;  %v100_v44 = vld [vmem:[%s18647_s1 + $0x8] sm:$0xff]  ;;  %v99_v45 = vld [vmem:[%s18647_s1] sm:$0xff] }
  0x19   :  { %v13220_v60 = vunpack.c.h.bf16 %v64_v48  ;;  %v13222_v61 = vunpack.c.h.bf16 %v63_v49  ;;  %v13224_v0 = vunpack.c.l.bf16 %v64_v48  ;;  %v13226_v1 = vunpack.c.l.bf16 %v63_v49 }
  0x1a   :  { %v13250_v26 = vunpack.c.h.bf16 %v66_v14  ;;  %v13252_v27 = vunpack.c.h.bf16 %v65_v15  ;;  %v13254_v30 = vunpack.c.l.bf16 %v66_v14  ;;  %v13256_v31 = vunpack.c.l.bf16 %v65_v15  ;;  %v102_v15 = vld [vmem:[%s18647_s1 + $0x18] sm:$0xff] }
  0x1b   :  { %397 = vadd.xlane.f32.xlu1 %v396_v56  ;;  %393 = vadd.xlane.f32.xlu0 %v392_v57  ;;  %v419_v56 = vsel %vm149_vm0, %v334_v46, 0.0  ;;  %v415_v57 = vsel %vm149_vm0, %v332_v47, 0.0  ;;  %v202_v2 = vsel %vm149_vm0, %v13220_v60, 0.0  ;;  %v336_v12 = vmul.f32 %v13222_v61, %v13222_v61 }
  0x1c   :  { %v420_v62 = vadd.f32 %v419_v56, %v333_v50  ;;  %v416_v63 = vadd.f32 %v415_v57, %v331_v53  ;;  %v335_v23 = vmul.f32 %v13226_v1, %v13226_v1  ;;  %18979 = vst [vmem:[#allocation2_spill] sm:$0xff] %v13252_v27  ;;  %v210_v32 = vsel %vm149_vm0, %v13250_v26, 0.0  ;;  %v12254_v57 = vld [vmem:[%s18646_s4 + $0x38] sm:$0xff]  }
  0x1d   :  { %v423_v25 = vsel %vm149_vm0, %v336_v12, 0.0  ;;  %v206_v33 = vsel %vm149_vm0, %v13252_v27, 0.0  ;;  %v341_v46 = vmul.f32 %v13254_v30, %v13254_v30  ;;  %v211_v47 = vadd.f32 %v210_v32, %v13254_v30 }
  0x1e   :  { %v207_v48 = vadd.f32 %v206_v33, %v13256_v31  ;;  %v339_v49 = vmul.f32 %v13256_v31, %v13256_v31  ;;  %v13278_v50 = vunpack.c.h.bf16 %v100_v44  ;;  %v13282_v53 = vunpack.c.h.bf16 %v99_v45 }
  0x1f   :  { %180 = vadd.xlane.f32.xlu1 %v179_v7  ;;  %176 = vadd.xlane.f32.xlu0 %v175_v11  ;;  %v198_v7 = vsel %vm149_vm0, %v13222_v61, 0.0  ;;  %v338_v11 = vmul.f32 %v13220_v60, %v13220_v60  ;;  %v13284_v56 = vunpack.c.l.bf16 %v100_v44  ;;  %v13318_v33 = vunpack.c.h.bf16 %v102_v15 }
  0x20   :  { %v199_v21 = vadd.f32 %v198_v7, %v13226_v1  ;;  %18980 = vst [vmem:[#allocation3_spill] sm:$0xff] %v13278_v50  ;;  %18981 = vst [vmem:[#allocation4_spill] sm:$0xff] %v13282_v53  ;;  %v13291_v7 = vunpack.c.l.bf16 %v99_v45  ;;  %v346_v12 = vmul.f32 %v13278_v50, %v13278_v50  ;;  %v344_v14 = vmul.f32 %v13282_v53, %v13282_v53 }
  0x21   :  { %v427_v24 = vsel %vm149_vm0, %v338_v11, 0.0  ;;  %18982 = vst [vmem:[#allocation5_spill] sm:$0xff] %v13284_v56  ;;  %v214_v11 = vsel %vm149_vm0, %v13282_v53, 0.0  ;;  %18984 = vst [vmem:[#allocation7_spill] sm:$0xff] %v13318_v33  ;;  %vm9715_vm5 = vcmask 654336   ;;  %vm9732_vm6 = vcmask 785408  }
  0x22   :  { %18983 = vst [vmem:[#allocation6_spill] sm:$0xff] %v13291_v7  ;;  %v439_v32 = vsel %vm149_vm0, %v344_v14, 0.0  ;;  %vm9749_vm7 = vcmask 916480   ;;  %vm10758_vm8 = vcmask 1041408   ;;  %vm10733_vm9 = vcmask 293888  }
  0x23   :  { %405 = vadd.xlane.f32.xlu1 %v404_v18  ;;  %401 = vadd.xlane.f32.xlu0 %v400_v19  ;;  %v337_v18 = vmul.f32 %v13224_v0, %v13224_v0  ;;  %v203_v19 = vadd.f32 %v202_v2, %v13224_v0  ;;  %v218_v2 = vsel %vm149_vm0, %v13278_v50, 0.0 }
  0x27   :  { %188 = vadd.xlane.f32.xlu1 %v187_v28  ;;  %184 = vadd.xlane.f32.xlu0 %v183_v29  ;;  %v428_v28 = vadd.f32 %v427_v24, %v337_v18  ;;  %v424_v29 = vadd.f32 %v423_v25, %v335_v23  ;;  %v101_v18 = vld [vmem:[%s18647_s1 + $0x10] sm:$0xff]  ;;  %v219_v24 = vadd.f32 %v218_v2, %v13284_v56  ;;  %v12257_v2 = vld [vmem:[%s18646_s4 + $0x20] sm:$0xff]  }
  0x28   :  { %v12255_v23 = vld [vmem:[%s18646_s4 + $0x30] sm:$0xff]   ;;  %v215_v25 = vadd.f32 %v214_v11, %v13291_v7 }
  0x2b   :  { %413 = vadd.xlane.f32.xlu1 %v412_v38  ;;  %409 = vadd.xlane.f32.xlu0 %v408_v39  ;;  %v342_v38 = vmul.f32 %v13250_v26, %v13250_v26  ;;  %v340_v39 = vmul.f32 %v13252_v27, %v13252_v27 }
  0x2f   :  { %196 = vadd.xlane.f32.xlu1 %v195_v51  ;;  %192 = vadd.xlane.f32.xlu0 %v191_v52  ;;  %v435_v51 = vsel %vm149_vm0, %v342_v38, 0.0  ;;  %v431_v52 = vsel %vm149_vm0, %v340_v39, 0.0  ;;  %v13320_v38 = vunpack.c.h.bf16 %v101_v18  ;;  %v12256_v39 = vld [vmem:[%s18646_s4 + $0x28] sm:$0xff]  }
  0x31   :  { %18985 = vst [vmem:[#allocation8_spill] sm:$0xff] %v13320_v38 }
  0x33   :  { %421 = vadd.xlane.f32.xlu1 %v420_v62  ;;  %417 = vadd.xlane.f32.xlu0 %v416_v63  ;;  %v436_v62 = vadd.f32 %v435_v51, %v341_v46  ;;  %v432_v63 = vadd.f32 %v431_v52, %v339_v49  ;;  %v13326_v46 = vunpack.c.l.bf16 %v102_v15  ;;  %v222_v49 = vsel %vm149_vm0, %v13320_v38, 0.0 }
  0x34   :  { %v350_v51 = vmul.f32 %v13318_v33, %v13318_v33  ;;  %v348_v52 = vmul.f32 %v13320_v38, %v13320_v38 }
  0x35   :  { %18986 = vst [vmem:[#allocation9_spill] sm:$0xff] %v13326_v46 }
  0x36   :  { %v451_v15 = vsel %vm149_vm0, %v350_v51, 0.0  ;;  %v105_v51 = vld [vmem:[%s18647_s1 + $0x30] sm:$0xff] }
  0x37   :  { %204 = vadd.xlane.f32.xlu1 %v203_v19  ;;  %200 = vadd.xlane.f32.xlu0 %v199_v21  ;;  %v18661_v19 = vmov 0   ;;  %v345_v21 = vmul.f32 %v13284_v56, %v13284_v56 }
  0x38   :  { %1125 = vmatprep.subr.bf16.mxu0 %v18661_v19  ;;  %1599 = vmatprep.mubr.bf16.mxu1 %v18661_v19 }
  0x39   :  { %1126 = vmatpush1.bf16.msra.mxu0 %v12254_v57  ;;  %v104_v57 = vld [vmem:[%s18647_s1 + $0x28] sm:$0xff] }
  0x3a   :  { %1127 = vmatprep.subr.bf16.mxu0 %v18661_v19 }
  0x3b   :  { %429 = vadd.xlane.f32.xlu1 %v428_v28  ;;  %425 = vadd.xlane.f32.xlu0 %v424_v29  ;;  %v343_v28 = vmul.f32 %v13291_v7, %v13291_v7  ;;  %v443_v29 = vsel %vm149_vm0, %v346_v12, 0.0 }
  0x3c   :  { %v444_v44 = vadd.f32 %v443_v29, %v345_v21  ;;  %v13356_v21 = vunpack.c.h.bf16 %v104_v57  ;;  %v13364_v29 = vunpack.c.l.bf16 %v104_v57  ;;  %v12259_v57 = vld [vmem:[%s18646_s4 + $0x10] sm:$0xff]  }
  0x3d   :  { %1128 = vmatpush1.bf16.msra.mxu0 %v12255_v23  ;;  %v440_v45 = vadd.f32 %v439_v32, %v343_v28 }
  0x3e   :  { %1129 = vmatprep.subr.bf16.mxu0 %v18661_v19  ;;  %18988 = vst [vmem:[#allocation11_spill] sm:$0xff] %v13356_v21  ;;  %18990 = vst [vmem:[#allocation13_spill] sm:$0xff] %v13364_v29 }
  0x3f   :  { %212 = vadd.xlane.f32.xlu1 %v211_v47  ;;  %208 = vadd.xlane.f32.xlu0 %v207_v48  ;;  %v13328_v47 = vunpack.c.l.bf16 %v101_v18  ;;  %v226_v48 = vsel %vm149_vm0, %v13318_v33, 0.0  ;;  %v447_v18 = vsel %vm149_vm0, %v348_v52, 0.0  ;;  %v353_v52 = vmul.f32 %v13364_v29, %v13364_v29 }
  0x40   :  { %v227_v11 = vadd.f32 %v226_v48, %v13326_v46 }
  0x41   :  { %18987 = vst [vmem:[#allocation10_spill] sm:$0xff] %v13328_v47  ;;  %1130 = vmatpush1.bf16.msra.mxu0 %v12256_v39  ;;  %v223_v12 = vadd.f32 %v222_v49, %v13328_v47  ;;  %v347_v14 = vmul.f32 %v13328_v47, %v13328_v47  ;;  %v234_v39 = vsel %vm149_vm0, %v13356_v21, 0.0  ;;  %v106_v49 = vld [vmem:[%s18647_s1 + $0x38] sm:$0xff] }
  0x42   :  { %1131 = vmatprep.subr.bf16.mxu0 %v18661_v19 }
  0x43   :  { %437 = vadd.xlane.f32.xlu1 %v436_v62  ;;  %433 = vadd.xlane.f32.xlu0 %v432_v63  ;;  %v103_v62 = vld [vmem:[%s18647_s1 + $0x20] sm:$0xff]  ;;  %v349_v63 = vmul.f32 %v13326_v46, %v13326_v46  ;;  %v448_v28 = vadd.f32 %v447_v18, %v347_v14  ;;  %v13394_v14 = vunpack.c.h.bf16 %v106_v49  ;;  %v12260_v18 = vld [vmem:[%s18646_s4 + $0x8] sm:$0xff]  }
  0x44   :  { %v13358_v23 = vunpack.c.h.bf16 %v103_v62  ;;  %v13366_v32 = vunpack.c.l.bf16 %v103_v62  ;;  %v235_v62 = vadd.f32 %v234_v39, %v13364_v29  ;;  %v13404_v39 = vunpack.c.l.bf16 %v105_v51 }
  0x45   :  { %1132 = vmatpush1.bf16.msra.mxu0 %v12257_v2  ;;  %18992 = vst [vmem:[#allocation15_spill] sm:$0xff] %v13394_v14 }
  0x46   :  { %18989 = vst [vmem:[#allocation12_spill] sm:$0xff] %v13358_v23  ;;  %18991 = vst [vmem:[#allocation14_spill] sm:$0xff] %v13366_v32  ;;  %v352_v48 = vmul.f32 %v13358_v23, %v13358_v23  ;;  %1133 = vmatprep.subr.bf16.mxu0 %v18661_v19  ;;  %v351_v2 = vmul.f32 %v13366_v32, %v13366_v32 }
  0x47   :  { %220 = vadd.xlane.f32.xlu1 %v219_v24  ;;  %216 = vadd.xlane.f32.xlu0 %v215_v25  ;;  %v12258_v24 = vld [vmem:[%s18646_s4 + $0x18] sm:$0xff]   ;;  %v452_v25 = vadd.f32 %v451_v15, %v349_v63  ;;  %v13396_v15 = vunpack.c.h.bf16 %v105_v51  ;;  %18995 = vst [vmem:[#allocation18_spill] sm:$0xff] %v13404_v39  ;;  %v107_v51 = vld [vmem:[%s18647_s1 + $0x40] sm:$0xff] }
  0x49   :  { %1134 = vmatpush1.bf16.msra.mxu0 %v12258_v24  ;;  %18993 = vst [vmem:[#allocation16_spill] sm:$0xff] %v13396_v15 }
  0x4a   :  { %1135 = vmatprep.subr.bf16.mxu0 %v18661_v19 }
  0x4b   :  { %445 = vadd.xlane.f32.xlu1 %v444_v44  ;;  %441 = vadd.xlane.f32.xlu0 %v440_v45  ;;  %v230_v44 = vsel %vm149_vm0, %v13358_v23, 0.0  ;;  %v354_v45 = vmul.f32 %v13356_v21, %v13356_v21 }
  0x4c   :  { %v231_v63 = vadd.f32 %v230_v44, %v13366_v32  ;;  %v242_v44 = vsel %vm149_vm0, %v13394_v14, 0.0 }
  0x4d   :  { %1136 = vmatpush1.bf16.msra.mxu0 %v12259_v57  ;;  %v356_v57 = vmul.f32 %v13396_v15, %v13396_v15 }
  0x4e   :  { %1137 = vmatprep.subr.bf16.mxu0 %v18661_v19 }
  0x4f   :  { %228 = vadd.xlane.f32.xlu1 %v227_v11  ;;  %224 = vadd.xlane.f32.xlu0 %v223_v12  ;;  %v459_v11 = vsel %vm149_vm0, %v354_v45, 0.0  ;;  %v455_v12 = vsel %vm149_vm0, %v352_v48, 0.0  ;;  %v238_v45 = vsel %vm149_vm0, %v13396_v15, 0.0  ;;  %v358_v48 = vmul.f32 %v13394_v14, %v13394_v14 }
  0x50   :  { %v460_v24 = vadd.f32 %v459_v11, %v353_v52  ;;  %v355_v11 = vmul.f32 %v13404_v39, %v13404_v39  ;;  %v463_v19 = vsel %vm149_vm0, %v356_v57, 0.0  ;;  %v18998_v14 = vmov 0  }
  0x51   :  { %1138 = vmatpush1.bf16.msra.mxu0 %v12260_v18  ;;  %v13434_v18 = vunpack.c.h.bf16 %v107_v51 }
  0x52   :  { %1139 = vmatprep.subr.bf16.mxu0 %v18998_v14 }
  0x53   :  { %453 = vadd.xlane.f32.xlu1 %v452_v25  ;;  %449 = vadd.xlane.f32.xlu0 %v448_v28  ;;  %v456_v25 = vadd.f32 %v455_v12, %v351_v2  ;;  %v13402_v28 = vunpack.c.l.bf16 %v106_v49  ;;  %v108_v49 = vld [vmem:[%s18647_s1 + $0x48] sm:$0xff]  ;;  %v239_v2 = vadd.f32 %v238_v45, %v13404_v39  ;;  %v467_v12 = vsel %vm149_vm0, %v358_v48, 0.0  ;;  %18997 = vst [vmem:[#allocation20_spill] sm:$0xff] %v13434_v18 }
  0x54   :  { %v13432_v15 = vunpack.c.h.bf16 %v108_v49  ;;  %v13440_v45 = vunpack.c.l.bf16 %v108_v49  ;;  %v13442_v48 = vunpack.c.l.bf16 %v107_v51  ;;  %v246_v39 = vsel %vm149_vm0, %v13434_v18, 0.0  ;;  %v109_v49 = vld [vmem:[%s18647_s1 + $0x50] sm:$0xff] }
  0x55   :  { %18994 = vst [vmem:[#allocation17_spill] sm:$0xff] %v13402_v28  ;;  %v357_v52 = vmul.f32 %v13402_v28, %v13402_v28 }
  0x56   :  { %18996 = vst [vmem:[#allocation19_spill] sm:$0xff] %v13432_v15  ;;  %18999 = vst [vmem:[#allocation21_spill] sm:$0xff] %v13440_v45  ;;  %v250_v57 = vsel %vm149_vm0, %v13432_v15, 0.0  ;;  %v361_v51 = vmul.f32 %v13440_v45, %v13440_v45 }
  0x57   :  { %236 = vadd.xlane.f32.xlu1 %v235_v62  ;;  %232 = vadd.xlane.f32.xlu0 %v231_v63  ;;  %v12261_v62 = vld [vmem:[%s18646_s4] sm:$0xff]   ;;  %v243_v63 = vadd.f32 %v242_v44, %v13402_v28  ;;  %v464_v44 = vadd.f32 %v463_v19, %v355_v11  ;;  %19000 = vst [vmem:[#allocation22_spill] sm:$0xff] %v13442_v48  ;;  %v110_v19 = vld [vmem:[%s18647_s1 + $0x58] sm:$0xff] }
  0x58   :  { %1140 = vmatpush1.bf16.msra.mxu0 %v12261_v62  ;;  %v362_v62 = vmul.f32 %v13432_v15, %v13432_v15  ;;  %v360_v28 = vmul.f32 %v13434_v18, %v13434_v18  ;;  %v13469_v18 = vunpack.c.h.bf16 %v109_v49 }
  0x59   :  { %1155 = vmatprep.subr.bf16.mxu0 %v18998_v14  ;;  %v13467_v14 = vunpack.c.h.bf16 %v110_v19 }
  0x5a   :  { %v475_v11 = vsel %vm149_vm0, %v362_v62, 0.0  ;;  %19002 = vst [vmem:[#allocation24_spill] sm:$0xff] %v13469_v18  ;;  %v254_v62 = vsel %vm149_vm0, %v13469_v18, 0.0 }
  0x5b   :  { %461 = vadd.xlane.f32.xlu1 %v460_v24  ;;  %457 = vadd.xlane.f32.xlu0 %v456_v25  ;;  %v12262_v24 = vld [vmem:[%s18646_s4 + $0x40] sm:$0xff]   ;;  %v468_v25 = vadd.f32 %v467_v12, %v357_v52  ;;  %v251_v52 = vadd.f32 %v250_v57, %v13440_v45  ;;  %v471_v12 = vsel %vm149_vm0, %v360_v28, 0.0  ;;  %19001 = vst [vmem:[#allocation23_spill] sm:$0xff] %v13467_v14  ;;  %v13473_v57 = vunpack.c.l.bf16 %v109_v49 }
  0x5c   :  { %1156 = vmatpush2.bf16.msra.mxu0 %v12262_v24  ;;  %v476_v24 = vadd.f32 %v475_v11, %v361_v51  ;;  %v366_v28 = vmul.f32 %v13467_v14, %v13467_v14  ;;  %v112_v51 = vld [vmem:[%s18647_s1 + $0x68] sm:$0xff] }
  0x5d   :  { %19004 = vst [vmem:[#allocation26_spill] sm:$0xff] %v13473_v57 }
  0x5e   :  { %v483_v11 = vsel %vm149_vm0, %v366_v28, 0.0 }
  0x5f   :  { %244 = vadd.xlane.f32.xlu1 %v243_v63  ;;  %240 = vadd.xlane.f32.xlu0 %v239_v2  ;;  %v247_v63 = vadd.f32 %v246_v39, %v13442_v48  ;;  %v359_v2 = vmul.f32 %v13442_v48, %v13442_v48  ;;  %v258_v39 = vsel %vm149_vm0, %v13467_v14, 0.0  ;;  %v364_v48 = vmul.f32 %v13469_v18, %v13469_v18 }
  0x60   :  { %v13497_v18 = vunpack.c.h.bf16 %v112_v51 }
  0x62   :  { %19005 = vst [vmem:[#allocation27_spill] sm:$0xff] %v13497_v18 }
  0x63   :  { %469 = vadd.xlane.f32.xlu1 %v468_v25  ;;  %465 = vadd.xlane.f32.xlu0 %v464_v44  ;;  %v472_v25 = vadd.f32 %v471_v12, %v359_v2  ;;  %v13471_v44 = vunpack.c.l.bf16 %v110_v19  ;;  %v111_v19 = vld [vmem:[%s18647_s1 + $0x60] sm:$0xff]  ;;  %v363_v2 = vmul.f32 %v13473_v57, %v13473_v57  ;;  %v479_v12 = vsel %vm149_vm0, %v364_v48, 0.0 }
  0x64   :  { %v13499_v14 = vunpack.c.h.bf16 %v111_v19  ;;  %v370_v48 = vmul.f32 %v13497_v18, %v13497_v18 }
  0x65   :  { %19003 = vst [vmem:[#allocation25_spill] sm:$0xff] %v13471_v44  ;;  %v365_v49 = vmul.f32 %v13471_v44, %v13471_v44 }
  0x66   :  { %19006 = vst [vmem:[#allocation28_spill] sm:$0xff] %v13499_v14  ;;  %v262_v28 = vsel %vm149_vm0, %v13499_v14, 0.0 }
  0x67   :  { %252 = vadd.xlane.f32.xlu1 %v251_v52  ;;  %248 = vadd.xlane.f32.xlu0 %v247_v63  ;;  %v259_v52 = vadd.f32 %v258_v39, %v13471_v44  ;;  %v255_v63 = vadd.f32 %v254_v62, %v13473_v57  ;;  %v484_v15 = vadd.f32 %v483_v11, %v365_v49  ;;  %v13503_v39 = vunpack.c.l.bf16 %v111_v19  ;;  %v114_v49 = vld [vmem:[%s18647_s1 + $0x78] sm:$0xff] }
  0x68   :  { %v266_v62 = vsel %vm149_vm0, %v13497_v18, 0.0  ;;  %v368_v57 = vmul.f32 %v13499_v14, %v13499_v14  ;;  %v491_v11 = vsel %vm149_vm0, %v370_v48, 0.0  ;;  %v13527_v14 = vunpack.c.h.bf16 %v114_v49 }
  0x69   :  { %19008 = vst [vmem:[#allocation30_spill] sm:$0xff] %v13503_v39 }
  0x6a   :  { %19009 = vst [vmem:[#allocation31_spill] sm:$0xff] %v13527_v14 }
  0x6b   :  { %477 = vadd.xlane.f32.xlu1 %v476_v24  ;;  %473 = vadd.xlane.f32.xlu0 %v472_v25  ;;  %v480_v24 = vadd.f32 %v479_v12, %v363_v2  ;;  %v13501_v25 = vunpack.c.l.bf16 %v112_v51  ;;  %v113_v51 = vld [vmem:[%s18647_s1 + $0x70] sm:$0xff]  ;;  %v367_v2 = vmul.f32 %v13503_v39, %v13503_v39  ;;  %v487_v12 = vsel %vm149_vm0, %v368_v57, 0.0 }
  0x6c   :  { %v13529_v18 = vunpack.c.h.bf16 %v113_v51  ;;  %v374_v57 = vmul.f32 %v13527_v14, %v13527_v14 }
  0x6d   :  { %19007 = vst [vmem:[#allocation29_spill] sm:$0xff] %v13501_v25  ;;  %v369_v19 = vmul.f32 %v13501_v25, %v13501_v25 }
  0x6e   :  { %19010 = vst [vmem:[#allocation32_spill] sm:$0xff] %v13529_v18  ;;  %v270_v48 = vsel %vm149_vm0, %v13529_v18, 0.0 }
  0x6f   :  { %260 = vadd.xlane.f32.xlu1 %v259_v52  ;;  %256 = vadd.xlane.f32.xlu0 %v255_v63  ;;  %v267_v52 = vadd.f32 %v266_v62, %v13501_v25  ;;  %v263_v63 = vadd.f32 %v262_v28, %v13503_v39  ;;  %v492_v44 = vadd.f32 %v491_v11, %v369_v19  ;;  %v13533_v62 = vunpack.c.l.bf16 %v113_v51 }
  0x70   :  { %v274_v28 = vsel %vm149_vm0, %v13527_v14, 0.0  ;;  %v372_v39 = vmul.f32 %v13529_v18, %v13529_v18 }
  0x71   :  { %19012 = vst [vmem:[#allocation34_spill] sm:$0xff] %v13533_v62  ;;  %v271_v51 = vadd.f32 %v270_v48, %v13533_v62 }
  0x73   :  { %485 = vadd.xlane.f32.xlu1 %v484_v15  ;;  %481 = vadd.xlane.f32.xlu0 %v480_v24  ;;  %v488_v15 = vadd.f32 %v487_v12, %v367_v2  ;;  %v13531_v24 = vunpack.c.l.bf16 %v114_v49  ;;  %v495_v2 = vsel %vm149_vm0, %v372_v39, 0.0 }
  0x75   :  { %19011 = vst [vmem:[#allocation33_spill] sm:$0xff] %v13531_v24  ;;  %v373_v19 = vmul.f32 %v13531_v24, %v13531_v24  ;;  %v275_v49 = vadd.f32 %v274_v28, %v13531_v24 }
  0x77   :  { %268 = vadd.xlane.f32.xlu1 %v267_v52  ;;  %264 = vadd.xlane.f32.xlu0 %v263_v63  ;;  %v371_v52 = vmul.f32 %v13533_v62, %v13533_v62  ;;  %v499_v63 = vsel %vm149_vm0, %v374_v57, 0.0 }
  0x78   :  { %v500_v11 = vadd.f32 %v499_v63, %v373_v19 }
  0x79   :  { %v496_v12 = vadd.f32 %v495_v2, %v371_v52 }
  0x7b   :  { %493 = vadd.xlane.f32.xlu1 %v492_v44  ;;  %489 = vadd.xlane.f32.xlu0 %v488_v15  ;;  %v13554_v15 = vld [vmem:[%s18648_s5 + $0x38] sm:$0xff]  }
  0x7c   :  { %11444 = vmatprep.subr.bf16.mxu0 %v13554_v15 }
  0x7f   :  { %276 = vadd.xlane.f32.xlu1 %v275_v49  ;;  %272 = vadd.xlane.f32.xlu0 %v271_v51 }
  0x83   :  { %501 = vadd.xlane.f32.xlu1 %v500_v11  ;;  %497 = vadd.xlane.f32.xlu0 %v496_v12 }
  0x90   :  { %v165_v18 = vpop.xlane.xlu1 %164  ;;  %v153_v44 = vpop.xlane.xlu0 %152 }
  0x91   :  { %v13556_v28 = vmul.f32 0.0069444445, %v153_v44  ;;  %v13565_v63 = vmul.f32 0.0069444445, %v165_v18 }
  0x93   :  { %v535_v39 = vmul.f32 %v13556_v28, %v13556_v28  ;;  %v538_v25 = vmul.f32 %v13565_v63, %v13565_v63 }
  0x94   :  { %v378_v48 = vpop.xlane.xlu1 %377  ;;  %v157_v57 = vpop.xlane.xlu0 %156 }
  0x95   :  { %v503_v19 = vmul.f32 0.0069444445, %v378_v48  ;;  %v13561_v49 = vmul.f32 0.0069444445, %v157_v57 }
  0x97   :  { %v567_v51 = vsub.f32 %v503_v19, %v535_v39  ;;  %v536_v52 = vmul.f32 %v13561_v49, %v13561_v49 }
  0x98   :  { %v382_v2 = vpop.xlane.xlu1 %381  ;;  %v161_v11 = vpop.xlane.xlu0 %160 }
  0x99   :  { %v599_v12 = vmax.f32 %v567_v51, 0.0  ;;  %v504_v44 = vmul.f32 0.0069444445, %v382_v2  ;;  %v13567_v62 = vmul.f32 0.0069444445, %v161_v11  ;;  %v824_v2 = vlaneseq }
  0x9b   :  { %v695_v14 = vadd.f32 1e-05, %v599_v12  ;;  %v568_v24 = vsub.f32 %v504_v44, %v536_v52  ;;  %v537_v39 = vmul.f32 %v13567_v62, %v13567_v62  ;;  %v825_v33 = vshrl.u32 %v824_v2, 7 }
  0x9c   :  { %v390_v48 = vpop.xlane.xlu1 %389  ;;  %v386_v57 = vpop.xlane.xlu0 %385 }
  0x9d   :  { %12336 = vrsqrt.f32 %v695_v14  ;;  %v600_v19 = vmax.f32 %v568_v24, 0.0  ;;  %v506_v18 = vmul.f32 0.0069444445, %v390_v48  ;;  %v505_v45 = vmul.f32 0.0069444445, %v386_v57 }
  0x9e   :  { %v13581_v57 = vsub.s32 0, %v825_v33 }
  0x9f   :  { %v696_v23 = vadd.f32 1e-05, %v600_v19  ;;  %v570_v32 = vsub.f32 %v506_v18, %v538_v25  ;;  %v569_v51 = vsub.f32 %v505_v45, %v537_v39  ;;  %v147_v18 = vld [vmem:[%s18649_s2] sm:$0x3] }
  0xa0   :  { %v173_v11 = vpop.xlane.xlu1 %172  ;;  %v169_v21 = vpop.xlane.xlu0 %168  ;;  %19013 = vst [vmem:[#allocation35_spill] sm:$0xff] %v13581_v57 }
  0xa1   :  { %12338 = vrsqrt.f32 %v696_v23  ;;  %v602_v52 = vmax.f32 %v570_v32, 0.0  ;;  %v601_v12 = vmax.f32 %v569_v51, 0.0  ;;  %v13573_v44 = vmul.f32 0.0069444445, %v173_v11 }
  0xa2   :  { %v13575_v29 = vmul.f32 0.0069444445, %v169_v21  ;;  %v13586_v51 = vsub.s32 1, %v825_v33  ;;  %v631_v33 = vsub.f32 %v13047_v5, %v13556_v28  ;;  %v633_v5 = vsub.f32 %v13054_v8, %v13561_v49 }
  0xa3   :  { %v698_v38 = vadd.f32 1e-05, %v602_v52  ;;  %v697_v47 = vadd.f32 1e-05, %v601_v12  ;;  %v540_v14 = vmul.f32 %v13573_v44, %v13573_v44 }
  0xa4   :  { %v398_v24 = vpop.xlane.xlu1 %397  ;;  %v539_v45 = vmul.f32 %v13575_v29, %v13575_v29  ;;  %v394_v25 = vpop.xlane.xlu0 %393  ;;  %19014 = vst [vmem:[#allocation36_spill] sm:$0xff] %v13586_v51 }
  0xa5   :  { %v508_v48 = vmul.f32 0.0069444445, %v398_v24  ;;  %v507_v39 = vmul.f32 0.0069444445, %v394_v25  ;;  %12340 = vrsqrt.f32 %v697_v47  ;;  %v13598_v25 = vrot.slane %v147_v18, %v13581_v57 }
  0xa6   :  { %12342 = vrsqrt.f32 %v698_v38  ;;  %v632_v38 = vsub.f32 %v13049_v6, %v13556_v28 }
  0xa7   :  { %v572_v23 = vsub.f32 %v508_v48, %v540_v14  ;;  %v571_v32 = vsub.f32 %v507_v39, %v539_v45  ;;  %v148_v45 = vld [vmem:[%s18650_s3] sm:$0x3] }
  0xa8   :  { %v181_v21 = vpop.xlane.xlu1 %180  ;;  %v177_v19 = vpop.xlane.xlu0 %176  ;;  %v13614_v28 = vrot.slane %v148_v45, %v13581_v57 }
  0xa9   :  { %v604_v2 = vmax.f32 %v572_v23, 0.0  ;;  %v603_v11 = vmax.f32 %v571_v32, 0.0  ;;  %v13588_v52 = vmul.f32 0.0069444445, %v181_v21  ;;  %v13590_v12 = vmul.f32 0.0069444445, %v177_v19 }
  0xaa   :  { %v12337_v47 = vpop.eup %12336  ;;  %v13607_v32 = vrot.slane %v147_v18, %v13586_v51  ;;  %v634_v21 = vsub.f32 %v13056_v9, %v13561_v49 }
  0xab   :  { %v700_v14 = vadd.f32 1e-05, %v604_v2  ;;  %v699_v24 = vadd.f32 1e-05, %v603_v11  ;;  %v542_v48 = vmul.f32 %v13588_v52, %v13588_v52  ;;  %v541_v23 = vmul.f32 %v13590_v12, %v13590_v12 }
  0xac   :  { %v406_v39 = vpop.xlane.xlu1 %405  ;;  %v402_v6 = vpop.xlane.xlu0 %401  ;;  %v760_v11 = vmul.f32 %v12337_v47, %v632_v38  ;;  %v759_v53 = vmul.f32 %v12337_v47, %v631_v33  ;;  %v637_v47 = vsub.f32 %v13043_v3, %v13565_v63 }
  0xad   :  { %v510_v19 = vmul.f32 0.0069444445, %v406_v39  ;;  %v509_v2 = vmul.f32 0.0069444445, %v402_v6  ;;  %12344 = vrsqrt.f32 %v700_v14  ;;  %v13618_v39 = vrot.slane %v148_v45, %v13586_v51 }
  0xae   :  { %v12339_v46 = vpop.eup %12338  ;;  %12346 = vrsqrt.f32 %v699_v24  ;;  %v835_v9 = vmul.f32 %v13607_v32, %v760_v11  ;;  %v834_v6 = vmul.f32 %v13598_v25, %v759_v53  ;;  %v638_v24 = vsub.f32 %v13045_v4, %v13565_v63 }
  0xaf   :  { %v574_v7 = vsub.f32 %v510_v19, %v542_v48  ;;  %v573_v50 = vsub.f32 %v509_v2, %v541_v23  ;;  %v762_v18 = vmul.f32 %v12339_v46, %v634_v21  ;;  %v761_v38 = vmul.f32 %v12339_v46, %v633_v5 }
  0xb0   :  { %v189_v56 = vpop.xlane.xlu1 %188  ;;  %v185_v27 = vpop.xlane.xlu0 %184  ;;  %v635_v53 = vsub.f32 %v13075_v20, %v13567_v62  ;;  %v910_v46 = vadd.f32 %v13618_v39, %v835_v9  ;;  %v909_v23 = vadd.f32 %v13614_v28, %v834_v6  ;;  %v12264_v6 = vld [vmem:[%s18648_s5 + $0x30] sm:$0xff]  }
  0xb1   :  { %v606_v8 = vmax.f32 %v574_v7, 0.0  ;;  %v605_v49 = vmax.f32 %v573_v50, 0.0  ;;  %v13621_v14 = vmul.f32 0.0069444445, %v189_v56  ;;  %v13623_v57 = vmul.f32 0.0069444445, %v185_v27 }
  0xb2   :  { %v837_v33 = vmul.f32 %v13607_v32, %v762_v18  ;;  %v836_v45 = vmul.f32 %v13598_v25, %v761_v38  ;;  %v12341_v48 = vpop.eup %12340  ;;  %v636_v50 = vsub.f32 %v13058_v10, %v13567_v62 }
  0xb3   :  { %v702_v56 = vadd.f32 1e-05, %v606_v8  ;;  %v701_v27 = vadd.f32 1e-05, %v605_v49  ;;  %v12343_v7 = vpop.eup %12342  ;;  %v544_v4 = vmul.f32 %v13621_v14, %v13621_v14  ;;  %v543_v10 = vmul.f32 %v13623_v57, %v13623_v57 }
  0xb4   :  { %v912_v3 = vadd.f32 %v13618_v39, %v837_v33  ;;  %v414_v63 = vpop.xlane.xlu1 %413  ;;  %v410_v21 = vpop.xlane.xlu0 %409  ;;  %v911_v20 = vadd.f32 %v13614_v28, %v836_v45  ;;  %v764_v11 = vmul.f32 %v12341_v48, %v636_v50  ;;  %v766_v9 = vmul.f32 %v12343_v7, %v638_v24 }
  0xb5   :  { %12348 = vrsqrt.f32 %v702_v56  ;;  %v512_v19 = vmul.f32 0.0069444445, %v414_v63  ;;  %v511_v2 = vmul.f32 0.0069444445, %v410_v21  ;;  %v763_v38 = vmul.f32 %v12341_v48, %v635_v53 }
  0xb6   :  { %12350 = vrsqrt.f32 %v701_v27  ;;  %v974_v62 = vpack.c.bf16 %v912_v3, %v910_v46  ;;  %v973_v18 = vpack.c.bf16 %v911_v20, %v909_v23  ;;  %v641_v8 = vsub.f32 %v13104_v40, %v13573_v44 }
  0xb7   :  { %v576_v5 = vsub.f32 %v512_v19, %v544_v4  ;;  %v575_v49 = vsub.f32 %v511_v2, %v543_v10  ;;  %v839_v33 = vmul.f32 %v13607_v32, %v764_v11  ;;  %v765_v27 = vmul.f32 %v12343_v7, %v637_v47 }
  0xb8   :  { %10955 = vmatprep.mubr.msk.bf16.mxu0 %vm149_vm0, %v974_v62  ;;  %v197_v45 = vpop.xlane.xlu1 %196  ;;  %v193_v56 = vpop.xlane.xlu0 %192  ;;  %v841_v24 = vmul.f32 %v13607_v32, %v766_v9  ;;  %v838_v40 = vmul.f32 %v13598_v25, %v763_v38  ;;  %v642_v47 = vsub.f32 %v13100_v36, %v13573_v44  ;;  %v639_v7 = vsub.f32 %v13106_v41, %v13575_v29  ;;  %v12265_v41 = vld [vmem:[%s18648_s5 + $0x28] sm:$0xff]  }
  0xb9   :  { %v608_v50 = vmax.f32 %v576_v5, 0.0  ;;  %1158 = vmatmul.mubr.bf16.vlgmr.msra.gmra.mxu0 %v973_v18  ;;  %v13651_v48 = vmul.f32 0.0069444445, %v197_v45  ;;  %v13653_v53 = vmul.f32 0.0069444445, %v193_v56  ;;  %v607_v46 = vmax.f32 %v575_v49, 0.0 }
  0xba   :  { %v914_v3 = vadd.f32 %v13618_v39, %v839_v33  ;;  %v840_v4 = vmul.f32 %v13598_v25, %v765_v27  ;;  %11445 = vmatpush3.bf16.msra.mxu0 %v13554_v15  ;;  %v12345_v63 = vpop.eup %12344  ;;  %v916_v21 = vadd.f32 %v13618_v39, %v841_v24  ;;  %v640_v20 = vsub.f32 %v13102_v37, %v13575_v29 }
  0xbb   :  { %v704_v23 = vadd.f32 1e-05, %v608_v50  ;;  %11446 = vmatprep.subr.bf16.mxu0 %v12264_v6  ;;  %v12347_v19 = vpop.eup %12346  ;;  %v645_v10 = vsub.f32 %v13134_v58, %v13588_v52  ;;  %v703_v62 = vadd.f32 1e-05, %v607_v46  ;;  %v546_v15 = vmul.f32 %v13651_v48, %v13651_v48 }
  0xbc   :  { %v422_v2 = vpop.xlane.xlu1 %421  ;;  %v418_v36 = vpop.xlane.xlu0 %417  ;;  %v976_v44 = vpack.c.bf16 %v916_v21, %v914_v3  ;;  %v913_v5 = vadd.f32 %v13614_v28, %v838_v40  ;;  %v915_v37 = vadd.f32 %v13614_v28, %v840_v4  ;;  %v545_v29 = vmul.f32 %v13653_v53, %v13653_v53  ;;  %v12266_v3 = vld [vmem:[%s18648_s5 + $0x20] sm:$0xff]  }
  0xbd   :  { %12352 = vrsqrt.f32 %v704_v23  ;;  %v514_v11 = vmul.f32 0.0069444445, %v422_v2  ;;  %v513_v18 = vmul.f32 0.0069444445, %v418_v36  ;;  %v768_v38 = vmul.f32 %v12347_v19, %v640_v20 }
  0xbe   :  { %12354 = vrsqrt.f32 %v703_v62  ;;  %11447 = vmatpush3.bf16.msra.mxu0 %v12264_v6  ;;  %10956 = vmatprep.mubr.msk.bf16.mxu0 %vm149_vm0, %v976_v44  ;;  %v770_v49 = vmul.f32 %v12345_v63, %v642_v47  ;;  %v767_v33 = vmul.f32 %v12347_v19, %v639_v7  ;;  %v646_v45 = vsub.f32 %v13130_v54, %v13588_v52 }
  0xbf   :  { %v578_v9 = vsub.f32 %v514_v11, %v546_v15  ;;  %v975_v56 = vpack.c.bf16 %v915_v37, %v913_v5  ;;  %v577_v27 = vsub.f32 %v513_v18, %v545_v29  ;;  %v769_v46 = vmul.f32 %v12345_v63, %v641_v8  ;;  %11448 = vmatprep.subr.bf16.mxu0 %v12265_v41 }
  0xc0   :  { %v205_v50 = vpop.xlane.xlu1 %204  ;;  %v201_v24 = vpop.xlane.xlu0 %200  ;;  %v843_v40 = vmul.f32 %v13607_v32, %v768_v38  ;;  %v845_v4 = vmul.f32 %v13607_v32, %v770_v49  ;;  %v842_v21 = vmul.f32 %v13598_v25, %v767_v33  ;;  %v643_v19 = vsub.f32 %v13136_v59, %v13590_v12 }
  0xc1   :  { %v610_v6 = vmax.f32 %v578_v9, 0.0  ;;  %v13685_v47 = vmul.f32 0.0069444445, %v205_v50  ;;  %1166 = vmatmul.mubr.bf16.gmra.mxu0 %v975_v56  ;;  %v609_v54 = vmax.f32 %v577_v27, 0.0  ;;  %v13687_v23 = vmul.f32 0.0069444445, %v201_v24 }
  0xc2   :  { %v12349_v7 = vpop.eup %12348  ;;  %v844_v8 = vmul.f32 %v13598_v25, %v769_v46  ;;  %v644_v20 = vsub.f32 %v13132_v55, %v13590_v12  ;;  %v918_v62 = vadd.f32 %v13618_v39, %v843_v40  ;;  %v920_v15 = vadd.f32 %v13618_v39, %v845_v4  ;;  %11449 = vmatpush3.bf16.msra.mxu0 %v12265_v41  ;;  %v12267_v55 = vld [vmem:[%s18648_s5 + $0x18] sm:$0xff]   ;;  %v12268_v40 = vld [vmem:[%s18648_s5 + $0x10] sm:$0xff]  }
  0xc3   :  { %v12351_v63 = vpop.eup %12350  ;;  %v649_v2 = vsub.f32 %v13164_v17, %v13621_v14  ;;  %v650_v36 = vsub.f32 %v13158_v13, %v13621_v14  ;;  %v706_v44 = vadd.f32 1e-05, %v610_v6  ;;  %v705_v11 = vadd.f32 1e-05, %v609_v54  ;;  %11450 = vmatprep.subr.bf16.mxu0 %v12266_v3 }
  0xc4   :  { %v430_v5 = vpop.xlane.xlu1 %429  ;;  %v426_v37 = vpop.xlane.xlu0 %425  ;;  %v648_v59 = vsub.f32 %v13162_v16, %v13623_v57  ;;  %v978_v12 = vpack.c.bf16 %v920_v15, %v918_v62  ;;  %v548_v41 = vmul.f32 %v13685_v47, %v13685_v47  ;;  %v917_v18 = vadd.f32 %v13614_v28, %v842_v21 }
  0xc5   :  { %v516_v29 = vmul.f32 0.0069444445, %v430_v5  ;;  %12356 = vrsqrt.f32 %v705_v11  ;;  %v919_v9 = vadd.f32 %v13614_v28, %v844_v8  ;;  %v547_v38 = vmul.f32 %v13687_v23, %v13687_v23 }
  0xc6   :  { %10957 = vmatprep.mubr.msk.bf16.mxu0 %vm149_vm0, %v978_v12  ;;  %v515_v33 = vmul.f32 0.0069444445, %v426_v37  ;;  %v772_v56 = vmul.f32 %v12351_v63, %v644_v20  ;;  %v774_v27 = vmul.f32 %v12349_v7, %v646_v45  ;;  %11451 = vmatpush3.bf16.msra.mxu0 %v12266_v3  ;;  %12358 = vrsqrt.f32 %v706_v44 }
  0xc7   :  { %v580_v49 = vsub.f32 %v516_v29, %v548_v41  ;;  %v977_v16 = vpack.c.bf16 %v919_v9, %v917_v18  ;;  %v771_v46 = vmul.f32 %v12351_v63, %v643_v19  ;;  %v773_v6 = vmul.f32 %v12349_v7, %v645_v10  ;;  %11452 = vmatprep.subr.bf16.mxu0 %v12267_v55  ;;  %v12269_v41 = vld [vmem:[%s18648_s5 + $0x8] sm:$0xff]  }
  0xc8   :  { %v213_v50 = vpop.xlane.xlu1 %212  ;;  %v209_v24 = vpop.xlane.xlu0 %208  ;;  %v579_v54 = vsub.f32 %v515_v33, %v547_v38  ;;  %v847_v21 = vmul.f32 %v13607_v32, %v772_v56  ;;  %v849_v45 = vmul.f32 %v13607_v32, %v774_v27  ;;  %v647_v15 = vsub.f32 %v13168_v22, %v13623_v57 }
  0xc9   :  { %v612_v4 = vmax.f32 %v580_v49, 0.0  ;;  %1174 = vmatmul.mubr.bf16.gmra.mxu0 %v977_v16  ;;  %v13721_v8 = vmul.f32 0.0069444445, %v213_v50  ;;  %v13723_v63 = vmul.f32 0.0069444445, %v209_v24  ;;  %v846_v58 = vmul.f32 %v13598_v25, %v771_v46 }
  0xca   :  { %v12353_v3 = vpop.eup %12352  ;;  %v848_v52 = vmul.f32 %v13598_v25, %v773_v6  ;;  %v611_v19 = vmax.f32 %v579_v54, 0.0  ;;  %v922_v20 = vadd.f32 %v13618_v39, %v847_v21  ;;  %v924_v62 = vadd.f32 %v13618_v39, %v849_v45  ;;  %11453 = vmatpush3.bf16.msra.mxu0 %v12267_v55 }
  0xcb   :  { %v12355_v10 = vpop.eup %12354  ;;  %v708_v7 = vadd.f32 1e-05, %v612_v4  ;;  %v653_v44 = vsub.f32 %v13194_v42, %v13651_v48  ;;  %v654_v11 = vsub.f32 %v13190_v34, %v13651_v48  ;;  %v651_v5 = vsub.f32 %v13196_v43, %v13653_v53  ;;  %11454 = vmatprep.subr.bf16.mxu0 %v12268_v40 }
  0xcc   :  { %v438_v37 = vpop.xlane.xlu1 %437  ;;  %v434_v12 = vpop.xlane.xlu0 %433  ;;  %v707_v55 = vadd.f32 1e-05, %v611_v19  ;;  %v980_v29 = vpack.c.bf16 %v924_v62, %v922_v20  ;;  %v550_v22 = vmul.f32 %v13721_v8, %v13721_v8  ;;  %v921_v18 = vadd.f32 %v13614_v28, %v846_v58 }
  0xcd   :  { %12360 = vrsqrt.f32 %v708_v7  ;;  %v518_v57 = vmul.f32 0.0069444445, %v438_v37  ;;  %v923_v9 = vadd.f32 %v13614_v28, %v848_v52  ;;  %v549_v38 = vmul.f32 %v13723_v63, %v13723_v63 }
  0xce   :  { %12362 = vrsqrt.f32 %v707_v55  ;;  %10958 = vmatprep.mubr.msk.bf16.mxu0 %vm149_vm0, %v980_v29  ;;  %v517_v49 = vmul.f32 0.0069444445, %v434_v12  ;;  %v776_v33 = vmul.f32 %v12355_v10, %v648_v59  ;;  %v778_v56 = vmul.f32 %v12353_v3, %v650_v36  ;;  %11455 = vmatpush3.bf16.msra.mxu0 %v12268_v40 }
  0xcf   :  { %v582_v27 = vsub.f32 %v518_v57, %v550_v22  ;;  %v979_v16 = vpack.c.bf16 %v923_v9, %v921_v18  ;;  %v775_v46 = vmul.f32 %v12355_v10, %v647_v15  ;;  %v777_v6 = vmul.f32 %v12353_v3, %v649_v2  ;;  %11456 = vmatprep.subr.bf16.mxu0 %v12269_v41 }
  0xd0   :  { %v221_v50 = vpop.xlane.xlu1 %220  ;;  %v217_v24 = vpop.xlane.xlu0 %216  ;;  %v581_v4 = vsub.f32 %v517_v49, %v549_v38  ;;  %v851_v59 = vmul.f32 %v13607_v32, %v776_v33  ;;  %v853_v36 = vmul.f32 %v13607_v32, %v778_v56  ;;  %v652_v17 = vsub.f32 %v13192_v35, %v13653_v53 }
  0xd1   :  { %v13753_v54 = vmul.f32 0.0069444445, %v221_v50  ;;  %v13755_v21 = vmul.f32 0.0069444445, %v217_v24  ;;  %v614_v13 = vmax.f32 %v582_v27, 0.0  ;;  %1182 = vmatmul.mubr.bf16.gmra.mxu0 %v979_v16  ;;  %v850_v40 = vmul.f32 %v13598_v25, %v775_v46 }
  0xd2   :  { %v852_v45 = vmul.f32 %v13598_v25, %v777_v6  ;;  %v12357_v58 = vpop.eup %12356  ;;  %v657_v14 = vsub.f32 %v13224_v0, %v13685_v47  ;;  %v658_v2 = vsub.f32 %v13220_v60, %v13685_v47  ;;  %v613_v3 = vmax.f32 %v581_v4, 0.0  ;;  %11457 = vmatpush3.bf16.msra.mxu0 %v12269_v41  ;;  %v19016_v47 = vld [vmem:[#allocation5_spill] sm:$0xff] }
  0xd3   :  { %v655_v52 = vsub.f32 %v13226_v1, %v13687_v23  ;;  %v710_v10 = vadd.f32 1e-05, %v614_v13  ;;  %v926_v7 = vadd.f32 %v13618_v39, %v851_v59  ;;  %v928_v19 = vadd.f32 %v13618_v39, %v853_v36  ;;  %v12359_v15 = vpop.eup %12358 }
  0xd4   :  { %v446_v20 = vpop.xlane.xlu1 %445  ;;  %v442_v62 = vpop.xlane.xlu0 %441  ;;  %v709_v35 = vadd.f32 1e-05, %v613_v3  ;;  %v552_v37 = vmul.f32 %v13753_v54, %v13753_v54  ;;  %v925_v55 = vadd.f32 %v13614_v28, %v850_v40  ;;  %v927_v29 = vadd.f32 %v13614_v28, %v852_v45 }
  0xd5   :  { %v520_v12 = vmul.f32 0.0069444445, %v446_v20  ;;  %12364 = vrsqrt.f32 %v710_v10  ;;  %v982_v41 = vpack.c.bf16 %v928_v19, %v926_v7  ;;  %v551_v22 = vmul.f32 %v13755_v21, %v13755_v21 }
  0xd6   :  { %12366 = vrsqrt.f32 %v709_v35  ;;  %v519_v18 = vmul.f32 0.0069444445, %v442_v62  ;;  %v780_v9 = vmul.f32 %v12357_v58, %v652_v17  ;;  %v981_v38 = vpack.c.bf16 %v927_v29, %v925_v55 }
  0xd7   :  { %v584_v57 = vsub.f32 %v520_v12, %v552_v37  ;;  %10959 = vmatprep.mubr.msk.bf16.mxu0 %vm149_vm0, %v982_v41  ;;  %v782_v56 = vmul.f32 %v12359_v15, %v654_v11  ;;  %v779_v27 = vmul.f32 %v12357_v58, %v651_v5  ;;  %v781_v16 = vmul.f32 %v12359_v15, %v653_v44 }
  0xd8   :  { %v229_v49 = vpop.xlane.xlu1 %228  ;;  %v225_v33 = vpop.xlane.xlu0 %224  ;;  %v583_v24 = vsub.f32 %v519_v18, %v551_v22  ;;  %v855_v59 = vmul.f32 %v13607_v32, %v780_v9  ;;  %v656_v42 = vsub.f32 %v13222_v61, %v13687_v23  ;;  %v661_v48 = vsub.f32 %v13254_v30, %v13721_v8 }
  0xd9   :  { %v616_v50 = vmax.f32 %v584_v57, 0.0  ;;  %v13787_v46 = vmul.f32 0.0069444445, %v229_v49  ;;  %v13789_v6 = vmul.f32 0.0069444445, %v225_v33  ;;  %1190 = vmatmul.mubr.bf16.gmra.mxu0 %v981_v38  ;;  %v857_v34 = vmul.f32 %v13607_v32, %v782_v56 }
  0xda   :  { %v12361_v4 = vpop.eup %12360  ;;  %v854_v11 = vmul.f32 %v13598_v25, %v779_v27  ;;  %v856_v43 = vmul.f32 %v13598_v25, %v781_v16  ;;  %v615_v44 = vmax.f32 %v583_v24, 0.0  ;;  %v662_v13 = vsub.f32 %v13250_v26, %v13721_v8  ;;  %v19017_v27 = vld [vmem:[#allocation3_spill] sm:$0xff]  ;;  %v19020_v8 = vld [vmem:[#allocation9_spill] sm:$0xff] }
  0xdb   :  { %v712_v53 = vadd.f32 1e-05, %v616_v50  ;;  %v12363_v5 = vpop.eup %12362  ;;  %v659_v36 = vsub.f32 %v13256_v31, %v13723_v63  ;;  %v930_v40 = vadd.f32 %v13618_v39, %v855_v59  ;;  %v932_v45 = vadd.f32 %v13618_v39, %v857_v34  ;;  %v19018_v50 = vld [vmem:[#allocation6_spill] sm:$0xff] }
  0xdc   :  { %v454_v58 = vpop.xlane.xlu1 %453  ;;  %v450_v17 = vpop.xlane.xlu0 %449  ;;  %v711_v61 = vadd.f32 1e-05, %v615_v44  ;;  %v554_v3 = vmul.f32 %v13787_v46, %v13787_v46  ;;  %v929_v19 = vadd.f32 %v13614_v28, %v854_v11  ;;  %v931_v26 = vadd.f32 %v13614_v28, %v856_v43 }
  0xdd   :  { %12368 = vrsqrt.f32 %v712_v53  ;;  %v522_v10 = vmul.f32 0.0069444445, %v454_v58  ;;  %v984_v7 = vpack.c.bf16 %v932_v45, %v930_v40  ;;  %v553_v31 = vmul.f32 %v13789_v6, %v13789_v6 }
  0xde   :  { %12370 = vrsqrt.f32 %v711_v61  ;;  %v521_v62 = vmul.f32 0.0069444445, %v450_v17  ;;  %v784_v15 = vmul.f32 %v12363_v5, %v656_v42  ;;  %v983_v35 = vpack.c.bf16 %v931_v26, %v929_v19 }
  0xdf   :  { %v586_v20 = vsub.f32 %v522_v10, %v554_v3  ;;  %10960 = vmatprep.mubr.msk.bf16.mxu0 %vm149_vm0, %v984_v7  ;;  %v786_v55 = vmul.f32 %v12361_v4, %v658_v2  ;;  %v783_v41 = vmul.f32 %v12363_v5, %v655_v52  ;;  %v785_v29 = vmul.f32 %v12361_v4, %v657_v14  ;;  %v19015_v52 = vld [vmem:[#allocation2_spill] sm:$0xff] }
  0xe0   :  { %v237_v37 = vpop.xlane.xlu1 %236  ;;  %v233_v12 = vpop.xlane.xlu0 %232  ;;  %v585_v57 = vsub.f32 %v521_v62, %v553_v31  ;;  %v859_v38 = vmul.f32 %v13607_v32, %v784_v15  ;;  %v660_v0 = vsub.f32 %v19015_v52, %v13723_v63  ;;  %v665_v14 = vsub.f32 %v19016_v47, %v13753_v54 }
  0xe1   :  { %v618_v22 = vmax.f32 %v586_v20, 0.0  ;;  %v13821_v18 = vmul.f32 0.0069444445, %v237_v37  ;;  %v13823_v9 = vmul.f32 0.0069444445, %v233_v12  ;;  %1198 = vmatmul.mubr.bf16.gmra.mxu0 %v983_v35  ;;  %v861_v60 = vmul.f32 %v13607_v32, %v786_v55 }
  0xe2   :  { %v858_v2 = vmul.f32 %v13598_v25, %v783_v41  ;;  %v860_v1 = vmul.f32 %v13598_v25, %v785_v29  ;;  %v12365_v23 = vpop.eup %12364  ;;  %v617_v33 = vmax.f32 %v585_v57, 0.0  ;;  %v666_v16 = vsub.f32 %v19017_v27, %v13753_v54  ;;  %v19021_v57 = vld [vmem:[#allocation7_spill] sm:$0xff] }
  0xe3   :  { %v714_v49 = vadd.f32 1e-05, %v618_v22  ;;  %v12367_v56 = vpop.eup %12366  ;;  %v663_v24 = vsub.f32 %v19018_v50, %v13755_v21  ;;  %v934_v4 = vadd.f32 %v13618_v39, %v859_v38  ;;  %v936_v59 = vadd.f32 %v13618_v39, %v861_v60  ;;  %v19022_v60 = vld [vmem:[#allocation10_spill] sm:$0xff] }
  0xe4   :  { %v462_v34 = vpop.xlane.xlu1 %461  ;;  %v458_v11 = vpop.xlane.xlu0 %457  ;;  %v713_v63 = vadd.f32 1e-05, %v617_v33  ;;  %v556_v43 = vmul.f32 %v13821_v18, %v13821_v18  ;;  %v933_v44 = vadd.f32 %v13614_v28, %v858_v2  ;;  %v935_v5 = vadd.f32 %v13614_v28, %v860_v1 }
  0xe5   :  { %12372 = vrsqrt.f32 %v714_v49  ;;  %v524_v42 = vmul.f32 0.0069444445, %v462_v34  ;;  %v986_v53 = vpack.c.bf16 %v936_v59, %v934_v4  ;;  %v555_v40 = vmul.f32 %v13823_v9, %v13823_v9 }
  0xe6   :  { %12374 = vrsqrt.f32 %v713_v63  ;;  %v523_v58 = vmul.f32 0.0069444445, %v458_v11  ;;  %v788_v17 = vmul.f32 %v12367_v56, %v660_v0  ;;  %v985_v61 = vpack.c.bf16 %v935_v5, %v933_v44 }
  0xe7   :  { %v588_v45 = vsub.f32 %v524_v42, %v556_v43  ;;  %10961 = vmatprep.mubr.msk.bf16.mxu0 %vm149_vm0, %v986_v53  ;;  %v790_v7 = vmul.f32 %v12365_v23, %v662_v13  ;;  %v787_v19 = vmul.f32 %v12367_v56, %v659_v36  ;;  %v789_v26 = vmul.f32 %v12365_v23, %v661_v48  ;;  %v19019_v36 = vld [vmem:[#allocation4_spill] sm:$0xff] }
  0xe8   :  { %v245_v3 = vpop.xlane.xlu1 %244  ;;  %v241_v10 = vpop.xlane.xlu0 %240  ;;  %v587_v20 = vsub.f32 %v523_v58, %v555_v40  ;;  %v863_v37 = vmul.f32 %v13607_v32, %v788_v17  ;;  %v664_v30 = vsub.f32 %v19019_v36, %v13755_v21  ;;  %v669_v48 = vsub.f32 %v19020_v8, %v13787_v46 }
  0xe9   :  { %v620_v31 = vmax.f32 %v588_v45, 0.0  ;;  %v13849_v62 = vmul.f32 0.0069444445, %v245_v3  ;;  %v13851_v15 = vmul.f32 0.0069444445, %v241_v10  ;;  %1206 = vmatmul.mubr.bf16.gmra.mxu0 %v985_v61  ;;  %v865_v12 = vmul.f32 %v13607_v32, %v790_v7 }
  0xea   :  { %v12369_v35 = vpop.eup %12368  ;;  %v862_v55 = vmul.f32 %v13598_v25, %v787_v19  ;;  %v864_v13 = vmul.f32 %v13598_v25, %v789_v26  ;;  %v619_v29 = vmax.f32 %v587_v20, 0.0  ;;  %v670_v38 = vsub.f32 %v19021_v57, %v13787_v46 }
  0xeb   :  { %v716_v41 = vadd.f32 1e-05, %v620_v31  ;;  %v12371_v22 = vpop.eup %12370  ;;  %v667_v2 = vsub.f32 %v19022_v60, %v13789_v6  ;;  %v938_v1 = vadd.f32 %v13618_v39, %v863_v37  ;;  %v940_v23 = vadd.f32 %v13618_v39, %v865_v12  ;;  %v19025_v12 = vld [vmem:[#allocation11_spill] sm:$0xff] }
  0xec   :  { %v470_v52 = vpop.xlane.xlu1 %469  ;;  %v466_v0 = vpop.xlane.xlu0 %465  ;;  %v715_v21 = vadd.f32 1e-05, %v619_v29  ;;  %v558_v49 = vmul.f32 %v13849_v62, %v13849_v62  ;;  %v937_v4 = vadd.f32 %v13614_v28, %v862_v55  ;;  %v939_v59 = vadd.f32 %v13614_v28, %v864_v13  ;;  %v19026_v13 = vld [vmem:[#allocation14_spill] sm:$0xff] }
  0xed   :  { %12376 = vrsqrt.f32 %v716_v41  ;;  %v526_v33 = vmul.f32 0.0069444445, %v470_v52  ;;  %v988_v56 = vpack.c.bf16 %v940_v23, %v938_v1  ;;  %v557_v34 = vmul.f32 %v13851_v15, %v13851_v15 }
  0xee   :  { %12378 = vrsqrt.f32 %v715_v21  ;;  %v525_v63 = vmul.f32 0.0069444445, %v466_v0  ;;  %v792_v43 = vmul.f32 %v12371_v22, %v664_v30  ;;  %v987_v42 = vpack.c.bf16 %v939_v59, %v937_v4 }
  0xef   :  { %v590_v11 = vsub.f32 %v526_v33, %v558_v49  ;;  %10962 = vmatprep.mubr.msk.bf16.mxu0 %vm149_vm0, %v988_v56  ;;  %v794_v5 = vmul.f32 %v12369_v35, %v666_v16  ;;  %v791_v40 = vmul.f32 %v12371_v22, %v663_v24  ;;  %v793_v45 = vmul.f32 %v12369_v35, %v665_v14  ;;  %v19023_v24 = vld [vmem:[#allocation8_spill] sm:$0xff]  ;;  %v19024_v14 = vld [vmem:[#allocation13_spill] sm:$0xff] }
  0xf0   :  { %v253_v53 = vpop.xlane.xlu1 %252  ;;  %v249_v44 = vpop.xlane.xlu0 %248  ;;  %v589_v17 = vsub.f32 %v525_v63, %v557_v34  ;;  %v867_v7 = vmul.f32 %v13607_v32, %v792_v43  ;;  %v668_v54 = vsub.f32 %v19023_v24, %v13789_v6  ;;  %v673_v31 = vsub.f32 %v19024_v14, %v13821_v18 }
  0xf1   :  { %v622_v58 = vmax.f32 %v590_v11, 0.0  ;;  %v13877_v61 = vmul.f32 0.0069444445, %v253_v53  ;;  %v13879_v3 = vmul.f32 0.0069444445, %v249_v44  ;;  %1214 = vmatmul.mubr.bf16.gmra.mxu0 %v987_v42  ;;  %v869_v19 = vmul.f32 %v13607_v32, %v794_v5 }
  0xf2   :  { %v12373_v10 = vpop.eup %12372  ;;  %v866_v26 = vmul.f32 %v13598_v25, %v791_v40  ;;  %v868_v16 = vmul.f32 %v13598_v25, %v793_v45  ;;  %v621_v35 = vmax.f32 %v589_v17, 0.0  ;;  %v674_v55 = vsub.f32 %v19025_v12, %v13821_v18 }
  0xf3   :  { %v718_v20 = vadd.f32 1e-05, %v622_v58  ;;  %v12375_v37 = vpop.eup %12374  ;;  %v671_v30 = vsub.f32 %v19026_v13, %v13823_v9  ;;  %v942_v41 = vadd.f32 %v13618_v39, %v867_v7  ;;  %v944_v29 = vadd.f32 %v13618_v39, %v869_v19 }
  0xf4   :  { %v478_v22 = vpop.xlane.xlu1 %477  ;;  %v474_v1 = vpop.xlane.xlu0 %473  ;;  %v717_v6 = vadd.f32 1e-05, %v621_v35  ;;  %v560_v23 = vmul.f32 %v13877_v61, %v13877_v61  ;;  %v941_v21 = vadd.f32 %v13614_v28, %v866_v26  ;;  %v943_v49 = vadd.f32 %v13614_v28, %v868_v16  ;;  %v19029_v35 = vld [vmem:[#allocation15_spill] sm:$0xff] }
  0xf5   :  { %12380 = vrsqrt.f32 %v718_v20  ;;  %v528_v52 = vmul.f32 0.0069444445, %v478_v22  ;;  %v990_v0 = vpack.c.bf16 %v944_v29, %v942_v41  ;;  %v559_v33 = vmul.f32 %v13879_v3, %v13879_v3  ;;  %v19030_v41 = vld [vmem:[#allocation18_spill] sm:$0xff] }
  0xf6   :  { %12382 = vrsqrt.f32 %v717_v6  ;;  %v527_v4 = vmul.f32 0.0069444445, %v474_v1  ;;  %v796_v59 = vmul.f32 %v12375_v37, %v668_v54  ;;  %v989_v34 = vpack.c.bf16 %v943_v49, %v941_v21  ;;  %v12270_v54 = vld [vmem:[%s18648_s5] sm:$0xff]  }
  0xf7   :  { %v592_v56 = vsub.f32 %v528_v52, %v560_v23  ;;  %10963 = vmatprep.mubr.msk.bf16.mxu0 %vm149_vm0, %v990_v0  ;;  %v798_v43 = vmul.f32 %v12373_v10, %v670_v38  ;;  %v795_v42 = vmul.f32 %v12375_v37, %v667_v2  ;;  %v797_v53 = vmul.f32 %v12373_v10, %v669_v48  ;;  %v19027_v2 = vld [vmem:[#allocation12_spill] sm:$0xff]  ;;  %v19028_v48 = vld [vmem:[#allocation17_spill] sm:$0xff] }
  0xf8   :  { %v261_v11 = vpop.xlane.xlu1 %260  ;;  %v257_v63 = vpop.xlane.xlu0 %256  ;;  %v591_v5 = vsub.f32 %v527_v4, %v559_v33  ;;  %v871_v17 = vmul.f32 %v13607_v32, %v796_v59  ;;  %v672_v46 = vsub.f32 %v19027_v2, %v13823_v9  ;;  %v677_v10 = vsub.f32 %v19028_v48, %v13849_v62  ;;  %11458 = vmatprep.subr.bf16.mxu0 %v12270_v54 }
  0xf9   :  { %v624_v44 = vmax.f32 %v592_v56, 0.0  ;;  %v13905_v40 = vmul.f32 0.0069444445, %v261_v11  ;;  %v13907_v45 = vmul.f32 0.0069444445, %v257_v63  ;;  %1222 = vmatmul.mubr.bf16.gmra.mxu0 %v989_v34  ;;  %v873_v7 = vmul.f32 %v13607_v32, %v798_v43 }
  0xfa   :  { %v12377_v58 = vpop.eup %12376  ;;  %v870_v19 = vmul.f32 %v13598_v25, %v795_v42  ;;  %v872_v38 = vmul.f32 %v13598_v25, %v797_v53  ;;  %v623_v16 = vmax.f32 %v591_v5, 0.0  ;;  %v678_v37 = vsub.f32 %v19029_v35, %v13849_v62  ;;  %11459 = vmatpush3.bf16.msra.mxu0 %v12270_v54 }
  0xfb   :  { %v720_v26 = vadd.f32 1e-05, %v624_v44  ;;  %v12379_v20 = vpop.eup %12378  ;;  %v675_v29 = vsub.f32 %v19030_v41, %v13851_v15  ;;  %v946_v22 = vadd.f32 %v13618_v39, %v871_v17  ;;  %v948_v1 = vadd.f32 %v13618_v39, %v873_v7 }
  0xfc   :  { %v486_v6 = vpop.xlane.xlu1 %485  ;;  %v482_v23 = vpop.xlane.xlu0 %481  ;;  %v719_v52 = vadd.f32 1e-05, %v623_v16  ;;  %v562_v0 = vmul.f32 %v13905_v40, %v13905_v40  ;;  %v945_v33 = vadd.f32 %v13614_v28, %v870_v19  ;;  %v947_v56 = vadd.f32 %v13614_v28, %v872_v38 }
  0xfd   :  { %12384 = vrsqrt.f32 %v720_v26  ;;  %v530_v21 = vmul.f32 0.0069444445, %v486_v6  ;;  %v992_v49 = vpack.c.bf16 %v948_v1, %v946_v22  ;;  %v561_v4 = vmul.f32 %v13907_v45, %v13907_v45  ;;  %v19033_v1 = vld [vmem:[#allocation19_spill] sm:$0xff] }
  0xfe   :  { %12386 = vrsqrt.f32 %v719_v52  ;;  %v529_v34 = vmul.f32 0.0069444445, %v482_v23  ;;  %v800_v11 = vmul.f32 %v12379_v20, %v672_v46  ;;  %v991_v63 = vpack.c.bf16 %v947_v56, %v945_v33  ;;  %v19034_v23 = vld [vmem:[#allocation22_spill] sm:$0xff] }
  0xff   :  { %v594_v59 = vsub.f32 %v530_v21, %v562_v0  ;;  %10964 = vmatprep.mubr.msk.bf16.mxu0 %vm149_vm0, %v992_v49  ;;  %v802_v53 = vmul.f32 %v12377_v58, %v674_v55  ;;  %v799_v44 = vmul.f32 %v12379_v20, %v671_v30  ;;  %v801_v5 = vmul.f32 %v12377_v58, %v673_v31  ;;  %v19031_v30 = vld [vmem:[#allocation16_spill] sm:$0xff]  ;;  %v19032_v31 = vld [vmem:[#allocation21_spill] sm:$0xff] }
 0x100   :  { %v269_v43 = vpop.xlane.xlu1 %268  ;;  %v265_v42 = vpop.xlane.xlu0 %264  ;;  %v593_v7 = vsub.f32 %v529_v34, %v561_v4  ;;  %v875_v26 = vmul.f32 %v13607_v32, %v800_v11  ;;  %v676_v18 = vsub.f32 %v19031_v30, %v13851_v15  ;;  %v681_v58 = vsub.f32 %v19032_v31, %v13877_v61 }
 0x101   :  { %v626_v17 = vmax.f32 %v594_v59, 0.0  ;;  %v13942_v19 = vmul.f32 0.0069444445, %v269_v43  ;;  %v13944_v38 = vmul.f32 0.0069444445, %v265_v42  ;;  %1230 = vmatmul.mubr.bf16.gmra.mxu0 %v991_v63  ;;  %v877_v55 = vmul.f32 %v13607_v32, %v802_v53 }
 0x102   :  { %v12381_v46 = vpop.eup %12380  ;;  %v874_v16 = vmul.f32 %v13598_v25, %v799_v44  ;;  %v876_v9 = vmul.f32 %v13598_v25, %v801_v5  ;;  %v625_v20 = vmax.f32 %v593_v7, 0.0  ;;  %v682_v6 = vsub.f32 %v19033_v1, %v13877_v61 }
 0x103   :  { %v722_v54 = vadd.f32 1e-05, %v626_v17  ;;  %v12383_v22 = vpop.eup %12382  ;;  %v679_v52 = vsub.f32 %v19034_v23, %v13879_v3  ;;  %v950_v0 = vadd.f32 %v13618_v39, %v875_v26  ;;  %v952_v21 = vadd.f32 %v13618_v39, %v877_v55 }
 0x104   :  { %v494_v49 = vpop.xlane.xlu1 %493  ;;  %v490_v33 = vpop.xlane.xlu0 %489  ;;  %v721_v56 = vadd.f32 1e-05, %v625_v20  ;;  %v564_v4 = vmul.f32 %v13942_v19, %v13942_v19  ;;  %v949_v11 = vadd.f32 %v13614_v28, %v874_v16  ;;  %v951_v63 = vadd.f32 %v13614_v28, %v876_v9 }
 0x105   :  { %12388 = vrsqrt.f32 %v722_v54  ;;  %v532_v59 = vmul.f32 0.0069444445, %v494_v49  ;;  %v994_v34 = vpack.c.bf16 %v952_v21, %v950_v0  ;;  %v563_v43 = vmul.f32 %v13944_v38, %v13944_v38 }
 0x106   :  { %12390 = vrsqrt.f32 %v721_v56  ;;  %v531_v53 = vmul.f32 0.0069444445, %v490_v33  ;;  %v804_v44 = vmul.f32 %v12383_v22, %v676_v18  ;;  %v993_v5 = vpack.c.bf16 %v951_v63, %v949_v11 }
 0x107   :  { %v596_v42 = vsub.f32 %v532_v59, %v564_v4  ;;  %10965 = vmatprep.mubr.msk.bf16.mxu0 %vm149_vm0, %v994_v34  ;;  %v806_v26 = vmul.f32 %v12381_v46, %v678_v37  ;;  %v803_v55 = vmul.f32 %v12383_v22, %v675_v29  ;;  %v805_v16 = vmul.f32 %v12381_v46, %v677_v10  ;;  %v19035_v29 = vld [vmem:[#allocation20_spill] sm:$0xff]  ;;  %v19036_v10 = vld [vmem:[#allocation25_spill] sm:$0xff]  ;;  %v19037_v4 = vld [vmem:[#allocation23_spill] sm:$0xff] }
 0x108   :  { %v277_v17 = vpop.xlane.xlu1 %276  ;;  %v273_v7 = vpop.xlane.xlu0 %272  ;;  %v595_v54 = vsub.f32 %v531_v53, %v563_v43  ;;  %v879_v21 = vmul.f32 %v13607_v32, %v804_v44  ;;  %v680_v62 = vsub.f32 %v19035_v29, %v13879_v3  ;;  %v685_v46 = vsub.f32 %v19036_v10, %v13905_v40  ;;  %v19038_v34 = vld [vmem:[#allocation26_spill] sm:$0xff] }
 0x109   :  { %v628_v9 = vmax.f32 %v596_v42, 0.0  ;;  %v13976_v18 = vmul.f32 0.0069444445, %v277_v17  ;;  %v13978_v20 = vmul.f32 0.0069444445, %v273_v7  ;;  %1238 = vmatmul.mubr.bf16.gmra.mxu0 %v993_v5  ;;  %v881_v37 = vmul.f32 %v13607_v32, %v806_v26 }
 0x10a   :  { %v12385_v0 = vpop.eup %12384  ;;  %v878_v49 = vmul.f32 %v13598_v25, %v803_v55  ;;  %v880_v15 = vmul.f32 %v13598_v25, %v805_v16  ;;  %v627_v33 = vmax.f32 %v595_v54, 0.0  ;;  %v686_v59 = vsub.f32 %v19037_v4, %v13905_v40 }
 0x10b   :  { %v724_v22 = vadd.f32 1e-05, %v628_v9  ;;  %v12387_v56 = vpop.eup %12386  ;;  %v683_v11 = vsub.f32 %v19038_v34, %v13907_v45  ;;  %v954_v63 = vadd.f32 %v13618_v39, %v879_v21  ;;  %v956_v43 = vadd.f32 %v13618_v39, %v881_v37 }
 0x10c   :  { %v502_v42 = vpop.xlane.xlu1 %501  ;;  %v498_v53 = vpop.xlane.xlu0 %497  ;;  %v723_v3 = vadd.f32 1e-05, %v627_v33  ;;  %v566_v44 = vmul.f32 %v13976_v18, %v13976_v18  ;;  %v953_v7 = vadd.f32 %v13614_v28, %v878_v49  ;;  %v955_v40 = vadd.f32 %v13614_v28, %v880_v15  ;;  %v19039_v49 = vld [vmem:[#allocation24_spill] sm:$0xff] }
 0x10d   :  { %12392 = vrsqrt.f32 %v724_v22  ;;  %v534_v5 = vmul.f32 0.0069444445, %v502_v42  ;;  %v996_v17 = vpack.c.bf16 %v956_v43, %v954_v63  ;;  %v565_v26 = vmul.f32 %v13978_v20, %v13978_v20 }
 0x10e   :  { %12394 = vrsqrt.f32 %v723_v3  ;;  %v533_v16 = vmul.f32 0.0069444445, %v498_v53  ;;  %v808_v9 = vmul.f32 %v12387_v56, %v680_v62  ;;  %v995_v54 = vpack.c.bf16 %v955_v40, %v953_v7  ;;  %v19040_v53 = vld [vmem:[#allocation29_spill] sm:$0xff] }
 0x10f   :  { %v598_v55 = vsub.f32 %v534_v5, %v566_v44  ;;  %10966 = vmatprep.mubr.msk.bf16.mxu0 %vm149_vm0, %v996_v17  ;;  %v810_v21 = vmul.f32 %v12385_v0, %v682_v6  ;;  %v807_v37 = vmul.f32 %v12387_v56, %v679_v52  ;;  %v809_v22 = vmul.f32 %v12385_v0, %v681_v58 }
 0x110   :  { %v684_v33 = vsub.f32 %v19039_v49, %v13907_v45  ;;  %v597_v63 = vsub.f32 %v533_v16, %v565_v26  ;;  %v883_v43 = vmul.f32 %v13607_v32, %v808_v9  ;;  %v689_v62 = vsub.f32 %v19040_v53, %v13942_v19 }
 0x111   :  { %v630_v15 = vmax.f32 %v598_v55, 0.0  ;;  %1246 = vmatmul.mubr.bf16.gmra.mxu0 %v995_v54  ;;  %v885_v3 = vmul.f32 %v13607_v32, %v810_v21  ;;  %v882_v6 = vmul.f32 %v13598_v25, %v807_v37  ;;  %v884_v52 = vmul.f32 %v13598_v25, %v809_v22 }
 0x112   :  { %v12389_v42 = vpop.eup %12388  ;;  %v629_v58 = vmax.f32 %v597_v63, 0.0  ;;  %v958_v0 = vadd.f32 %v13618_v39, %v883_v43  ;;  %v19043_v43 = vld [vmem:[#allocation28_spill] sm:$0xff] }
 0x113   :  { %v726_v61 = vadd.f32 1e-05, %v630_v15  ;;  %v814_v45 = vmul.f32 %v12389_v42, %v686_v59  ;;  %v12391_v56 = vpop.eup %12390  ;;  %v960_v44 = vadd.f32 %v13618_v39, %v885_v3  ;;  %v957_v5 = vadd.f32 %v13614_v28, %v882_v6  ;;  %v19041_v59 = vld [vmem:[#allocation27_spill] sm:$0xff] }
 0x114   :  { %v959_v17 = vadd.f32 %v13614_v28, %v884_v52  ;;  %v813_v7 = vmul.f32 %v12389_v42, %v685_v46  ;;  %v725_v40 = vadd.f32 1e-05, %v629_v58  ;;  %v812_v26 = vmul.f32 %v12391_v56, %v684_v33  ;;  %v19042_v33 = vld [vmem:[#allocation30_spill] sm:$0xff] }
 0x115   :  { %12396 = vrsqrt.f32 %v726_v61  ;;  %v889_v55 = vmul.f32 %v13607_v32, %v814_v45  ;;  %v998_v16 = vpack.c.bf16 %v960_v44, %v958_v0  ;;  %v811_v54 = vmul.f32 %v12391_v56, %v683_v11 }
 0x116   :  { %v997_v9 = vpack.c.bf16 %v959_v17, %v957_v5  ;;  %v888_v21 = vmul.f32 %v13598_v25, %v813_v7  ;;  %v690_v37 = vsub.f32 %v19041_v59, %v13942_v19  ;;  %12398 = vrsqrt.f32 %v725_v40  ;;  %v19045_v40 = vld [vmem:[#allocation31_spill] sm:$0xff] }
 0x117   :  { %v887_v22 = vmul.f32 %v13607_v32, %v812_v26  ;;  %v964_v15 = vadd.f32 %v13618_v39, %v889_v55  ;;  %10967 = vmatprep.mubr.msk.bf16.mxu0 %vm149_vm0, %v998_v16  ;;  %v886_v46 = vmul.f32 %v13598_v25, %v811_v54  ;;  %v687_v63 = vsub.f32 %v19042_v33, %v13944_v38 }
 0x118   :  { %v688_v11 = vsub.f32 %v19043_v43, %v13944_v38  ;;  %v963_v6 = vadd.f32 %v13614_v28, %v888_v21  ;;  %v19044_v38 = vld [vmem:[#allocation33_spill] sm:$0xff]  ;;  %v694_v26 = vsub.f32 %v19045_v40, %v13976_v18  ;;  %v19047_v21 = vld [vmem:[#allocation32_spill] sm:$0xff] }
 0x119   :  { %v962_v42 = vadd.f32 %v13618_v39, %v887_v22  ;;  %1254 = vmatmul.mubr.bf16.gmra.mxu0 %v997_v9  ;;  %v961_v19 = vadd.f32 %v13614_v28, %v886_v46  ;;  %v693_v5 = vsub.f32 %v19044_v38, %v13976_v18  ;;  %v19046_v9 = vld [vmem:[#allocation34_spill] sm:$0xff]  ;;  %v19050_v38 = vmov 0.0  }
 0x11a   :  { %v12393_v3 = vpop.eup %12392  ;;  %v691_v54 = vsub.f32 %v19046_v9, %v13978_v20 }
 0x11b   :  { %v1000_v52 = vpack.c.bf16 %v964_v15, %v962_v42  ;;  %v818_v61 = vmul.f32 %v12393_v3, %v690_v37  ;;  %v817_v58 = vmul.f32 %v12393_v3, %v689_v62  ;;  %v12395_v0 = vpop.eup %12394  ;;  %v999_v17 = vpack.c.bf16 %v963_v6, %v961_v19  ;;  %v12271_v15 = vld [vmem:[%s18651_s6 + $0x74] ss:$8 sps:$4 sm:$0xff]   ;;  %v12274_v6 = vld [vmem:[%s18651_s6 + $0x64] ss:$8 sps:$4 sm:$0xff]  }
 0x11c   :  { %v816_v45 = vmul.f32 %v12395_v0, %v688_v11  ;;  %v815_v44 = vmul.f32 %v12395_v0, %v687_v63  ;;  %v692_v37 = vsub.f32 %v19047_v21, %v13978_v20  ;;  %v12273_v11 = vld [vmem:[%s18651_s6 + $0x70] ss:$8 sps:$4 sm:$0xff]   ;;  %1567 = vmatprep.subr.bf16.mxu1 %v12271_v15  ;;  %v12288_v15 = vld [vmem:[%s18651_s6 + $0x20] ss:$8 sps:$4 sm:$0xff]  }
 0x11d   :  { %10968 = vmatprep.mubr.msk.bf16.mxu0 %vm149_vm0, %v1000_v52  ;;  %v893_v56 = vmul.f32 %v13607_v32, %v818_v61  ;;  %v892_v7 = vmul.f32 %v13598_v25, %v817_v58  ;;  %1568 = vmatpush1.bf16.msra.mxu1 %v12273_v11  ;;  %v12294_v11 = vld [vmem:[%s18651_s6] ss:$8 sps:$4 sm:$0xff]  }
 0x11e   :  { %v891_v55 = vmul.f32 %v13607_v32, %v816_v45  ;;  %v890_v16 = vmul.f32 %v13598_v25, %v815_v44  ;;  %1569 = vmatprep.subr.bf16.mxu1 %v12274_v6 }
 0x11f   :  { %v968_v62 = vadd.f32 %v13618_v39, %v893_v56  ;;  %v967_v63 = vadd.f32 %v13614_v28, %v892_v7 }
 0x120   :  { %v966_v22 = vadd.f32 %v13618_v39, %v891_v55  ;;  %v965_v18 = vadd.f32 %v13614_v28, %v890_v16 }
 0x121   :  { %1262 = vmatmul.mubr.bf16.gmra.mxu0 %v999_v17  ;;  %v12276_v17 = vld [vmem:[%s18651_s6 + $0x60] ss:$8 sps:$4 sm:$0xff]  }
 0x122   :  { %v12397_v46 = vpop.eup %12396  ;;  %v1002_v42 = vpack.c.bf16 %v968_v62, %v966_v22  ;;  %v1001_v0 = vpack.c.bf16 %v967_v63, %v965_v18  ;;  %1570 = vmatpush1.bf16.msra.mxu1 %v12276_v17  ;;  %v12286_v22 = vld [vmem:[%s18651_s6 + $0x24] ss:$8 sps:$4 sm:$0xff]   ;;  %v12291_v18 = vld [vmem:[%s18651_s6 + $0x10] ss:$8 sps:$4 sm:$0xff]  }
 0x123   :  { %v822_v3 = vmul.f32 %v12397_v46, %v694_v26  ;;  %v821_v19 = vmul.f32 %v12397_v46, %v693_v5  ;;  %v12399_v20 = vpop.eup %12398  ;;  %v12277_v26 = vld [vmem:[%s18651_s6 + $0x54] ss:$8 sps:$4 sm:$0xff]   ;;  %v12292_v63 = vld [vmem:[%s18651_s6 + $0x4] ss:$8 sps:$4 sm:$0xff]  }
 0x124   :  { %10969 = vmatprep.mubr.msk.bf16.mxu0 %vm149_vm0, %v1002_v42  ;;  %v820_v52 = vmul.f32 %v12399_v20, %v692_v37  ;;  %v819_v58 = vmul.f32 %v12399_v20, %v691_v54  ;;  %1571 = vmatprep.subr.bf16.mxu1 %v12277_v26  ;;  %v12282_v54 = vld [vmem:[%s18651_s6 + $0x40] ss:$8 sps:$4 sm:$0xff]   ;;  %v12285_v37 = vld [vmem:[%s18651_s6 + $0x30] ss:$8 sps:$4 sm:$0xff]   ;;  %v12289_v46 = vld [vmem:[%s18651_s6 + $0x14] ss:$8 sps:$4 sm:$0xff]  }
 0x125   :  { %v897_v61 = vmul.f32 %v13607_v32, %v822_v3  ;;  %v896_v45 = vmul.f32 %v13598_v25, %v821_v19 }
 0x126   :  { %v895_v56 = vmul.f32 %v13607_v32, %v820_v52  ;;  %v894_v5 = vmul.f32 %v13598_v25, %v819_v58  ;;  %v12279_v25 = vld [vmem:[%s18651_s6 + $0x50] ss:$8 sps:$4 sm:$0xff]  }
 0x127   :  { %v972_v44 = vadd.f32 %v13618_v39, %v897_v61  ;;  %v971_v32 = vadd.f32 %v13614_v28, %v896_v45  ;;  %1572 = vmatpush1.bf16.msra.mxu1 %v12279_v25 }
 0x128   :  { %v970_v7 = vadd.f32 %v13618_v39, %v895_v56  ;;  %v969_v55 = vadd.f32 %v13614_v28, %v894_v5  ;;  %v12280_v39 = vld [vmem:[%s18651_s6 + $0x44] ss:$8 sps:$4 sm:$0xff]   ;;  %v12283_v28 = vld [vmem:[%s18651_s6 + $0x34] ss:$8 sps:$4 sm:$0xff]   ;;  %s12947_s6 = smov 16  }
 0x129   :  { %1270 = vmatmul.mubr.bf16.gmra.mxu0 %v1001_v0  ;;  %1573 = vmatprep.subr.bf16.mxu1 %v12280_v39 }
 0x12a   :  { %v1004_v62 = vpack.c.bf16 %v972_v44, %v970_v7  ;;  %v1003_v16 = vpack.c.bf16 %v971_v32, %v969_v55 }
 0x12b   :  { %1574 = vmatpush1.bf16.msra.mxu1 %v12282_v54 }
 0x12c   :  { %10970 = vmatprep.mubr.msk.bf16.mxu0 %vm149_vm0, %v1004_v62  ;;  %1575 = vmatprep.subr.bf16.mxu1 %v12283_v28 }
 0x12f   :  { %1576 = vmatpush1.bf16.msra.mxu1 %v12285_v37 }
 0x130   :  { %1577 = vmatprep.subr.bf16.mxu1 %v12286_v22 }
 0x131   :  { %1278 = vmatmul.mubr.bf16.gmra.mxu0 %v1003_v16 }
 0x133   :  { %1578 = vmatpush1.bf16.msra.mxu1 %v12288_v15 }
 0x134   :  { %1579 = vmatprep.subr.bf16.mxu1 %v12289_v46 }
 0x137   :  { %1580 = vmatpush1.bf16.msra.mxu1 %v12291_v18 }
 0x138   :  { %1581 = vmatprep.subr.bf16.mxu1 %v12292_v63 }
 0x13b   :  { %1582 = vmatpush1.bf16.msra.mxu1 %v12294_v11 }
 0x179   :  { %v1159_v42 = vpop.f32.mrf.mxu0 }
 0x17b   :  { %v1161_v3 = vpop.f32.mrf.mxu0 }
 0x17d   :  { %v1162_v19 = vpop.f32.mrf.mxu0 }
 0x17e   :  { %v1286_v20 = vpack.c.bf16 %v1162_v19, %v1159_v42 }
 0x17f   :  { %v1164_v6 = vpop.f32.mrf.mxu0 }
 0x180   :  { %11460 = vmatprep.mubr.bf16.mxu0 %v1286_v20 }
 0x181   :  { %v1167_v52 = vpop.f32.mrf.mxu0 }
 0x183   :  { %v1169_v61 = vpop.f32.mrf.mxu0 }
 0x185   :  { %v1170_v58 = vpop.f32.mrf.mxu0 }
 0x186   :  { %v1287_v0 = vpack.c.bf16 %v1170_v58, %v1167_v52 }
 0x187   :  { %v1172_v45 = vpop.f32.mrf.mxu0 }
 0x188   :  { %11461 = vmatmul.mubr.bf16.vlgmr.msra.gmra.mxu0 %v1287_v0 }
 0x189   :  { %v1175_v56 = vpop.f32.mrf.mxu0 }
 0x18b   :  { %v1177_v44 = vpop.f32.mrf.mxu0 }
 0x18d   :  { %v1178_v5 = vpop.f32.mrf.mxu0 }
 0x18e   :  { %v1288_v17 = vpack.c.bf16 %v1178_v5, %v1175_v56 }
 0x18f   :  { %v1180_v7 = vpop.f32.mrf.mxu0 }
 0x190   :  { %11464 = vmatprep.mubr.bf16.mxu0 %v1288_v17 }
 0x191   :  { %v1183_v26 = vpop.f32.mrf.mxu0 }
 0x193   :  { %v1185_v55 = vpop.f32.mrf.mxu0 }
 0x195   :  { %v1186_v32 = vpop.f32.mrf.mxu0 }
 0x196   :  { %v1289_v25 = vpack.c.bf16 %v1186_v32, %v1183_v26  ;;  %v19048_v26 = vmov 0  }
 0x197   :  { %v1188_v62 = vpop.f32.mrf.mxu0 }
 0x198   :  { %11465 = vmatmul.mubr.bf16.gmra.mxu0 %v1289_v25 }
 0x199   :  { %v1191_v39 = vpop.f32.mrf.mxu0 }
 0x19b   :  { %v1193_v16 = vpop.f32.mrf.mxu0 }
 0x19d   :  { %v1194_v54 = vpop.f32.mrf.mxu0 }
 0x19e   :  { %v1290_v28 = vpack.c.bf16 %v1194_v54, %v1191_v39 }
 0x19f   :  { %v1196_v37 = vpop.f32.mrf.mxu0 }
 0x1a0   :  { %11468 = vmatprep.mubr.bf16.mxu0 %v1290_v28 }
 0x1a1   :  { %v1199_v22 = vpop.f32.mrf.mxu0 }
 0x1a3   :  { %v1201_v15 = vpop.f32.mrf.mxu0 }
 0x1a5   :  { %v1202_v46 = vpop.f32.mrf.mxu0 }
 0x1a6   :  { %v1291_v18 = vpack.c.bf16 %v1202_v46, %v1199_v22 }
 0x1a7   :  { %v1204_v63 = vpop.f32.mrf.mxu0 }
 0x1a8   :  { %11469 = vmatmul.mubr.bf16.gmra.mxu0 %v1291_v18 }
 0x1a9   :  { %v1207_v11 = vpop.f32.mrf.mxu0 }
 0x1ab   :  { %v1209_v42 = vpop.f32.mrf.mxu0 }
 0x1ad   :  { %v1210_v3 = vpop.f32.mrf.mxu0 }
 0x1ae   :  { %v1292_v19 = vpack.c.bf16 %v1210_v3, %v1207_v11 }
 0x1af   :  { %v1212_v20 = vpop.f32.mrf.mxu0 }
 0x1b0   :  { %11472 = vmatprep.mubr.bf16.mxu0 %v1292_v19 }
 0x1b1   :  { %v1215_v6 = vpop.f32.mrf.mxu0 }
 0x1b3   :  { %v1217_v52 = vpop.f32.mrf.mxu0 }
 0x1b5   :  { %v1218_v61 = vpop.f32.mrf.mxu0 }
 0x1b6   :  { %v1293_v58 = vpack.c.bf16 %v1218_v61, %v1215_v6 }
 0x1b7   :  { %v1220_v0 = vpop.f32.mrf.mxu0 }
 0x1b8   :  { %11473 = vmatmul.mubr.bf16.gmra.mxu0 %v1293_v58 }
 0x1b9   :  { %v1223_v45 = vpop.f32.mrf.mxu0 }
 0x1bb   :  { %v1225_v56 = vpop.f32.mrf.mxu0 }
 0x1bd   :  { %v1226_v44 = vpop.f32.mrf.mxu0 }
 0x1be   :  { %v1294_v5 = vpack.c.bf16 %v1226_v44, %v1223_v45 }
 0x1bf   :  { %v1228_v17 = vpop.f32.mrf.mxu0 }
 0x1c0   :  { %1600 = vmatmul.mubr.bf16.vlgmr.msra.gmra.mxu1 %v1294_v5 }
 0x1c1   :  { %v1231_v7 = vpop.f32.mrf.mxu0  ;;  %1609 = vmatprep.mubr.bf16.mxu1 %v19048_v26 }
 0x1c3   :  { %v1233_v55 = vpop.f32.mrf.mxu0 }
 0x1c5   :  { %v1234_v32 = vpop.f32.mrf.mxu0 }
 0x1c6   :  { %v1295_v25 = vpack.c.bf16 %v1234_v32, %v1231_v7 }
 0x1c7   :  { %v1236_v62 = vpop.f32.mrf.mxu0 }
 0x1c8   :  { %1610 = vmatmul.mubr.bf16.gmra.mxu1 %v1295_v25 }
 0x1c9   :  { %v1239_v39 = vpop.f32.mrf.mxu0  ;;  %1619 = vmatprep.mubr.bf16.mxu1 %v19048_v26 }
 0x1cb   :  { %v1241_v16 = vpop.f32.mrf.mxu0 }
 0x1cd   :  { %v1242_v54 = vpop.f32.mrf.mxu0 }
 0x1ce   :  { %v1296_v28 = vpack.c.bf16 %v1242_v54, %v1239_v39  ;;  %v18731_v39 = vmov 0.0  }
 0x1cf   :  { %v1244_v37 = vpop.f32.mrf.mxu0  ;;  %11476 = vmatprep.subr.bf16.mxu1 %v18731_v39  ;;  %11506 = vmatprep.subr.bf16.mxu0 %v18731_v39 }
 0x1d0   :  { %1620 = vmatmul.mubr.bf16.gmra.mxu1 %v1296_v28  ;;  %11508 = vmatprep.mubr.msk.bf16.mxu0 %vm12946_vm1, %v18731_v39 }
 0x1d1   :  { %v1247_v22 = vpop.f32.mrf.mxu0  ;;  %1629 = vmatprep.mubr.bf16.mxu1 %v19048_v26 }
 0x1d3   :  { %v1249_v15 = vpop.f32.mrf.mxu0 }
 0x1d5   :  { %v1250_v46 = vpop.f32.mrf.mxu0 }
 0x1d6   :  { %v1297_v18 = vpack.c.bf16 %v1250_v46, %v1247_v22 }
 0x1d7   :  { %v1252_v63 = vpop.f32.mrf.mxu0 }
 0x1d8   :  { %1630 = vmatmul.mubr.bf16.gmra.mxu1 %v1297_v18 }
 0x1d9   :  { %v1255_v11 = vpop.f32.mrf.mxu0  ;;  %1639 = vmatprep.mubr.bf16.mxu1 %v19048_v26 }
 0x1db   :  { %v1257_v42 = vpop.f32.mrf.mxu0 }
 0x1dd   :  { %v1258_v3 = vpop.f32.mrf.mxu0 }
 0x1de   :  { %v1298_v19 = vpack.c.bf16 %v1258_v3, %v1255_v11 }
 0x1df   :  { %v1260_v20 = vpop.f32.mrf.mxu0 }
 0x1e0   :  { %1640 = vmatmul.mubr.bf16.gmra.mxu1 %v1298_v19 }
 0x1e1   :  { %v1263_v6 = vpop.f32.mrf.mxu0  ;;  %1649 = vmatprep.mubr.bf16.mxu1 %v19048_v26 }
 0x1e3   :  { %v1265_v52 = vpop.f32.mrf.mxu0 }
 0x1e5   :  { %v1266_v61 = vpop.f32.mrf.mxu0 }
 0x1e6   :  { %v1299_v58 = vpack.c.bf16 %v1266_v61, %v1263_v6 }
 0x1e7   :  { %v1268_v0 = vpop.f32.mrf.mxu0 }
 0x1e8   :  { %1650 = vmatmul.mubr.bf16.gmra.mxu1 %v1299_v58 }
 0x1e9   :  { %v1271_v45 = vpop.f32.mrf.mxu0  ;;  %1659 = vmatprep.mubr.bf16.mxu1 %v19048_v26 }
 0x1eb   :  { %v1273_v56 = vpop.f32.mrf.mxu0 }
 0x1ed   :  { %v1274_v44 = vpop.f32.mrf.mxu0 }
 0x1ee   :  { %v1300_v5 = vpack.c.bf16 %v1274_v44, %v1271_v45 }
 0x1ef   :  { %v1276_v17 = vpop.f32.mrf.mxu0 }
 0x1f0   :  { %1660 = vmatmul.mubr.bf16.gmra.mxu1 %v1300_v5 }
 0x1f1   :  { %v1279_v7 = vpop.f32.mrf.mxu0  ;;  %1669 = vmatprep.mubr.bf16.mxu1 %v19048_v26 }
 0x1f3   :  { %v1281_v55 = vpop.f32.mrf.mxu0 }
 0x1f5   :  { %v1282_v32 = vpop.f32.mrf.mxu0 }
 0x1f6   :  { %v1301_v25 = vpack.c.bf16 %v1282_v32, %v1279_v7 }
 0x1f7   :  { %v1284_v62 = vpop.f32.mrf.mxu0 }
 0x1f8   :  { %1670 = vmatmul.mubr.bf16.gmra.mxu1 %v1301_v25 }
 0x1f9   :  { %11478 = vmatprep.mubr.msk.bf16.mxu1 %vm12946_vm1, %v18731_v39 }
 0x248   :  { %v11462_v16 = vpop.f32.mrf.mxu0 }
 0x24a   :  { %v1400_v54 = vpop.f32.mrf.mxu0 }
 0x24c   :  { %v11463_v28 = vpop.f32.mrf.mxu0 }
 0x24d   :  { %v14119_v37 = vpack.c.bf16 %v11463_v28, %v11462_v16 }
 0x24e   :  { %v1403_v22 = vpop.f32.mrf.mxu0 }
 0x24f   :  { %1802 = vrot.lane.b32.xlu1 %v14119_v37, %s12947_s6  ;;  %1706 = vrot.lane.b32.xlu0 %v14119_v37, %s12948_s26  ;;  %v1463_v15 = vpack.c.bf16 %v1403_v22, %v1400_v54 }
 0x253   :  { %1722 = vrot.lane.b32.xlu0 %v14119_v37, %s12949_s27  ;;  %1704 = vrot.lane.b32.xlu1 %v1463_v15, %s12948_s26 }
 0x257   :  { %1738 = vrot.lane.b32.xlu0 %v14119_v37, %s12950_s28  ;;  %1720 = vrot.lane.b32.xlu1 %v1463_v15, %s12949_s27 }
 0x258   :  { %v11466_v46 = vpop.f32.mrf.mxu0 }
 0x25a   :  { %v1416_v18 = vpop.f32.mrf.mxu0 }
 0x25b   :  { %1754 = vrot.lane.b32.xlu0 %v14119_v37, %s12951_s29  ;;  %1736 = vrot.lane.b32.xlu1 %v1463_v15, %s12950_s28 }
 0x25c   :  { %v11467_v63 = vpop.f32.mrf.mxu0 }
 0x25d   :  { %v14140_v11 = vpack.c.bf16 %v11467_v63, %v11466_v46 }
 0x25e   :  { %v1419_v42 = vpop.f32.mrf.mxu0 }
 0x25f   :  { %1770 = vrot.lane.b32.xlu0 %v14119_v37, %s12952_s30  ;;  %1752 = vrot.lane.b32.xlu1 %v1463_v15, %s12951_s29  ;;  %v14152_v3 = vpack.c.bf16 %v1419_v42, %v1416_v18 }
 0x263   :  { %1786 = vrot.lane.b32.xlu0 %v14119_v37, %s12953_s16  ;;  %1768 = vrot.lane.b32.xlu1 %v1463_v15, %s12952_s30 }
 0x267   :  { %1784 = vrot.lane.b32.xlu1 %v1463_v15, %s12953_s16  ;;  %1710 = vrot.lane.b32.xlu0 %v14140_v11, %s12948_s26 }
 0x268   :  { %v11470_v19 = vpop.f32.mrf.mxu0 }
 0x26a   :  { %v1432_v20 = vpop.f32.mrf.mxu0 }
 0x26b   :  { %1800 = vrot.lane.b32.xlu1 %v1463_v15, %s12947_s6  ;;  %1726 = vrot.lane.b32.xlu0 %v14140_v11, %s12949_s27 }
 0x26c   :  { %v11471_v6 = vpop.f32.mrf.mxu0 }
 0x26d   :  { %v14166_v52 = vpack.c.bf16 %v11471_v6, %v11470_v19 }
 0x26e   :  { %v1435_v7 = vpop.f32.mrf.mxu0 }
 0x26f   :  { %1806 = vrot.lane.b32.xlu1 %v14140_v11, %s12947_s6  ;;  %1742 = vrot.lane.b32.xlu0 %v14140_v11, %s12950_s28  ;;  %v14197_v25 = vpack.c.bf16 %v1435_v7, %v1432_v20 }
 0x273   :  { %1758 = vrot.lane.b32.xlu0 %v14140_v11, %s12951_s29  ;;  %1708 = vrot.lane.b32.xlu1 %v14152_v3, %s12948_s26 }
 0x277   :  { %1774 = vrot.lane.b32.xlu0 %v14140_v11, %s12952_s30  ;;  %1724 = vrot.lane.b32.xlu1 %v14152_v3, %s12949_s27 }
 0x278   :  { %v11474_v54 = vpop.f32.mrf.mxu0 }
 0x27b   :  { %1790 = vrot.lane.b32.xlu0 %v14140_v11, %s12953_s16  ;;  %1740 = vrot.lane.b32.xlu1 %v14152_v3, %s12950_s28 }
 0x27f   :  { %1756 = vrot.lane.b32.xlu1 %v14152_v3, %s12951_s29  ;;  %1714 = vrot.lane.b32.xlu0 %v14166_v52, %s12948_s26 }
 0x280   :  { %v1601_v61 = vpop.f32.mrf.mxu1 }
 0x282   :  { %v14172_v58 = vpop.f32.mrf.mxu1 }
 0x283   :  { %1772 = vrot.lane.b32.xlu1 %v14152_v3, %s12952_s30  ;;  %1730 = vrot.lane.b32.xlu0 %v14166_v52, %s12949_s27 }
 0x284   :  { %v1605_v0 = vpop.f32.mrf.mxu1 }
 0x285   :  { %v14178_v45 = vpack.c.bf16 %v1605_v0, %v1601_v61 }
 0x286   :  { %v14180_v56 = vpop.f32.mrf.mxu1 }
 0x287   :  { %1788 = vrot.lane.b32.xlu1 %v14152_v3, %s12953_s16  ;;  %1746 = vrot.lane.b32.xlu0 %v14166_v52, %s12950_s28  ;;  %v2116_v44 = vsel %vm149_vm0, %v14178_v45, 0  ;;  %v14411_v34 = vpack.c.bf16 %v14180_v56, %v14172_v58 }
 0x288   :  { %v1611_v5 = vpop.f32.mrf.mxu1  ;;  %11477 = vmatpush3.bf16.xpose.msra.mxu1 %v2116_v44 }
 0x289   :  { %11482 = vmatprep.subr.bf16.mxu1 %v18731_v39  ;;  %19057 = vst [vmem:[#allocation43_spill] sm:$0xff] %v14411_v34 }
 0x28a   :  { %v14189_v17 = vpop.f32.mrf.mxu1 }
 0x28b   :  { %1804 = vrot.lane.b32.xlu1 %v14152_v3, %s12947_s6  ;;  %1762 = vrot.lane.b32.xlu0 %v14166_v52, %s12951_s29 }
 0x28c   :  { %v1615_v55 = vpop.f32.mrf.mxu1 }
 0x28d   :  { %v14195_v32 = vpack.c.bf16 %v1615_v55, %v1611_v5 }
 0x28e   :  { %v14199_v62 = vpop.f32.mrf.mxu1 }
 0x28f   :  { %11479 = vmatmul.mubr.msk.bf16.vlgmr.msra.gmra.mxu1 %vm149_vm0, %v1463_v15  ;;  %1778 = vrot.lane.b32.xlu0 %v14166_v52, %s12952_s30  ;;  %v2163_v16 = vsel %vm149_vm0, %v14195_v32, 0  ;;  %v1448_v15 = vpop.f32.mrf.mxu0  ;;  %v14359_v9 = vpack.c.bf16 %v14199_v62, %v14189_v17 }
 0x290   :  { %1712 = vrot.lane.b32.xlu1 %v14197_v25, %s12948_s26  ;;  %v1621_v28 = vpop.f32.mrf.mxu1  ;;  %11483 = vmatpush3.bf16.xpose.msra.mxu1 %v2163_v16 }
 0x291   :  { %11484 = vmatprep.mubr.msk.bf16.mxu1 %vm12946_vm1, %v18731_v39  ;;  %11488 = vmatprep.subr.bf16.mxu1 %v18731_v39  ;;  %v11475_v19 = vpop.f32.mrf.mxu0  ;;  %19051 = vst [vmem:[#allocation37_spill] sm:$0xff] %v14359_v9 }
 0x292   :  { %v14211_v22 = vpop.f32.mrf.mxu1  ;;  %v14229_v6 = vpack.c.bf16 %v11475_v19, %v11474_v54 }
 0x293   :  { %1794 = vrot.lane.b32.xlu0 %v14166_v52, %s12953_s16  ;;  %v1451_v19 = vpop.f32.mrf.mxu0 }
 0x294   :  { %1728 = vrot.lane.b32.xlu1 %v14197_v25, %s12949_s27  ;;  %v1625_v46 = vpop.f32.mrf.mxu1 }
 0x295   :  { %v14217_v18 = vpack.c.bf16 %v1625_v46, %v1621_v28 }
 0x296   :  { %v14219_v63 = vpop.f32.mrf.mxu1 }
 0x297   :  { %11485 = vmatmul.mubr.msk.bf16.vlgmr.msra.gmra.mxu1 %vm149_vm0, %v14119_v37  ;;  %1810 = vrot.lane.b32.xlu0 %v14166_v52, %s12947_s6  ;;  %v2210_v42 = vsel %vm149_vm0, %v14217_v18, 0  ;;  %v14387_v59 = vpack.c.bf16 %v14219_v63, %v14211_v22 }
 0x298   :  { %1744 = vrot.lane.b32.xlu1 %v14197_v25, %s12950_s28  ;;  %v1631_v20 = vpop.f32.mrf.mxu1  ;;  %11489 = vmatpush3.bf16.xpose.msra.mxu1 %v2210_v42 }
 0x299   :  { %11490 = vmatprep.mubr.msk.bf16.mxu1 %vm12946_vm1, %v18731_v39  ;;  %11494 = vmatprep.subr.bf16.mxu1 %v18731_v39  ;;  %19053 = vst [vmem:[#allocation39_spill] sm:$0xff] %v14387_v59 }
 0x29a   :  { %v14234_v37 = vpop.f32.mrf.mxu1 }
 0x29b   :  { %1718 = vrot.lane.b32.xlu0 %v14229_v6, %s12948_s26 }
 0x29c   :  { %1760 = vrot.lane.b32.xlu1 %v14197_v25, %s12951_s29  ;;  %v1635_v61 = vpop.f32.mrf.mxu1 }
 0x29d   :  { %v14240_v0 = vpack.c.bf16 %v1635_v61, %v1631_v20  ;;  %v1469_v61 = vpack.c.bf16 %v1451_v19, %v1448_v15 }
 0x29e   :  { %v14242_v44 = vpop.f32.mrf.mxu1 }
 0x29f   :  { %11491 = vmatmul.mubr.msk.bf16.vlgmr.msra.gmra.mxu1 %vm149_vm0, %v14152_v3  ;;  %1734 = vrot.lane.b32.xlu0 %v14229_v6, %s12949_s27  ;;  %v2257_v5 = vsel %vm149_vm0, %v14240_v0, 0 }
 0x2a0   :  { %1776 = vrot.lane.b32.xlu1 %v14197_v25, %s12952_s30  ;;  %v1641_v7 = vpop.f32.mrf.mxu1  ;;  %11495 = vmatpush3.bf16.xpose.msra.mxu1 %v2257_v5 }
 0x2a1   :  { %11496 = vmatprep.mubr.msk.bf16.mxu1 %vm12946_vm1, %v18731_v39  ;;  %11500 = vmatprep.subr.bf16.mxu1 %v18731_v39 }
 0x2a2   :  { %v14255_v55 = vpop.f32.mrf.mxu1 }
 0x2a3   :  { %1750 = vrot.lane.b32.xlu0 %v14229_v6, %s12950_s28 }
 0x2a4   :  { %1792 = vrot.lane.b32.xlu1 %v14197_v25, %s12953_s16  ;;  %v1645_v3 = vpop.f32.mrf.mxu1 }
 0x2a5   :  { %v14261_v16 = vpack.c.bf16 %v1645_v3, %v1641_v7 }
 0x2a6   :  { %v14263_v54 = vpop.f32.mrf.mxu1 }
 0x2a7   :  { %11497 = vmatmul.mubr.msk.bf16.vlgmr.msra.gmra.mxu1 %vm149_vm0, %v14140_v11  ;;  %1766 = vrot.lane.b32.xlu0 %v14229_v6, %s12951_s29  ;;  %v2304_v28 = vsel %vm149_vm0, %v14261_v16, 0 }
 0x2a8   :  { %1808 = vrot.lane.b32.xlu1 %v14197_v25, %s12947_s6  ;;  %v1651_v46 = vpop.f32.mrf.mxu1  ;;  %11501 = vmatpush3.bf16.xpose.msra.mxu1 %v2304_v28 }
 0x2a9   :  { %11502 = vmatprep.mubr.msk.bf16.mxu1 %vm12946_vm1, %v18731_v39  ;;  %11512 = vmatprep.subr.bf16.mxu1 %v18731_v39 }
 0x2aa   :  { %v14276_v42 = vpop.f32.mrf.mxu1 }
 0x2ab   :  { %1782 = vrot.lane.b32.xlu0 %v14229_v6, %s12952_s30 }
 0x2ac   :  { %1814 = vrot.lane.b32.xlu1 %v14229_v6, %s12947_s6  ;;  %v1655_v11 = vpop.f32.mrf.mxu1 }
 0x2ad   :  { %v14282_v20 = vpack.c.bf16 %v1655_v11, %v1651_v46 }
 0x2ae   :  { %v14284_v5 = vpop.f32.mrf.mxu1 }
 0x2af   :  { %11503 = vmatmul.mubr.msk.bf16.vlgmr.msra.gmra.mxu1 %vm149_vm0, %v14197_v25  ;;  %1798 = vrot.lane.b32.xlu0 %v14229_v6, %s12953_s16  ;;  %v2351_v7 = vsel %vm149_vm0, %v14282_v20, 0  ;;  %v14547_v26 = vpack.c.bf16 %v14284_v5, %v14276_v42 }
 0x2b0   :  { %1716 = vrot.lane.b32.xlu1 %v1469_v61, %s12948_s26  ;;  %v1661_v3 = vpop.f32.mrf.mxu1  ;;  %11507 = vmatpush3.bf16.xpose.msra.mxu0 %v2351_v7 }
 0x2b1   :  { %11514 = vmatprep.mubr.msk.bf16.mxu1 %vm12946_vm1, %v18731_v39  ;;  %11518 = vmatprep.subr.bf16.mxu0 %v18731_v39  ;;  %19071 = vst [vmem:[#allocation57_spill] sm:$0xff] %v14547_v26 }
 0x2b2   :  { %v14296_v15 = vpop.f32.mrf.mxu1 }
 0x2b3   :  { %1824 = vrot.lane.b32.xlu0 %v14178_v45, %s12948_s26 }
 0x2b4   :  { %1732 = vrot.lane.b32.xlu1 %v1469_v61, %s12949_s27  ;;  %v1665_v25 = vpop.f32.mrf.mxu1 }
 0x2b5   :  { %v14301_v28 = vpack.c.bf16 %v1665_v25, %v1661_v3 }
 0x2b6   :  { %v14303_v46 = vpop.f32.mrf.mxu1 }
 0x2b7   :  { %11509 = vmatmul.mubr.msk.bf16.vlgmr.msra.gmra.mxu0 %vm149_vm0, %v14166_v52  ;;  %1842 = vrot.lane.b32.xlu0 %v14195_v32, %s12949_s27  ;;  %v2398_v19 = vsel %vm149_vm0, %v14301_v28, 0 }
 0x2b8   :  { %1748 = vrot.lane.b32.xlu1 %v1469_v61, %s12950_s28  ;;  %v1671_v11 = vpop.f32.mrf.mxu1  ;;  %11513 = vmatpush3.bf16.xpose.msra.mxu1 %v2398_v19 }
 0x2b9   :  { %11520 = vmatprep.mubr.msk.bf16.mxu0 %vm12946_vm1, %v18731_v39  ;;  %11524 = vmatprep.subr.bf16.mxu1 %v18731_v39 }
 0x2ba   :  { %v14315_v7 = vpop.f32.mrf.mxu1 }
 0x2bb   :  { %1858 = vrot.lane.b32.xlu0 %v14195_v32, %s12950_s28 }
 0x2bc   :  { %1764 = vrot.lane.b32.xlu1 %v1469_v61, %s12951_s29  ;;  %v1675_v52 = vpop.f32.mrf.mxu1 }
 0x2bd   :  { %v14320_v3 = vpack.c.bf16 %v1675_v52, %v1671_v11 }
 0x2bf   :  { %1874 = vrot.lane.b32.xlu0 %v14195_v32, %s12951_s29  ;;  %11515 = vmatmul.mubr.msk.bf16.vlgmr.msra.gmra.mxu1 %vm149_vm0, %v1469_v61  ;;  %v2445_v25 = vsel %vm149_vm0, %v14320_v3, 0 }
 0x2c0   :  { %1780 = vrot.lane.b32.xlu1 %v1469_v61, %s12952_s30  ;;  %11519 = vmatpush3.bf16.xpose.msra.mxu0 %v2445_v25 }
 0x2c1   :  { %v14328_v19 = vpop.permute.xlu1 %1802  ;;  %v14330_v39 = vpop.permute.xlu0 %1706  ;;  %11526 = vmatprep.mubr.msk.bf16.mxu1 %vm12946_vm1, %v19050_v38  ;;  %11530 = vmatprep.subr.bf16.mxu0 %v19050_v38 }
 0x2c2   :  { %19049 = vst [vmem:[#allocation2_spill] sm:$0xff] %v14328_v19 }
 0x2c3   :  { %1890 = vrot.lane.b32.xlu0 %v14195_v32, %s12952_s30 }
 0x2c4   :  { %1796 = vrot.lane.b32.xlu1 %v1469_v61, %s12953_s16 }
 0x2c5   :  { %v14338_v11 = vpop.permute.xlu0 %1722  ;;  %v14340_v52 = vpop.permute.xlu1 %1704 }
 0x2c7   :  { %1906 = vrot.lane.b32.xlu0 %v14195_v32, %s12953_s16  ;;  %11521 = vmatmul.mubr.msk.bf16.vlgmr.msra.gmra.mxu0 %vm149_vm0, %v14229_v6 }
 0x2c8   :  { %1812 = vrot.lane.b32.xlu1 %v1469_v61, %s12947_s6  ;;  %11532 = vmatprep.mubr.msk.bf16.mxu0 %vm12946_vm1, %v19050_v38 }
 0x2c9   :  { %v14349_v25 = vpop.permute.xlu0 %1738  ;;  %v14351_v40 = vpop.permute.xlu1 %1720 }
 0x2cb   :  { %1922 = vrot.lane.b32.xlu0 %v14195_v32, %s12947_s6 }
 0x2cc   :  { %1840 = vrot.lane.b32.xlu1 %v14178_v45, %s12949_s27 }
 0x2cd   :  { %v14361_v6 = vpop.permute.xlu0 %1754  ;;  %v14363_v61 = vpop.permute.xlu1 %1736 }
 0x2cf   :  { %1946 = vrot.lane.b32.xlu0 %v14359_v9, %s12948_s26 }
 0x2d0   :  { %1856 = vrot.lane.b32.xlu1 %v14178_v45, %s12950_s28 }
 0x2d1   :  { %v14369_v21 = vpop.permute.xlu0 %1770  ;;  %v14371_v53 = vpop.permute.xlu1 %1752 }
 0x2d3   :  { %1970 = vrot.lane.b32.xlu0 %v14359_v9, %s12949_s27 }
 0x2d4   :  { %1872 = vrot.lane.b32.xlu1 %v14178_v45, %s12951_s29 }
 0x2d5   :  { %v14377_v17 = vpop.permute.xlu0 %1786  ;;  %v14379_v62 = vpop.permute.xlu1 %1768 }
 0x2d6   :  { %19052 = vst [vmem:[#allocation38_spill] sm:$0xff] %v14377_v17 }
 0x2d7   :  { %1924 = vrot.lane.b32.xlu0 %v14217_v18, %s12947_s6 }
 0x2d8   :  { %1888 = vrot.lane.b32.xlu1 %v14178_v45, %s12952_s30 }
 0x2d9   :  { %v14389_v43 = vpop.permute.xlu1 %1784  ;;  %v14391_v33 = vpop.permute.xlu0 %1710 }
 0x2da   :  { %19054 = vst [vmem:[#allocation40_spill] sm:$0xff] %v14389_v43 }
 0x2db   :  { %1948 = vrot.lane.b32.xlu0 %v14387_v59, %s12948_s26 }
 0x2dc   :  { %1904 = vrot.lane.b32.xlu1 %v14178_v45, %s12953_s16 }
 0x2dd   :  { %v14397_v10 = vpop.permute.xlu1 %1800  ;;  %v14399_v4 = vpop.permute.xlu0 %1726 }
 0x2de   :  { %19055 = vst [vmem:[#allocation41_spill] sm:$0xff] %v14397_v10  ;;  %v1677_v10 = vpop.f32.mrf.mxu1 }
 0x2df   :  { %1830 = vrot.lane.b32.xlu0 %v14240_v0, %s12948_s26  ;;  %v14626_v19 = vpack.c.bf16 %v1677_v10, %v14315_v7 }
 0x2e0   :  { %1920 = vrot.lane.b32.xlu1 %v14178_v45, %s12947_s6 }
 0x2e1   :  { %v14405_v22 = vpop.permute.xlu1 %1806  ;;  %v14407_v63 = vpop.permute.xlu0 %1742  ;;  %19079 = vst [vmem:[#allocation65_spill] sm:$0xff] %v14626_v19 }
 0x2e2   :  { %19056 = vst [vmem:[#allocation42_spill] sm:$0xff] %v14405_v22 }
 0x2e3   :  { %1846 = vrot.lane.b32.xlu0 %v14240_v0, %s12949_s27 }
 0x2e4   :  { %1944 = vrot.lane.b32.xlu1 %v14411_v34, %s12948_s26 }
 0x2e5   :  { %v14417_v49 = vpop.permute.xlu0 %1758  ;;  %v14419_v31 = vpop.permute.xlu1 %1708 }
 0x2e7   :  { %1862 = vrot.lane.b32.xlu0 %v14240_v0, %s12950_s28 }
 0x2e8   :  { %1968 = vrot.lane.b32.xlu1 %v14411_v34, %s12949_s27 }
 0x2e9   :  { %v14425_v45 = vpop.permute.xlu0 %1774  ;;  %v14427_v58 = vpop.permute.xlu1 %1724 }
 0x2eb   :  { %1878 = vrot.lane.b32.xlu0 %v14240_v0, %s12951_s29 }
 0x2ec   :  { %1992 = vrot.lane.b32.xlu1 %v14411_v34, %s12950_s28 }
 0x2ed   :  { %v14433_v56 = vpop.permute.xlu0 %1790  ;;  %v14435_v1 = vpop.permute.xlu1 %1740 }
 0x2ee   :  { %19058 = vst [vmem:[#allocation44_spill] sm:$0xff] %v14433_v56 }
 0x2ef   :  { %1894 = vrot.lane.b32.xlu0 %v14240_v0, %s12952_s30 }
 0x2f0   :  { %1826 = vrot.lane.b32.xlu1 %v14195_v32, %s12948_s26  ;;  %v14459_v32 = vpack.c.bf16 %v14242_v44, %v14234_v37  ;;  %v14479_v37 = vpack.c.bf16 %v14263_v54, %v14255_v55 }
 0x2f1   :  { %v14441_v23 = vpop.permute.xlu1 %1756  ;;  %v14443_v29 = vpop.permute.xlu0 %1714 }
 0x2f2   :  { %19059 = vst [vmem:[#allocation45_spill] sm:$0xff] %v14459_v32  ;;  %19062 = vst [vmem:[#allocation48_spill] sm:$0xff] %v14479_v37 }
 0x2f3   :  { %1910 = vrot.lane.b32.xlu0 %v14240_v0, %s12953_s16 }
 0x2f4   :  { %1828 = vrot.lane.b32.xlu1 %v14217_v18, %s12948_s26 }
 0x2f5   :  { %v14449_v48 = vpop.permute.xlu1 %1772  ;;  %v14451_v35 = vpop.permute.xlu0 %1730 }
 0x2f7   :  { %1926 = vrot.lane.b32.xlu0 %v14240_v0, %s12947_s6 }
 0x2f8   :  { %1844 = vrot.lane.b32.xlu1 %v14217_v18, %s12949_s27 }
 0x2f9   :  { %v14461_v41 = vpop.permute.xlu1 %1788  ;;  %v14463_v30 = vpop.permute.xlu0 %1746 }
 0x2fa   :  { %19060 = vst [vmem:[#allocation46_spill] sm:$0xff] %v14461_v41 }
 0x2fb   :  { %1974 = vrot.lane.b32.xlu0 %v14459_v32, %s12949_s27 }
 0x2fc   :  { %1860 = vrot.lane.b32.xlu1 %v14217_v18, %s12950_s28 }
 0x2fd   :  { %v14469_v14 = vpop.permute.xlu1 %1804  ;;  %v14471_v0 = vpop.permute.xlu0 %1762 }
 0x2fe   :  { %19061 = vst [vmem:[#allocation47_spill] sm:$0xff] %v14469_v14 }
 0x2ff   :  { %1928 = vrot.lane.b32.xlu0 %v14261_v16, %s12947_s6 }
 0x300   :  { %1876 = vrot.lane.b32.xlu1 %v14217_v18, %s12951_s29 }
 0x301   :  { %v14481_v44 = vpop.permute.xlu0 %1778 }
 0x302   :  { %19063 = vst [vmem:[#allocation49_spill] sm:$0xff] %v14481_v44  ;;  %v14483_v12 = vpop.permute.xlu1 %1712 }
 0x303   :  { %1952 = vrot.lane.b32.xlu0 %v14479_v37, %s12948_s26 }
 0x304   :  { %1892 = vrot.lane.b32.xlu1 %v14217_v18, %s12952_s30 }
 0x305   :  { %v14489_v13 = vpop.permute.xlu0 %1794 }
 0x306   :  { %19064 = vst [vmem:[#allocation50_spill] sm:$0xff] %v14489_v13  ;;  %v14491_v2 = vpop.permute.xlu1 %1728 }
 0x307   :  { %1834 = vrot.lane.b32.xlu0 %v14282_v20, %s12948_s26 }
 0x308   :  { %1908 = vrot.lane.b32.xlu1 %v14217_v18, %s12953_s16 }
 0x309   :  { %v14497_v55 = vpop.permute.xlu0 %1810 }
 0x30a   :  { %19065 = vst [vmem:[#allocation51_spill] sm:$0xff] %v14497_v55  ;;  %v14499_v54 = vpop.permute.xlu1 %1744 }
 0x30b   :  { %1850 = vrot.lane.b32.xlu0 %v14282_v20, %s12949_s27 }
 0x30c   :  { %1972 = vrot.lane.b32.xlu1 %v14387_v59, %s12949_s27 }
 0x30d   :  { %v14505_v8 = vpop.permute.xlu0 %1718 }
 0x30e   :  { %v14507_v57 = vpop.permute.xlu1 %1760 }
 0x30f   :  { %1866 = vrot.lane.b32.xlu0 %v14282_v20, %s12950_s28 }
 0x310   :  { %1950 = vrot.lane.b32.xlu1 %v14459_v32, %s12948_s26 }
 0x311   :  { %v14513_v18 = vpop.permute.xlu0 %1734 }
 0x312   :  { %v14515_v60 = vpop.permute.xlu1 %1776 }
 0x313   :  { %19066 = vst [vmem:[#allocation52_spill] sm:$0xff] %v14515_v60  ;;  %1882 = vrot.lane.b32.xlu0 %v14282_v20, %s12951_s29 }
 0x314   :  { %1832 = vrot.lane.b32.xlu1 %v14261_v16, %s12948_s26 }
 0x315   :  { %v14521_v24 = vpop.permute.xlu0 %1750 }
 0x316   :  { %v14523_v47 = vpop.permute.xlu1 %1792 }
 0x317   :  { %19067 = vst [vmem:[#allocation53_spill] sm:$0xff] %v14523_v47  ;;  %1898 = vrot.lane.b32.xlu0 %v14282_v20, %s12952_s30 }
 0x318   :  { %1848 = vrot.lane.b32.xlu1 %v14261_v16, %s12949_s27 }
 0x319   :  { %v14529_v27 = vpop.permute.xlu0 %1766 }
 0x31a   :  { %v14531_v50 = vpop.permute.xlu1 %1808 }
 0x31b   :  { %19068 = vst [vmem:[#allocation54_spill] sm:$0xff] %v14531_v50  ;;  %1914 = vrot.lane.b32.xlu0 %v14282_v20, %s12953_s16 }
 0x31c   :  { %1864 = vrot.lane.b32.xlu1 %v14261_v16, %s12950_s28 }
 0x31d   :  { %v14537_v36 = vpop.permute.xlu0 %1782 }
 0x31e   :  { %19069 = vst [vmem:[#allocation55_spill] sm:$0xff] %v14537_v36  ;;  %v14539_v51 = vpop.permute.xlu1 %1814 }
 0x31f   :  { %19070 = vst [vmem:[#allocation56_spill] sm:$0xff] %v14539_v51  ;;  %1930 = vrot.lane.b32.xlu0 %v14282_v20, %s12947_s6 }
 0x320   :  { %1880 = vrot.lane.b32.xlu1 %v14261_v16, %s12951_s29 }
 0x321   :  { %v14549_v32 = vpop.permute.xlu0 %1798 }
 0x322   :  { %19072 = vst [vmem:[#allocation58_spill] sm:$0xff] %v14549_v32  ;;  %v14551_v59 = vpop.permute.xlu1 %1716 }
 0x323   :  { %1954 = vrot.lane.b32.xlu0 %v14547_v26, %s12948_s26 }
 0x324   :  { %1896 = vrot.lane.b32.xlu1 %v14261_v16, %s12952_s30 }
 0x325   :  { %v1825_v34 = vpop.permute.xlu0 %1824 }
 0x326   :  { %v2492_v20 = vsel %vm149_vm0, %v1825_v34, 0  ;;  %v14558_v9 = vpop.permute.xlu1 %1732 }
 0x327   :  { %1978 = vrot.lane.b32.xlu0 %v14547_v26, %s12949_s27  ;;  %11525 = vmatpush3.bf16.xpose.msra.mxu1 %v2492_v20 }
 0x328   :  { %1912 = vrot.lane.b32.xlu1 %v14261_v16, %s12953_s16  ;;  %11536 = vmatprep.subr.bf16.mxu1 %v19050_v38 }
 0x329   :  { %v14565_v42 = vpop.permute.xlu0 %1842 }
 0x32a   :  { %v14567_v5 = vpop.permute.xlu1 %1748 }
 0x32b   :  { %1838 = vrot.lane.b32.xlu0 %v14320_v3, %s12948_s26 }
 0x32c   :  { %1976 = vrot.lane.b32.xlu1 %v14479_v37, %s12949_s27 }
 0x32d   :  { %v14573_v34 = vpop.permute.xlu0 %1858 }
 0x32e   :  { %v14575_v51 = vpop.permute.xlu1 %1764  ;;  %11527 = vmatmul.mubr.msk.bf16.vlgmr.msra.gmra.mxu1 %vm149_vm0, %v14340_v52 }
 0x32f   :  { %1854 = vrot.lane.b32.xlu0 %v14320_v3, %s12949_s27  ;;  %11538 = vmatprep.mubr.msk.bf16.mxu1 %vm12946_vm1, %v19050_v38 }
 0x330   :  { %1836 = vrot.lane.b32.xlu1 %v14301_v28, %s12948_s26 }
 0x331   :  { %v14585_v16 = vpop.permute.xlu0 %1874 }
 0x332   :  { %v14587_v20 = vpop.permute.xlu1 %1780 }
 0x333   :  { %19073 = vst [vmem:[#allocation59_spill] sm:$0xff] %v14587_v20  ;;  %1870 = vrot.lane.b32.xlu0 %v14320_v3, %s12950_s28 }
 0x334   :  { %1852 = vrot.lane.b32.xlu1 %v14301_v28, %s12949_s27 }
 0x335   :  { %v14593_v52 = vpop.permute.xlu0 %1890 }
 0x336   :  { %v14595_v26 = vpop.permute.xlu1 %1796 }
 0x337   :  { %19074 = vst [vmem:[#allocation60_spill] sm:$0xff] %v14595_v26  ;;  %1886 = vrot.lane.b32.xlu0 %v14320_v3, %s12951_s29 }
 0x338   :  { %1868 = vrot.lane.b32.xlu1 %v14301_v28, %s12950_s28 }
 0x339   :  { %v14601_v37 = vpop.permute.xlu0 %1906 }
 0x33a   :  { %19075 = vst [vmem:[#allocation61_spill] sm:$0xff] %v14601_v37  ;;  %v14603_v50 = vpop.permute.xlu1 %1812 }
 0x33b   :  { %19076 = vst [vmem:[#allocation62_spill] sm:$0xff] %v14603_v50  ;;  %1902 = vrot.lane.b32.xlu0 %v14320_v3, %s12952_s30 }
 0x33c   :  { %1884 = vrot.lane.b32.xlu1 %v14301_v28, %s12951_s29 }
 0x33d   :  { %v14609_v55 = vpop.permute.xlu0 %1922 }
 0x33e   :  { %19077 = vst [vmem:[#allocation63_spill] sm:$0xff] %v14609_v55  ;;  %v14611_v14 = vpop.permute.xlu1 %1840 }
 0x33f   :  { %1918 = vrot.lane.b32.xlu0 %v14320_v3, %s12953_s16 }
 0x340   :  { %1900 = vrot.lane.b32.xlu1 %v14301_v28, %s12952_s30 }
 0x341   :  { %v14617_v22 = vpop.permute.xlu0 %1946 }
 0x342   :  { %19078 = vst [vmem:[#allocation64_spill] sm:$0xff] %v14617_v22  ;;  %v14619_v50 = vpop.permute.xlu1 %1856 }
 0x343   :  { %1934 = vrot.lane.b32.xlu0 %v14320_v3, %s12947_s6  ;;  %v14640_v3 = vpack.c.bf16 %v14303_v46, %v14296_v15 }
 0x344   :  { %1916 = vrot.lane.b32.xlu1 %v14301_v28, %s12953_s16 }
 0x345   :  { %v14628_v26 = vpop.permute.xlu0 %1970  ;;  %19082 = vst [vmem:[#allocation68_spill] sm:$0xff] %v14640_v3 }
 0x346   :  { %19080 = vst [vmem:[#allocation66_spill] sm:$0xff] %v14628_v26  ;;  %v14630_v32 = vpop.permute.xlu1 %1872 }
 0x347   :  { %1958 = vrot.lane.b32.xlu0 %v14626_v19, %s12948_s26 }
 0x348   :  { %1932 = vrot.lane.b32.xlu1 %v14301_v28, %s12947_s6 }
 0x349   :  { %v14636_v22 = vpop.permute.xlu0 %1924 }
 0x34a   :  { %19081 = vst [vmem:[#allocation67_spill] sm:$0xff] %v14636_v22  ;;  %v14642_v55 = vpop.permute.xlu1 %1888 }
 0x34b   :  { %1982 = vrot.lane.b32.xlu0 %v14626_v19, %s12949_s27 }
 0x34c   :  { %1956 = vrot.lane.b32.xlu1 %v14640_v3, %s12948_s26 }
 0x34d   :  { %v14648_v10 = vpop.permute.xlu0 %1948 }
 0x34e   :  { %19083 = vst [vmem:[#allocation69_spill] sm:$0xff] %v14648_v10  ;;  %v14650_v7 = vpop.permute.xlu1 %1904 }
 0x34f   :  { %19084 = vst [vmem:[#allocation70_spill] sm:$0xff] %v14650_v7  ;;  %v14652_v26 = vpop.f32.mrf.mxu1 }
 0x350   :  { %19085 = vst [vmem:[#allocation71_spill] sm:$0xff] %v14652_v26  ;;  %1980 = vrot.lane.b32.xlu1 %v14640_v3, %s12949_s27 }
 0x351   :  { %v11480_v28 = vpop.f32.mrf.mxu1  ;;  %v1831_v15 = vpop.permute.xlu0 %1830 }
 0x352   :  { %v14656_v46 = vpop.permute.xlu1 %1920 }
 0x353   :  { %19086 = vst [vmem:[#allocation72_spill] sm:$0xff] %v14656_v46  ;;  %v14658_v22 = vpop.f32.mrf.mxu1 }
 0x354   :  { %19087 = vst [vmem:[#allocation73_spill] sm:$0xff] %v14658_v22 }
 0x355   :  { %v11481_v47 = vpop.f32.mrf.mxu1  ;;  %v14660_v19 = vpop.permute.xlu0 %1846 }
 0x356   :  { %v14662_v13 = vpop.permute.xlu1 %1944 }
 0x357   :  { %19088 = vst [vmem:[#allocation74_spill] sm:$0xff] %v14662_v13  ;;  %v14664_v41 = vpop.f32.mrf.mxu1 }
 0x358   :  { %19089 = vst [vmem:[#allocation75_spill] sm:$0xff] %v14664_v41 }
 0x359   :  { %v11486_v10 = vpop.f32.mrf.mxu1  ;;  %v14666_v56 = vpop.permute.xlu0 %1862 }
 0x35a   :  { %v14668_v43 = vpop.permute.xlu1 %1968 }
 0x35b   :  { %19090 = vst [vmem:[#allocation76_spill] sm:$0xff] %v14668_v43  ;;  %v14670_v17 = vpop.f32.mrf.mxu1 }
 0x35c   :  { %19091 = vst [vmem:[#allocation77_spill] sm:$0xff] %v14670_v17 }
 0x35d   :  { %v11487_v28 = vpop.f32.mrf.mxu1  ;;  %v14672_v3 = vpop.permute.xlu0 %1878 }
 0x35e   :  { %v14674_v46 = vpop.permute.xlu1 %1992 }
 0x35f   :  { %19092 = vst [vmem:[#allocation78_spill] sm:$0xff] %v14674_v46  ;;  %v14676_v20 = vpop.f32.mrf.mxu1 }
 0x360   :  { %19093 = vst [vmem:[#allocation79_spill] sm:$0xff] %v14676_v20 }
 0x361   :  { %v11492_v47 = vpop.f32.mrf.mxu1  ;;  %v14678_v7 = vpop.permute.xlu0 %1894 }
 0x362   :  { %v1827_v13 = vpop.permute.xlu1 %1826 }
 0x363   :  { %v2539_v36 = vsel %vm149_vm0, %v1827_v13, 0  ;;  %v14681_v10 = vpop.f32.mrf.mxu1  ;;  %v5123_v13 = vsel %vm149_vm0, %v14658_v22, -inf }
 0x364   :  { %19094 = vst [vmem:[#allocation80_spill] sm:$0xff] %v14681_v10  ;;  %11531 = vmatpush3.bf16.xpose.msra.mxu0 %v2539_v36 }
 0x365   :  { %v11493_v37 = vpop.f32.mrf.mxu1  ;;  %v14683_v43 = vpop.permute.xlu0 %1910  ;;  %11542 = vmatprep.subr.bf16.mxu0 %v19050_v38 }
 0x366   :  { %19095 = vst [vmem:[#allocation81_spill] sm:$0xff] %v14683_v43  ;;  %v1829_v28 = vpop.permute.xlu1 %1828  ;;  %v2633_v37 = vsel %vm149_vm0, %v1831_v15, 0 }
 0x367   :  { %v2586_v60 = vsel %vm149_vm0, %v1829_v28, 0  ;;  %v14687_v46 = vpop.f32.mrf.mxu1 }
 0x368   :  { %19096 = vst [vmem:[#allocation82_spill] sm:$0xff] %v14687_v46  ;;  %11537 = vmatpush3.bf16.xpose.msra.mxu1 %v2586_v60 }
 0x369   :  { %v11498_v47 = vpop.f32.mrf.mxu1  ;;  %v14689_v44 = vpop.permute.xlu0 %1926  ;;  %11548 = vmatprep.subr.bf16.mxu1 %v19050_v38 }
 0x36a   :  { %19097 = vst [vmem:[#allocation83_spill] sm:$0xff] %v14689_v44  ;;  %v14694_v36 = vpop.permute.xlu1 %1844  ;;  %5124 = vmax.xlane.f32.xlu0 %v5123_v13  ;;  %v5129_v44 = vsel %vm149_vm0, %v14670_v17, -inf }
 0x36b   :  { %11533 = vmatmul.mubr.msk.bf16.vlgmr.msra.gmra.mxu0 %vm149_vm0, %v14330_v39  ;;  %v14699_v28 = vpop.f32.mrf.mxu1 }
 0x36c   :  { %19098 = vst [vmem:[#allocation84_spill] sm:$0xff] %v14699_v28  ;;  %11543 = vmatpush3.bf16.xpose.msra.mxu0 %v2633_v37  ;;  %11544 = vmatprep.mubr.msk.bf16.mxu0 %vm12946_vm1, %v19050_v38 }
 0x36d   :  { %v11499_v60 = vpop.f32.mrf.mxu1  ;;  %v14703_v47 = vpop.permute.xlu0 %1974  ;;  %11554 = vmatprep.subr.bf16.mxu0 %v19050_v38 }
 0x36e   :  { %19099 = vst [vmem:[#allocation85_spill] sm:$0xff] %v14703_v47  ;;  %v14708_v13 = vpop.permute.xlu1 %1860  ;;  %5130 = vmax.xlane.f32.xlu0 %v5129_v44  ;;  %v5132_v60 = vsel %vm149_vm0, %v14676_v20, -inf  ;;  %v5135_v20 = vsel %vm149_vm0, %v14681_v10, -inf }
 0x36f   :  { %11539 = vmatmul.mubr.msk.bf16.vlgmr.msra.gmra.mxu1 %vm149_vm0, %v14419_v31  ;;  %v14712_v39 = vpop.f32.mrf.mxu1  ;;  %v5120_v31 = vsel %vm149_vm0, %v14652_v26, -inf  ;;  %v5141_v26 = vsel %vm149_vm0, %v14699_v28, -inf }
 0x370   :  { %19100 = vst [vmem:[#allocation86_spill] sm:$0xff] %v14712_v39  ;;  %11550 = vmatprep.mubr.msk.bf16.mxu1 %vm12946_vm1, %v19050_v38 }
 0x371   :  { %v11504_v15 = vpop.f32.mrf.mxu1  ;;  %v14716_v37 = vpop.permute.xlu0 %1928 }
 0x372   :  { %19101 = vst [vmem:[#allocation87_spill] sm:$0xff] %v14716_v37  ;;  %v14720_v47 = vpop.permute.xlu1 %1876  ;;  %5133 = vmax.xlane.f32.xlu0 %v5132_v60 }
 0x373   :  { %11545 = vmatmul.mubr.msk.bf16.vlgmr.msra.gmra.mxu0 %vm149_vm0, %v14391_v33  ;;  %v14724_v44 = vpop.f32.mrf.mxu1  ;;  %v5126_v33 = vsel %vm149_vm0, %v14664_v41, -inf }
 0x374   :  { %19102 = vst [vmem:[#allocation88_spill] sm:$0xff] %v14724_v44  ;;  %5121 = vmax.xlane.f32.xlu1 %v5120_v31  ;;  %11556 = vmatprep.mubr.msk.bf16.mxu0 %vm12946_vm1, %v19050_v38  ;;  %v5147_v28 = vsel %vm149_vm0, %v14724_v44, -inf }
 0x375   :  { %v11505_v15 = vpop.f32.mrf.mxu1  ;;  %v14730_v17 = vpop.permute.xlu0 %1952 }
 0x376   :  { %19103 = vst [vmem:[#allocation89_spill] sm:$0xff] %v14730_v17  ;;  %v14734_v37 = vpop.permute.xlu1 %1892  ;;  %5136 = vmax.xlane.f32.xlu0 %v5135_v20  ;;  %v5138_v20 = vsel %vm149_vm0, %v14687_v46, -inf }
 0x377   :  { %v14736_v60 = vpop.f32.mrf.mxu0 }
 0x378   :  { %19104 = vst [vmem:[#allocation90_spill] sm:$0xff] %v14736_v60  ;;  %5127 = vmax.xlane.f32.xlu1 %v5126_v33 }
 0x379   :  { %v1835_v22 = vpop.permute.xlu0 %1834  ;;  %v11510_v31 = vpop.f32.mrf.mxu0 }
 0x37a   :  { %v2727_v15 = vsel %vm149_vm0, %v1835_v22, 0  ;;  %v14743_v17 = vpop.permute.xlu1 %1908  ;;  %5142 = vmax.xlane.f32.xlu0 %v5141_v26  ;;  %v5144_v26 = vsel %vm149_vm0, %v14712_v39, -inf }
 0x37b   :  { %19105 = vst [vmem:[#allocation91_spill] sm:$0xff] %v14743_v17  ;;  %v14745_v10 = vpop.f32.mrf.mxu0  ;;  %11555 = vmatpush3.bf16.xpose.msra.mxu0 %v2727_v15 }
 0x37c   :  { %19106 = vst [vmem:[#allocation92_spill] sm:$0xff] %v14745_v10  ;;  %5139 = vmax.xlane.f32.xlu1 %v5138_v20  ;;  %11566 = vmatprep.subr.bf16.mxu0 %v19050_v38  ;;  %v5150_v20 = vsel %vm149_vm0, %v14736_v60, -inf }
 0x37d   :  { %v14750_v33 = vpop.permute.xlu0 %1850  ;;  %v11511_v31 = vpop.f32.mrf.mxu0 }
 0x37e   :  { %v14754_v41 = vpop.permute.xlu1 %1972  ;;  %5148 = vmax.xlane.f32.xlu0 %v5147_v28 }
 0x37f   :  { %19107 = vst [vmem:[#allocation93_spill] sm:$0xff] %v14754_v41  ;;  %v14758_v22 = vpop.f32.mrf.mxu1 }
 0x380   :  { %19108 = vst [vmem:[#allocation94_spill] sm:$0xff] %v14758_v22  ;;  %5145 = vmax.xlane.f32.xlu1 %v5144_v26 }
 0x381   :  { %v14760_v46 = vpop.permute.xlu0 %1866  ;;  %v11516_v15 = vpop.f32.mrf.mxu1 }
 0x382   :  { %v14764_v17 = vpop.permute.xlu1 %1950  ;;  %5151 = vmax.xlane.f32.xlu0 %v5150_v20  ;;  %11557 = vmatmul.mubr.msk.bf16.vlgmr.msra.gmra.mxu0 %vm149_vm0, %v14443_v29  ;;  %v5153_v15 = vsel %vm149_vm0, %v14745_v10, -inf }
 0x383   :  { %19109 = vst [vmem:[#allocation95_spill] sm:$0xff] %v14764_v17  ;;  %v14768_v31 = vpop.f32.mrf.mxu1  ;;  %11568 = vmatprep.mubr.msk.bf16.mxu0 %vm12946_vm1, %v19050_v38 }
 0x384   :  { %19110 = vst [vmem:[#allocation96_spill] sm:$0xff] %v14768_v31 }
 0x385   :  { %v14772_v28 = vpop.permute.xlu0 %1882  ;;  %v11517_v26 = vpop.f32.mrf.mxu1 }
 0x386   :  { %v1833_v41 = vpop.permute.xlu1 %1832  ;;  %5154 = vmax.xlane.f32.xlu0 %v5153_v15  ;;  %v5156_v26 = vsel %vm149_vm0, %v14758_v22, -inf }
 0x387   :  { %v2680_v60 = vsel %vm149_vm0, %v1833_v41, 0  ;;  %v14777_v17 = vpop.f32.mrf.mxu0 }
 0x388   :  { %19111 = vst [vmem:[#allocation97_spill] sm:$0xff] %v14777_v17  ;;  %11549 = vmatpush3.bf16.xpose.msra.mxu1 %v2680_v60  ;;  %v5162_v29 = vsel %vm149_vm0, %v14777_v17, -inf  ;;  %v5159_v60 = vsel %vm149_vm0, %v14768_v31, -inf }
 0x389   :  { %v14781_v20 = vpop.permute.xlu0 %1898  ;;  %v11522_v44 = vpop.f32.mrf.mxu0  ;;  %5163 = vmax.xlane.f32.xlu1 %v5162_v29  ;;  %11560 = vmatprep.subr.bf16.mxu1 %v19050_v38 }
 0x38a   :  { %v1849_v10 = vpop.permute.xlu1 %1848  ;;  %5157 = vmax.xlane.f32.xlu0 %v5156_v26 }
 0x38b   :  { %v14786_v15 = vpop.f32.mrf.mxu0 }
 0x38c   :  { %19112 = vst [vmem:[#allocation98_spill] sm:$0xff] %v14786_v15  ;;  %v5165_v29 = vsel %vm149_vm0, %v14786_v15, -inf }
 0x38d   :  { %v14788_v41 = vpop.permute.xlu0 %1914  ;;  %v11523_v39 = vpop.f32.mrf.mxu0 }
 0x38e   :  { %19113 = vst [vmem:[#allocation99_spill] sm:$0xff] %v14788_v41  ;;  %v14792_v17 = vpop.permute.xlu1 %1864  ;;  %5160 = vmax.xlane.f32.xlu0 %v5159_v60 }
 0x38f   :  { %11551 = vmatmul.mubr.msk.bf16.vlgmr.msra.gmra.mxu1 %vm149_vm0, %v14483_v12 }
 0x390   :  { %11562 = vmatprep.mubr.msk.bf16.mxu1 %vm12946_vm1, %v19050_v38 }
 0x391   :  { %v14798_v44 = vpop.permute.xlu0 %1930 }
 0x392   :  { %19114 = vst [vmem:[#allocation100_spill] sm:$0xff] %v14798_v44  ;;  %v14802_v26 = vpop.permute.xlu1 %1880  ;;  %5166 = vmax.xlane.f32.xlu0 %v5165_v29  ;;  %v2915_v29 = vsel %vm149_vm0, %v14565_v42, 0 }
 0x395   :  { %v14804_v39 = vpop.permute.xlu0 %1954 }
 0x396   :  { %19115 = vst [vmem:[#allocation101_spill] sm:$0xff] %v14804_v39  ;;  %v14806_v31 = vpop.permute.xlu1 %1896 }
 0x399   :  { %v14808_v22 = vpop.permute.xlu0 %1978 }
 0x39a   :  { %19116 = vst [vmem:[#allocation102_spill] sm:$0xff] %v14808_v22  ;;  %v14810_v60 = vpop.permute.xlu1 %1912 }
 0x39d   :  { %v1839_v12 = vpop.permute.xlu0 %1838 }
 0x39e   :  { %v2821_v41 = vsel %vm149_vm0, %v1839_v12, 0  ;;  %v14813_v43 = vpop.permute.xlu1 %1976 }
 0x39f   :  { %19117 = vst [vmem:[#allocation103_spill] sm:$0xff] %v14813_v43  ;;  %11567 = vmatpush3.bf16.xpose.msra.mxu0 %v2821_v41  ;;  %v2868_v41 = vsel %vm149_vm0, %v14611_v14, 0  ;;  %v2962_v14 = vsel %vm149_vm0, %v14694_v36, 0  ;;  %v19119_v36 = vld [vmem:[#allocation52_spill] sm:$0xff] }
 0x3a0   :  { %11578 = vmatprep.subr.bf16.mxu0 %v19050_v38 }
 0x3a2   :  { %v1837_v15 = vpop.permute.xlu1 %1836 }
 0x3a3   :  { %v2774_v44 = vsel %vm149_vm0, %v1837_v15, 0 }
 0x3a4   :  { %11561 = vmatpush3.bf16.xpose.msra.mxu1 %v2774_v44  ;;  %v19123_v44 = vld [vmem:[#allocation59_spill] sm:$0xff] }
 0x3a5   :  { %11572 = vmatprep.subr.bf16.mxu1 %v19050_v38 }
 0x3a6   :  { %11569 = vmatmul.mubr.msk.bf16.vlgmr.msra.gmra.mxu0 %vm149_vm0, %v14505_v8  ;;  %v3009_v8 = vsel %vm149_vm0, %v14660_v19, 0  ;;  %v1855_v19 = vpop.permute.xlu0 %1854 }
 0x3a7   :  { %11579 = vmatpush3.bf16.xpose.msra.mxu0 %v2915_v29  ;;  %11580 = vmatprep.mubr.msk.bf16.mxu0 %vm12946_vm1, %v19050_v38 }
 0x3a8   :  { %11590 = vmatprep.subr.bf16.mxu0 %v19050_v38 }
 0x3ab   :  { %11563 = vmatmul.mubr.msk.bf16.vlgmr.msra.gmra.mxu1 %vm149_vm0, %v14551_v59  ;;  %v3103_v59 = vsel %vm149_vm0, %v14750_v33, 0  ;;  %v19121_v33 = vld [vmem:[#allocation55_spill] sm:$0xff] }
 0x3ac   :  { %11573 = vmatpush3.bf16.xpose.msra.mxu1 %v2868_v41  ;;  %11574 = vmatprep.mubr.msk.bf16.mxu1 %vm12946_vm1, %v19050_v38  ;;  %v19124_v41 = vld [vmem:[#allocation81_spill] sm:$0xff] }
 0x3ad   :  { %11584 = vmatprep.subr.bf16.mxu1 %v19050_v38 }
 0x3ae   :  { %11581 = vmatmul.mubr.msk.bf16.vlgmr.msra.gmra.mxu0 %vm149_vm0, %v14338_v11  ;;  %v1853_v11 = vpop.permute.xlu1 %1852 }
 0x3af   :  { %11591 = vmatpush3.bf16.xpose.msra.mxu0 %v3009_v8  ;;  %11592 = vmatprep.mubr.msk.bf16.mxu0 %vm12946_vm1, %v19050_v38  ;;  %v4513_v8 = vsel %vm149_vm0, %v19124_v41, 0 }
 0x3b0   :  { %11602 = vmatprep.subr.bf16.mxu0 %v19050_v38 }
 0x3b3   :  { %11575 = vmatmul.mubr.msk.bf16.vlgmr.msra.gmra.mxu1 %vm149_vm0, %v14351_v40  ;;  %v3056_v40 = vsel %vm149_vm0, %v1849_v10, 0 }
 0x3b4   :  { %11585 = vmatpush3.bf16.xpose.msra.mxu1 %v2962_v14  ;;  %11586 = vmatprep.mubr.msk.bf16.mxu1 %vm12946_vm1, %v19050_v38  ;;  %v19125_v14 = vld [vmem:[#allocation38_spill] sm:$0xff] }
 0x3b5   :  { %11596 = vmatprep.subr.bf16.mxu1 %v19050_v38 }
 0x3b6   :  { %11593 = vmatmul.mubr.msk.bf16.vlgmr.msra.gmra.mxu0 %vm149_vm0, %v14399_v4  ;;  %v3197_v4 = vsel %vm149_vm0, %v1855_v19, 0 }
 0x3b7   :  { %11603 = vmatpush3.bf16.xpose.msra.mxu0 %v3103_v59  ;;  %11604 = vmatprep.mubr.msk.bf16.mxu0 %vm12946_vm1, %v19050_v38 }
 0x3b8   :  { %11614 = vmatprep.subr.bf16.mxu0 %v19050_v38 }
 0x3bb   :  { %11587 = vmatmul.mubr.msk.bf16.vlgmr.msra.gmra.mxu1 %vm149_vm0, %v14427_v58  ;;  %v3150_v58 = vsel %vm149_vm0, %v1853_v11, 0 }
 0x3bc   :  { %11597 = vmatpush3.bf16.xpose.msra.mxu1 %v3056_v40  ;;  %11598 = vmatprep.mubr.msk.bf16.mxu1 %vm12946_vm1, %v19050_v38 }
 0x3bd   :  { %11608 = vmatprep.subr.bf16.mxu1 %v19050_v38 }
 0x3be   :  { %11605 = vmatmul.mubr.msk.bf16.vlgmr.msra.gmra.mxu0 %vm149_vm0, %v14451_v35  ;;  %v3291_v35 = vsel %vm149_vm0, %v14573_v34, 0  ;;  %v3714_v34 = vsel %vm149_vm0, %v14720_v47, 0  ;;  %v19120_v47 = vld [vmem:[#allocation61_spill] sm:$0xff] }
 0x3bf   :  { %11615 = vmatpush3.bf16.xpose.msra.mxu0 %v3197_v4  ;;  %11616 = vmatprep.mubr.msk.bf16.mxu0 %vm12946_vm1, %v19050_v38 }
 0x3c0   :  { %11626 = vmatprep.subr.bf16.mxu0 %v19050_v38 }
 0x3c3   :  { %11599 = vmatmul.mubr.msk.bf16.vlgmr.msra.gmra.mxu1 %vm149_vm0, %v14491_v2  ;;  %v3244_v2 = vsel %vm149_vm0, %v14619_v50, 0  ;;  %v3338_v50 = vsel %vm149_vm0, %v14708_v13, 0  ;;  %v4419_v13 = vsel %vm149_vm0, %v19120_v47, 0 }
 0x3c4   :  { %11609 = vmatpush3.bf16.xpose.msra.mxu1 %v3150_v58  ;;  %11610 = vmatprep.mubr.msk.bf16.mxu1 %vm12946_vm1, %v19050_v38 }
 0x3c5   :  { %11620 = vmatprep.subr.bf16.mxu1 %v19050_v38 }
 0x3c6   :  { %11617 = vmatmul.mubr.msk.bf16.vlgmr.msra.gmra.mxu0 %vm149_vm0, %v14513_v18  ;;  %v3385_v18 = vsel %vm149_vm0, %v14666_v56, 0  ;;  %v3620_v56 = vsel %vm149_vm0, %v14630_v32, 0 }
 0x3c7   :  { %11627 = vmatpush3.bf16.xpose.msra.mxu0 %v3291_v35  ;;  %11628 = vmatprep.mubr.msk.bf16.mxu0 %vm12946_vm1, %v19050_v38 }
 0x3c8   :  { %11638 = vmatprep.subr.bf16.mxu0 %v19050_v38 }
 0x3cb   :  { %11611 = vmatmul.mubr.msk.bf16.vlgmr.msra.gmra.mxu1 %vm149_vm0, %v14558_v9  ;;  %v3479_v9 = vsel %vm149_vm0, %v14760_v46, 0 }
 0x3cc   :  { %11621 = vmatpush3.bf16.xpose.msra.mxu1 %v3244_v2  ;;  %11622 = vmatprep.mubr.msk.bf16.mxu1 %vm12946_vm1, %v19050_v38  ;;  %v19127_v2 = vld [vmem:[#allocation91_spill] sm:$0xff] }
 0x3cd   :  { %11632 = vmatprep.subr.bf16.mxu1 %v19050_v38 }
 0x3ce   :  { %11629 = vmatmul.mubr.msk.bf16.vlgmr.msra.gmra.mxu0 %vm149_vm0, %v14349_v25  ;;  %v3432_v25 = vsel %vm149_vm0, %v14792_v17, 0  ;;  %v1869_v17 = vpop.permute.xlu1 %1868 }
 0x3cf   :  { %11639 = vmatpush3.bf16.xpose.msra.mxu0 %v3385_v18  ;;  %11640 = vmatprep.mubr.msk.bf16.mxu0 %vm12946_vm1, %v19050_v38  ;;  %v4466_v18 = vsel %vm149_vm0, %v19127_v2, 0  ;;  %v19146_v2 = vld [vmem:[#allocation41_spill] sm:$0xff] }
 0x3d0   :  { %11650 = vmatprep.subr.bf16.mxu0 %v19050_v38 }
 0x3d2   :  { %v1885_v10 = vpop.permute.xlu1 %1884 }
 0x3d3   :  { %11623 = vmatmul.mubr.msk.bf16.vlgmr.msra.gmra.mxu1 %vm149_vm0, %v14363_v61  ;;  %v1871_v61 = vpop.permute.xlu0 %1870 }
 0x3d4   :  { %11633 = vmatpush3.bf16.xpose.msra.mxu1 %v3338_v50  ;;  %11634 = vmatprep.mubr.msk.bf16.mxu1 %vm12946_vm1, %v19050_v38 }
 0x3d5   :  { %11644 = vmatprep.subr.bf16.mxu1 %v19050_v38 }
 0x3d6   :  { %11641 = vmatmul.mubr.msk.bf16.vlgmr.msra.gmra.mxu0 %vm149_vm0, %v14407_v63  ;;  %v3573_v63 = vsel %vm149_vm0, %v1871_v61, 0 }
 0x3d7   :  { %11651 = vmatpush3.bf16.xpose.msra.mxu0 %v3479_v9  ;;  %11652 = vmatprep.mubr.msk.bf16.mxu0 %vm12946_vm1, %v19050_v38  ;;  %v1887_v46 = vpop.permute.xlu0 %1886 }
 0x3d8   :  { %11662 = vmatprep.subr.bf16.mxu0 %v19050_v38 }
 0x3db   :  { %11635 = vmatmul.mubr.msk.bf16.vlgmr.msra.gmra.mxu1 %vm149_vm0, %v14435_v1  ;;  %v3526_v1 = vsel %vm149_vm0, %v1869_v17, 0 }
 0x3dc   :  { %11645 = vmatpush3.bf16.xpose.msra.mxu1 %v3432_v25  ;;  %11646 = vmatprep.mubr.msk.bf16.mxu1 %vm12946_vm1, %v19050_v38  ;;  %v19128_v25 = vld [vmem:[#allocation40_spill] sm:$0xff] }
 0x3dd   :  { %11656 = vmatprep.subr.bf16.mxu1 %v19050_v38 }
 0x3de   :  { %11653 = vmatmul.mubr.msk.bf16.vlgmr.msra.gmra.mxu0 %vm149_vm0, %v14463_v30  ;;  %v3667_v30 = vsel %vm149_vm0, %v14585_v16, 0 }
 0x3df   :  { %11663 = vmatpush3.bf16.xpose.msra.mxu0 %v3573_v63  ;;  %11664 = vmatprep.mubr.msk.bf16.mxu0 %vm12946_vm1, %v19050_v38 }
 0x3e0   :  { %11674 = vmatprep.subr.bf16.mxu0 %v19050_v38 }
 0x3e3   :  { %11647 = vmatmul.mubr.msk.bf16.vlgmr.msra.gmra.mxu1 %vm149_vm0, %v14499_v54 }
 0x3e4   :  { %11657 = vmatpush3.bf16.xpose.msra.mxu1 %v3526_v1  ;;  %11658 = vmatprep.mubr.msk.bf16.mxu1 %vm12946_vm1, %v19050_v38  ;;  %v19129_v1 = vld [vmem:[#allocation99_spill] sm:$0xff] }
 0x3e5   :  { %11668 = vmatprep.subr.bf16.mxu1 %v19050_v38 }
 0x3e6   :  { %11665 = vmatmul.mubr.msk.bf16.vlgmr.msra.gmra.mxu0 %vm149_vm0, %v14521_v24  ;;  %v3761_v24 = vsel %vm149_vm0, %v14672_v3, 0  ;;  %v3855_v3 = vsel %vm149_vm0, %v14772_v28, 0  ;;  %v19122_v28 = vld [vmem:[#allocation70_spill] sm:$0xff] }
 0x3e7   :  { %11675 = vmatpush3.bf16.xpose.msra.mxu0 %v3667_v30  ;;  %11676 = vmatprep.mubr.msk.bf16.mxu0 %vm12946_vm1, %v19050_v38  ;;  %v4607_v30 = vsel %vm149_vm0, %v19129_v1, 0  ;;  %v19147_v1 = vld [vmem:[#allocation100_spill] sm:$0xff] }
 0x3e8   :  { %11686 = vmatprep.subr.bf16.mxu0 %v19050_v38 }
 0x3eb   :  { %11659 = vmatmul.mubr.msk.bf16.vlgmr.msra.gmra.mxu1 %vm149_vm0, %v14567_v5 }
 0x3ec   :  { %11669 = vmatpush3.bf16.xpose.msra.mxu1 %v3620_v56  ;;  %11670 = vmatprep.mubr.msk.bf16.mxu1 %vm12946_vm1, %v19050_v38  ;;  %v19130_v56 = vld [vmem:[#allocation44_spill] sm:$0xff] }
 0x3ed   :  { %11680 = vmatprep.subr.bf16.mxu1 %v19050_v38 }
 0x3ee   :  { %v14941_v54 = vpop.f32.mrf.mxu1  ;;  %11677 = vmatmul.mubr.msk.bf16.vlgmr.msra.gmra.mxu0 %vm149_vm0, %v14361_v6 }
 0x3ef   :  { %11687 = vmatpush3.bf16.xpose.msra.mxu0 %v3761_v24  ;;  %v5168_v32 = vsel %vm149_vm0, %v14941_v54, -inf  ;;  %11688 = vmatprep.mubr.msk.bf16.mxu0 %vm12946_vm1, %v19050_v38 }
 0x3f0   :  { %5169 = vmax.xlane.f32.xlu0 %v5168_v32  ;;  %v11528_v42 = vpop.f32.mrf.mxu1  ;;  %11698 = vmatprep.subr.bf16.mxu0 %v19050_v38 }
 0x3f2   :  { %v14950_v5 = vpop.f32.mrf.mxu1 }
 0x3f3   :  { %11671 = vmatmul.mubr.msk.bf16.vlgmr.msra.gmra.mxu1 %vm149_vm0, %v14371_v53  ;;  %v5171_v6 = vsel %vm149_vm0, %v14950_v5, -inf  ;;  %v3808_v53 = vsel %vm149_vm0, %v14802_v26, 0 }
 0x3f4   :  { %11681 = vmatpush3.bf16.xpose.msra.mxu1 %v3714_v34  ;;  %5172 = vmax.xlane.f32.xlu0 %v5171_v6  ;;  %v11529_v16 = vpop.f32.mrf.mxu1 }
 0x3f5   :  { %11682 = vmatprep.mubr.msk.bf16.mxu1 %vm12946_vm1, %v19050_v38  ;;  %11692 = vmatprep.subr.bf16.mxu1 %v19050_v38  ;;  %v4560_v16 = vsel %vm149_vm0, %v14810_v60, 0  ;;  %v19136_v60 = vld [vmem:[#allocation71_spill] sm:$0xff] }
 0x3f6   :  { %11689 = vmatmul.mubr.msk.bf16.vlgmr.msra.gmra.mxu0 %vm149_vm0, %v14417_v49  ;;  %v3949_v49 = vsel %vm149_vm0, %v1887_v46, 0 }
 0x3f7   :  { %11699 = vmatpush3.bf16.xpose.msra.mxu0 %v3855_v3  ;;  %11700 = vmatprep.mubr.msk.bf16.mxu0 %vm12946_vm1, %v19050_v38  ;;  %v19133_v3 = vld [vmem:[#allocation46_spill] sm:$0xff] }
 0x3f8   :  { %11710 = vmatprep.subr.bf16.mxu0 %v19050_v38 }
 0x3fb   :  { %11683 = vmatmul.mubr.msk.bf16.vlgmr.msra.gmra.mxu1 %vm149_vm0, %v14441_v23  ;;  %v3902_v23 = vsel %vm149_vm0, %v1885_v10, 0 }
 0x3fc   :  { %11693 = vmatpush3.bf16.xpose.msra.mxu1 %v3808_v53  ;;  %11694 = vmatprep.mubr.msk.bf16.mxu1 %vm12946_vm1, %v19050_v38 }
 0x3fd   :  { %11704 = vmatprep.subr.bf16.mxu1 %v19050_v38 }
 0x3fe   :  { %11701 = vmatmul.mubr.msk.bf16.vlgmr.msra.gmra.mxu0 %vm149_vm0, %v14471_v0  ;;  %v4043_v0 = vsel %vm149_vm0, %v14593_v52, 0  ;;  %v19118_v52 = vld [vmem:[#allocation49_spill] sm:$0xff] }
 0x3ff   :  { %11711 = vmatpush3.bf16.xpose.msra.mxu0 %v3949_v49  ;;  %11712 = vmatprep.mubr.msk.bf16.mxu0 %vm12946_vm1, %v19050_v38 }
 0x400   :  { %11722 = vmatprep.subr.bf16.mxu0 %v19050_v38 }
 0x403   :  { %11695 = vmatmul.mubr.msk.bf16.vlgmr.msra.gmra.mxu1 %vm149_vm0, %v14507_v57  ;;  %v3996_v57 = vsel %vm149_vm0, %v14642_v55, 0  ;;  %v1903_v55 = vpop.permute.xlu0 %1902 }
 0x404   :  { %11705 = vmatpush3.bf16.xpose.msra.mxu1 %v3902_v23  ;;  %11706 = vmatprep.mubr.msk.bf16.mxu1 %vm12946_vm1, %v19050_v38  ;;  %v19135_v23 = vld [vmem:[#allocation50_spill] sm:$0xff] }
 0x405   :  { %11716 = vmatprep.subr.bf16.mxu1 %v19050_v38 }
 0x406   :  { %11713 = vmatmul.mubr.msk.bf16.vlgmr.msra.gmra.mxu0 %vm149_vm0, %v14529_v27  ;;  %v4137_v27 = vsel %vm149_vm0, %v14678_v7, 0  ;;  %v1901_v7 = vpop.permute.xlu1 %1900 }
 0x407   :  { %11723 = vmatpush3.bf16.xpose.msra.mxu0 %v4043_v0  ;;  %11724 = vmatprep.mubr.msk.bf16.mxu0 %vm12946_vm1, %v19050_v38 }
 0x408   :  { %11734 = vmatprep.subr.bf16.mxu0 %v19050_v38 }
 0x40b   :  { %11707 = vmatmul.mubr.msk.bf16.vlgmr.msra.gmra.mxu1 %vm149_vm0, %v14575_v51  ;;  %v4090_v51 = vsel %vm149_vm0, %v14734_v37, 0  ;;  %v15043_v37 = vpop.permute.xlu1 %1916 }
 0x40c   :  { %11717 = vmatpush3.bf16.xpose.msra.mxu1 %v3996_v57  ;;  %11718 = vmatprep.mubr.msk.bf16.mxu1 %vm12946_vm1, %v19050_v38 }
 0x40d   :  { %11728 = vmatprep.subr.bf16.mxu1 %v19050_v38 }
 0x40e   :  { %11725 = vmatmul.mubr.msk.bf16.vlgmr.msra.gmra.mxu0 %vm149_vm0, %v14369_v21  ;;  %v4231_v21 = vsel %vm149_vm0, %v14781_v20, 0  ;;  %v4372_v20 = vsel %vm149_vm0, %v19122_v28, 0 }
 0x40f   :  { %11735 = vmatpush3.bf16.xpose.msra.mxu0 %v4137_v27  ;;  %11736 = vmatprep.mubr.msk.bf16.mxu0 %vm12946_vm1, %v19050_v38  ;;  %v15056_v26 = vpop.permute.xlu1 %1932 }
 0x410   :  { %11746 = vmatprep.subr.bf16.mxu0 %v19050_v38 }
 0x413   :  { %11719 = vmatmul.mubr.msk.bf16.vlgmr.msra.gmra.mxu1 %vm149_vm0, %v14379_v62  ;;  %v4184_v62 = vsel %vm149_vm0, %v14806_v31, 0  ;;  %v1919_v31 = vpop.permute.xlu0 %1918  ;;  %v15078_v35 = vpop.permute.xlu1 %1956 }
 0x414   :  { %11729 = vmatpush3.bf16.xpose.msra.mxu1 %v4090_v51  ;;  %11730 = vmatprep.mubr.msk.bf16.mxu1 %vm12946_vm1, %v19050_v38  ;;  %19126 = vst [vmem:[#allocation49_spill] sm:$0xff] %v15078_v35  ;;  %v4701_v10 = vsel %vm149_vm0, %v1919_v31, 0  ;;  %v19141_v31 = vld [vmem:[#allocation72_spill] sm:$0xff]  ;;  %v19195_v35 = vld [vmem:[#allocation97_spill] sm:$0xff] }
 0x415   :  { %11740 = vmatprep.subr.bf16.mxu1 %v19050_v38  ;;  %v4748_v28 = vsel %vm149_vm0, %v19141_v31, 0  ;;  %v19157_v31 = vld [vmem:[#allocation37_spill] sm:$0xff] }
 0x416   :  { %11737 = vmatmul.mubr.msk.bf16.vlgmr.msra.gmra.mxu0 %vm149_vm0, %v14425_v45  ;;  %v4325_v45 = vsel %vm149_vm0, %v1903_v55, 0  ;;  %v19138_v55 = vld [vmem:[#allocation73_spill] sm:$0xff] }
 0x417   :  { %11747 = vmatpush3.bf16.xpose.msra.mxu0 %v4231_v21  ;;  %11748 = vmatprep.mubr.msk.bf16.mxu0 %vm12946_vm1, %v19050_v38  ;;  %v15073_v19 = vpop.permute.xlu0 %1934  ;;  %v15106_v34 = vpop.permute.xlu1 %1980  ;;  %v4654_v21 = vsel %vm149_vm0, %v15043_v37, 0 }
 0x418   :  { %11758 = vmatprep.subr.bf16.mxu0 %v19050_v38  ;;  %19132 = vst [vmem:[#allocation61_spill] sm:$0xff] %v15106_v34  ;;  %v19189_v34 = vld [vmem:[#allocation96_spill] sm:$0xff] }
 0x41b   :  { %11731 = vmatmul.mubr.msk.bf16.vlgmr.msra.gmra.mxu1 %vm149_vm0, %v14449_v48  ;;  %v4278_v48 = vsel %vm149_vm0, %v1901_v7, 0  ;;  %v15097_v24 = vpop.permute.xlu0 %1958  ;;  %v5122_v49 = vpop.xlane.xlu1 %5121 }
 0x41c   :  { %11741 = vmatpush3.bf16.xpose.msra.mxu1 %v4184_v62  ;;  %11742 = vmatprep.mubr.msk.bf16.mxu1 %vm12946_vm1, %v19050_v38  ;;  %19131 = vst [vmem:[#allocation52_spill] sm:$0xff] %v15097_v24  ;;  %v5504_v0 = vsub.f32 %v19136_v60, %v5122_v49  ;;  %v19137_v62 = vld [vmem:[#allocation53_spill] sm:$0xff]  ;;  %v19151_v60 = vld [vmem:[#allocation47_spill] sm:$0xff] }
 0x41d   :  { %11752 = vmatprep.subr.bf16.mxu1 %v19050_v38 }
 0x41e   :  { %11749 = vmatmul.mubr.msk.bf16.vlgmr.msra.gmra.mxu0 %vm149_vm0, %v19118_v52  ;;  %v5632_v52 = vmul.f32 1.442695, %v5504_v0  ;;  %v19152_v0 = vld [vmem:[#allocation77_spill] sm:$0xff] }
 0x41f   :  { %11759 = vmatpush3.bf16.xpose.msra.mxu0 %v4325_v45  ;;  %11760 = vmatprep.mubr.msk.bf16.mxu0 %vm12946_vm1, %v19050_v38  ;;  %v15116_v46 = vpop.permute.xlu0 %1982 }
 0x420   :  { %11770 = vmatprep.subr.bf16.mxu0 %v19050_v38  ;;  %19134 = vst [vmem:[#allocation55_spill] sm:$0xff] %v15116_v46  ;;  %12400 = vpow2.f32 %v5632_v52 }
 0x423   :  { %11743 = vmatmul.mubr.msk.bf16.vlgmr.msra.gmra.mxu1 %vm149_vm0, %v19119_v36  ;;  %v5125_v27 = vpop.xlane.xlu0 %5124 }
 0x424   :  { %11753 = vmatpush3.bf16.xpose.msra.mxu1 %v4278_v48  ;;  %11754 = vmatprep.mubr.msk.bf16.mxu1 %vm12946_vm1, %v19050_v38  ;;  %v5505_v45 = vsub.f32 %v19138_v55, %v5125_v27  ;;  %v19139_v48 = vld [vmem:[#allocation63_spill] sm:$0xff] }
 0x425   :  { %11764 = vmatprep.subr.bf16.mxu1 %v19050_v38  ;;  %v4795_v36 = vsel %vm149_vm0, %v19139_v48, 0  ;;  %v19153_v55 = vld [vmem:[#allocation51_spill] sm:$0xff]  ;;  %v19154_v48 = vld [vmem:[#allocation54_spill] sm:$0xff] }
 0x426   :  { %11761 = vmatmul.mubr.msk.bf16.vlgmr.msra.gmra.mxu0 %vm149_vm0, %v19121_v33  ;;  %v5634_v37 = vmul.f32 1.442695, %v5505_v45 }
 0x427   :  { %11771 = vmatpush3.bf16.xpose.msra.mxu0 %v4419_v13  ;;  %11772 = vmatprep.mubr.msk.bf16.mxu0 %vm12946_vm1, %v19050_v38  ;;  %v19140_v13 = vld [vmem:[#allocation58_spill] sm:$0xff]  ;;  %v5131_v49 = vpop.xlane.xlu0 %5130 }
 0x428   :  { %11782 = vmatprep.subr.bf16.mxu0 %v19050_v38  ;;  %12402 = vpow2.f32 %v5634_v37 }
 0x42b   :  { %v15052_v15 = vpop.f32.mrf.mxu0  ;;  %11755 = vmatmul.mubr.msk.bf16.vlgmr.msra.gmra.mxu1 %vm149_vm0, %v19123_v44  ;;  %v19143_v44 = vld [vmem:[#allocation83_spill] sm:$0xff]  ;;  %v5134_v45 = vpop.xlane.xlu0 %5133 }
 0x42c   :  { %11765 = vmatpush3.bf16.xpose.msra.mxu1 %v4372_v20  ;;  %v5174_v12 = vsel %vm149_vm0, %v15052_v15, -inf  ;;  %11766 = vmatprep.mubr.msk.bf16.mxu1 %vm12946_vm1, %v19050_v38  ;;  %v19142_v20 = vld [vmem:[#allocation60_spill] sm:$0xff] }
 0x42d   :  { %v11534_v29 = vpop.f32.mrf.mxu0  ;;  %5175 = vmax.xlane.f32.xlu0 %v5174_v12  ;;  %11776 = vmatprep.subr.bf16.mxu1 %v19050_v38  ;;  %v4889_v12 = vsel %vm149_vm0, %v19143_v44, 0 }
 0x42e   :  { %11773 = vmatmul.mubr.msk.bf16.vlgmr.msra.gmra.mxu0 %vm149_vm0, %v19125_v14  ;;  %v19144_v29 = vld [vmem:[#allocation2_spill] sm:$0xff] }
 0x42f   :  { %v15067_v59 = vpop.f32.mrf.mxu0  ;;  %v15069_v40 = vpop.f32.mrf.mxu1  ;;  %11783 = vmatpush3.bf16.xpose.msra.mxu0 %v4513_v8  ;;  %11784 = vmatprep.mubr.msk.bf16.mxu0 %vm12946_vm1, %v19050_v38 }
 0x430   :  { %v5177_v4 = vsel %vm149_vm0, %v15067_v59, -inf  ;;  %11794 = vmatprep.subr.bf16.mxu0 %v19050_v38  ;;  %v5180_v61 = vsel %vm149_vm0, %v15069_v40, -inf }
 0x431   :  { %v11535_v11 = vpop.f32.mrf.mxu0  ;;  %5178 = vmax.xlane.f32.xlu0 %v5177_v4  ;;  %v11540_v58 = vpop.f32.mrf.mxu1  ;;  %v19145_v4 = vld [vmem:[#allocation67_spill] sm:$0xff] }
 0x432   :  { %v4842_v11 = vsel %vm149_vm0, %v19145_v4, 0  ;;  %v19160_v4 = vld [vmem:[#allocation43_spill] sm:$0xff] }
 0x433   :  { %v15082_v50 = vpop.f32.mrf.mxu1  ;;  %v15084_v9 = vpop.f32.mrf.mxu0  ;;  %11767 = vmatmul.mubr.msk.bf16.vlgmr.msra.gmra.mxu1 %vm149_vm0, %v19128_v25 }
 0x434   :  { %11777 = vmatpush3.bf16.xpose.msra.mxu1 %v4466_v18  ;;  %11778 = vmatprep.mubr.msk.bf16.mxu1 %vm12946_vm1, %v19050_v38  ;;  %v5183_v42 = vsel %vm149_vm0, %v15082_v50, -inf  ;;  %v5186_v53 = vsel %vm149_vm0, %v15084_v9, -inf }
 0x435   :  { %v11546_v63 = vpop.f32.mrf.mxu0  ;;  %5181 = vmax.xlane.f32.xlu0 %v5180_v61  ;;  %v11541_v17 = vpop.f32.mrf.mxu1  ;;  %11788 = vmatprep.subr.bf16.mxu1 %v19050_v38 }
 0x436   :  { %11785 = vmatmul.mubr.msk.bf16.vlgmr.msra.gmra.mxu0 %vm149_vm0, %v19130_v56  ;;  %v15177_v61 = vpop.eup %12400  ;;  %v5128_v63 = vpop.xlane.xlu1 %5127  ;;  %v19148_v56 = vld [vmem:[#allocation42_spill] sm:$0xff] }
 0x437   :  { %v15099_v32 = vpop.f32.mrf.mxu0  ;;  %11795 = vmatpush3.bf16.xpose.msra.mxu0 %v4607_v30  ;;  %11796 = vmatprep.mubr.msk.bf16.mxu0 %vm12946_vm1, %v19050_v38  ;;  %v4983_v30 = vsel %vm149_vm0, %v19147_v1, 0 }
 0x438   :  { %11806 = vmatprep.subr.bf16.mxu0 %v19050_v38  ;;  %v5189_v57 = vsel %vm149_vm0, %v15099_v32, -inf }
 0x439   :  { %v11547_v6 = vpop.f32.mrf.mxu0  ;;  %5184 = vmax.xlane.f32.xlu0 %v5183_v42  ;;  %v19149_v42 = vld [vmem:[#allocation75_spill] sm:$0xff] }
 0x43a   :  { %v5506_v6 = vsub.f32 %v19149_v42, %v5128_v63 }
 0x43b   :  { %11779 = vmatmul.mubr.msk.bf16.vlgmr.msra.gmra.mxu1 %vm149_vm0, %v19133_v3 }
 0x43c   :  { %11789 = vmatpush3.bf16.xpose.msra.mxu1 %v4560_v16  ;;  %11790 = vmatprep.mubr.msk.bf16.mxu1 %vm12946_vm1, %v19050_v38  ;;  %v5888_v16 = vsel %vm149_vm0, %v15177_v61, 0.0  ;;  %v5636_v27 = vmul.f32 1.442695, %v5506_v6 }
 0x43d   :  { %5187 = vmax.xlane.f32.xlu0 %v5186_v53  ;;  %11800 = vmatprep.subr.bf16.mxu1 %v19050_v38  ;;  %v15192_v53 = vpop.eup %12402 }
 0x43e   :  { %11797 = vmatmul.mubr.msk.bf16.vlgmr.msra.gmra.mxu0 %vm149_vm0, %v19135_v23  ;;  %12404 = vpow2.f32 %v5636_v27 }
 0x43f   :  { %11807 = vmatpush3.bf16.xpose.msra.mxu0 %v4701_v10  ;;  %11808 = vmatprep.mubr.msk.bf16.mxu0 %vm12946_vm1, %v19050_v38  ;;  %v19150_v10 = vld [vmem:[#allocation87_spill] sm:$0xff] }
 0x440   :  { %11818 = vmatprep.subr.bf16.mxu0 %v19050_v38  ;;  %v4936_v23 = vsel %vm149_vm0, %v19150_v10, 0 }
 0x441   :  { %5190 = vmax.xlane.f32.xlu0 %v5189_v57  ;;  %v5507_v57 = vsub.f32 %v19152_v0, %v5131_v49  ;;  %v19163_v0 = vld [vmem:[#allocation84_spill] sm:$0xff] }
 0x442   :  { %v15128_v51 = vpop.f32.mrf.mxu0 }
 0x443   :  { %11791 = vmatmul.mubr.msk.bf16.vlgmr.msra.gmra.mxu1 %vm149_vm0, %v19137_v62  ;;  %v5198_v18 = vsel %vm149_vm0, %v15128_v51, -inf  ;;  %v5077_v62 = vsel %vm149_vm0, %v15073_v19, 0  ;;  %v5638_v52 = vmul.f32 1.442695, %v5507_v57  ;;  %v19155_v19 = vld [vmem:[#allocation79_spill] sm:$0xff] }
 0x444   :  { %11801 = vmatpush3.bf16.xpose.msra.mxu1 %v4654_v21  ;;  %v11558_v7 = vpop.f32.mrf.mxu0  ;;  %11802 = vmatprep.mubr.msk.bf16.mxu1 %vm12946_vm1, %v19050_v38  ;;  %v5891_v21 = vsel %vm149_vm0, %v15192_v53, 0.0 }
 0x445   :  { %11812 = vmatprep.subr.bf16.mxu1 %v19050_v38  ;;  %v5030_v7 = vsel %vm149_vm0, %v15056_v26, 0  ;;  %12406 = vpow2.f32 %v5638_v52 }
 0x446   :  { %v15140_v47 = vpop.f32.mrf.mxu0  ;;  %11809 = vmatmul.mubr.msk.bf16.vlgmr.msra.gmra.mxu0 %vm149_vm0, %v19140_v13  ;;  %v5137_v13 = vpop.xlane.xlu0 %5136 }
 0x447   :  { %11819 = vmatpush3.bf16.xpose.msra.mxu0 %v4795_v36  ;;  %11820 = vmatprep.mubr.msk.bf16.mxu0 %vm12946_vm1, %v19050_v38  ;;  %v5201_v3 = vsel %vm149_vm0, %v15140_v47, -inf  ;;  %v5508_v36 = vsub.f32 %v19155_v19, %v5134_v45 }
 0x448   :  { %v11559_v33 = vpop.f32.mrf.mxu0  ;;  %11830 = vmatprep.subr.bf16.mxu0 %v19050_v38 }
 0x449   :  { %v19156_v33 = vld [vmem:[#allocation56_spill] sm:$0xff]  ;;  %v5640_v26 = vmul.f32 1.442695, %v5508_v36 }
 0x44a   :  { %v5143_v49 = vpop.xlane.xlu0 %5142 }
 0x44b   :  { %11803 = vmatmul.mubr.msk.bf16.vlgmr.msra.gmra.mxu1 %vm149_vm0, %v19142_v20  ;;  %12408 = vpow2.f32 %v5640_v26  ;;  %v5511_v57 = vsub.f32 %v19163_v0, %v5143_v49 }
 0x44c   :  { %11813 = vmatpush3.bf16.xpose.msra.mxu1 %v4748_v28  ;;  %11814 = vmatprep.mubr.msk.bf16.mxu1 %vm12946_vm1, %v19050_v38  ;;  %v19158_v28 = vld [vmem:[#allocation80_spill] sm:$0xff] }
 0x44d   :  { %11824 = vmatprep.subr.bf16.mxu1 %v19050_v38  ;;  %v5509_v20 = vsub.f32 %v19158_v28, %v5137_v13 }
 0x44e   :  { %11821 = vmatmul.mubr.msk.bf16.vlgmr.msra.gmra.mxu0 %vm149_vm0, %v19144_v29 }
 0x44f   :  { %v15158_v41 = vpop.f32.mrf.mxu1  ;;  %11831 = vmatpush3.bf16.xpose.msra.mxu0 %v4889_v12  ;;  %11832 = vmatprep.mubr.msk.bf16.mxu0 %vm12946_vm1, %v19050_v38 }
 0x450   :  { %v5192_v8 = vsel %vm149_vm0, %v15158_v41, -inf  ;;  %11842 = vmatprep.subr.bf16.mxu0 %v19050_v38 }
 0x451   :  { %5193 = vmax.xlane.f32.xlu1 %v5192_v8  ;;  %v11552_v14 = vpop.f32.mrf.mxu1  ;;  %v19159_v8 = vld [vmem:[#allocation62_spill] sm:$0xff] }
 0x452   :  { %v5642_v14 = vmul.f32 1.442695, %v5509_v20 }
 0x453   :  { %v15167_v58 = vpop.f32.mrf.mxu1  ;;  %11815 = vmatmul.mubr.msk.bf16.vlgmr.msra.gmra.mxu1 %vm149_vm0, %v19146_v2 }
 0x454   :  { %11825 = vmatpush3.bf16.xpose.msra.mxu1 %v4842_v11  ;;  %v5195_v25 = vsel %vm149_vm0, %v15167_v58, -inf  ;;  %11826 = vmatprep.mubr.msk.bf16.mxu1 %vm12946_vm1, %v19050_v38  ;;  %12410 = vpow2.f32 %v5642_v14 }
 0x455   :  { %5199 = vmax.xlane.f32.xlu1 %v5198_v18  ;;  %5196 = vmax.xlane.f32.xlu0 %v5195_v25  ;;  %v11553_v17 = vpop.f32.mrf.mxu1  ;;  %v15239_v18 = vpop.eup %12404 }
 0x456   :  { %11833 = vmatmul.mubr.msk.bf16.vlgmr.msra.gmra.mxu0 %vm149_vm0, %v19148_v56  ;;  %11836 = vmatprep.subr.bf16.mxu1 %v19050_v38  ;;  %v5140_v25 = vpop.xlane.xlu1 %5139  ;;  %v5894_v6 = vsel %vm149_vm0, %v15239_v18, 0.0 }
 0x457   :  { %11843 = vmatpush3.bf16.xpose.msra.mxu0 %v4983_v30  ;;  %11844 = vmatprep.mubr.msk.bf16.mxu0 %vm12946_vm1, %v19050_v38  ;;  %v19161_v30 = vld [vmem:[#allocation82_spill] sm:$0xff] }
 0x458   :  { %11854 = vmatprep.subr.bf16.mxu0 %v19050_v38  ;;  %v5510_v56 = vsub.f32 %v19161_v30, %v5140_v25  ;;  %v5149_v30 = vpop.xlane.xlu0 %5148 }
 0x459   :  { %5889 = vadd.xlane.f32.xlu1 %v5888_v16  ;;  %5202 = vmax.xlane.f32.xlu0 %v5201_v3  ;;  %v15251_v3 = vpop.eup %12406 }
 0x45a   :  { %v5644_v27 = vmul.f32 1.442695, %v5510_v56  ;;  %v5146_v26 = vpop.xlane.xlu1 %5145 }
 0x45b   :  { %11827 = vmatmul.mubr.msk.bf16.vlgmr.msra.gmra.mxu1 %vm149_vm0, %v19151_v60 }
 0x45c   :  { %11837 = vmatpush3.bf16.xpose.msra.mxu1 %v4936_v23  ;;  %11838 = vmatprep.mubr.msk.bf16.mxu1 %vm12946_vm1, %v19050_v38  ;;  %12412 = vpow2.f32 %v5644_v27 }
 0x45d   :  { %5892 = vadd.xlane.f32.xlu0 %v5891_v21  ;;  %11848 = vmatprep.subr.bf16.mxu1 %v19050_v38 }
 0x45e   :  { %11845 = vmatmul.mubr.msk.bf16.vlgmr.msra.gmra.mxu0 %vm149_vm0, %v19153_v55  ;;  %v5897_v55 = vsel %vm149_vm0, %v15251_v3, 0.0 }
 0x45f   :  { %11855 = vmatpush3.bf16.xpose.msra.mxu0 %v5077_v62  ;;  %11856 = vmatprep.mubr.msk.bf16.mxu0 %vm12946_vm1, %v19050_v38 }
 0x460   :  { %11866 = vmatprep.subr.bf16.mxu0 %v19050_v38 }
 0x463   :  { %11839 = vmatmul.mubr.msk.bf16.vlgmr.msra.gmra.mxu1 %vm149_vm0, %v19154_v48  ;;  %v5646_v48 = vmul.f32 1.442695, %v5511_v57 }
 0x464   :  { %11849 = vmatpush3.bf16.xpose.msra.mxu1 %v5030_v7  ;;  %11850 = vmatprep.mubr.msk.bf16.mxu1 %vm12946_vm1, %v19050_v38 }
 0x465   :  { %11860 = vmatprep.subr.bf16.mxu1 %v19050_v38  ;;  %12414 = vpow2.f32 %v5646_v48 }
 0x466   :  { %v15219_v37 = vpop.f32.mrf.mxu0  ;;  %11857 = vmatmul.mubr.msk.bf16.vlgmr.msra.gmra.mxu0 %vm149_vm0, %v19156_v33  ;;  %v15270_v33 = vpop.eup %12408 }
 0x467   :  { %11867 = vmatpush3.bf16.msra.mxu0 %v19157_v31  ;;  %11868 = vmatprep.mubr.msk.bf16.mxu0 %vm12946_vm1, %v19050_v38  ;;  %v5210_v62 = vsel %vm149_vm0, %v15219_v37, -inf }
 0x468   :  { %v11570_v44 = vpop.f32.mrf.mxu0  ;;  %11878 = vmatprep.subr.bf16.mxu0 %v19050_v38 }
 0x46a   :  { %v15228_v12 = vpop.f32.mrf.mxu0 }
 0x46b   :  { %v15230_v29 = vpop.f32.mrf.mxu1  ;;  %11851 = vmatmul.mubr.msk.bf16.vlgmr.msra.gmra.mxu1 %vm149_vm0, %v19159_v8  ;;  %v5213_v36 = vsel %vm149_vm0, %v15228_v12, -inf  ;;  %v19168_v8 = vld [vmem:[#allocation86_spill] sm:$0xff] }
 0x46c   :  { %11861 = vmatpush3.bf16.msra.mxu1 %v19160_v4  ;;  %v11571_v11 = vpop.f32.mrf.mxu0  ;;  %v5204_v2 = vsel %vm149_vm0, %v15230_v29, -inf  ;;  %11862 = vmatprep.mubr.msk.bf16.mxu1 %vm12946_vm1, %v19050_v38  ;;  %v5512_v14 = vsub.f32 %v19168_v8, %v5146_v26 }
 0x46d   :  { %5205 = vmax.xlane.f32.xlu1 %v5204_v2  ;;  %v11564_v63 = vpop.f32.mrf.mxu1  ;;  %11872 = vmatprep.subr.bf16.mxu1 %v19050_v38  ;;  %v5900_v2 = vsel %vm149_vm0, %v15270_v33, 0.0 }
 0x46e   :  { %v15242_v17 = vpop.f32.mrf.mxu0  ;;  %v15281_v63 = vpop.eup %12410 }
 0x46f   :  { %v15244_v1 = vpop.f32.mrf.mxu1  ;;  %v5222_v57 = vsel %vm149_vm0, %v15242_v17, -inf  ;;  %v5903_v27 = vsel %vm149_vm0, %v15281_v63, 0.0  ;;  %v15300_v26 = vpop.eup %12412 }
 0x470   :  { %v11582_v42 = vpop.f32.mrf.mxu0  ;;  %v5207_v16 = vsel %vm149_vm0, %v15244_v1, -inf }
 0x471   :  { %5895 = vadd.xlane.f32.xlu1 %v5894_v6  ;;  %5208 = vmax.xlane.f32.xlu0 %v5207_v16  ;;  %v11565_v10 = vpop.f32.mrf.mxu1  ;;  %v19171_v16 = vld [vmem:[#allocation88_spill] sm:$0xff] }
 0x472   :  { %v15253_v23 = vpop.f32.mrf.mxu0  ;;  %v5513_v49 = vsub.f32 %v19171_v16, %v5149_v30  ;;  %v5648_v10 = vmul.f32 1.442695, %v5512_v14  ;;  %v5906_v30 = vsel %vm149_vm0, %v15300_v26, 0.0  ;;  %v15311_v16 = vpop.eup %12414 }
 0x473   :  { %19162 = vst [vmem:[#allocation70_spill] sm:$0xff] %v15253_v23  ;;  %v15255_v60 = vpop.f32.mrf.mxu1 }
 0x474   :  { %v11583_v21 = vpop.f32.mrf.mxu0  ;;  %v5216_v13 = vsel %vm149_vm0, %v15255_v60, -inf  ;;  %v5650_v48 = vmul.f32 1.442695, %v5513_v49  ;;  %12416 = vpow2.f32 %v5648_v10 }
 0x475   :  { %5211 = vmax.xlane.f32.xlu1 %v5210_v62  ;;  %5898 = vadd.xlane.f32.xlu0 %v5897_v55  ;;  %v11576_v45 = vpop.f32.mrf.mxu1  ;;  %v5152_v55 = vpop.xlane.xlu0 %5151 }
 0x476   :  { %v15262_v52 = vpop.f32.mrf.mxu0  ;;  %12418 = vpow2.f32 %v5650_v48 }
 0x477   :  { %19164 = vst [vmem:[#allocation59_spill] sm:$0xff] %v15262_v52  ;;  %v15264_v7 = vpop.f32.mrf.mxu1 }
 0x478   :  { %19165 = vst [vmem:[#allocation81_spill] sm:$0xff] %v15264_v7  ;;  %v11594_v19 = vpop.f32.mrf.mxu0  ;;  %v5219_v25 = vsel %vm149_vm0, %v15264_v7, -inf }
 0x479   :  { %5214 = vmax.xlane.f32.xlu0 %v5213_v36  ;;  %5217 = vmax.xlane.f32.xlu1 %v5216_v13  ;;  %v11577_v28 = vpop.f32.mrf.mxu1  ;;  %v5225_v36 = vsel %vm149_vm0, %v15253_v23, -inf  ;;  %v5155_v49 = vpop.xlane.xlu0 %5154 }
 0x47a   :  { %v15272_v20 = vpop.f32.mrf.mxu0 }
 0x47b   :  { %19166 = vst [vmem:[#allocation38_spill] sm:$0xff] %v15272_v20  ;;  %v15274_v44 = vpop.f32.mrf.mxu1 }
 0x47c   :  { %19167 = vst [vmem:[#allocation91_spill] sm:$0xff] %v15274_v44  ;;  %v11595_v11 = vpop.f32.mrf.mxu0  ;;  %v5228_v13 = vsel %vm149_vm0, %v15274_v44, -inf }
 0x47d   :  { %5901 = vadd.xlane.f32.xlu1 %v5900_v2  ;;  %5220 = vmax.xlane.f32.xlu0 %v5219_v25  ;;  %v11588_v56 = vpop.f32.mrf.mxu1  ;;  %v19176_v11 = vld [vmem:[#allocation90_spill] sm:$0xff] }
 0x47e   :  { %v15283_v42 = vpop.f32.mrf.mxu0  ;;  %v5514_v2 = vsub.f32 %v19176_v11, %v5152_v55  ;;  %v5158_v11 = vpop.xlane.xlu0 %5157 }
 0x47f   :  { %19169 = vst [vmem:[#allocation40_spill] sm:$0xff] %v15283_v42  ;;  %v15285_v6 = vpop.f32.mrf.mxu1 }
 0x480   :  { %19170 = vst [vmem:[#allocation99_spill] sm:$0xff] %v15285_v6  ;;  %v11606_v0 = vpop.f32.mrf.mxu0  ;;  %v5231_v56 = vsel %vm149_vm0, %v15285_v6, -inf }
 0x481   :  { %5223 = vmax.xlane.f32.xlu1 %v5222_v57  ;;  %5904 = vadd.xlane.f32.xlu0 %v5903_v27  ;;  %v11589_v21 = vpop.f32.mrf.mxu1  ;;  %v5652_v27 = vmul.f32 1.442695, %v5514_v2 }
 0x482   :  { %v15292_v62 = vpop.f32.mrf.mxu0  ;;  %v19179_v21 = vld [vmem:[#allocation92_spill] sm:$0xff]  ;;  %v5161_v46 = vpop.xlane.xlu0 %5160 }
 0x483   :  { %19172 = vst [vmem:[#allocation44_spill] sm:$0xff] %v15292_v62  ;;  %v15294_v45 = vpop.f32.mrf.mxu1  ;;  %v5515_v55 = vsub.f32 %v19179_v21, %v5155_v49  ;;  %12420 = vpow2.f32 %v5652_v27 }
 0x484   :  { %19173 = vst [vmem:[#allocation46_spill] sm:$0xff] %v15294_v45  ;;  %v11607_v19 = vpop.f32.mrf.mxu0  ;;  %v5240_v49 = vsel %vm149_vm0, %v15294_v45, -inf }
 0x485   :  { %5226 = vmax.xlane.f32.xlu0 %v5225_v36  ;;  %5229 = vmax.xlane.f32.xlu1 %v5228_v13  ;;  %v11600_v28 = vpop.f32.mrf.mxu1  ;;  %v5234_v19 = vsel %vm149_vm0, %v15262_v52, -inf  ;;  %v5909_v36 = vsel %vm149_vm0, %v15311_v16, 0.0 }
 0x486   :  { %v15302_v8 = vpop.f32.mrf.mxu0 }
 0x487   :  { %19174 = vst [vmem:[#allocation50_spill] sm:$0xff] %v15302_v8  ;;  %v15304_v14 = vpop.f32.mrf.mxu1 }
 0x488   :  { %19175 = vst [vmem:[#allocation71_spill] sm:$0xff] %v15304_v14  ;;  %v11618_v25 = vpop.f32.mrf.mxu0 }
 0x489   :  { %5907 = vadd.xlane.f32.xlu1 %v5906_v30  ;;  %5232 = vmax.xlane.f32.xlu0 %v5231_v56  ;;  %v11601_v10 = vpop.f32.mrf.mxu1  ;;  %v5654_v30 = vmul.f32 1.442695, %v5515_v55  ;;  %v5237_v56 = vsel %vm149_vm0, %v15272_v20, -inf }
 0x48a   :  { %v15313_v0 = vpop.f32.mrf.mxu0  ;;  %v15330_v10 = vpop.eup %12416 }
 0x48b   :  { %19177 = vst [vmem:[#allocation53_spill] sm:$0xff] %v15313_v0  ;;  %v15315_v57 = vpop.f32.mrf.mxu1  ;;  %19182 = vst [vmem:[#allocation72_spill] sm:$0xff] %v15330_v10  ;;  %12422 = vpow2.f32 %v5654_v30  ;;  %v15341_v4 = vpop.eup %12418 }
 0x48c   :  { %19178 = vst [vmem:[#allocation73_spill] sm:$0xff] %v15315_v57  ;;  %v11619_v48 = vpop.f32.mrf.mxu0  ;;  %19186 = vst [vmem:[#allocation2_spill] sm:$0xff] %v15341_v4  ;;  %v5915_v22 = vsel %vm149_vm0, %v15341_v4, 0.0 }
 0x48d   :  { %5235 = vmax.xlane.f32.xlu1 %v5234_v19  ;;  %5910 = vadd.xlane.f32.xlu0 %v5909_v36  ;;  %v11612_v13 = vpop.f32.mrf.mxu1  ;;  %v19185_v36 = vld [vmem:[#allocation94_spill] sm:$0xff] }
 0x48e   :  { %v15322_v28 = vpop.f32.mrf.mxu0  ;;  %v5516_v27 = vsub.f32 %v19185_v36, %v5158_v11  ;;  %v5912_v13 = vsel %vm149_vm0, %v15330_v10, 0.0  ;;  %v5517_v11 = vsub.f32 %v19189_v34, %v5161_v46  ;;  %v5249_v34 = vsel %vm149_vm0, %v15292_v62, -inf }
 0x48f   :  { %19180 = vst [vmem:[#allocation63_spill] sm:$0xff] %v15322_v28  ;;  %v15324_v25 = vpop.f32.mrf.mxu1  ;;  %v5252_v46 = vsel %vm149_vm0, %v15315_v57, -inf  ;;  %v5167_v57 = vpop.xlane.xlu0 %5166 }
 0x490   :  { %19181 = vst [vmem:[#allocation58_spill] sm:$0xff] %v15324_v25  ;;  %v11630_v2 = vpop.f32.mrf.mxu0  ;;  %v5656_v30 = vmul.f32 1.442695, %v5516_v27  ;;  %v15360_v27 = vpop.eup %12420  ;;  %v5255_v39 = vsel %vm149_vm0, %v15324_v25, -inf }
 0x491   :  { %5238 = vmax.xlane.f32.xlu0 %v5237_v56  ;;  %5241 = vmax.xlane.f32.xlu1 %v5240_v49  ;;  %v11613_v21 = vpop.f32.mrf.mxu1  ;;  %v5243_v2 = vsel %vm149_vm0, %v15304_v14, -inf  ;;  %19192 = vst [vmem:[#allocation75_spill] sm:$0xff] %v15360_v27 }
 0x492   :  { %v15332_v48 = vpop.f32.mrf.mxu0  ;;  %12424 = vpow2.f32 %v5656_v30 }
 0x493   :  { %19183 = vst [vmem:[#allocation60_spill] sm:$0xff] %v15332_v48  ;;  %v15334_v19 = vpop.f32.mrf.mxu1 }
 0x494   :  { %19184 = vst [vmem:[#allocation83_spill] sm:$0xff] %v15334_v19  ;;  %v11631_v55 = vpop.f32.mrf.mxu0 }
 0x495   :  { %5913 = vadd.xlane.f32.xlu1 %v5912_v13  ;;  %5244 = vmax.xlane.f32.xlu0 %v5243_v2  ;;  %v11624_v56 = vpop.f32.mrf.mxu1  ;;  %v5246_v55 = vsel %vm149_vm0, %v15283_v42, -inf }
 0x496   :  { %v15343_v49 = vpop.f32.mrf.mxu0  ;;  %v5658_v56 = vmul.f32 1.442695, %v5517_v11  ;;  %v5918_v11 = vsel %vm149_vm0, %v15360_v27, 0.0 }
 0x497   :  { %19187 = vst [vmem:[#allocation67_spill] sm:$0xff] %v15343_v49  ;;  %v15345_v21 = vpop.f32.mrf.mxu1 }
 0x498   :  { %19188 = vst [vmem:[#allocation41_spill] sm:$0xff] %v15345_v21  ;;  %v11642_v36 = vpop.f32.mrf.mxu0  ;;  %12426 = vpow2.f32 %v5658_v56  ;;  %v15371_v31 = vpop.eup %12422 }
 0x499   :  { %5247 = vmax.xlane.f32.xlu1 %v5246_v55  ;;  %5916 = vadd.xlane.f32.xlu0 %v5915_v22  ;;  %v11625_v43 = vpop.f32.mrf.mxu1  ;;  %v5164_v36 = vpop.xlane.xlu1 %5163  ;;  %19196 = vst [vmem:[#allocation77_spill] sm:$0xff] %v15371_v31  ;;  %v5921_v25 = vsel %vm149_vm0, %v15371_v31, 0.0 }
 0x49a   :  { %v15352_v13 = vpop.f32.mrf.mxu0  ;;  %v5518_v30 = vsub.f32 %v19195_v35, %v5164_v36  ;;  %v19199_v35 = vld [vmem:[#allocation98_spill] sm:$0xff] }
 0x49b   :  { %19190 = vst [vmem:[#allocation100_spill] sm:$0xff] %v15352_v13  ;;  %v15354_v2 = vpop.f32.mrf.mxu1  ;;  %v5519_v56 = vsub.f32 %v19199_v35, %v5167_v57  ;;  %v5261_v57 = vsel %vm149_vm0, %v15313_v0, -inf  ;;  %v15410_v0 = vpop.xlane.xlu0 %5169 }
 0x49c   :  { %19191 = vst [vmem:[#allocation42_spill] sm:$0xff] %v15354_v2  ;;  %v11643_v24 = vpop.f32.mrf.mxu0  ;;  %v5660_v62 = vmul.f32 1.442695, %v5518_v30  ;;  %v5264_v30 = vsel %vm149_vm0, %v15334_v19, -inf }
 0x49d   :  { %5250 = vmax.xlane.f32.xlu0 %v5249_v34  ;;  %5253 = vmax.xlane.f32.xlu1 %v5252_v46  ;;  %v11636_v22 = vpop.f32.mrf.mxu1 }
 0x49e   :  { %v15362_v43 = vpop.f32.mrf.mxu0  ;;  %12428 = vpow2.f32 %v5660_v62 }
 0x49f   :  { %19193 = vst [vmem:[#allocation87_spill] sm:$0xff] %v15362_v43  ;;  %v15364_v55 = vpop.f32.mrf.mxu1  ;;  %v15390_v35 = vpop.eup %12424 }
 0x4a0   :  { %19194 = vst [vmem:[#allocation47_spill] sm:$0xff] %v15364_v55  ;;  %v11654_v24 = vpop.f32.mrf.mxu0  ;;  %19202 = vst [vmem:[#allocation80_spill] sm:$0xff] %v15390_v35  ;;  %v5924_v62 = vsel %vm149_vm0, %v15390_v35, 0.0 }
 0x4a1   :  { %5919 = vadd.xlane.f32.xlu1 %v5918_v11  ;;  %5256 = vmax.xlane.f32.xlu0 %v5255_v39  ;;  %v11637_v34 = vpop.f32.mrf.mxu1  ;;  %v5258_v24 = vsel %vm149_vm0, %v15302_v8, -inf }
 0x4a2   :  { %v15373_v46 = vpop.f32.mrf.mxu0  ;;  %v5662_v34 = vmul.f32 1.442695, %v5519_v56 }
 0x4a3   :  { %19197 = vst [vmem:[#allocation51_spill] sm:$0xff] %v15373_v46  ;;  %v15375_v22 = vpop.f32.mrf.mxu1 }
 0x4a4   :  { %19198 = vst [vmem:[#allocation54_spill] sm:$0xff] %v15375_v22  ;;  %v11655_v36 = vpop.f32.mrf.mxu0  ;;  %12430 = vpow2.f32 %v5662_v34  ;;  %v5270_v34 = vsel %vm149_vm0, %v15322_v28, -inf }
 0x4a5   :  { %5259 = vmax.xlane.f32.xlu1 %v5258_v24  ;;  %5922 = vadd.xlane.f32.xlu0 %v5921_v25  ;;  %v11648_v42 = vpop.f32.mrf.mxu1  ;;  %v15400_v56 = vpop.eup %12426 }
 0x4a6   :  { %v15382_v11 = vpop.f32.mrf.mxu0  ;;  %19205 = vst [vmem:[#allocation84_spill] sm:$0xff] %v15400_v56 }
 0x4a7   :  { %19200 = vst [vmem:[#allocation79_spill] sm:$0xff] %v15382_v11  ;;  %v15384_v39 = vpop.f32.mrf.mxu1 }
 0x4a8   :  { %19201 = vst [vmem:[#allocation56_spill] sm:$0xff] %v15384_v39  ;;  %v11666_v27 = vpop.f32.mrf.mxu0 }
 0x4a9   :  { %5262 = vmax.xlane.f32.xlu0 %v5261_v57  ;;  %5265 = vmax.xlane.f32.xlu1 %v5264_v30  ;;  %v11649_v36 = vpop.f32.mrf.mxu1  ;;  %v5267_v27 = vsel %vm149_vm0, %v15345_v21, -inf }
 0x4aa   :  { %v15392_v25 = vpop.f32.mrf.mxu0 }
 0x4ab   :  { %19203 = vst [vmem:[#allocation62_spill] sm:$0xff] %v15392_v25  ;;  %v15394_v42 = vpop.f32.mrf.mxu1  ;;  %v15420_v28 = vpop.eup %12428 }
 0x4ac   :  { %19204 = vst [vmem:[#allocation82_spill] sm:$0xff] %v15394_v42  ;;  %v11667_v24 = vpop.f32.mrf.mxu0  ;;  %19210 = vst [vmem:[#allocation94_spill] sm:$0xff] %v15420_v28 }
 0x4ad   :  { %5925 = vadd.xlane.f32.xlu1 %v5924_v62  ;;  %5268 = vmax.xlane.f32.xlu0 %v5267_v27  ;;  %v11660_v19 = vpop.f32.mrf.mxu1  ;;  %v5927_v24 = vsel %vm149_vm0, %v15400_v56, 0.0  ;;  %v5273_v27 = vsel %vm149_vm0, %v15332_v48, -inf  ;;  %v5279_v48 = vsel %vm149_vm0, %v15364_v55, -inf }
 0x4ae   :  { %v15402_v57 = vpop.f32.mrf.mxu0 }
 0x4af   :  { %19206 = vst [vmem:[#allocation86_spill] sm:$0xff] %v15402_v57  ;;  %v15404_v30 = vpop.f32.mrf.mxu1 }
 0x4b0   :  { %19207 = vst [vmem:[#allocation88_spill] sm:$0xff] %v15404_v30  ;;  %v11678_v36 = vpop.f32.mrf.mxu0 }
 0x4b1   :  { %5271 = vmax.xlane.f32.xlu1 %v5270_v34  ;;  %5928 = vadd.xlane.f32.xlu0 %v5927_v24  ;;  %v11661_v21 = vpop.f32.mrf.mxu1  ;;  %v5276_v36 = vsel %vm149_vm0, %v15354_v2, -inf  ;;  %v15424_v34 = vpop.xlane.xlu0 %5172 }
 0x4b2   :  { %v15412_v35 = vpop.f32.mrf.mxu0  ;;  %v15432_v31 = vpop.eup %12430 }
 0x4b3   :  { %19208 = vst [vmem:[#allocation90_spill] sm:$0xff] %v15412_v35  ;;  %v15414_v62 = vpop.f32.mrf.mxu1  ;;  %19213 = vst [vmem:[#allocation98_spill] sm:$0xff] %v15432_v31 }
 0x4b4   :  { %19209 = vst [vmem:[#allocation92_spill] sm:$0xff] %v15414_v62  ;;  %v11679_v19 = vpop.f32.mrf.mxu0 }
 0x4b5   :  { %5274 = vmax.xlane.f32.xlu0 %v5273_v27  ;;  %5277 = vmax.xlane.f32.xlu1 %v5276_v36  ;;  %v11672_v56 = vpop.f32.mrf.mxu1  ;;  %v5930_v19 = vsel %vm149_vm0, %v15420_v28, 0.0  ;;  %v5933_v28 = vsel %vm149_vm0, %v15432_v31, 0.0 }
 0x4b6   :  { %v15422_v8 = vpop.f32.mrf.mxu0  ;;  %v15436_v56 = vpop.xlane.xlu0 %5175 }
 0x4b7   :  { %19211 = vst [vmem:[#allocation96_spill] sm:$0xff] %v15422_v8  ;;  %v15426_v21 = vpop.f32.mrf.mxu1 }
 0x4b8   :  { %19212 = vst [vmem:[#allocation97_spill] sm:$0xff] %v15426_v21  ;;  %v11690_v24 = vpop.f32.mrf.mxu0 }
 0x4b9   :  { %5931 = vadd.xlane.f32.xlu1 %v5930_v19  ;;  %5280 = vmax.xlane.f32.xlu0 %v5279_v48  ;;  %v11673_v27 = vpop.f32.mrf.mxu1  ;;  %v5282_v24 = vsel %vm149_vm0, %v15343_v49, -inf }
 0x4ba   :  { %v15434_v36 = vpop.f32.mrf.mxu0  ;;  %v5285_v27 = vsel %vm149_vm0, %v15352_v13, -inf  ;;  %v15452_v20 = vpop.xlane.xlu0 %5178 }
 0x4bb   :  { %19214 = vst [vmem:[#allocation104_spill] sm:$0xff] %v15434_v36  ;;  %v15438_v2 = vpop.f32.mrf.mxu1 }
 0x4bc   :  { %19215 = vst [vmem:[#allocation105_spill] sm:$0xff] %v15438_v2  ;;  %v11691_v14 = vpop.f32.mrf.mxu0 }
 0x4bd   :  { %5283 = vmax.xlane.f32.xlu1 %v5282_v24  ;;  %5934 = vadd.xlane.f32.xlu0 %v5933_v28  ;;  %v11684_v55 = vpop.f32.mrf.mxu1  ;;  %v5288_v14 = vsel %vm149_vm0, %v15375_v22, -inf  ;;  %v5294_v24 = vsel %vm149_vm0, %v15362_v43, -inf }
 0x4be   :  { %v15444_v45 = vpop.f32.mrf.mxu0  ;;  %v15464_v52 = vpop.xlane.xlu0 %5181 }
 0x4bf   :  { %19216 = vst [vmem:[#allocation106_spill] sm:$0xff] %v15444_v45  ;;  %v15446_v48 = vpop.f32.mrf.mxu1 }
 0x4c0   :  { %19217 = vst [vmem:[#allocation107_spill] sm:$0xff] %v15446_v48  ;;  %v11702_v19 = vpop.f32.mrf.mxu0 }
 0x4c1   :  { %5286 = vmax.xlane.f32.xlu0 %v5285_v27  ;;  %5289 = vmax.xlane.f32.xlu1 %v5288_v14  ;;  %v11685_v49 = vpop.f32.mrf.mxu1  ;;  %v5291_v19 = vsel %vm149_vm0, %v15384_v39, -inf  ;;  %v5297_v14 = vsel %vm149_vm0, %v15373_v46, -inf }
 0x4c2   :  { %v15454_v31 = vpop.f32.mrf.mxu0  ;;  %v15480_v6 = vpop.xlane.xlu0 %5184 }
 0x4c3   :  { %19218 = vst [vmem:[#allocation108_spill] sm:$0xff] %v15454_v31  ;;  %v15456_v28 = vpop.f32.mrf.mxu1 }
 0x4c4   :  { %19219 = vst [vmem:[#allocation109_spill] sm:$0xff] %v15456_v28  ;;  %v11703_v55 = vpop.f32.mrf.mxu0 }
 0x4c5   :  { %5295 = vmax.xlane.f32.xlu1 %v5294_v24  ;;  %5292 = vmax.xlane.f32.xlu0 %v5291_v19  ;;  %v11696_v13 = vpop.f32.mrf.mxu1  ;;  %v5300_v55 = vsel %vm149_vm0, %v15394_v42, -inf  ;;  %v5306_v19 = vsel %vm149_vm0, %v15382_v11, -inf }
 0x4c6   :  { %v15462_v22 = vpop.f32.mrf.mxu0  ;;  %v15492_v23 = vpop.xlane.xlu0 %5187 }
 0x4c7   :  { %19220 = vst [vmem:[#allocation110_spill] sm:$0xff] %v15462_v22  ;;  %v15466_v27 = vpop.f32.mrf.mxu1 }
 0x4c8   :  { %19221 = vst [vmem:[#allocation111_spill] sm:$0xff] %v15466_v27  ;;  %v11714_v49 = vpop.f32.mrf.mxu0 }
 0x4c9   :  { %5298 = vmax.xlane.f32.xlu0 %v5297_v14  ;;  %5301 = vmax.xlane.f32.xlu1 %v5300_v55  ;;  %v11697_v43 = vpop.f32.mrf.mxu1  ;;  %v5303_v49 = vsel %vm149_vm0, %v15404_v30, -inf  ;;  %v5309_v55 = vsel %vm149_vm0, %v15392_v25, -inf }
 0x4ca   :  { %v15472_v39 = vpop.f32.mrf.mxu0  ;;  %v15510_v4 = vpop.xlane.xlu0 %5190 }
 0x4cb   :  { %19222 = vst [vmem:[#allocation112_spill] sm:$0xff] %v15472_v39  ;;  %v15474_v24 = vpop.f32.mrf.mxu1 }
 0x4cc   :  { %19223 = vst [vmem:[#allocation113_spill] sm:$0xff] %v15474_v24  ;;  %v11715_v13 = vpop.f32.mrf.mxu0 }
 0x4cd   :  { %5307 = vmax.xlane.f32.xlu1 %v5306_v19  ;;  %5304 = vmax.xlane.f32.xlu0 %v5303_v49  ;;  %v11708_v46 = vpop.f32.mrf.mxu1  ;;  %v5312_v13 = vsel %vm149_vm0, %v15414_v62, -inf  ;;  %v5318_v49 = vsel %vm149_vm0, %v15402_v57, -inf  ;;  %v5324_v57 = vsel %vm149_vm0, %v15438_v2, -inf }
 0x4ce   :  { %v15482_v42 = vpop.f32.mrf.mxu0 }
 0x4cf   :  { %19224 = vst [vmem:[#allocation114_spill] sm:$0xff] %v15482_v42  ;;  %v15484_v14 = vpop.f32.mrf.mxu1 }
 0x4d0   :  { %19225 = vst [vmem:[#allocation115_spill] sm:$0xff] %v15484_v14  ;;  %v11726_v43 = vpop.f32.mrf.mxu0 }
 0x4d1   :  { %5310 = vmax.xlane.f32.xlu0 %v5309_v55  ;;  %5313 = vmax.xlane.f32.xlu1 %v5312_v13  ;;  %v11709_v11 = vpop.f32.mrf.mxu1  ;;  %v5315_v43 = vsel %vm149_vm0, %v15426_v21, -inf }
 0x4d2   :  { %v15490_v30 = vpop.f32.mrf.mxu0  ;;  %v5520_v11 = vsub.f32 %v14941_v54, %v15410_v0  ;;  %v5330_v0 = vsel %vm149_vm0, %v15422_v8, -inf }
 0x4d3   :  { %19226 = vst [vmem:[#allocation116_spill] sm:$0xff] %v15490_v30  ;;  %v15494_v19 = vpop.f32.mrf.mxu1 }
 0x4d4   :  { %19227 = vst [vmem:[#allocation117_spill] sm:$0xff] %v15494_v19  ;;  %v11727_v46 = vpop.f32.mrf.mxu0  ;;  %v5664_v10 = vmul.f32 1.442695, %v5520_v11  ;;  %v5333_v11 = vsel %vm149_vm0, %v15434_v36, -inf }
 0x4d5   :  { %5319 = vmax.xlane.f32.xlu1 %v5318_v49  ;;  %5316 = vmax.xlane.f32.xlu0 %v5315_v43  ;;  %v11720_v25 = vpop.f32.mrf.mxu1  ;;  %v5321_v46 = vsel %vm149_vm0, %v15412_v35, -inf }
 0x4d6   :  { %v15500_v62 = vpop.f32.mrf.mxu0  ;;  %12432 = vpow2.f32 %v5664_v10  ;;  %v5354_v10 = vsel %vm149_vm0, %v15462_v22, -inf  ;;  %v5342_v22 = vsel %vm149_vm0, %v15444_v45, -inf }
 0x4d7   :  { %19228 = vst [vmem:[#allocation118_spill] sm:$0xff] %v15500_v62  ;;  %v15502_v55 = vpop.f32.mrf.mxu1 }
 0x4d8   :  { %19229 = vst [vmem:[#allocation119_spill] sm:$0xff] %v15502_v55  ;;  %v11738_v13 = vpop.f32.mrf.mxu0 }
 0x4d9   :  { %5322 = vmax.xlane.f32.xlu0 %v5321_v46  ;;  %5325 = vmax.xlane.f32.xlu1 %v5324_v57  ;;  %v11721_v49 = vpop.f32.mrf.mxu1  ;;  %v5327_v13 = vsel %vm149_vm0, %v15446_v48, -inf  ;;  %v5521_v48 = vsub.f32 %v14950_v5, %v15424_v34  ;;  %v5522_v34 = vsub.f32 %v15052_v15, %v15436_v56  ;;  %v5348_v15 = vsel %vm149_vm0, %v15474_v24, -inf }
 0x4da   :  { %v15512_v25 = vpop.xlane.xlu1 %5193  ;;  %v15514_v43 = vpop.f32.mrf.mxu0  ;;  %v5363_v56 = vsel %vm149_vm0, %v15502_v55, -inf }
 0x4db   :  { %19230 = vst [vmem:[#allocation120_spill] sm:$0xff] %v15514_v43  ;;  %v15516_v21 = vpop.f32.mrf.mxu1 }
 0x4dc   :  { %19231 = vst [vmem:[#allocation121_spill] sm:$0xff] %v15516_v21  ;;  %v11739_v54 = vpop.f32.mrf.mxu0 }
 0x4dd   :  { %5331 = vmax.xlane.f32.xlu1 %v5330_v0  ;;  %5328 = vmax.xlane.f32.xlu0 %v5327_v13  ;;  %v11732_v2 = vpop.f32.mrf.mxu1  ;;  %v5336_v54 = vsel %vm149_vm0, %v15456_v28, -inf  ;;  %v5339_v28 = vsel %vm149_vm0, %v15466_v27, -inf  ;;  %v5527_v27 = vsub.f32 %v15099_v32, %v15510_v4 }
 0x4de   :  { %v15522_v46 = vpop.xlane.xlu1 %5199  ;;  %v15524_v57 = vpop.xlane.xlu0 %5196 }
 0x4df   :  { %v15526_v49 = vpop.f32.mrf.mxu1  ;;  %v15528_v35 = vpop.f32.mrf.mxu0 }
 0x4e0   :  { %19232 = vst [vmem:[#allocation122_spill] sm:$0xff] %v15526_v49  ;;  %19233 = vst [vmem:[#allocation123_spill] sm:$0xff] %v15528_v35 }
 0x4e1   :  { %v11750_v8 = vpop.f32.mrf.mxu0  ;;  %5334 = vmax.xlane.f32.xlu0 %v5333_v11  ;;  %5337 = vmax.xlane.f32.xlu1 %v5336_v54  ;;  %v11733_v0 = vpop.f32.mrf.mxu1 }
 0x4e2   :  { %v5890_v2 = vpop.xlane.xlu1 %5889  ;;  %v15534_v13 = vpop.xlane.xlu0 %5202  ;;  %v5666_v0 = vmul.f32 1.442695, %v5521_v48 }
 0x4e3   :  { %v15538_v7 = vpop.f32.mrf.mxu1  ;;  %v15540_v44 = vpop.f32.mrf.mxu0  ;;  %12434 = vrcp.f32 %v5890_v2 }
 0x4e4   :  { %19234 = vst [vmem:[#allocation124_spill] sm:$0xff] %v15538_v7  ;;  %19235 = vst [vmem:[#allocation125_spill] sm:$0xff] %v15540_v44 }
 0x4e5   :  { %v11751_v8 = vpop.f32.mrf.mxu0  ;;  %5355 = vmax.xlane.f32.xlu1 %v5354_v10  ;;  %5340 = vmax.xlane.f32.xlu0 %v5339_v28  ;;  %v11744_v11 = vpop.f32.mrf.mxu1 }
 0x4e6   :  { %v5893_v54 = vpop.xlane.xlu0 %5892  ;;  %v5360_v8 = vsel %vm149_vm0, %v15494_v19, -inf  ;;  %v5668_v11 = vmul.f32 1.442695, %v5522_v34  ;;  %v5366_v19 = vsel %vm149_vm0, %v15482_v42, -inf  ;;  %v5357_v42 = vsel %vm149_vm0, %v15472_v39, -inf }
 0x4e7   :  { %v15546_v36 = vpop.f32.mrf.mxu1  ;;  %v15548_v5 = vpop.f32.mrf.mxu0  ;;  %12436 = vrcp.f32 %v5893_v54 }
 0x4e8   :  { %19236 = vst [vmem:[#allocation126_spill] sm:$0xff] %v15546_v36  ;;  %19237 = vst [vmem:[#allocation127_spill] sm:$0xff] %v15548_v5  ;;  %12438 = vpow2.f32 %v5666_v0  ;;  %v15564_v54 = vpop.eup %12432  ;;  %v5345_v0 = vsel %vm149_vm0, %v15454_v31, -inf }
 0x4e9   :  { %v11762_v10 = vpop.f32.mrf.mxu0  ;;  %5343 = vmax.xlane.f32.xlu0 %v5342_v22  ;;  %5361 = vmax.xlane.f32.xlu1 %v5360_v8  ;;  %v11745_v28 = vpop.f32.mrf.mxu1  ;;  %v5523_v8 = vsub.f32 %v15067_v59, %v15452_v20  ;;  %12440 = vpow2.f32 %v5668_v11  ;;  %v5936_v34 = vsel %vm149_vm0, %v15564_v54, 0.0  ;;  %v5524_v20 = vsub.f32 %v15069_v40, %v15464_v52 }
 0x4ea   :  { %v5351_v11 = vsel %vm149_vm0, %v15484_v14, -inf }
 0x4eb   :  { %v15556_v2 = vpop.f32.mrf.mxu1  ;;  %v15558_v48 = vpop.f32.mrf.mxu0  ;;  %v5672_v52 = vmul.f32 1.442695, %v5524_v20  ;;  %v19246_v20 = vld [vmem:[#allocation39_spill] sm:$0xff] }
 0x4ec   :  { %19238 = vst [vmem:[#allocation128_spill] sm:$0xff] %v15556_v2  ;;  %19239 = vst [vmem:[#allocation129_spill] sm:$0xff] %v15558_v48 }
 0x4ed   :  { %v11763_v45 = vpop.f32.mrf.mxu0  ;;  %5349 = vmax.xlane.f32.xlu0 %v5348_v15  ;;  %5364 = vmax.xlane.f32.xlu1 %v5363_v56  ;;  %v11756_v22 = vpop.f32.mrf.mxu1  ;;  %v5670_v56 = vmul.f32 1.442695, %v5523_v8 }
 0x4ef   :  { %v15568_v10 = vpop.f32.mrf.mxu1  ;;  %v15570_v28 = vpop.f32.mrf.mxu0  ;;  %12442 = vpow2.f32 %v5670_v56  ;;  %v5525_v56 = vsub.f32 %v15082_v50, %v15480_v6 }
 0x4f0   :  { %19240 = vst [vmem:[#allocation130_spill] sm:$0xff] %v15568_v10  ;;  %19241 = vst [vmem:[#allocation131_spill] sm:$0xff] %v15570_v28  ;;  %v12435_v15 = vpop.eup %12434  ;;  %12444 = vpow2.f32 %v5672_v52 }
 0x4f1   :  { %v11774_v55 = vpop.f32.mrf.mxu0  ;;  %5346 = vmax.xlane.f32.xlu0 %v5345_v0  ;;  %5937 = vadd.xlane.f32.xlu1 %v5936_v34  ;;  %v11757_v45 = vpop.f32.mrf.mxu1  ;;  %v6400_v8 = vmul.f32 %v12435_v15, %v15177_v61 }
 0x4f3   :  { %v15576_v22 = vpop.f32.mrf.mxu1  ;;  %v15578_v59 = vpop.f32.mrf.mxu0 }
 0x4f4   :  { %19242 = vst [vmem:[#allocation132_spill] sm:$0xff] %v15576_v22  ;;  %19243 = vst [vmem:[#allocation133_spill] sm:$0xff] %v15578_v59  ;;  %v12437_v31 = vpop.eup %12436 }
 0x4f5   :  { %v11775_v55 = vpop.f32.mrf.mxu0  ;;  %5352 = vmax.xlane.f32.xlu0 %v5351_v11  ;;  %5367 = vmax.xlane.f32.xlu1 %v5366_v19  ;;  %v11768_v0 = vpop.f32.mrf.mxu1  ;;  %v6401_v34 = vmul.f32 %v12437_v31, %v15192_v53  ;;  %v5372_v19 = vsel %vm149_vm0, %v15516_v21, -inf  ;;  %v5369_v21 = vsel %vm149_vm0, %v15490_v30, -inf }
 0x4f6   :  { %v15588_v45 = vpop.xlane.xlu1 %5205  ;;  %v15598_v11 = vpop.eup %12438 }
 0x4f7   :  { %v15590_v24 = vpop.f32.mrf.mxu1  ;;  %v15592_v40 = vpop.f32.mrf.mxu0  ;;  %v6528_v14 = vpack.c.bf16 %v6401_v34, %v6400_v8 }
 0x4f8   :  { %19244 = vst [vmem:[#allocation134_spill] sm:$0xff] %v15590_v24  ;;  %19245 = vst [vmem:[#allocation135_spill] sm:$0xff] %v15592_v40  ;;  %v15617_v8 = vpop.eup %12440 }
 0x4f9   :  { %v11786_v61 = vpop.f32.mrf.mxu0  ;;  %5358 = vmax.xlane.f32.xlu0 %v5357_v42  ;;  %5373 = vmax.xlane.f32.xlu1 %v5372_v19  ;;  %v11769_v53 = vpop.f32.mrf.mxu1  ;;  %v5939_v42 = vsel %vm149_vm0, %v15598_v11, 0.0  ;;  %19249 = vst [vmem:[#allocation138_spill] sm:$0xff] %v15617_v8 }
 0x4fa   :  { %11863 = vmatmul.mubr.msk.bf16.vlgmr.msra.gmra.mxu1 %vm149_vm0, %v6528_v14  ;;  %v5896_v31 = vpop.xlane.xlu1 %5895  ;;  %v15601_v15 = vpop.xlane.xlu0 %5208  ;;  %v5375_v14 = vsel %vm149_vm0, %v15526_v49, -inf  ;;  %v5674_v61 = vmul.f32 1.442695, %v5525_v56  ;;  %v5526_v49 = vsub.f32 %v15084_v9, %v15492_v23 }
 0x4fb   :  { %11873 = vmatpush3.bf16.msra.mxu1 %v19246_v20  ;;  %v15606_v55 = vpop.f32.mrf.mxu1  ;;  %v15608_v0 = vpop.f32.mrf.mxu0  ;;  %11874 = vmatprep.mubr.msk.bf16.mxu1 %vm12946_vm1, %v19050_v38  ;;  %12446 = vrcp.f32 %v5896_v31 }
 0x4fc   :  { %19247 = vst [vmem:[#allocation136_spill] sm:$0xff] %v15606_v55  ;;  %19248 = vst [vmem:[#allocation137_spill] sm:$0xff] %v15608_v0  ;;  %11884 = vmatprep.subr.bf16.mxu1 %v19050_v38  ;;  %v15639_v9 = vpop.eup %12442  ;;  %v5676_v23 = vmul.f32 1.442695, %v5526_v49 }
 0x4fd   :  { %v11787_v50 = vpop.f32.mrf.mxu0  ;;  %5940 = vadd.xlane.f32.xlu0 %v5939_v42  ;;  %5376 = vmax.xlane.f32.xlu1 %v5375_v14  ;;  %v11780_v6 = vpop.f32.mrf.mxu1  ;;  %v5942_v42 = vsel %vm149_vm0, %v15617_v8, 0.0  ;;  %19254 = vst [vmem:[#allocation143_spill] sm:$0xff] %v15639_v9  ;;  %v5945_v49 = vsel %vm149_vm0, %v15639_v9, 0.0  ;;  %v5528_v9 = vsub.f32 %v15158_v41, %v15512_v25 }
 0x4fe   :  { %v15619_v34 = vpop.xlane.xlu1 %5211  ;;  %v5899_v19 = vpop.xlane.xlu0 %5898 }
 0x4ff   :  { %v15621_v52 = vpop.f32.mrf.mxu1  ;;  %v15623_v53 = vpop.f32.mrf.mxu0  ;;  %12448 = vrcp.f32 %v5899_v19  ;;  %v5378_v19 = vsel %vm149_vm0, %v15500_v62, -inf  ;;  %v5678_v62 = vmul.f32 1.442695, %v5527_v27 }
 0x500   :  { %19250 = vst [vmem:[#allocation139_spill] sm:$0xff] %v15621_v52  ;;  %19251 = vst [vmem:[#allocation140_spill] sm:$0xff] %v15623_v53  ;;  %12450 = vpow2.f32 %v5674_v61 }
 0x501   :  { %v11798_v14 = vpop.f32.mrf.mxu0  ;;  %5370 = vmax.xlane.f32.xlu0 %v5369_v21  ;;  %5943 = vadd.xlane.f32.xlu1 %v5942_v42  ;;  %v11781_v31 = vpop.f32.mrf.mxu1  ;;  %v5384_v21 = vsel %vm149_vm0, %v15538_v7, -inf  ;;  %12452 = vpow2.f32 %v5676_v23 }
 0x502   :  { %v15631_v50 = vpop.xlane.xlu0 %5214  ;;  %v15633_v56 = vpop.xlane.xlu1 %5217 }
 0x503   :  { %v15635_v6 = vpop.f32.mrf.mxu1  ;;  %v15637_v39 = vpop.f32.mrf.mxu0 }
 0x504   :  { %19252 = vst [vmem:[#allocation141_spill] sm:$0xff] %v15635_v6  ;;  %19253 = vst [vmem:[#allocation142_spill] sm:$0xff] %v15637_v39 }
 0x505   :  { %v11799_v42 = vpop.f32.mrf.mxu0  ;;  %5379 = vmax.xlane.f32.xlu1 %v5378_v19  ;;  %5385 = vmax.xlane.f32.xlu0 %v5384_v21  ;;  %v11792_v14 = vpop.f32.mrf.mxu1 }
 0x506   :  { %v5902_v31 = vpop.xlane.xlu1 %5901  ;;  %v15645_v30 = vpop.xlane.xlu0 %5220  ;;  %v5387_v42 = vsel %vm149_vm0, %v15546_v36, -inf }
 0x507   :  { %v15649_v8 = vpop.f32.mrf.mxu1  ;;  %v15651_v61 = vpop.f32.mrf.mxu0  ;;  %12454 = vrcp.f32 %v5902_v31 }
 0x508   :  { %19255 = vst [vmem:[#allocation144_spill] sm:$0xff] %v15649_v8  ;;  %19256 = vst [vmem:[#allocation145_spill] sm:$0xff] %v15651_v61  ;;  %v15657_v19 = vpop.eup %12444 }
 0x509   :  { %v11810_v21 = vpop.f32.mrf.mxu0  ;;  %5946 = vadd.xlane.f32.xlu0 %v5945_v49  ;;  %5388 = vmax.xlane.f32.xlu1 %v5387_v42  ;;  %v11793_v14 = vpop.f32.mrf.mxu1  ;;  %v5948_v49 = vsel %vm149_vm0, %v15657_v19, 0.0 }
 0x50a   :  { %v15659_v7 = vpop.xlane.xlu1 %5223  ;;  %v5905_v32 = vpop.xlane.xlu0 %5904  ;;  %v5381_v21 = vsel %vm149_vm0, %v15514_v43, -inf }
 0x50b   :  { %v12447_v4 = vpop.eup %12446  ;;  %v15661_v61 = vpop.f32.mrf.mxu1  ;;  %12456 = vrcp.f32 %v5905_v32  ;;  %v5680_v32 = vmul.f32 1.442695, %v5528_v9 }
 0x50c   :  { %19257 = vst [vmem:[#allocation146_spill] sm:$0xff] %v15661_v61  ;;  %v15663_v23 = vpop.f32.mrf.mxu0  ;;  %v12449_v31 = vpop.eup %12448  ;;  %v6402_v27 = vmul.f32 %v12447_v4, %v15239_v18  ;;  %12458 = vpow2.f32 %v5678_v62 }
 0x50d   :  { %19258 = vst [vmem:[#allocation147_spill] sm:$0xff] %v15663_v23  ;;  %5382 = vmax.xlane.f32.xlu0 %v5381_v21  ;;  %5949 = vadd.xlane.f32.xlu1 %v5948_v49  ;;  %v11804_v14 = vpop.f32.mrf.mxu1  ;;  %v6403_v36 = vmul.f32 %v12449_v31, %v15251_v3  ;;  %v5390_v21 = vsel %vm149_vm0, %v15528_v35, -inf  ;;  %v5396_v49 = vsel %vm149_vm0, %v15556_v2, -inf  ;;  %v15685_v18 = vpop.eup %12450  ;;  %12460 = vpow2.f32 %v5680_v32 }
 0x50e   :  { %v11811_v42 = vpop.f32.mrf.mxu0  ;;  %v15673_v23 = vpop.xlane.xlu0 %5226  ;;  %v5529_v14 = vsub.f32 %v15167_v58, %v15524_v57  ;;  %v5530_v58 = vsub.f32 %v15128_v51, %v15522_v46 }
 0x50f   :  { %v15675_v20 = vpop.xlane.xlu1 %5229  ;;  %v15677_v41 = vpop.f32.mrf.mxu1  ;;  %v6529_v43 = vpack.c.bf16 %v6403_v36, %v6402_v27  ;;  %v19261_v42 = vld [vmem:[#allocation45_spill] sm:$0xff]  ;;  %v5951_v27 = vsel %vm149_vm0, %v15685_v18, 0.0 }
 0x510   :  { %19259 = vst [vmem:[#allocation148_spill] sm:$0xff] %v15677_v41  ;;  %v15679_v25 = vpop.f32.mrf.mxu0 }
 0x511   :  { %19260 = vst [vmem:[#allocation149_spill] sm:$0xff] %v15679_v25  ;;  %5391 = vmax.xlane.f32.xlu1 %v5390_v21  ;;  %5397 = vmax.xlane.f32.xlu0 %v5396_v49  ;;  %v11805_v4 = vpop.f32.mrf.mxu1  ;;  %v15704_v21 = vpop.eup %12452 }
 0x512   :  { %v11822_v3 = vpop.f32.mrf.mxu0  ;;  %11869 = vmatmul.mubr.msk.bf16.vlgmr.msra.gmra.mxu0 %vm149_vm0, %v6529_v43  ;;  %v15688_v31 = vpop.xlane.xlu0 %5232  ;;  %v5399_v43 = vsel %vm149_vm0, %v15568_v10, -inf  ;;  %v5682_v10 = vmul.f32 1.442695, %v5529_v14  ;;  %v5684_v14 = vmul.f32 1.442695, %v5530_v58 }
 0x513   :  { %v5908_v62 = vpop.xlane.xlu1 %5907  ;;  %11879 = vmatpush3.bf16.msra.mxu0 %v19261_v42  ;;  %v15691_v36 = vpop.f32.mrf.mxu1  ;;  %11880 = vmatprep.mubr.msk.bf16.mxu0 %vm12946_vm1, %v19050_v38 }
 0x514   :  { %19262 = vst [vmem:[#allocation45_spill] sm:$0xff] %v15691_v36  ;;  %v15693_v9 = vpop.f32.mrf.mxu0  ;;  %11890 = vmatprep.subr.bf16.mxu0 %v19050_v38  ;;  %12462 = vrcp.f32 %v5908_v62  ;;  %v12455_v2 = vpop.eup %12454 }
 0x515   :  { %19263 = vst [vmem:[#allocation150_spill] sm:$0xff] %v15693_v9  ;;  %5952 = vadd.xlane.f32.xlu0 %v5951_v27  ;;  %5400 = vmax.xlane.f32.xlu1 %v5399_v43  ;;  %v11816_v3 = vpop.f32.mrf.mxu1  ;;  %v5954_v27 = vsel %vm149_vm0, %v15704_v21, 0.0  ;;  %v6404_v25 = vmul.f32 %v12455_v2, %v15270_v33  ;;  %v5408_v33 = vsel %vm149_vm0, %v15576_v22, -inf }
 0x516   :  { %v11823_v49 = vpop.f32.mrf.mxu0  ;;  %v5911_v32 = vpop.xlane.xlu0 %5910 }
 0x517   :  { %v15706_v4 = vpop.xlane.xlu1 %5235  ;;  %v15710_v57 = vpop.f32.mrf.mxu1  ;;  %12464 = vrcp.f32 %v5911_v32  ;;  %v5393_v49 = vsel %vm149_vm0, %v15540_v44, -inf }
 0x518   :  { %19264 = vst [vmem:[#allocation151_spill] sm:$0xff] %v15710_v57  ;;  %v15712_v35 = vpop.f32.mrf.mxu0  ;;  %v12457_v62 = vpop.eup %12456  ;;  %12466 = vpow2.f32 %v5682_v10  ;;  %v5531_v10 = vsub.f32 %v15140_v47, %v15534_v13 }
 0x519   :  { %19265 = vst [vmem:[#allocation152_spill] sm:$0xff] %v15712_v35  ;;  %5394 = vmax.xlane.f32.xlu0 %v5393_v49  ;;  %5955 = vadd.xlane.f32.xlu1 %v5954_v27  ;;  %v11817_v3 = vpop.f32.mrf.mxu1  ;;  %v6405_v51 = vmul.f32 %v12457_v62, %v15281_v63  ;;  %v15728_v9 = vpop.eup %12458  ;;  %v5402_v49 = vsel %vm149_vm0, %v15548_v5, -inf  ;;  %12468 = vpow2.f32 %v5684_v14 }
 0x51a   :  { %v11834_v43 = vpop.f32.mrf.mxu0  ;;  %v15720_v46 = vpop.xlane.xlu0 %5238 }
 0x51b   :  { %v15722_v35 = vpop.xlane.xlu1 %5241  ;;  %v15724_v32 = vpop.f32.mrf.mxu1  ;;  %v6530_v43 = vpack.c.bf16 %v6405_v51, %v6404_v25  ;;  %v19268_v25 = vld [vmem:[#allocation48_spill] sm:$0xff]  ;;  %v5957_v51 = vsel %vm149_vm0, %v15728_v9, 0.0 }
 0x51c   :  { %19266 = vst [vmem:[#allocation153_spill] sm:$0xff] %v15724_v32  ;;  %v15726_v44 = vpop.f32.mrf.mxu0  ;;  %v15751_v14 = vpop.eup %12460 }
 0x51d   :  { %19267 = vst [vmem:[#allocation154_spill] sm:$0xff] %v15726_v44  ;;  %5403 = vmax.xlane.f32.xlu1 %v5402_v49  ;;  %5409 = vmax.xlane.f32.xlu0 %v5408_v33  ;;  %v11828_v2 = vpop.f32.mrf.mxu1  ;;  %v19308_v44 = vld [vmem:[#allocation98_spill] sm:$0xff] }
 0x51e   :  { %v11835_v63 = vpop.f32.mrf.mxu0  ;;  %11875 = vmatmul.mubr.msk.bf16.vlgmr.msra.gmra.mxu1 %vm149_vm0, %v6530_v43  ;;  %v15735_v27 = vpop.xlane.xlu0 %5244  ;;  %v5411_v43 = vsel %vm149_vm0, %v15590_v24, -inf  ;;  %v5686_v2 = vmul.f32 1.442695, %v5531_v10  ;;  %v5532_v24 = vsub.f32 %v15230_v29, %v15588_v45 }
 0x51f   :  { %v5914_v58 = vpop.xlane.xlu1 %5913  ;;  %11885 = vmatpush3.bf16.msra.mxu1 %v19268_v25  ;;  %v15740_v62 = vpop.f32.mrf.mxu1  ;;  %11886 = vmatprep.mubr.msk.bf16.mxu1 %vm12946_vm1, %v19050_v38 }
 0x520   :  { %19269 = vst [vmem:[#allocation48_spill] sm:$0xff] %v15740_v62  ;;  %v15742_v3 = vpop.f32.mrf.mxu0  ;;  %11896 = vmatprep.subr.bf16.mxu1 %v19050_v38  ;;  %12470 = vrcp.f32 %v5914_v58 }
 0x521   :  { %19270 = vst [vmem:[#allocation155_spill] sm:$0xff] %v15742_v3  ;;  %5958 = vadd.xlane.f32.xlu0 %v5957_v51  ;;  %5412 = vmax.xlane.f32.xlu1 %v5411_v43  ;;  %v11829_v13 = vpop.f32.mrf.mxu1  ;;  %v12463_v63 = vpop.eup %12462  ;;  %v5960_v51 = vsel %vm149_vm0, %v15751_v14, 0.0  ;;  %v5533_v43 = vsub.f32 %v15244_v1, %v15601_v15  ;;  %v5688_v1 = vmul.f32 1.442695, %v5532_v24 }
 0x522   :  { %v11846_v47 = vpop.f32.mrf.mxu0  ;;  %v5917_v33 = vpop.xlane.xlu0 %5916  ;;  %v6406_v3 = vmul.f32 %v12463_v63, %v15300_v26  ;;  %v5420_v26 = vsel %vm149_vm0, %v15606_v55, -inf }
 0x523   :  { %v15753_v49 = vpop.xlane.xlu1 %5247  ;;  %v15755_v22 = vpop.f32.mrf.mxu1  ;;  %12472 = vrcp.f32 %v5917_v33  ;;  %v5405_v47 = vsel %vm149_vm0, %v15558_v48, -inf  ;;  %v5534_v33 = vsub.f32 %v15219_v37, %v15619_v34  ;;  %v5690_v63 = vmul.f32 1.442695, %v5533_v43 }
 0x524   :  { %19271 = vst [vmem:[#allocation156_spill] sm:$0xff] %v15755_v22  ;;  %v15757_v5 = vpop.f32.mrf.mxu0  ;;  %v12465_v58 = vpop.eup %12464  ;;  %12474 = vpow2.f32 %v5686_v2 }
 0x525   :  { %19272 = vst [vmem:[#allocation157_spill] sm:$0xff] %v15757_v5  ;;  %5406 = vmax.xlane.f32.xlu0 %v5405_v47  ;;  %5961 = vadd.xlane.f32.xlu1 %v5960_v51  ;;  %v11840_v10 = vpop.f32.mrf.mxu1  ;;  %v6407_v5 = vmul.f32 %v12465_v58, %v15311_v16  ;;  %v5414_v47 = vsel %vm149_vm0, %v15570_v28, -inf  ;;  %v15783_v16 = vpop.eup %12466  ;;  %v5692_v24 = vmul.f32 1.442695, %v5534_v33  ;;  %12476 = vpow2.f32 %v5688_v1 }
 0x526   :  { %v11847_v13 = vpop.f32.mrf.mxu0  ;;  %v15769_v29 = vpop.xlane.xlu0 %5250  ;;  %v5538_v10 = vsub.f32 %v15242_v17, %v15659_v7  ;;  %v5963_v33 = vsel %vm149_vm0, %v15783_v16, 0.0  ;;  %12478 = vpow2.f32 %v5690_v63  ;;  %v5535_v17 = vsub.f32 %v15228_v12, %v15631_v50  ;;  %v19281_v50 = vld [vmem:[#allocation72_spill] sm:$0xff] }
 0x527   :  { %v15771_v45 = vpop.xlane.xlu1 %5253  ;;  %v15775_v48 = vpop.f32.mrf.mxu1  ;;  %v6531_v15 = vpack.c.bf16 %v6407_v5, %v6406_v3  ;;  %v5536_v5 = vsub.f32 %v15255_v60, %v15633_v56  ;;  %v19275_v3 = vld [vmem:[#allocation57_spill] sm:$0xff]  ;;  %v5423_v60 = vsel %vm149_vm0, %v15621_v52, -inf  ;;  %v19282_v52 = vld [vmem:[#allocation2_spill] sm:$0xff] }
 0x528   :  { %19273 = vst [vmem:[#allocation158_spill] sm:$0xff] %v15775_v48  ;;  %v15777_v22 = vpop.f32.mrf.mxu0  ;;  %v15797_v43 = vpop.eup %12468  ;;  %v5700_v63 = vmul.f32 1.442695, %v5538_v10 }
 0x529   :  { %19274 = vst [vmem:[#allocation159_spill] sm:$0xff] %v15777_v22  ;;  %5415 = vmax.xlane.f32.xlu1 %v5414_v47  ;;  %5421 = vmax.xlane.f32.xlu0 %v5420_v26  ;;  %v11841_v2 = vpop.f32.mrf.mxu1  ;;  %v5696_v7 = vmul.f32 1.442695, %v5536_v5 }
 0x52a   :  { %v11858_v51 = vpop.f32.mrf.mxu0  ;;  %11881 = vmatmul.mubr.msk.bf16.vlgmr.msra.gmra.mxu0 %vm149_vm0, %v6531_v15  ;;  %v15786_v34 = vpop.xlane.xlu0 %5256  ;;  %v5966_v2 = vsel %vm149_vm0, %v15797_v43, 0.0 }
 0x52b   :  { %v5920_v37 = vpop.xlane.xlu1 %5919  ;;  %11891 = vmatpush3.bf16.msra.mxu0 %v19275_v3  ;;  %v15791_v58 = vpop.f32.mrf.mxu1  ;;  %11892 = vmatprep.mubr.msk.bf16.mxu0 %vm12946_vm1, %v19050_v38  ;;  %v19319_v3 = vld [vmem:[#allocation82_spill] sm:$0xff] }
 0x52c   :  { %19276 = vst [vmem:[#allocation160_spill] sm:$0xff] %v15791_v58  ;;  %v15793_v13 = vpop.f32.mrf.mxu0  ;;  %11902 = vmatprep.subr.bf16.mxu0 %v19050_v38  ;;  %12480 = vrcp.f32 %v5920_v37  ;;  %v5417_v37 = vsel %vm149_vm0, %v15578_v59, -inf  ;;  %v5426_v59 = vsel %vm149_vm0, %v15592_v40, -inf }
 0x52d   :  { %19277 = vst [vmem:[#allocation161_spill] sm:$0xff] %v15793_v13  ;;  %5964 = vadd.xlane.f32.xlu0 %v5963_v33  ;;  %5424 = vmax.xlane.f32.xlu1 %v5423_v60  ;;  %v11852_v15 = vpop.f32.mrf.mxu1  ;;  %v12471_v26 = vpop.eup %12470  ;;  %12482 = vpow2.f32 %v5692_v24  ;;  %v19279_v33 = vld [vmem:[#allocation91_spill] sm:$0xff]  ;;  %v19280_v24 = vld [vmem:[#allocation81_spill] sm:$0xff] }
 0x52e   :  { %v11859_v56 = vpop.f32.mrf.mxu0  ;;  %v5923_v1 = vpop.xlane.xlu0 %5922  ;;  %v5540_v60 = vsub.f32 %v19279_v33, %v15675_v20  ;;  %v5537_v15 = vsub.f32 %v19280_v24, %v15645_v30  ;;  %v6408_v5 = vmul.f32 %v12471_v26, %v19281_v50  ;;  %v5694_v20 = vmul.f32 1.442695, %v5535_v17 }
 0x52f   :  { %v15806_v47 = vpop.xlane.xlu1 %5259  ;;  %v15810_v51 = vpop.f32.mrf.mxu1  ;;  %12484 = vrcp.f32 %v5923_v1  ;;  %v19283_v1 = vld [vmem:[#allocation70_spill] sm:$0xff] }
 0x530   :  { %19278 = vst [vmem:[#allocation162_spill] sm:$0xff] %v15810_v51  ;;  %v12473_v56 = vpop.eup %12472  ;;  %12486 = vpow2.f32 %v5696_v7  ;;  %v5539_v33 = vsub.f32 %v19283_v1, %v15673_v23  ;;  %v5698_v26 = vmul.f32 1.442695, %v5537_v15  ;;  %v19287_v1 = vld [vmem:[#allocation38_spill] sm:$0xff] }
 0x531   :  { %5418 = vmax.xlane.f32.xlu0 %v5417_v37  ;;  %5967 = vadd.xlane.f32.xlu1 %v5966_v2  ;;  %v11853_v12 = vpop.f32.mrf.mxu1  ;;  %v6409_v55 = vmul.f32 %v12473_v56, %v19282_v52  ;;  %v15830_v30 = vpop.eup %12474  ;;  %12488 = vpow2.f32 %v5700_v63  ;;  %v5704_v2 = vmul.f32 1.442695, %v5540_v60  ;;  %v5432_v52 = vsel %vm149_vm0, %v15635_v6, -inf  ;;  %v19284_v56 = vld [vmem:[#allocation99_spill] sm:$0xff] }
 0x532   :  { %v15822_v28 = vpop.xlane.xlu0 %5262  ;;  %12490 = vpow2.f32 %v5694_v20  ;;  %v5702_v23 = vmul.f32 1.442695, %v5539_v33  ;;  %v5541_v24 = vsub.f32 %v19284_v56, %v15688_v31  ;;  %v19285_v12 = vld [vmem:[#allocation68_spill] sm:$0xff]  ;;  %v5969_v63 = vsel %vm149_vm0, %v15830_v30, 0.0  ;;  %v15849_v15 = vpop.eup %12476 }
 0x533   :  { %v15824_v10 = vpop.xlane.xlu1 %5265  ;;  %v6532_v37 = vpack.c.bf16 %v6409_v55, %v6408_v5  ;;  %12492 = vpow2.f32 %v5704_v2  ;;  %v19286_v55 = vld [vmem:[#allocation59_spill] sm:$0xff]  ;;  %v5435_v60 = vsel %vm149_vm0, %v15649_v8, -inf  ;;  %v15851_v31 = vpop.eup %12478  ;;  %v5543_v33 = vsub.f32 %v19287_v1, %v15720_v46 }
 0x534   :  { %12494 = vpow2.f32 %v5698_v26  ;;  %v5706_v20 = vmul.f32 1.442695, %v5541_v24  ;;  %v5429_v2 = vsel %vm149_vm0, %v15608_v0, -inf  ;;  %v19288_v26 = vld [vmem:[#allocation46_spill] sm:$0xff]  ;;  %v19290_v46 = vld [vmem:[#allocation75_spill] sm:$0xff]  ;;  %v5975_v40 = vsel %vm149_vm0, %v15851_v31, 0.0 }
 0x535   :  { %5427 = vmax.xlane.f32.xlu1 %v5426_v59  ;;  %5433 = vmax.xlane.f32.xlu0 %v5432_v52  ;;  %v5542_v59 = vsub.f32 %v19286_v55, %v15706_v4  ;;  %v5544_v56 = vsub.f32 %v19288_v26, %v15722_v35  ;;  %v5710_v35 = vmul.f32 1.442695, %v5543_v33  ;;  %v19299_v0 = vld [vmem:[#allocation84_spill] sm:$0xff] }
 0x536   :  { %11887 = vmatmul.mubr.msk.bf16.vlgmr.msra.gmra.mxu1 %vm149_vm0, %v6532_v37  ;;  %v15835_v7 = vpop.xlane.xlu0 %5268 }
 0x537   :  { %v5926_v17 = vpop.xlane.xlu1 %5925  ;;  %11897 = vmatpush3.bf16.msra.mxu1 %v19285_v12  ;;  %11898 = vmatprep.mubr.msk.bf16.mxu1 %vm12946_vm1, %v19050_v38  ;;  %v5708_v52 = vmul.f32 1.442695, %v5542_v59 }
 0x538   :  { %11908 = vmatprep.subr.bf16.mxu1 %v19050_v38  ;;  %12496 = vrcp.f32 %v5926_v17  ;;  %v5972_v17 = vsel %vm149_vm0, %v15849_v15, 0.0 }
 0x539   :  { %5970 = vadd.xlane.f32.xlu0 %v5969_v63  ;;  %5436 = vmax.xlane.f32.xlu1 %v5435_v60  ;;  %v12481_v4 = vpop.eup %12480  ;;  %12498 = vpow2.f32 %v5702_v23  ;;  %v19289_v23 = vld [vmem:[#allocation71_spill] sm:$0xff]  ;;  %v19291_v60 = vld [vmem:[#allocation77_spill] sm:$0xff] }
 0x53a   :  { %v5929_v5 = vpop.xlane.xlu0 %5928  ;;  %v15859_v37 = vpop.eup %12482  ;;  %v5545_v24 = vsub.f32 %v19289_v23, %v15735_v27  ;;  %v6410_v63 = vmul.f32 %v12481_v4, %v19290_v46  ;;  %v5712_v27 = vmul.f32 1.442695, %v5544_v56  ;;  %v19293_v23 = vld [vmem:[#allocation44_spill] sm:$0xff]  ;;  %v19294_v56 = vld [vmem:[#allocation65_spill] sm:$0xff] }
 0x53b   :  { %v15853_v50 = vpop.xlane.xlu1 %5271  ;;  %12500 = vrcp.f32 %v5929_v5  ;;  %v19292_v5 = vld [vmem:[#allocation40_spill] sm:$0xff]  ;;  %v5978_v4 = vsel %vm149_vm0, %v15859_v37, 0.0 }
 0x53c   :  { %v12485_v55 = vpop.eup %12484  ;;  %12502 = vpow2.f32 %v5706_v20  ;;  %v5546_v26 = vsub.f32 %v19292_v5, %v15753_v49 }
 0x53d   :  { %5430 = vmax.xlane.f32.xlu0 %v5429_v2  ;;  %5973 = vadd.xlane.f32.xlu1 %v5972_v17  ;;  %v6411_v1 = vmul.f32 %v12485_v55, %v19291_v60  ;;  %v15877_v6 = vpop.eup %12486  ;;  %12504 = vpow2.f32 %v5708_v52  ;;  %v5714_v55 = vmul.f32 1.442695, %v5545_v24  ;;  %v5547_v52 = vsub.f32 %v19293_v23, %v15769_v29 }
 0x53e   :  { %v15869_v8 = vpop.xlane.xlu0 %5274  ;;  %v15881_v17 = vpop.eup %12488  ;;  %12506 = vpow2.f32 %v5710_v35  ;;  %v5716_v33 = vmul.f32 1.442695, %v5546_v26 }
 0x53f   :  { %v15871_v59 = vpop.xlane.xlu1 %5277  ;;  %v6533_v2 = vpack.c.bf16 %v6411_v1, %v6410_v63  ;;  %v15891_v46 = vpop.eup %12490  ;;  %12508 = vpow2.f32 %v5712_v27  ;;  %v5984_v63 = vsel %vm149_vm0, %v15877_v6, 0.0  ;;  %v5990_v60 = vsel %vm149_vm0, %v15881_v17, 0.0  ;;  %v19296_v27 = vld [vmem:[#allocation58_spill] sm:$0xff] }
 0x540   :  { %v15900_v29 = vpop.eup %12492  ;;  %12510 = vpow2.f32 %v5714_v55  ;;  %v5718_v26 = vmul.f32 1.442695, %v5547_v52 }
 0x541   :  { %5976 = vadd.xlane.f32.xlu0 %v5975_v40  ;;  %5979 = vadd.xlane.f32.xlu1 %v5978_v4  ;;  %v19295_v40 = vld [vmem:[#allocation73_spill] sm:$0xff]  ;;  %v15902_v1 = vpop.eup %12494  ;;  %v5981_v4 = vsel %vm149_vm0, %v15891_v46, 0.0 }
 0x542   :  { %11893 = vmatmul.mubr.msk.bf16.vlgmr.msra.gmra.mxu0 %vm149_vm0, %v6533_v2  ;;  %v15884_v49 = vpop.xlane.xlu0 %5280  ;;  %v5548_v24 = vsub.f32 %v19295_v40, %v15771_v45  ;;  %v5549_v2 = vsub.f32 %v19296_v27, %v15786_v34  ;;  %v19297_v40 = vld [vmem:[#allocation50_spill] sm:$0xff] }
 0x543   :  { %v5932_v20 = vpop.xlane.xlu1 %5931  ;;  %11903 = vmatpush3.bf16.msra.mxu0 %v19294_v56  ;;  %11904 = vmatprep.mubr.msk.bf16.mxu0 %vm12946_vm1, %v19050_v38 }
 0x544   :  { %11914 = vmatprep.subr.bf16.mxu0 %v19050_v38  ;;  %12512 = vrcp.f32 %v5932_v20  ;;  %v5720_v55 = vmul.f32 1.442695, %v5548_v24  ;;  %v5996_v20 = vsel %vm149_vm0, %v15900_v29, 0.0  ;;  %v5987_v24 = vsel %vm149_vm0, %v15902_v1, 0.0 }
 0x545   :  { %5985 = vadd.xlane.f32.xlu0 %v5984_v63  ;;  %5991 = vadd.xlane.f32.xlu1 %v5990_v60  ;;  %v12497_v45 = vpop.eup %12496  ;;  %12514 = vpow2.f32 %v5716_v33  ;;  %v5550_v63 = vsub.f32 %v19297_v40, %v15806_v47  ;;  %v19298_v33 = vld [vmem:[#allocation80_spill] sm:$0xff]  ;;  %v5722_v47 = vmul.f32 1.442695, %v5549_v2 }
 0x546   :  { %v5935_v5 = vpop.xlane.xlu0 %5934  ;;  %v15910_v23 = vpop.eup %12498  ;;  %v6412_v52 = vmul.f32 %v12497_v45, %v19298_v33 }
 0x547   :  { %v15904_v35 = vpop.xlane.xlu1 %5283  ;;  %12516 = vrcp.f32 %v5935_v5  ;;  %v19300_v5 = vld [vmem:[#allocation53_spill] sm:$0xff]  ;;  %v5724_v45 = vmul.f32 1.442695, %v5550_v63  ;;  %v19303_v63 = vld [vmem:[#allocation74_spill] sm:$0xff] }
 0x548   :  { %v12501_v60 = vpop.eup %12500  ;;  %12518 = vpow2.f32 %v5718_v26  ;;  %v5551_v40 = vsub.f32 %v19300_v5, %v15822_v28  ;;  %v19302_v5 = vld [vmem:[#allocation41_spill] sm:$0xff] }
 0x549   :  { %5982 = vadd.xlane.f32.xlu0 %v5981_v4  ;;  %5997 = vadd.xlane.f32.xlu1 %v5996_v20  ;;  %v6413_v34 = vmul.f32 %v12501_v60, %v19299_v0  ;;  %v5993_v4 = vsel %vm149_vm0, %v15910_v23, 0.0  ;;  %v15928_v20 = vpop.eup %12502  ;;  %12520 = vpow2.f32 %v5720_v55  ;;  %v19301_v0 = vld [vmem:[#allocation83_spill] sm:$0xff]  ;;  %v5553_v55 = vsub.f32 %v19302_v5, %v15835_v7 }
 0x54a   :  { %v15918_v27 = vpop.xlane.xlu0 %5286  ;;  %v5552_v60 = vsub.f32 %v19301_v0, %v15824_v10  ;;  %v15932_v13 = vpop.eup %12504  ;;  %12522 = vpow2.f32 %v5722_v47  ;;  %v5726_v2 = vmul.f32 1.442695, %v5551_v40  ;;  %v5999_v10 = vsel %vm149_vm0, %v15928_v20, 0.0 }
 0x54b   :  { %v15920_v22 = vpop.xlane.xlu1 %5289  ;;  %v6534_v33 = vpack.c.bf16 %v6413_v34, %v6412_v52  ;;  %v15946_v52 = vpop.eup %12506  ;;  %12524 = vpow2.f32 %v5724_v45  ;;  %v6002_v47 = vsel %vm149_vm0, %v15932_v13, 0.0 }
 0x54c   :  { %v5728_v34 = vmul.f32 1.442695, %v5552_v60  ;;  %v15953_v7 = vpop.eup %12508  ;;  %12526 = vpow2.f32 %v5726_v2  ;;  %v5730_v60 = vmul.f32 1.442695, %v5553_v55  ;;  %v19307_v2 = vld [vmem:[#allocation94_spill] sm:$0xff] }
 0x54d   :  { %5988 = vadd.xlane.f32.xlu0 %v5987_v24  ;;  %5994 = vadd.xlane.f32.xlu1 %v5993_v4  ;;  %v19304_v24 = vld [vmem:[#allocation63_spill] sm:$0xff]  ;;  %v15955_v40 = vpop.eup %12510  ;;  %v6008_v51 = vsel %vm149_vm0, %v15953_v7, 0.0 }
 0x54e   :  { %11899 = vmatmul.mubr.msk.bf16.vlgmr.msra.gmra.mxu1 %vm149_vm0, %v6534_v33  ;;  %v15937_v28 = vpop.xlane.xlu0 %5292  ;;  %v5554_v4 = vsub.f32 %v19304_v24, %v15853_v50  ;;  %v19305_v50 = vld [vmem:[#allocation60_spill] sm:$0xff]  ;;  %12528 = vpow2.f32 %v5728_v34  ;;  %v6011_v34 = vsel %vm149_vm0, %v15955_v40, 0.0 }
 0x54f   :  { %v15935_v26 = vpop.xlane.xlu1 %5295  ;;  %11909 = vmatpush3.bf16.msra.mxu1 %v19303_v63  ;;  %11910 = vmatprep.mubr.msk.bf16.mxu1 %vm12946_vm1, %v19050_v38  ;;  %v5555_v5 = vsub.f32 %v19305_v50, %v15869_v8  ;;  %v6005_v63 = vsel %vm149_vm0, %v15946_v52, 0.0  ;;  %12530 = vpow2.f32 %v5730_v60 }
 0x550   :  { %11920 = vmatprep.subr.bf16.mxu1 %v19050_v38 }
 0x551   :  { %6003 = vadd.xlane.f32.xlu0 %v6002_v47  ;;  %6000 = vadd.xlane.f32.xlu1 %v5999_v10  ;;  %v12513_v45 = vpop.eup %12512  ;;  %v5732_v47 = vmul.f32 1.442695, %v5554_v4  ;;  %v19306_v10 = vld [vmem:[#allocation42_spill] sm:$0xff]  ;;  %v5734_v4 = vmul.f32 1.442695, %v5555_v5 }
 0x552   :  { %v15957_v0 = vpop.xlane.xlu0 %5298  ;;  %v15965_v24 = vpop.eup %12514  ;;  %v5556_v58 = vsub.f32 %v19306_v10, %v15871_v59  ;;  %v6414_v55 = vmul.f32 %v12513_v45, %v19307_v2  ;;  %v19309_v59 = vld [vmem:[#allocation47_spill] sm:$0xff] }
 0x553   :  { %v15959_v33 = vpop.xlane.xlu1 %5301  ;;  %v5557_v10 = vsub.f32 %v19309_v59, %v15884_v49  ;;  %12532 = vpow2.f32 %v5732_v47  ;;  %v19311_v59 = vld [vmem:[#allocation100_spill] sm:$0xff] }
 0x554   :  { %v12517_v48 = vpop.eup %12516  ;;  %v5736_v45 = vmul.f32 1.442695, %v5556_v58  ;;  %12534 = vpow2.f32 %v5734_v4  ;;  %v5559_v47 = vsub.f32 %v19311_v59, %v15918_v27  ;;  %v19312_v58 = vld [vmem:[#allocation64_spill] sm:$0xff] }
 0x555   :  { %6009 = vadd.xlane.f32.xlu0 %v6008_v51  ;;  %6006 = vadd.xlane.f32.xlu1 %v6005_v63  ;;  %v6415_v8 = vmul.f32 %v12517_v48, %v19308_v44  ;;  %v6014_v51 = vsel %vm149_vm0, %v15965_v24, 0.0  ;;  %v15983_v63 = vpop.eup %12518  ;;  %v19310_v44 = vld [vmem:[#allocation67_spill] sm:$0xff]  ;;  %v5738_v5 = vmul.f32 1.442695, %v5557_v10 }
 0x556   :  { %v15975_v56 = vpop.xlane.xlu0 %5304  ;;  %v5558_v48 = vsub.f32 %v19310_v44, %v15904_v35  ;;  %v15987_v32 = vpop.eup %12520  ;;  %v6017_v35 = vsel %vm149_vm0, %v15983_v63, 0.0  ;;  %12536 = vpow2.f32 %v5736_v45  ;;  %v19314_v45 = vld [vmem:[#allocation87_spill] sm:$0xff] }
 0x557   :  { %v15973_v50 = vpop.xlane.xlu1 %5307  ;;  %v6535_v2 = vpack.c.bf16 %v6415_v8, %v6414_v55  ;;  %v16001_v55 = vpop.eup %12522  ;;  %v6020_v4 = vsel %vm149_vm0, %v15987_v32, 0.0  ;;  %12538 = vpow2.f32 %v5738_v5 }
 0x558   :  { %v5740_v8 = vmul.f32 1.442695, %v5558_v48  ;;  %v16008_v27 = vpop.eup %12524  ;;  %v5562_v48 = vsub.f32 %v19314_v45, %v15935_v26  ;;  %v19317_v45 = vld [vmem:[#allocation51_spill] sm:$0xff] }
 0x559   :  { %6015 = vadd.xlane.f32.xlu0 %v6014_v51  ;;  %6012 = vadd.xlane.f32.xlu1 %v6011_v34  ;;  %v19313_v34 = vld [vmem:[#allocation54_spill] sm:$0xff]  ;;  %v16018_v59 = vpop.eup %12526 }
 0x55a   :  { %11905 = vmatmul.mubr.msk.bf16.vlgmr.msra.gmra.mxu0 %vm149_vm0, %v6535_v2  ;;  %v15990_v60 = vpop.xlane.xlu0 %5310  ;;  %v5560_v51 = vsub.f32 %v19313_v34, %v15920_v22  ;;  %v5742_v2 = vmul.f32 1.442695, %v5559_v47  ;;  %v6023_v22 = vsel %vm149_vm0, %v16001_v55, 0.0  ;;  %12540 = vpow2.f32 %v5740_v8  ;;  %v19315_v34 = vld [vmem:[#allocation56_spill] sm:$0xff] }
 0x55b   :  { %v15992_v49 = vpop.xlane.xlu1 %5313  ;;  %11915 = vmatpush3.bf16.msra.mxu0 %v19312_v58  ;;  %11916 = vmatprep.mubr.msk.bf16.mxu0 %vm12946_vm1, %v19050_v38  ;;  %v16024_v62 = vpop.eup %12528  ;;  %v5748_v47 = vmul.f32 1.442695, %v5562_v48  ;;  %v5563_v8 = vsub.f32 %v19317_v45, %v15957_v0 }
 0x55c   :  { %11926 = vmatprep.subr.bf16.mxu0 %v19050_v38  ;;  %v5744_v58 = vmul.f32 1.442695, %v5560_v51  ;;  %19316 = vst [vmem:[#allocation91_spill] sm:$0xff] %v16024_v62  ;;  %12542 = vpow2.f32 %v5742_v2  ;;  %v6029_v51 = vsel %vm149_vm0, %v16018_v59, 0.0 }
 0x55d   :  { %6021 = vadd.xlane.f32.xlu0 %v6020_v4  ;;  %6018 = vadd.xlane.f32.xlu1 %v6017_v35  ;;  %v5561_v4 = vsub.f32 %v19315_v34, %v15937_v28  ;;  %v6026_v35 = vsel %vm149_vm0, %v16008_v27, 0.0  ;;  %v16034_v28 = vpop.eup %12530  ;;  %v5750_v48 = vmul.f32 1.442695, %v5563_v8 }
 0x55e   :  { %v16012_v44 = vpop.xlane.xlu0 %5316  ;;  %19318 = vst [vmem:[#allocation81_spill] sm:$0xff] %v16034_v28  ;;  %12544 = vpow2.f32 %v5744_v58  ;;  %v6035_v58 = vsel %vm149_vm0, %v16034_v28, 0.0 }
 0x55f   :  { %v16010_v10 = vpop.xlane.xlu1 %5319  ;;  %v5746_v34 = vmul.f32 1.442695, %v5561_v4  ;;  %12546 = vpow2.f32 %v5748_v47 }
 0x560   :  { %v16040_v12 = vpop.eup %12532 }
 0x561   :  { %6027 = vadd.xlane.f32.xlu0 %v6026_v35  ;;  %6024 = vadd.xlane.f32.xlu1 %v6023_v22  ;;  %v5564_v35 = vsub.f32 %v19319_v3, %v15959_v33  ;;  %v6032_v22 = vsel %vm149_vm0, %v16024_v62, 0.0  ;;  %19320 = vst [vmem:[#allocation72_spill] sm:$0xff] %v16040_v12  ;;  %v16048_v4 = vpop.eup %12534  ;;  %12548 = vpow2.f32 %v5746_v34  ;;  %v19322_v33 = vld [vmem:[#allocation88_spill] sm:$0xff] }
 0x562   :  { %v16026_v5 = vpop.xlane.xlu0 %5322  ;;  %19321 = vst [vmem:[#allocation2_spill] sm:$0xff] %v16048_v4  ;;  %v5565_v45 = vsub.f32 %v19322_v33, %v15975_v56  ;;  %12550 = vpow2.f32 %v5750_v48  ;;  %v6041_v56 = vsel %vm149_vm0, %v16048_v4, 0.0  ;;  %v19327_v48 = vld [vmem:[#allocation79_spill] sm:$0xff] }
 0x563   :  { %v16028_v26 = vpop.xlane.xlu1 %5325  ;;  %v5752_v3 = vmul.f32 1.442695, %v5564_v35 }
 0x564   :  { %v5754_v34 = vmul.f32 1.442695, %v5565_v45 }
 0x565   :  { %6033 = vadd.xlane.f32.xlu0 %v6032_v22  ;;  %6030 = vadd.xlane.f32.xlu1 %v6029_v51  ;;  %v6038_v22 = vsel %vm149_vm0, %v16040_v12, 0.0  ;;  %v16054_v51 = vpop.eup %12536  ;;  %12552 = vpow2.f32 %v5752_v3  ;;  %v5566_v12 = vsub.f32 %v19327_v48, %v15973_v50  ;;  %v19332_v50 = vld [vmem:[#allocation62_spill] sm:$0xff] }
 0x566   :  { %v16044_v0 = vpop.xlane.xlu0 %5328  ;;  %19323 = vst [vmem:[#allocation70_spill] sm:$0xff] %v16054_v51  ;;  %v16060_v8 = vpop.eup %12538  ;;  %v6044_v35 = vsel %vm149_vm0, %v16054_v51, 0.0  ;;  %12554 = vpow2.f32 %v5754_v34  ;;  %v5567_v48 = vsub.f32 %v19332_v50, %v15990_v60  ;;  %v19334_v34 = vld [vmem:[#allocation92_spill] sm:$0xff] }
 0x567   :  { %v16042_v2 = vpop.xlane.xlu1 %5331  ;;  %19324 = vst [vmem:[#allocation99_spill] sm:$0xff] %v16060_v8  ;;  %v16066_v33 = vpop.eup %12540  ;;  %v6047_v45 = vsel %vm149_vm0, %v16060_v8, 0.0 }
 0x568   :  { %19325 = vst [vmem:[#allocation59_spill] sm:$0xff] %v16066_v33  ;;  %v6050_v3 = vsel %vm149_vm0, %v16066_v33, 0.0  ;;  %v5568_v33 = vsub.f32 %v19334_v34, %v15992_v49  ;;  %v5758_v60 = vmul.f32 1.442695, %v5567_v48  ;;  %v19335_v49 = vld [vmem:[#allocation97_spill] sm:$0xff] }
 0x569   :  { %6039 = vadd.xlane.f32.xlu0 %v6038_v22  ;;  %6036 = vadd.xlane.f32.xlu1 %v6035_v58  ;;  %v16074_v28 = vpop.eup %12542  ;;  %v5569_v34 = vsub.f32 %v19335_v49, %v16012_v44 }
 0x56a   :  { %v16056_v62 = vpop.xlane.xlu0 %5334  ;;  %19328 = vst [vmem:[#allocation46_spill] sm:$0xff] %v16074_v28 }
 0x56b   :  { %v16058_v47 = vpop.xlane.xlu1 %5337  ;;  %v16080_v51 = vpop.eup %12544  ;;  %v5762_v48 = vmul.f32 1.442695, %v5569_v34 }
 0x56c   :  { %19329 = vst [vmem:[#allocation71_spill] sm:$0xff] %v16080_v51  ;;  %v16088_v4 = vpop.eup %12546  ;;  %v6056_v8 = vsel %vm149_vm0, %v16080_v51, 0.0 }
 0x56d   :  { %6045 = vadd.xlane.f32.xlu0 %v6044_v35  ;;  %6042 = vadd.xlane.f32.xlu1 %v6041_v56  ;;  %19333 = vst [vmem:[#allocation40_spill] sm:$0xff] %v16088_v4  ;;  %v6062_v51 = vsel %vm149_vm0, %v16088_v4, 0.0 }
 0x56e   :  { %v16070_v22 = vpop.xlane.xlu0 %5340 }
 0x56f   :  { %v16068_v58 = vpop.xlane.xlu1 %5355 }
 0x570   :  { %19326 = vst [vmem:[#allocation38_spill] sm:$0xff] %v16068_v58  ;;  %v5756_v58 = vmul.f32 1.442695, %v5566_v12 }
 0x571   :  { %6051 = vadd.xlane.f32.xlu0 %v6050_v3  ;;  %6048 = vadd.xlane.f32.xlu1 %v6047_v45  ;;  %v6053_v3 = vsel %vm149_vm0, %v16074_v28, 0.0  ;;  %v16096_v45 = vpop.eup %12548 }
 0x572   :  { %v16082_v35 = vpop.xlane.xlu0 %5343  ;;  %12556 = vpow2.f32 %v5756_v58  ;;  %v16102_v50 = vpop.eup %12550  ;;  %v6059_v28 = vsel %vm149_vm0, %v16096_v45, 0.0 }
 0x573   :  { %19330 = vst [vmem:[#allocation75_spill] sm:$0xff] %v16082_v35  ;;  %v16084_v56 = vpop.xlane.xlu1 %5361  ;;  %v5760_v35 = vmul.f32 1.442695, %v5568_v33  ;;  %12558 = vpow2.f32 %v5758_v60  ;;  %v6065_v44 = vsel %vm149_vm0, %v16102_v50, 0.0 }
 0x574   :  { %19331 = vst [vmem:[#allocation77_spill] sm:$0xff] %v16084_v56 }
 0x575   :  { %6057 = vadd.xlane.f32.xlu0 %v6056_v8  ;;  %6054 = vadd.xlane.f32.xlu1 %v6053_v3  ;;  %v16110_v8 = vpop.eup %12552  ;;  %12560 = vpow2.f32 %v5760_v35 }
 0x576   :  { %v16098_v56 = vpop.xlane.xlu0 %5349  ;;  %19336 = vst [vmem:[#allocation44_spill] sm:$0xff] %v16110_v8  ;;  %v6068_v33 = vsel %vm149_vm0, %v16110_v8, 0.0  ;;  %v16118_v49 = vpop.eup %12554  ;;  %12562 = vpow2.f32 %v5762_v48  ;;  %v5444_v48 = vsel %vm149_vm0, %v15661_v61, -inf }
 0x577   :  { %v16100_v12 = vpop.xlane.xlu1 %5364  ;;  %19337 = vst [vmem:[#allocation73_spill] sm:$0xff] %v16118_v49  ;;  %v6071_v35 = vsel %vm149_vm0, %v16118_v49, 0.0 }
 0x579   :  { %6063 = vadd.xlane.f32.xlu0 %v6062_v51  ;;  %6060 = vadd.xlane.f32.xlu1 %v6059_v28  ;;  %v5441_v28 = vsel %vm149_vm0, %v15637_v39, -inf }
 0x57a   :  { %v16112_v3 = vpop.xlane.xlu0 %5346 }
 0x57b   :  { %v5938_v58 = vpop.xlane.xlu1 %5937 }
 0x57c   :  { %12564 = vrcp.f32 %v5938_v58 }
 0x57d   :  { %6069 = vadd.xlane.f32.xlu0 %v6068_v33  ;;  %6066 = vadd.xlane.f32.xlu1 %v6065_v44  ;;  %v5438_v33 = vsel %vm149_vm0, %v15623_v53, -inf }
 0x57e   :  { %v16120_v4 = vpop.xlane.xlu0 %5352 }
 0x57f   :  { %v16122_v51 = vpop.xlane.xlu1 %5367  ;;  %v16132_v8 = vpop.eup %12556 }
 0x580   :  { %19338 = vst [vmem:[#allocation58_spill] sm:$0xff] %v16122_v51  ;;  %19340 = vst [vmem:[#allocation80_spill] sm:$0xff] %v16132_v8 }
 0x581   :  { %5442 = vmax.xlane.f32.xlu0 %v5441_v28  ;;  %6072 = vadd.xlane.f32.xlu1 %v6071_v35  ;;  %v16140_v28 = vpop.eup %12558  ;;  %v6074_v35 = vsel %vm149_vm0, %v16132_v8, 0.0 }
 0x582   :  { %v16128_v60 = vpop.xlane.xlu0 %5358  ;;  %19342 = vst [vmem:[#allocation53_spill] sm:$0xff] %v16140_v28  ;;  %v16146_v51 = vpop.eup %12560  ;;  %v6077_v58 = vsel %vm149_vm0, %v16140_v28, 0.0 }
 0x583   :  { %v16130_v34 = vpop.xlane.xlu1 %5373  ;;  %19343 = vst [vmem:[#allocation83_spill] sm:$0xff] %v16146_v51  ;;  %v16154_v61 = vpop.eup %12562 }
 0x584   :  { %19339 = vst [vmem:[#allocation50_spill] sm:$0xff] %v16130_v34  ;;  %v5447_v34 = vsel %vm149_vm0, %v15677_v41, -inf  ;;  %19345 = vst [vmem:[#allocation74_spill] sm:$0xff] %v16154_v61 }
 0x585   :  { %5439 = vmax.xlane.f32.xlu1 %v5438_v33  ;;  %5445 = vmax.xlane.f32.xlu0 %v5444_v48  ;;  %v6080_v48 = vsel %vm149_vm0, %v16146_v51, 0.0 }
 0x586   :  { %v5941_v44 = vpop.xlane.xlu0 %5940 }
 0x587   :  { %v16138_v39 = vpop.xlane.xlu1 %5376  ;;  %12566 = vrcp.f32 %v5941_v44 }
 0x588   :  { %19341 = vst [vmem:[#allocation84_spill] sm:$0xff] %v16138_v39 }
 0x589   :  { %6075 = vadd.xlane.f32.xlu0 %v6074_v35  ;;  %5448 = vmax.xlane.f32.xlu1 %v5447_v34  ;;  %v6083_v34 = vsel %vm149_vm0, %v16154_v61, 0.0  ;;  %v12565_v51 = vpop.eup %12564 }
 0x58a   :  { %v16148_v53 = vpop.xlane.xlu0 %5370 }
 0x58b   :  { %19344 = vst [vmem:[#allocation41_spill] sm:$0xff] %v16148_v53  ;;  %v5944_v33 = vpop.xlane.xlu1 %5943 }
 0x58c   :  { %12568 = vrcp.f32 %v5944_v33 }
 0x58d   :  { %6081 = vadd.xlane.f32.xlu0 %v6080_v48  ;;  %6078 = vadd.xlane.f32.xlu1 %v6077_v58  ;;  %v6416_v48 = vmul.f32 %v12565_v51, %v15564_v54 }
 0x58e   :  { %v16158_v41 = vpop.xlane.xlu0 %5385 }
 0x58f   :  { %v16156_v8 = vpop.xlane.xlu1 %5379  ;;  %19347 = vst [vmem:[#allocation60_spill] sm:$0xff] %v16158_v41 }
 0x590   :  { %19346 = vst [vmem:[#allocation63_spill] sm:$0xff] %v16156_v8 }
 0x591   :  { %6084 = vadd.xlane.f32.xlu1 %v6083_v34  ;;  %v19352_v34 = vld [vmem:[#allocation69_spill] sm:$0xff] }
 0x592   :  { %v5947_v44 = vpop.xlane.xlu0 %5946 }
 0x593   :  { %v16162_v35 = vpop.xlane.xlu1 %5388  ;;  %12570 = vrcp.f32 %v5947_v44 }
 0x594   :  { %19348 = vst [vmem:[#allocation42_spill] sm:$0xff] %v16162_v35  ;;  %v12567_v39 = vpop.eup %12566 }
 0x595   :  { %v6417_v58 = vmul.f32 %v12567_v39, %v15598_v11 }
 0x596   :  { %v16164_v28 = vpop.xlane.xlu0 %5382 }
 0x597   :  { %19349 = vst [vmem:[#allocation94_spill] sm:$0xff] %v16164_v28  ;;  %v5950_v53 = vpop.xlane.xlu1 %5949  ;;  %v6536_v8 = vpack.c.bf16 %v6417_v58, %v6416_v48  ;;  %v19355_v48 = vld [vmem:[#allocation39_spill] sm:$0xff] }
 0x598   :  { %12572 = vrcp.f32 %v5950_v53 }
 0x599   :  { %11911 = vmatmul.mubr.msk.bf16.vlgmr.msra.gmra.mxu1 %vm149_vm0, %v6536_v8  ;;  %v12569_v54 = vpop.eup %12568  ;;  %v19356_v8 = vld [vmem:[#allocation138_spill] sm:$0xff] }
 0x59a   :  { %v16170_v49 = vpop.xlane.xlu0 %5397  ;;  %11921 = vmatpush3.bf16.msra.mxu1 %v19352_v34  ;;  %11922 = vmatprep.mubr.msk.bf16.mxu1 %vm12946_vm1, %v19050_v38  ;;  %v6418_v58 = vmul.f32 %v12569_v54, %v19356_v8  ;;  %v19357_v34 = vld [vmem:[#allocation143_spill] sm:$0xff] }
 0x59b   :  { %v16168_v41 = vpop.xlane.xlu1 %5391  ;;  %19351 = vst [vmem:[#allocation47_spill] sm:$0xff] %v16170_v49  ;;  %11932 = vmatprep.subr.bf16.mxu1 %v19050_v38 }
 0x59c   :  { %19350 = vst [vmem:[#allocation98_spill] sm:$0xff] %v16168_v41  ;;  %v19358_v41 = vld [vmem:[#allocation37_spill] sm:$0xff] }
 0x59e   :  { %v5953_v33 = vpop.xlane.xlu0 %5952 }
 0x59f   :  { %v16177_v44 = vpop.xlane.xlu1 %5400  ;;  %12574 = vrcp.f32 %v5953_v33  ;;  %v19361_v33 = vld [vmem:[#allocation95_spill] sm:$0xff] }
 0x5a0   :  { %19353 = vst [vmem:[#allocation67_spill] sm:$0xff] %v16177_v44  ;;  %v12571_v39 = vpop.eup %12570 }
 0x5a1   :  { %v6419_v49 = vmul.f32 %v12571_v39, %v19357_v34 }
 0x5a2   :  { %v16179_v11 = vpop.xlane.xlu0 %5394  ;;  %1996 = vrot.lane.b32.xlu1 %v19355_v48, %s12950_s28 }
 0x5a3   :  { %19354 = vst [vmem:[#allocation100_spill] sm:$0xff] %v16179_v11  ;;  %v5956_v51 = vpop.xlane.xlu1 %5955  ;;  %1994 = vrot.lane.b32.xlu0 %v19358_v41, %s12950_s28  ;;  %v6537_v35 = vpack.c.bf16 %v6419_v49, %v6418_v58 }
 0x5a4   :  { %12576 = vrcp.f32 %v5956_v51 }
 0x5a5   :  { %11917 = vmatmul.mubr.msk.bf16.vlgmr.msra.gmra.mxu0 %vm149_vm0, %v6537_v35  ;;  %v12573_v39 = vpop.eup %12572 }
 0x5a6   :  { %v16189_v53 = vpop.xlane.xlu0 %5409  ;;  %11927 = vmatpush3.bf16.msra.mxu0 %v19361_v33  ;;  %11928 = vmatprep.mubr.msk.bf16.mxu0 %vm12946_vm1, %v19050_v38  ;;  %v19364_v33 = vld [vmem:[#allocation86_spill] sm:$0xff] }
 0x5a7   :  { %v16187_v28 = vpop.xlane.xlu1 %5403  ;;  %19360 = vst [vmem:[#allocation54_spill] sm:$0xff] %v16189_v53  ;;  %11938 = vmatprep.subr.bf16.mxu0 %v19050_v38  ;;  %v6420_v53 = vmul.f32 %v12573_v39, %v15657_v19  ;;  %v19367_v19 = vld [vmem:[#allocation105_spill] sm:$0xff] }
 0x5a8   :  { %19359 = vst [vmem:[#allocation64_spill] sm:$0xff] %v16187_v28  ;;  %v5570_v28 = vsub.f32 %v19364_v33, %v16010_v10 }
 0x5aa   :  { %v5959_v54 = vpop.xlane.xlu0 %5958  ;;  %v5764_v51 = vmul.f32 1.442695, %v5570_v28 }
 0x5ab   :  { %v16196_v8 = vpop.xlane.xlu1 %5412  ;;  %12578 = vrcp.f32 %v5959_v54  ;;  %v19365_v54 = vld [vmem:[#allocation90_spill] sm:$0xff] }
 0x5ac   :  { %19362 = vst [vmem:[#allocation87_spill] sm:$0xff] %v16196_v8  ;;  %v12575_v49 = vpop.eup %12574  ;;  %v5571_v8 = vsub.f32 %v19365_v54, %v16026_v5  ;;  %v19369_v5 = vld [vmem:[#allocation107_spill] sm:$0xff] }
 0x5ad   :  { %v6421_v35 = vmul.f32 %v12575_v49, %v15685_v18  ;;  %v5572_v18 = vsub.f32 %v19367_v19, %v16028_v26  ;;  %v5573_v49 = vsub.f32 %v19369_v5, %v16044_v0 }
 0x5ae   :  { %v16198_v58 = vpop.xlane.xlu0 %5406  ;;  %v5766_v28 = vmul.f32 1.442695, %v5571_v8 }
 0x5af   :  { %19363 = vst [vmem:[#allocation56_spill] sm:$0xff] %v16198_v58  ;;  %v5962_v34 = vpop.xlane.xlu1 %5961  ;;  %v6538_v44 = vpack.c.bf16 %v6421_v35, %v6420_v53  ;;  %v19366_v58 = vld [vmem:[#allocation89_spill] sm:$0xff] }
 0x5b0   :  { %12580 = vrcp.f32 %v5962_v34 }
 0x5b1   :  { %11923 = vmatmul.mubr.msk.bf16.vlgmr.msra.gmra.mxu1 %vm149_vm0, %v6538_v44  ;;  %v12577_v39 = vpop.eup %12576  ;;  %12582 = vpow2.f32 %v5764_v51  ;;  %v5768_v44 = vmul.f32 1.442695, %v5572_v18  ;;  %v5770_v51 = vmul.f32 1.442695, %v5573_v49 }
 0x5b2   :  { %v16206_v61 = vpop.xlane.xlu0 %5421  ;;  %11933 = vmatpush3.bf16.msra.mxu1 %v19366_v58  ;;  %11934 = vmatprep.mubr.msk.bf16.mxu1 %vm12946_vm1, %v19050_v38  ;;  %v6422_v26 = vmul.f32 %v12577_v39, %v15704_v21  ;;  %v19373_v21 = vld [vmem:[#allocation101_spill] sm:$0xff]  ;;  %v19374_v39 = vld [vmem:[#allocation147_spill] sm:$0xff] }
 0x5b3   :  { %v16204_v11 = vpop.xlane.xlu1 %5415  ;;  %11944 = vmatprep.subr.bf16.mxu1 %v19050_v38 }
 0x5b6   :  { %v5965_v10 = vpop.xlane.xlu0 %5964 }
 0x5b7   :  { %v16217_v53 = vpop.xlane.xlu1 %5424  ;;  %12584 = vrcp.f32 %v5965_v10 }
 0x5b8   :  { %19368 = vst [vmem:[#allocation51_spill] sm:$0xff] %v16217_v53  ;;  %v12579_v58 = vpop.eup %12578  ;;  %12586 = vpow2.f32 %v5766_v28  ;;  %v5453_v28 = vsel %vm149_vm0, %v19374_v39, -inf }
 0x5b9   :  { %v6423_v54 = vmul.f32 %v12579_v58, %v15728_v9  ;;  %12588 = vpow2.f32 %v5768_v44 }
 0x5ba   :  { %v16221_v35 = vpop.f32.mrf.mxu1  ;;  %v16223_v33 = vpop.xlane.xlu0 %5418  ;;  %12590 = vpow2.f32 %v5770_v51 }
 0x5bb   :  { %19370 = vst [vmem:[#allocation82_spill] sm:$0xff] %v16221_v35  ;;  %v5968_v19 = vpop.xlane.xlu1 %5967  ;;  %v6539_v8 = vpack.c.bf16 %v6423_v54, %v6422_v26  ;;  %v19376_v26 = vld [vmem:[#allocation145_spill] sm:$0xff]  ;;  %v5459_v35 = vsel %vm149_vm0, %v15710_v57, -inf }
 0x5bc   :  { %v11864_v34 = vpop.f32.mrf.mxu1  ;;  %12592 = vrcp.f32 %v5968_v19  ;;  %v5450_v54 = vsel %vm149_vm0, %v19376_v26, -inf }
 0x5bd   :  { %11929 = vmatmul.mubr.msk.bf16.vlgmr.msra.gmra.mxu0 %vm149_vm0, %v6539_v8  ;;  %v12581_v49 = vpop.eup %12580  ;;  %v5456_v34 = vsel %vm149_vm0, %v15691_v36, -inf }
 0x5be   :  { %v16227_v18 = vpop.f32.mrf.mxu1  ;;  %v16229_v53 = vpop.xlane.xlu0 %5433  ;;  %11939 = vmatpush3.bf16.msra.mxu0 %v19373_v21  ;;  %11940 = vmatprep.mubr.msk.bf16.mxu0 %vm12946_vm1, %v19050_v38  ;;  %v6424_v21 = vmul.f32 %v12581_v49, %v15751_v14 }
 0x5bf   :  { %19371 = vst [vmem:[#allocation88_spill] sm:$0xff] %v16227_v18  ;;  %v16234_v10 = vpop.xlane.xlu1 %5427  ;;  %11950 = vmatprep.subr.bf16.mxu0 %v19050_v38  ;;  %v16244_v58 = vpop.eup %12582 }
 0x5c0   :  { %19372 = vst [vmem:[#allocation79_spill] sm:$0xff] %v16234_v10  ;;  %v11865_v9 = vpop.f32.mrf.mxu1  ;;  %v19380_v10 = vld [vmem:[#allocation52_spill] sm:$0xff] }
 0x5c2   :  { %v5971_v44 = vpop.xlane.xlu0 %5970  ;;  %5454 = vmax.xlane.f32.xlu0 %v5453_v28 }
 0x5c3   :  { %v16242_v5 = vpop.xlane.xlu1 %5436  ;;  %12594 = vrcp.f32 %v5971_v44  ;;  %v6086_v44 = vsel %vm149_vm0, %v16244_v58, 0.0 }
 0x5c4   :  { %19375 = vst [vmem:[#allocation62_spill] sm:$0xff] %v16242_v5  ;;  %v12585_v51 = vpop.eup %12584 }
 0x5c5   :  { %v6425_v19 = vmul.f32 %v12585_v51, %v15783_v16  ;;  %v16254_v28 = vpop.eup %12586  ;;  %v19377_v16 = vld [vmem:[#allocation49_spill] sm:$0xff] }
 0x5c6   :  { %v16250_v8 = vpop.xlane.xlu0 %5430  ;;  %5451 = vmax.xlane.f32.xlu1 %v5450_v54  ;;  %5457 = vmax.xlane.f32.xlu0 %v5456_v34  ;;  %v16260_v18 = vpop.eup %12588  ;;  %v6089_v54 = vsel %vm149_vm0, %v16254_v28, 0.0 }
 0x5c7   :  { %v5974_v9 = vpop.xlane.xlu1 %5973  ;;  %v6540_v0 = vpack.c.bf16 %v6425_v19, %v6424_v21  ;;  %v6092_v49 = vsel %vm149_vm0, %v16260_v18, 0.0  ;;  %v16271_v34 = vpop.eup %12590 }
 0x5c8   :  { %12596 = vrcp.f32 %v5974_v9 }
 0x5c9   :  { %11935 = vmatmul.mubr.msk.bf16.vlgmr.msra.gmra.mxu1 %vm149_vm0, %v6540_v0  ;;  %v12593_v51 = vpop.eup %12592 }
 0x5ca   :  { %v5977_v36 = vpop.xlane.xlu0 %5976  ;;  %6087 = vadd.xlane.f32.xlu0 %v6086_v44  ;;  %5460 = vmax.xlane.f32.xlu1 %v5459_v35  ;;  %v6426_v44 = vmul.f32 %v12593_v51, %v15797_v43 }
 0x5cb   :  { %v5980_v14 = vpop.xlane.xlu1 %5979  ;;  %11945 = vmatpush3.bf16.msra.mxu1 %v19377_v16  ;;  %12598 = vrcp.f32 %v5977_v36  ;;  %11946 = vmatprep.mubr.msk.bf16.mxu1 %vm12946_vm1, %v19050_v38  ;;  %v6095_v36 = vsel %vm149_vm0, %v16271_v34, 0.0 }
 0x5cc   :  { %11956 = vmatprep.subr.bf16.mxu1 %v19050_v38  ;;  %12600 = vrcp.f32 %v5980_v14 }
 0x5ce   :  { %v5986_v35 = vpop.xlane.xlu0 %5985  ;;  %6093 = vadd.xlane.f32.xlu0 %v6092_v49  ;;  %6090 = vadd.xlane.f32.xlu1 %v6089_v54 }
 0x5cf   :  { %v5992_v0 = vpop.xlane.xlu1 %5991 }
 0x5d0   :  { %v12595_v21 = vpop.eup %12594 }
 0x5d1   :  { %v6427_v16 = vmul.f32 %v12595_v21, %v15830_v30 }
 0x5d2   :  { %v16275_v19 = vpop.f32.mrf.mxu0  ;;  %v5983_v9 = vpop.xlane.xlu0 %5982  ;;  %6096 = vadd.xlane.f32.xlu1 %v6095_v36 }
 0x5d3   :  { %19378 = vst [vmem:[#allocation92_spill] sm:$0xff] %v16275_v19  ;;  %12602 = vrcp.f32 %v5983_v9  ;;  %v5998_v57 = vpop.xlane.xlu1 %5997  ;;  %v6541_v49 = vpack.c.bf16 %v6427_v16, %v6426_v44 }
 0x5d4   :  { %v11870_v26 = vpop.f32.mrf.mxu0  ;;  %12604 = vrcp.f32 %v5986_v35 }
 0x5d5   :  { %v12597_v39 = vpop.eup %12596  ;;  %11941 = vmatmul.mubr.msk.bf16.vlgmr.msra.gmra.mxu0 %vm149_vm0, %v6541_v49  ;;  %v19382_v49 = vld [vmem:[#allocation76_spill] sm:$0xff] }
 0x5d6   :  { %v16279_v54 = vpop.f32.mrf.mxu0  ;;  %v5989_v14 = vpop.xlane.xlu0 %5988  ;;  %11951 = vmatpush3.bf16.msra.mxu0 %v19380_v10  ;;  %11952 = vmatprep.mubr.msk.bf16.mxu0 %vm12946_vm1, %v19050_v38  ;;  %v6428_v26 = vmul.f32 %v12597_v39, %v15849_v15 }
 0x5d7   :  { %19379 = vst [vmem:[#allocation97_spill] sm:$0xff] %v16279_v54  ;;  %12606 = vrcp.f32 %v5989_v14  ;;  %v5995_v36 = vpop.xlane.xlu1 %5994  ;;  %11962 = vmatprep.subr.bf16.mxu0 %v19050_v38  ;;  %v19433_v54 = vld [vmem:[#allocation43_spill] sm:$0xff] }
 0x5d8   :  { %12608 = vrcp.f32 %v5995_v36  ;;  %v11871_v43 = vpop.f32.mrf.mxu0  ;;  %v12599_v30 = vpop.eup %12598 }
 0x5d9   :  { %12610 = vrcp.f32 %v5992_v0  ;;  %v6429_v35 = vmul.f32 %v12599_v30, %v15851_v31  ;;  %v12601_v44 = vpop.eup %12600 }
 0x5da   :  { %v6004_v51 = vpop.xlane.xlu0 %6003  ;;  %v6430_v39 = vmul.f32 %v12601_v44, %v15859_v37 }
 0x5db   :  { %v6001_v21 = vpop.xlane.xlu1 %6000  ;;  %v6542_v9 = vpack.c.bf16 %v6429_v35, %v6428_v26 }
 0x5dc   :  { %12612 = vrcp.f32 %v6001_v21 }
 0x5dd   :  { %12614 = vrcp.f32 %v5998_v57  ;;  %11947 = vmatmul.mubr.msk.bf16.vlgmr.msra.gmra.mxu1 %vm149_vm0, %v6542_v9 }
 0x5de   :  { %v16290_v10 = vpop.f32.mrf.mxu1  ;;  %v6010_v16 = vpop.xlane.xlu0 %6009  ;;  %11957 = vmatpush3.bf16.msra.mxu1 %v19382_v49  ;;  %11958 = vmatprep.mubr.msk.bf16.mxu1 %vm12946_vm1, %v19050_v38  ;;  %v19384_v49 = vld [vmem:[#allocation66_spill] sm:$0xff] }
 0x5df   :  { %19381 = vst [vmem:[#allocation69_spill] sm:$0xff] %v16290_v10  ;;  %v6007_v0 = vpop.xlane.xlu1 %6006  ;;  %11968 = vmatprep.subr.bf16.mxu1 %v19050_v38 }
 0x5e0   :  { %v12603_v15 = vpop.eup %12602  ;;  %12616 = vrcp.f32 %v6007_v0  ;;  %v11876_v31 = vpop.f32.mrf.mxu1 }
 0x5e1   :  { %v6431_v57 = vmul.f32 %v12603_v15, %v15891_v46  ;;  %12618 = vrcp.f32 %v6004_v51  ;;  %v12605_v14 = vpop.eup %12604 }
 0x5e2   :  { %v16299_v36 = vpop.f32.mrf.mxu1  ;;  %v6016_v43 = vpop.xlane.xlu0 %6015  ;;  %v6432_v46 = vmul.f32 %v12605_v14, %v15877_v6  ;;  %v19386_v14 = vld [vmem:[#allocation93_spill] sm:$0xff] }
 0x5e3   :  { %19383 = vst [vmem:[#allocation39_spill] sm:$0xff] %v16299_v36  ;;  %v6013_v26 = vpop.xlane.xlu1 %6012  ;;  %2000 = vrot.lane.b32.xlu1 %v19268_v25, %s12950_s28  ;;  %v6543_v35 = vpack.c.bf16 %v6431_v57, %v6430_v39 }
 0x5e4   :  { %v12607_v21 = vpop.eup %12606  ;;  %12620 = vrcp.f32 %v6013_v26  ;;  %v11877_v9 = vpop.f32.mrf.mxu1  ;;  %1998 = vrot.lane.b32.xlu0 %v19261_v42, %s12950_s28 }
 0x5e5   :  { %v12609_v37 = vpop.eup %12608  ;;  %v6433_v51 = vmul.f32 %v12607_v21, %v15902_v1  ;;  %12622 = vrcp.f32 %v6010_v16  ;;  %11953 = vmatmul.mubr.msk.bf16.vlgmr.msra.gmra.mxu0 %vm149_vm0, %v6543_v35 }
 0x5e6   :  { %v12611_v44 = vpop.eup %12610  ;;  %11963 = vmatpush3.bf16.msra.mxu0 %v19384_v49  ;;  %v6022_v0 = vpop.xlane.xlu0 %6021  ;;  %11964 = vmatprep.mubr.msk.bf16.mxu0 %vm12946_vm1, %v19050_v38  ;;  %v6435_v15 = vmul.f32 %v12609_v37, %v15910_v23  ;;  %v19389_v49 = vld [vmem:[#allocation85_spill] sm:$0xff] }
 0x5e7   :  { %v6019_v31 = vpop.xlane.xlu1 %6018  ;;  %v6544_v39 = vpack.c.bf16 %v6433_v51, %v6432_v46  ;;  %11974 = vmatprep.subr.bf16.mxu0 %v19050_v38  ;;  %v6434_v1 = vmul.f32 %v12611_v44, %v15881_v17  ;;  %v19387_v46 = vld [vmem:[#allocation96_spill] sm:$0xff] }
 0x5e8   :  { %12624 = vrcp.f32 %v6019_v31  ;;  %v5574_v51 = vsub.f32 %v19387_v46, %v16042_v2 }
 0x5e9   :  { %v12613_v6 = vpop.eup %12612  ;;  %12626 = vrcp.f32 %v6016_v43  ;;  %11959 = vmatmul.mubr.msk.bf16.vlgmr.msra.gmra.mxu1 %vm149_vm0, %v6544_v39  ;;  %v6545_v21 = vpack.c.bf16 %v6435_v15, %v6434_v1 }
 0x5ea   :  { %v12615_v16 = vpop.eup %12614  ;;  %v16317_v57 = vpop.f32.mrf.mxu0  ;;  %11969 = vmatpush3.bf16.msra.mxu1 %v19386_v14  ;;  %11970 = vmatprep.mubr.msk.bf16.mxu1 %vm12946_vm1, %v19050_v38  ;;  %v6437_v23 = vmul.f32 %v12613_v6, %v15928_v20  ;;  %v19390_v6 = vld [vmem:[#allocation104_spill] sm:$0xff] }
 0x5eb   :  { %19385 = vst [vmem:[#allocation138_spill] sm:$0xff] %v16317_v57  ;;  %v6028_v26 = vpop.xlane.xlu0 %6027  ;;  %v6025_v35 = vpop.xlane.xlu1 %6024  ;;  %11980 = vmatprep.subr.bf16.mxu1 %v19050_v38  ;;  %v6436_v9 = vmul.f32 %v12615_v16, %v15900_v29  ;;  %v5575_v1 = vsub.f32 %v19390_v6, %v16056_v62  ;;  %v19424_v57 = vld [vmem:[#allocation48_spill] sm:$0xff] }
 0x5ec   :  { %12628 = vrcp.f32 %v6025_v35  ;;  %v11882_v17 = vpop.f32.mrf.mxu0  ;;  %v19391_v35 = vld [vmem:[#allocation109_spill] sm:$0xff] }
 0x5ed   :  { %v12617_v43 = vpop.eup %12616  ;;  %12630 = vrcp.f32 %v6022_v0  ;;  %11965 = vmatmul.mubr.msk.bf16.vlgmr.msra.gmra.mxu0 %vm149_vm0, %v6545_v21  ;;  %v6546_v31 = vpack.c.bf16 %v6437_v23, %v6436_v9  ;;  %v5576_v21 = vsub.f32 %v19391_v35, %v16058_v47  ;;  %v19392_v17 = vld [vmem:[#allocation103_spill] sm:$0xff] }
 0x5ee   :  { %v12619_v37 = vpop.eup %12618  ;;  %v16328_v44 = vpop.f32.mrf.mxu0  ;;  %11975 = vmatpush3.bf16.msra.mxu0 %v19389_v49  ;;  %11976 = vmatprep.mubr.msk.bf16.mxu0 %vm12946_vm1, %v19050_v38  ;;  %v6439_v15 = vmul.f32 %v12617_v43, %v15946_v52  ;;  %v5772_v52 = vmul.f32 1.442695, %v5574_v51  ;;  %v19393_v51 = vld [vmem:[#allocation111_spill] sm:$0xff] }
 0x5ef   :  { %19388 = vst [vmem:[#allocation143_spill] sm:$0xff] %v16328_v44  ;;  %v6034_v20 = vpop.xlane.xlu0 %6033  ;;  %v6031_v0 = vpop.xlane.xlu1 %6030  ;;  %11986 = vmatprep.subr.bf16.mxu0 %v19050_v38  ;;  %v6438_v16 = vmul.f32 %v12619_v37, %v15932_v13  ;;  %v5776_v46 = vmul.f32 1.442695, %v5576_v21  ;;  %v5577_v49 = vsub.f32 %v19393_v51, %v16070_v22 }
 0x5f0   :  { %12632 = vrcp.f32 %v6031_v0  ;;  %v11883_v39 = vpop.f32.mrf.mxu0 }
 0x5f1   :  { %v12621_v2 = vpop.eup %12620  ;;  %12634 = vrcp.f32 %v6028_v26  ;;  %11971 = vmatmul.mubr.msk.bf16.vlgmr.msra.gmra.mxu1 %vm149_vm0, %v6546_v31  ;;  %v6547_v9 = vpack.c.bf16 %v6439_v15, %v6438_v16  ;;  %v5774_v26 = vmul.f32 1.442695, %v5575_v1  ;;  %v5778_v1 = vmul.f32 1.442695, %v5577_v49 }
 0x5f2   :  { %v12623_v14 = vpop.eup %12622  ;;  %11981 = vmatpush3.bf16.msra.mxu1 %v19392_v17  ;;  %11982 = vmatprep.mubr.msk.bf16.mxu1 %vm12946_vm1, %v19050_v38  ;;  %v6441_v43 = vmul.f32 %v12621_v2, %v15955_v40  ;;  %v19395_v40 = vld [vmem:[#allocation102_spill] sm:$0xff] }
 0x5f3   :  { %v16344_v23 = vpop.xlane.xlu0 %6039  ;;  %v6037_v62 = vpop.xlane.xlu1 %6036  ;;  %11992 = vmatprep.subr.bf16.mxu1 %v19050_v38  ;;  %v6440_v37 = vmul.f32 %v12623_v14, %v15953_v7  ;;  %v19397_v14 = vld [vmem:[#allocation61_spill] sm:$0xff] }
 0x5f4   :  { %12636 = vrcp.f32 %v6037_v62 }
 0x5f5   :  { %v12625_v13 = vpop.eup %12624  ;;  %12638 = vrcp.f32 %v6034_v20  ;;  %11977 = vmatmul.mubr.msk.bf16.vlgmr.msra.gmra.mxu0 %vm149_vm0, %v6547_v9  ;;  %v6548_v31 = vpack.c.bf16 %v6441_v43, %v6440_v37 }
 0x5f6   :  { %v12627_v47 = vpop.eup %12626  ;;  %12640 = vpow2.f32 %v5772_v52  ;;  %v16354_v0 = vpop.f32.mrf.mxu1  ;;  %11987 = vmatpush3.bf16.msra.mxu0 %v19395_v40  ;;  %11988 = vmatprep.mubr.msk.bf16.mxu0 %vm12946_vm1, %v19050_v38  ;;  %v6443_v7 = vmul.f32 %v12625_v13, %v15983_v63  ;;  %v19398_v13 = vld [vmem:[#allocation55_spill] sm:$0xff]  ;;  %v19400_v40 = vld [vmem:[#allocation78_spill] sm:$0xff] }
 0x5f7   :  { %19394 = vst [vmem:[#allocation37_spill] sm:$0xff] %v16354_v0  ;;  %v16357_v15 = vpop.xlane.xlu0 %6045  ;;  %v16362_v20 = vpop.xlane.xlu1 %6042  ;;  %11998 = vmatprep.subr.bf16.mxu0 %v19050_v38  ;;  %12642 = vpow2.f32 %v5774_v26  ;;  %v6442_v22 = vmul.f32 %v12627_v47, %v15965_v24 }
 0x5f8   :  { %v11888_v39 = vpop.f32.mrf.mxu1  ;;  %12644 = vpow2.f32 %v5776_v46 }
 0x5f9   :  { %v12629_v2 = vpop.eup %12628  ;;  %11983 = vmatmul.mubr.msk.bf16.vlgmr.msra.gmra.mxu1 %vm149_vm0, %v6548_v31  ;;  %v6549_v21 = vpack.c.bf16 %v6443_v7, %v6442_v22  ;;  %12646 = vpow2.f32 %v5778_v1  ;;  %v19401_v31 = vld [vmem:[#allocation150_spill] sm:$0xff] }
 0x5fa   :  { %v12631_v6 = vpop.eup %12630  ;;  %v16367_v16 = vpop.f32.mrf.mxu1  ;;  %11993 = vmatpush3.bf16.msra.mxu1 %v19397_v14  ;;  %11994 = vmatprep.mubr.msk.bf16.mxu1 %vm12946_vm1, %v19050_v38  ;;  %v6445_v52 = vmul.f32 %v12629_v2, %v16001_v55  ;;  %v19402_v2 = vld [vmem:[#allocation81_spill] sm:$0xff]  ;;  %v19403_v14 = vld [vmem:[#allocation91_spill] sm:$0xff]  ;;  %12648 = vrcp.f32 %v16362_v20 }
 0x5fb   :  { %19396 = vst [vmem:[#allocation95_spill] sm:$0xff] %v16367_v16  ;;  %v16370_v63 = vpop.xlane.xlu0 %6051  ;;  %v6049_v24 = vpop.xlane.xlu1 %6048  ;;  %12004 = vmatprep.subr.bf16.mxu1 %v19050_v38  ;;  %v6444_v62 = vmul.f32 %v12631_v6, %v15987_v32  ;;  %12650 = vrcp.f32 %v16344_v23 }
 0x5fc   :  { %v11889_v17 = vpop.f32.mrf.mxu1  ;;  %12652 = vrcp.f32 %v6049_v24 }
 0x5fd   :  { %v12633_v43 = vpop.eup %12632  ;;  %11989 = vmatmul.mubr.msk.bf16.vlgmr.msra.gmra.mxu0 %vm149_vm0, %v6549_v21  ;;  %v6550_v47 = vpack.c.bf16 %v6445_v52, %v6444_v62  ;;  %12654 = vrcp.f32 %v16357_v15  ;;  %v19411_v15 = vld [vmem:[#allocation2_spill] sm:$0xff] }
 0x5fe   :  { %v12635_v9 = vpop.eup %12634  ;;  %11999 = vmatpush3.bf16.msra.mxu0 %v19398_v13  ;;  %12000 = vmatprep.mubr.msk.bf16.mxu0 %vm12946_vm1, %v19050_v38  ;;  %v6447_v55 = vmul.f32 %v12633_v43, %v16018_v59  ;;  %v5465_v59 = vsel %vm149_vm0, %v19401_v31, -inf }
 0x5ff   :  { %v16381_v26 = vpop.xlane.xlu0 %6057  ;;  %v16386_v37 = vpop.xlane.xlu1 %6054  ;;  %12010 = vmatprep.subr.bf16.mxu0 %v19050_v38  ;;  %v6446_v32 = vmul.f32 %v12635_v9, %v16008_v27  ;;  %v19405_v9 = vld [vmem:[#allocation149_spill] sm:$0xff] }
 0x600   :  { %v5462_v13 = vsel %vm149_vm0, %v19405_v9, -inf }
 0x601   :  { %v12637_v46 = vpop.eup %12636  ;;  %11995 = vmatmul.mubr.msk.bf16.vlgmr.msra.gmra.mxu1 %vm149_vm0, %v6550_v47  ;;  %v6551_v6 = vpack.c.bf16 %v6447_v55, %v6446_v32 }
 0x602   :  { %v12639_v51 = vpop.eup %12638  ;;  %v16391_v49 = vpop.f32.mrf.mxu0  ;;  %12005 = vmatpush3.bf16.msra.mxu1 %v19400_v40  ;;  %12006 = vmatprep.mubr.msk.bf16.mxu1 %vm12946_vm1, %v19050_v38  ;;  %v6449_v22 = vmul.f32 %v12637_v46, %v19402_v2 }
 0x603   :  { %19399 = vst [vmem:[#allocation86_spill] sm:$0xff] %v16391_v49  ;;  %v16394_v7 = vpop.xlane.xlu0 %6063  ;;  %v16400_v39 = vpop.eup %12640  ;;  %5466 = vmax.xlane.f32.xlu0 %v5465_v59  ;;  %12016 = vmatprep.subr.bf16.mxu1 %v19050_v38  ;;  %v6448_v52 = vmul.f32 %v12639_v51, %v19403_v14 }
 0x604   :  { %v16403_v27 = vpop.xlane.xlu1 %6060  ;;  %v11894_v1 = vpop.f32.mrf.mxu0  ;;  %v6098_v62 = vsel %vm149_vm0, %v16400_v39, 0.0 }
 0x605   :  { %12001 = vmatmul.mubr.msk.bf16.vlgmr.msra.gmra.mxu0 %vm149_vm0, %v6551_v6  ;;  %v16408_v21 = vpop.eup %12642  ;;  %v6552_v32 = vpack.c.bf16 %v6449_v22, %v6448_v52 }
 0x606   :  { %v16410_v17 = vpop.f32.mrf.mxu0  ;;  %12012 = vmatprep.mubr.msk.bf16.mxu0 %vm12946_vm1, %v19050_v38  ;;  %v16420_v55 = vpop.eup %12644  ;;  %v6101_v2 = vsel %vm149_vm0, %v16408_v21, 0.0 }
 0x607   :  { %19404 = vst [vmem:[#allocation90_spill] sm:$0xff] %v16410_v17  ;;  %v16412_v43 = vpop.xlane.xlu0 %6069  ;;  %6099 = vadd.xlane.f32.xlu0 %v6098_v62  ;;  %5463 = vmax.xlane.f32.xlu1 %v5462_v13  ;;  %v6104_v59 = vsel %vm149_vm0, %v16420_v55, 0.0  ;;  %v16437_v6 = vpop.eup %12646 }
 0x608   :  { %v16424_v46 = vpop.xlane.xlu1 %6066  ;;  %v11895_v51 = vpop.f32.mrf.mxu0  ;;  %v6107_v1 = vsel %vm149_vm0, %v16437_v6, 0.0 }
 0x609   :  { %12007 = vmatmul.mubr.msk.bf16.vlgmr.msra.gmra.mxu1 %vm149_vm0, %v6552_v32 }
 0x60a   :  { %12018 = vmatprep.mubr.msk.bf16.mxu1 %vm12946_vm1, %v19050_v38 }
 0x60b   :  { %v16429_v40 = vpop.xlane.xlu0 %5442  ;;  %6105 = vadd.xlane.f32.xlu0 %v6104_v59  ;;  %6102 = vadd.xlane.f32.xlu1 %v6101_v2  ;;  %v12649_v59 = vpop.eup %12648 }
 0x60c   :  { %v16439_v22 = vpop.xlane.xlu1 %6072  ;;  %v12651_v47 = vpop.eup %12650  ;;  %v6451_v29 = vmul.f32 %v12649_v59, %v19411_v15  ;;  %v19416_v59 = vld [vmem:[#allocation70_spill] sm:$0xff] }
 0x60e   :  { %v16441_v20 = vpop.f32.mrf.mxu1 }
 0x60f   :  { %19406 = vst [vmem:[#allocation89_spill] sm:$0xff] %v16441_v20  ;;  %v16443_v23 = vpop.xlane.xlu0 %5445  ;;  %6108 = vadd.xlane.f32.xlu1 %v6107_v1  ;;  %v12653_v1 = vpop.eup %12652 }
 0x610   :  { %19407 = vst [vmem:[#allocation105_spill] sm:$0xff] %v16443_v23  ;;  %v16448_v14 = vpop.xlane.xlu1 %5439  ;;  %v11900_v52 = vpop.f32.mrf.mxu1 }
 0x611   :  { %19408 = vst [vmem:[#allocation107_spill] sm:$0xff] %v16448_v14  ;;  %v19412_v52 = vld [vmem:[#allocation72_spill] sm:$0xff]  ;;  %v12655_v24 = vpop.eup %12654 }
 0x612   :  { %v16450_v62 = vpop.f32.mrf.mxu1  ;;  %v6450_v30 = vmul.f32 %v12651_v47, %v19412_v52  ;;  %v6452_v15 = vmul.f32 %v12655_v24, %v19416_v59  ;;  %v19420_v24 = vld [vmem:[#allocation106_spill] sm:$0xff] }
 0x613   :  { %19409 = vst [vmem:[#allocation101_spill] sm:$0xff] %v16450_v62  ;;  %v16452_v13 = vpop.xlane.xlu0 %6075  ;;  %v19414_v62 = vld [vmem:[#allocation99_spill] sm:$0xff] }
 0x614   :  { %v16456_v32 = vpop.xlane.xlu1 %5448  ;;  %v11901_v51 = vpop.f32.mrf.mxu1  ;;  %v6453_v0 = vmul.f32 %v12653_v1, %v19414_v62  ;;  %v19419_v62 = vld [vmem:[#allocation75_spill] sm:$0xff] }
 0x615   :  { %19410 = vst [vmem:[#allocation49_spill] sm:$0xff] %v16456_v32  ;;  %v6553_v51 = vpack.c.bf16 %v6451_v29, %v6450_v30  ;;  %v19417_v30 = vld [vmem:[#allocation68_spill] sm:$0xff]  ;;  %v19418_v29 = vld [vmem:[#allocation57_spill] sm:$0xff]  ;;  %v5578_v1 = vsub.f32 %v19420_v24, %v19419_v62  ;;  %v5471_v62 = vsel %vm149_vm0, %v19424_v57, -inf }
 0x617   :  { %v16458_v2 = vpop.xlane.xlu0 %6081 }
 0x618   :  { %v16460_v35 = vpop.xlane.xlu1 %6078 }
 0x61a   :  { %v16464_v5 = vpop.f32.mrf.mxu0 }
 0x61b   :  { %19413 = vst [vmem:[#allocation52_spill] sm:$0xff] %v16464_v5  ;;  %v1995_v49 = vpop.permute.xlu0 %1994 }
 0x61c   :  { %v16466_v17 = vpop.xlane.xlu1 %6084  ;;  %12011 = vmatpush3.bf16.msra.mxu0 %v1995_v49  ;;  %v11906_v20 = vpop.f32.mrf.mxu0 }
 0x61d   :  { %12022 = vmatprep.subr.bf16.mxu0 %v19050_v38  ;;  %v6554_v20 = vpack.c.bf16 %v6453_v0, %v6452_v15  ;;  %v19423_v15 = vld [vmem:[#allocation115_spill] sm:$0xff] }
 0x61e   :  { %v16470_v16 = vpop.f32.mrf.mxu0 }
 0x61f   :  { %19415 = vst [vmem:[#allocation76_spill] sm:$0xff] %v16470_v16  ;;  %12013 = vmatmul.mubr.msk.bf16.vlgmr.msra.gmra.mxu0 %vm149_vm0, %v6553_v51  ;;  %v19421_v51 = vld [vmem:[#allocation113_spill] sm:$0xff]  ;;  %v5581_v16 = vsub.f32 %v19423_v15, %v16120_v4 }
 0x620   :  { %v1997_v52 = vpop.permute.xlu1 %1996  ;;  %12024 = vmatprep.mubr.msk.bf16.mxu0 %vm12946_vm1, %v19050_v38  ;;  %v11907_v49 = vpop.f32.mrf.mxu0  ;;  %2004 = vrot.lane.b32.xlu1 %v19417_v30, %s12950_s28  ;;  %v5580_v59 = vsub.f32 %v19421_v51, %v16098_v56 }
 0x621   :  { %12017 = vmatpush3.bf16.msra.mxu1 %v1997_v52  ;;  %2002 = vrot.lane.b32.xlu0 %v19418_v29, %s12950_s28  ;;  %v5780_v52 = vmul.f32 1.442695, %v5578_v1  ;;  %v19422_v49 = vld [vmem:[#allocation108_spill] sm:$0xff]  ;;  %v19425_v1 = vld [vmem:[#allocation153_spill] sm:$0xff] }
 0x622   :  { %12028 = vmatprep.subr.bf16.mxu1 %v19050_v38  ;;  %v5579_v47 = vsub.f32 %v19422_v49, %v16112_v3  ;;  %v5784_v5 = vmul.f32 1.442695, %v5580_v59  ;;  %v5468_v3 = vsel %vm149_vm0, %v19425_v1, -inf }
 0x623   :  { %12656 = vpow2.f32 %v5780_v52 }
 0x624   :  { %12019 = vmatmul.mubr.msk.bf16.vlgmr.msra.gmra.mxu1 %vm149_vm0, %v6554_v20  ;;  %v5782_v0 = vmul.f32 1.442695, %v5579_v47  ;;  %12658 = vpow2.f32 %v5784_v5  ;;  %v5786_v20 = vmul.f32 1.442695, %v5581_v16 }
 0x625   :  { %12030 = vmatprep.mubr.msk.bf16.mxu1 %vm12946_vm1, %v19050_v38 }
 0x626   :  { %12660 = vpow2.f32 %v5782_v0 }
 0x627   :  { %12662 = vpow2.f32 %v5786_v20 }
 0x628   :  { %12664 = vrcp.f32 %v16386_v37 }
 0x629   :  { %12666 = vrcp.f32 %v16370_v63 }
 0x62a   :  { %12668 = vrcp.f32 %v16403_v27  ;;  %v19431_v27 = vld [vmem:[#allocation59_spill] sm:$0xff] }
 0x62b   :  { %12670 = vrcp.f32 %v16381_v26 }
 0x630   :  { %v16496_v24 = vpop.eup %12656 }
 0x631   :  { %v16498_v56 = vpop.eup %12658  ;;  %v6110_v47 = vsel %vm149_vm0, %v16496_v24, 0.0 }
 0x632   :  { %v6116_v5 = vsel %vm149_vm0, %v16498_v56, 0.0 }
 0x633   :  { %v16504_v51 = vpop.eup %12660 }
 0x634   :  { %v6113_v4 = vsel %vm149_vm0, %v16504_v51, 0.0  ;;  %v16510_v16 = vpop.eup %12662 }
 0x635   :  { %v6119_v52 = vsel %vm149_vm0, %v16510_v16, 0.0  ;;  %v12665_v37 = vpop.eup %12664 }
 0x640   :  { %5472 = vmax.xlane.f32.xlu0 %v5471_v62 }
 0x644   :  { %5469 = vmax.xlane.f32.xlu1 %v5468_v3  ;;  %6111 = vadd.xlane.f32.xlu0 %v6110_v47  ;;  %v12667_v3 = vpop.eup %12666  ;;  %v19430_v47 = vld [vmem:[#allocation46_spill] sm:$0xff] }
 0x648   :  { %6114 = vadd.xlane.f32.xlu1 %v6113_v4  ;;  %6117 = vadd.xlane.f32.xlu0 %v6116_v5  ;;  %v6455_v4 = vmul.f32 %v12665_v37, %v19430_v47  ;;  %v12669_v5 = vpop.eup %12668  ;;  %v19434_v37 = vld [vmem:[#allocation65_spill] sm:$0xff]  ;;  %v19436_v47 = vld [vmem:[#allocation71_spill] sm:$0xff] }
 0x649   :  { %v12671_v26 = vpop.eup %12670  ;;  %v6457_v57 = vmul.f32 %v12669_v5, %v16096_v45  ;;  %v19439_v5 = vld [vmem:[#allocation110_spill] sm:$0xff] }
 0x64b   :  { %v16514_v59 = vpop.xlane.xlu0 %5454 }
 0x64c   :  { %19426 = vst [vmem:[#allocation66_spill] sm:$0xff] %v16514_v59  ;;  %6120 = vadd.xlane.f32.xlu1 %v6119_v52  ;;  %v6454_v52 = vmul.f32 %v12667_v3, %v19431_v27  ;;  %v6456_v27 = vmul.f32 %v12671_v26, %v19436_v47 }
 0x64e   :  { %v6555_v1 = vpack.c.bf16 %v6455_v4, %v6454_v52  ;;  %v6556_v52 = vpack.c.bf16 %v6457_v57, %v6456_v27  ;;  %v19443_v57 = vld [vmem:[#allocation112_spill] sm:$0xff] }
 0x64f   :  { %v16519_v49 = vpop.xlane.xlu1 %5451  ;;  %v16521_v0 = vpop.xlane.xlu0 %5457  ;;  %v5583_v27 = vsub.f32 %v19443_v57, %v16128_v60  ;;  %v19447_v57 = vld [vmem:[#allocation154_spill] sm:$0xff] }
 0x650   :  { %19427 = vst [vmem:[#allocation93_spill] sm:$0xff] %v16519_v49  ;;  %19428 = vst [vmem:[#allocation96_spill] sm:$0xff] %v16521_v0 }
 0x653   :  { %v16524_v15 = vpop.xlane.xlu0 %6087  ;;  %v16526_v20 = vpop.xlane.xlu1 %5460 }
 0x654   :  { %19429 = vst [vmem:[#allocation85_spill] sm:$0xff] %v16526_v20  ;;  %v19444_v20 = vld [vmem:[#allocation119_spill] sm:$0xff] }
 0x655   :  { %v5585_v0 = vsub.f32 %v19444_v20, %v16100_v12 }
 0x657   :  { %v16528_v63 = vpop.xlane.xlu0 %6093  ;;  %v16530_v62 = vpop.xlane.xlu1 %6090 }
 0x659   :  { %v16534_v44 = vpop.f32.mrf.mxu1 }
 0x65a   :  { %19432 = vst [vmem:[#allocation104_spill] sm:$0xff] %v16534_v44  ;;  %v19441_v44 = vld [vmem:[#allocation117_spill] sm:$0xff] }
 0x65b   :  { %v1999_v10 = vpop.permute.xlu0 %1998  ;;  %v16536_v36 = vpop.xlane.xlu1 %6096 }
 0x65c   :  { %12023 = vmatpush3.bf16.msra.mxu0 %v1999_v10  ;;  %v11912_v19 = vpop.f32.mrf.mxu1 }
 0x65d   :  { %2016 = vrot.lane.b32.xlu1 %v19433_v54, %s12951_s29  ;;  %12034 = vmatprep.subr.bf16.mxu0 %v19050_v38  ;;  %v19440_v19 = vld [vmem:[#allocation77_spill] sm:$0xff] }
 0x65e   :  { %2006 = vrot.lane.b32.xlu0 %v19434_v37, %s12950_s28  ;;  %v16544_v3 = vpop.f32.mrf.mxu1 }
 0x65f   :  { %19435 = vst [vmem:[#allocation109_spill] sm:$0xff] %v16544_v3  ;;  %12025 = vmatmul.mubr.msk.bf16.vlgmr.msra.gmra.mxu0 %vm149_vm0, %v6555_v1  ;;  %v2001_v10 = vpop.permute.xlu1 %2000  ;;  %v19438_v1 = vld [vmem:[#allocation38_spill] sm:$0xff]  ;;  %v5584_v3 = vsub.f32 %v19441_v44, %v19440_v19  ;;  %v5794_v44 = vmul.f32 1.442695, %v5585_v0  ;;  %v19449_v0 = vld [vmem:[#allocation152_spill] sm:$0xff] }
 0x660   :  { %12036 = vmatprep.mubr.msk.bf16.mxu0 %vm12946_vm1, %v19050_v38  ;;  %v11913_v4 = vpop.f32.mrf.mxu1  ;;  %12029 = vmatpush3.bf16.msra.mxu1 %v2001_v10  ;;  %v5582_v26 = vsub.f32 %v19439_v5, %v19438_v1  ;;  %v5790_v1 = vmul.f32 1.442695, %v5583_v27  ;;  %v5474_v20 = vsel %vm149_vm0, %v19449_v0, -inf }
 0x661   :  { %12040 = vmatprep.subr.bf16.mxu1 %v19050_v38  ;;  %v5792_v31 = vmul.f32 1.442695, %v5584_v3  ;;  %v5477_v3 = vsel %vm149_vm0, %v19447_v57, -inf }
 0x662   :  { %v5788_v10 = vmul.f32 1.442695, %v5582_v26 }
 0x663   :  { %12031 = vmatmul.mubr.msk.bf16.vlgmr.msra.gmra.mxu1 %vm149_vm0, %v6556_v52 }
 0x664   :  { %12042 = vmatprep.mubr.msk.bf16.mxu1 %vm12946_vm1, %v19050_v38  ;;  %12672 = vpow2.f32 %v5788_v10 }
 0x665   :  { %v16556_v45 = vpop.f32.mrf.mxu0  ;;  %12674 = vpow2.f32 %v5792_v31 }
 0x666   :  { %19437 = vst [vmem:[#allocation103_spill] sm:$0xff] %v16556_v45  ;;  %12676 = vpow2.f32 %v5790_v1 }
 0x667   :  { %v11918_v47 = vpop.f32.mrf.mxu0  ;;  %12678 = vpow2.f32 %v5794_v44 }
 0x668   :  { %12680 = vrcp.f32 %v16424_v46 }
 0x669   :  { %v16562_v9 = vpop.f32.mrf.mxu0  ;;  %12682 = vrcp.f32 %v16394_v7 }
 0x66a   :  { %19442 = vst [vmem:[#allocation111_spill] sm:$0xff] %v16562_v9  ;;  %12684 = vrcp.f32 %v16439_v22 }
 0x66b   :  { %v11919_v52 = vpop.f32.mrf.mxu0  ;;  %12686 = vrcp.f32 %v16412_v43 }
 0x671   :  { %v16570_v5 = vpop.f32.mrf.mxu1  ;;  %v16578_v10 = vpop.eup %12672 }
 0x672   :  { %19445 = vst [vmem:[#allocation102_spill] sm:$0xff] %v16570_v5  ;;  %v16582_v31 = vpop.eup %12674  ;;  %v6122_v27 = vsel %vm149_vm0, %v16578_v10, 0.0 }
 0x673   :  { %v11924_v19 = vpop.f32.mrf.mxu1  ;;  %v16588_v52 = vpop.eup %12676 }
 0x674   :  { %v16598_v60 = vpop.eup %12678 }
 0x675   :  { %v16572_v26 = vpop.f32.mrf.mxu1 }
 0x676   :  { %19446 = vst [vmem:[#allocation61_spill] sm:$0xff] %v16572_v26  ;;  %v19456_v26 = vld [vmem:[#allocation40_spill] sm:$0xff] }
 0x677   :  { %v11925_v47 = vpop.f32.mrf.mxu1 }
 0x678   :  { %v6125_v47 = vsel %vm149_vm0, %v16588_v52, 0.0 }
 0x67d   :  { %5478 = vmax.xlane.f32.xlu0 %v5477_v3  ;;  %v16580_v12 = vpop.f32.mrf.mxu0  ;;  %v6128_v3 = vsel %vm149_vm0, %v16582_v31, 0.0 }
 0x67e   :  { %19448 = vst [vmem:[#allocation55_spill] sm:$0xff] %v16580_v12 }
 0x67f   :  { %v11930_v1 = vpop.f32.mrf.mxu0 }
 0x681   :  { %5475 = vmax.xlane.f32.xlu1 %v5474_v20  ;;  %6123 = vadd.xlane.f32.xlu0 %v6122_v27  ;;  %v16590_v44 = vpop.f32.mrf.mxu0  ;;  %v6131_v20 = vsel %vm149_vm0, %v16598_v60, 0.0 }
 0x682   :  { %19450 = vst [vmem:[#allocation78_spill] sm:$0xff] %v16590_v44 }
 0x683   :  { %v11931_v4 = vpop.f32.mrf.mxu0 }
 0x685   :  { %6126 = vadd.xlane.f32.xlu1 %v6125_v47  ;;  %6129 = vadd.xlane.f32.xlu0 %v6128_v3 }
 0x689   :  { %6132 = vadd.xlane.f32.xlu1 %v6131_v20  ;;  %v16605_v27 = vpop.f32.mrf.mxu1  ;;  %v12681_v20 = vpop.eup %12680 }
 0x68a   :  { %19451 = vst [vmem:[#allocation81_spill] sm:$0xff] %v16605_v27  ;;  %v12683_v44 = vpop.eup %12682  ;;  %v6459_v43 = vmul.f32 %v12681_v20, %v16102_v50 }
 0x68b   :  { %v11936_v19 = vpop.f32.mrf.mxu1  ;;  %v12685_v5 = vpop.eup %12684  ;;  %v6458_v45 = vmul.f32 %v12683_v44, %v19456_v26  ;;  %v19459_v26 = vld [vmem:[#allocation44_spill] sm:$0xff] }
 0x68c   :  { %v16608_v1 = vpop.xlane.xlu0 %5466  ;;  %v12687_v27 = vpop.eup %12686 }
 0x68d   :  { %19452 = vst [vmem:[#allocation91_spill] sm:$0xff] %v16608_v1  ;;  %v16610_v4 = vpop.f32.mrf.mxu1  ;;  %v6557_v57 = vpack.c.bf16 %v6459_v43, %v6458_v45  ;;  %v6460_v44 = vmul.f32 %v12687_v27, %v19459_v26  ;;  %v19462_v26 = vld [vmem:[#allocation58_spill] sm:$0xff] }
 0x68e   :  { %19453 = vst [vmem:[#allocation2_spill] sm:$0xff] %v16610_v4 }
 0x68f   :  { %v11937_v3 = vpop.f32.mrf.mxu1 }
 0x690   :  { %v16614_v47 = vpop.xlane.xlu0 %6099  ;;  %v16616_v7 = vpop.xlane.xlu1 %5463  ;;  %v19457_v3 = vld [vmem:[#allocation73_spill] sm:$0xff] }
 0x691   :  { %19454 = vst [vmem:[#allocation72_spill] sm:$0xff] %v16616_v7  ;;  %v6461_v0 = vmul.f32 %v12685_v5, %v19457_v3  ;;  %v19468_v7 = vld [vmem:[#allocation116_spill] sm:$0xff] }
 0x694   :  { %v16618_v12 = vpop.xlane.xlu0 %6105  ;;  %v16620_v22 = vpop.xlane.xlu1 %6102 }
 0x695   :  { %v16623_v19 = vpop.f32.mrf.mxu0 }
 0x696   :  { %19455 = vst [vmem:[#allocation99_spill] sm:$0xff] %v16623_v19  ;;  %v19466_v19 = vld [vmem:[#allocation121_spill] sm:$0xff] }
 0x697   :  { %v11942_v4 = vpop.f32.mrf.mxu0 }
 0x698   :  { %v2003_v9 = vpop.permute.xlu0 %2002  ;;  %v16626_v46 = vpop.xlane.xlu1 %6108  ;;  %v6558_v4 = vpack.c.bf16 %v6461_v0, %v6460_v44  ;;  %v19465_v44 = vld [vmem:[#allocation50_spill] sm:$0xff] }
 0x699   :  { %12035 = vmatpush3.bf16.msra.mxu0 %v2003_v9  ;;  %v16632_v50 = vpop.f32.mrf.mxu0 }
 0x69a   :  { %2020 = vrot.lane.b32.xlu1 %v19355_v48, %s12951_s29  ;;  %12046 = vmatprep.subr.bf16.mxu0 %v19050_v38  ;;  %19458 = vst [vmem:[#allocation70_spill] sm:$0xff] %v16632_v50 }
 0x69b   :  { %2018 = vrot.lane.b32.xlu0 %v19358_v41, %s12951_s29  ;;  %v11943_v5 = vpop.f32.mrf.mxu0 }
 0x69c   :  { %12037 = vmatmul.mubr.msk.bf16.vlgmr.msra.gmra.mxu0 %vm149_vm0, %v6557_v57  ;;  %v2005_v9 = vpop.permute.xlu1 %2004 }
 0x69d   :  { %12041 = vmatpush3.bf16.msra.mxu1 %v2005_v9  ;;  %12048 = vmatprep.mubr.msk.bf16.mxu0 %vm12946_vm1, %v19050_v38  ;;  %v16642_v45 = vpop.f32.mrf.mxu1  ;;  %v19463_v9 = vld [vmem:[#allocation114_spill] sm:$0xff] }
 0x69e   :  { %19460 = vst [vmem:[#allocation68_spill] sm:$0xff] %v16642_v45  ;;  %12052 = vmatprep.subr.bf16.mxu1 %v19050_v38  ;;  %v5586_v5 = vsub.f32 %v19463_v9, %v19462_v26  ;;  %v19471_v9 = vld [vmem:[#allocation84_spill] sm:$0xff] }
 0x69f   :  { %v11948_v43 = vpop.f32.mrf.mxu1 }
 0x6a0   :  { %12043 = vmatmul.mubr.msk.bf16.vlgmr.msra.gmra.mxu1 %vm149_vm0, %v6558_v4  ;;  %v5588_v43 = vsub.f32 %v19466_v19, %v19465_v44  ;;  %v5796_v50 = vmul.f32 1.442695, %v5586_v5  ;;  %v19467_v4 = vld [vmem:[#allocation41_spill] sm:$0xff] }
 0x6a1   :  { %12054 = vmatprep.mubr.msk.bf16.mxu1 %vm12946_vm1, %v19050_v38  ;;  %v16648_v27 = vpop.f32.mrf.mxu1  ;;  %v5587_v1 = vsub.f32 %v19468_v7, %v19467_v4 }
 0x6a2   :  { %19461 = vst [vmem:[#allocation57_spill] sm:$0xff] %v16648_v27  ;;  %v5800_v26 = vmul.f32 1.442695, %v5588_v43  ;;  %12688 = vpow2.f32 %v5796_v50 }
 0x6a3   :  { %v11949_v3 = vpop.f32.mrf.mxu1  ;;  %v5798_v32 = vmul.f32 1.442695, %v5587_v1 }
 0x6a4   :  { %12690 = vpow2.f32 %v5800_v26  ;;  %v19481_v3 = vld [vmem:[#allocation158_spill] sm:$0xff] }
 0x6a5   :  { %v16654_v20 = vpop.f32.mrf.mxu0  ;;  %12692 = vpow2.f32 %v5798_v32  ;;  %v5483_v7 = vsel %vm149_vm0, %v19481_v3, -inf  ;;  %v19498_v3 = vld [vmem:[#allocation74_spill] sm:$0xff] }
 0x6a6   :  { %19464 = vst [vmem:[#allocation75_spill] sm:$0xff] %v16654_v20 }
 0x6a7   :  { %v11954_v0 = vpop.f32.mrf.mxu0 }
 0x6a8   :  { %v19472_v0 = vld [vmem:[#allocation122_spill] sm:$0xff] }
 0x6a9   :  { %v16660_v49 = vpop.f32.mrf.mxu0  ;;  %v16662_v59 = vpop.f32.mrf.mxu1  ;;  %v5589_v27 = vsub.f32 %v19472_v0, %v19471_v9 }
 0x6aa   :  { %19469 = vst [vmem:[#allocation106_spill] sm:$0xff] %v16660_v49  ;;  %19470 = vst [vmem:[#allocation113_spill] sm:$0xff] %v16662_v59 }
 0x6ab   :  { %v11955_v57 = vpop.f32.mrf.mxu0  ;;  %v11960_v45 = vpop.f32.mrf.mxu1  ;;  %v5802_v14 = vmul.f32 1.442695, %v5589_v27 }
 0x6ad   :  { %v16668_v19 = vpop.f32.mrf.mxu1  ;;  %v16670_v5 = vpop.f32.mrf.mxu0  ;;  %12694 = vpow2.f32 %v5802_v14 }
 0x6ae   :  { %19473 = vst [vmem:[#allocation108_spill] sm:$0xff] %v16668_v19  ;;  %19474 = vst [vmem:[#allocation115_spill] sm:$0xff] %v16670_v5  ;;  %12696 = vrcp.f32 %v16460_v35 }
 0x6af   :  { %v11961_v44 = vpop.f32.mrf.mxu1  ;;  %v11966_v4 = vpop.f32.mrf.mxu0  ;;  %12698 = vrcp.f32 %v16452_v13 }
 0x6b0   :  { %v16692_v50 = vpop.eup %12688  ;;  %12700 = vrcp.f32 %v16466_v17 }
 0x6b1   :  { %v16674_v57 = vpop.f32.mrf.mxu0  ;;  %v16676_v45 = vpop.f32.mrf.mxu1  ;;  %12702 = vrcp.f32 %v16458_v2 }
 0x6b2   :  { %19475 = vst [vmem:[#allocation46_spill] sm:$0xff] %v16674_v57  ;;  %19476 = vst [vmem:[#allocation59_spill] sm:$0xff] %v16676_v45  ;;  %v16696_v20 = vpop.eup %12690  ;;  %v6134_v45 = vsel %vm149_vm0, %v16692_v50, 0.0 }
 0x6b3   :  { %v11967_v1 = vpop.f32.mrf.mxu0  ;;  %v11972_v43 = vpop.f32.mrf.mxu1  ;;  %19482 = vst [vmem:[#allocation110_spill] sm:$0xff] %v16696_v20  ;;  %v6140_v5 = vsel %vm149_vm0, %v16696_v20, 0.0 }
 0x6b5   :  { %v16680_v9 = vpop.f32.mrf.mxu1  ;;  %v16682_v0 = vpop.f32.mrf.mxu0 }
 0x6b6   :  { %19477 = vst [vmem:[#allocation43_spill] sm:$0xff] %v16680_v9  ;;  %19478 = vst [vmem:[#allocation65_spill] sm:$0xff] %v16682_v0  ;;  %v16706_v9 = vpop.eup %12692 }
 0x6b7   :  { %v11973_v26 = vpop.f32.mrf.mxu1  ;;  %v11978_v27 = vpop.f32.mrf.mxu0 }
 0x6b8   :  { %v19485_v27 = vld [vmem:[#allocation156_spill] sm:$0xff] }
 0x6b9   :  { %v16686_v32 = vpop.f32.mrf.mxu0  ;;  %v16688_v4 = vpop.f32.mrf.mxu1  ;;  %v5480_v49 = vsel %vm149_vm0, %v19485_v27, -inf }
 0x6ba   :  { %19479 = vst [vmem:[#allocation71_spill] sm:$0xff] %v16686_v32  ;;  %19480 = vst [vmem:[#allocation38_spill] sm:$0xff] %v16688_v4  ;;  %5484 = vmax.xlane.f32.xlu0 %v5483_v7  ;;  %v6137_v32 = vsel %vm149_vm0, %v16706_v9, 0.0  ;;  %v16718_v57 = vpop.eup %12694 }
 0x6bb   :  { %v11979_v1 = vpop.f32.mrf.mxu0  ;;  %v11984_v43 = vpop.f32.mrf.mxu1  ;;  %19488 = vst [vmem:[#allocation40_spill] sm:$0xff] %v16718_v57  ;;  %v6143_v14 = vsel %vm149_vm0, %v16718_v57, 0.0 }
 0x6bd   :  { %v16698_v44 = vpop.f32.mrf.mxu1  ;;  %v16700_v26 = vpop.f32.mrf.mxu0 }
 0x6be   :  { %19483 = vst [vmem:[#allocation77_spill] sm:$0xff] %v16698_v44  ;;  %19484 = vst [vmem:[#allocation117_spill] sm:$0xff] %v16700_v26  ;;  %5481 = vmax.xlane.f32.xlu1 %v5480_v49  ;;  %6135 = vadd.xlane.f32.xlu0 %v6134_v45 }
 0x6bf   :  { %v11985_v7 = vpop.f32.mrf.mxu1  ;;  %v11990_v1 = vpop.f32.mrf.mxu0 }
 0x6c1   :  { %v16710_v43 = vpop.f32.mrf.mxu0  ;;  %v16712_v0 = vpop.f32.mrf.mxu1 }
 0x6c2   :  { %19486 = vst [vmem:[#allocation112_spill] sm:$0xff] %v16710_v43  ;;  %19487 = vst [vmem:[#allocation119_spill] sm:$0xff] %v16712_v0  ;;  %6138 = vadd.xlane.f32.xlu1 %v6137_v32  ;;  %6141 = vadd.xlane.f32.xlu0 %v6140_v5 }
 0x6c3   :  { %v11991_v49 = vpop.f32.mrf.mxu0  ;;  %v11996_v45 = vpop.f32.mrf.mxu1 }
 0x6c5   :  { %v16724_v7 = vpop.f32.mrf.mxu1  ;;  %v16726_v1 = vpop.f32.mrf.mxu0 }
 0x6c6   :  { %19489 = vst [vmem:[#allocation73_spill] sm:$0xff] %v16724_v7  ;;  %19490 = vst [vmem:[#allocation44_spill] sm:$0xff] %v16726_v1  ;;  %6144 = vadd.xlane.f32.xlu1 %v6143_v14  ;;  %v19496_v1 = vld [vmem:[#allocation53_spill] sm:$0xff] }
 0x6c7   :  { %v11997_v5 = vpop.f32.mrf.mxu1  ;;  %v12002_v32 = vpop.f32.mrf.mxu0 }
 0x6c8   :  { %v12697_v5 = vpop.eup %12696 }
 0x6c9   :  { %v16734_v35 = vpop.f32.mrf.mxu0  ;;  %v16736_v13 = vpop.xlane.xlu0 %5472 }
 0x6ca   :  { %19491 = vst [vmem:[#allocation58_spill] sm:$0xff] %v16734_v35  ;;  %19492 = vst [vmem:[#allocation114_spill] sm:$0xff] %v16736_v13  ;;  %v16740_v45 = vpop.f32.mrf.mxu1  ;;  %v12699_v49 = vpop.eup %12698  ;;  %v6463_v35 = vmul.f32 %v12697_v5, %v19496_v1  ;;  %v19499_v1 = vld [vmem:[#allocation83_spill] sm:$0xff]  ;;  %v19508_v13 = vld [vmem:[#allocation120_spill] sm:$0xff] }
 0x6cb   :  { %19493 = vst [vmem:[#allocation50_spill] sm:$0xff] %v16740_v45  ;;  %v12003_v59 = vpop.f32.mrf.mxu0 }
 0x6cc   :  { %v12008_v26 = vpop.f32.mrf.mxu1  ;;  %v12701_v59 = vpop.eup %12700 }
 0x6cd   :  { %v16742_v43 = vpop.xlane.xlu1 %5469  ;;  %v16744_v14 = vpop.xlane.xlu0 %6111  ;;  %v19497_v26 = vld [vmem:[#allocation80_spill] sm:$0xff] }
 0x6ce   :  { %19494 = vst [vmem:[#allocation121_spill] sm:$0xff] %v16742_v43  ;;  %v16746_v17 = vpop.f32.mrf.mxu1  ;;  %v6462_v7 = vmul.f32 %v12699_v49, %v19497_v26  ;;  %v12703_v27 = vpop.eup %12702  ;;  %v6465_v43 = vmul.f32 %v12701_v59, %v19498_v3 }
 0x6cf   :  { %19495 = vst [vmem:[#allocation41_spill] sm:$0xff] %v16746_v17  ;;  %v6464_v5 = vmul.f32 %v12703_v27, %v19499_v1  ;;  %v19502_v27 = vld [vmem:[#allocation118_spill] sm:$0xff]  ;;  %v19506_v1 = vld [vmem:[#allocation124_spill] sm:$0xff] }
 0x6d0   :  { %v12009_v32 = vpop.f32.mrf.mxu1  ;;  %v19507_v17 = vld [vmem:[#allocation94_spill] sm:$0xff] }
 0x6d1   :  { %v16750_v4 = vpop.xlane.xlu1 %6114  ;;  %v16752_v0 = vpop.xlane.xlu0 %6117  ;;  %v6559_v32 = vpack.c.bf16 %v6463_v35, %v6462_v7  ;;  %v19501_v35 = vld [vmem:[#allocation63_spill] sm:$0xff]  ;;  %v5591_v20 = vsub.f32 %v19508_v13, %v19507_v17 }
 0x6d2   :  { %v5590_v49 = vsub.f32 %v19502_v27, %v19501_v35 }
 0x6d4   :  { %v5804_v45 = vmul.f32 1.442695, %v5590_v49  ;;  %v19512_v49 = vld [vmem:[#allocation157_spill] sm:$0xff] }
 0x6d5   :  { %v16756_v44 = vpop.xlane.xlu1 %6120  ;;  %v2007_v19 = vpop.permute.xlu0 %2006 }
 0x6d6   :  { %12047 = vmatpush3.bf16.msra.mxu0 %v2007_v19  ;;  %v6560_v19 = vpack.c.bf16 %v6465_v43, %v6464_v5  ;;  %12704 = vpow2.f32 %v5804_v45 }
 0x6d7   :  { %2024 = vrot.lane.b32.xlu1 %v19268_v25, %s12951_s29  ;;  %12058 = vmatprep.subr.bf16.mxu0 %v19050_v38 }
 0x6d8   :  { %2022 = vrot.lane.b32.xlu0 %v19261_v42, %s12951_s29 }
 0x6d9   :  { %v2017_v2 = vpop.permute.xlu1 %2016  ;;  %12049 = vmatmul.mubr.msk.bf16.vlgmr.msra.gmra.mxu0 %vm149_vm0, %v6559_v32  ;;  %v19505_v32 = vld [vmem:[#allocation60_spill] sm:$0xff] }
 0x6da   :  { %12053 = vmatpush3.bf16.msra.mxu1 %v2017_v2  ;;  %12060 = vmatprep.mubr.msk.bf16.mxu0 %vm12946_vm1, %v19050_v38  ;;  %v5592_v5 = vsub.f32 %v19506_v1, %v19505_v32  ;;  %v19510_v2 = vld [vmem:[#allocation42_spill] sm:$0xff]  ;;  %v5489_v32 = vsel %vm149_vm0, %v19512_v49, -inf  ;;  %v19513_v1 = vld [vmem:[#allocation155_spill] sm:$0xff] }
 0x6db   :  { %12064 = vmatprep.subr.bf16.mxu1 %v19050_v38 }
 0x6dc   :  { %v5808_v27 = vmul.f32 1.442695, %v5592_v5 }
 0x6dd   :  { %12055 = vmatmul.mubr.msk.bf16.vlgmr.msra.gmra.mxu1 %vm149_vm0, %v6560_v19 }
 0x6de   :  { %12066 = vmatprep.mubr.msk.bf16.mxu1 %vm12946_vm1, %v19050_v38  ;;  %12706 = vpow2.f32 %v5808_v27 }
 0x6df   :  { %v16770_v3 = vpop.f32.mrf.mxu0 }
 0x6e0   :  { %19500 = vst [vmem:[#allocation116_spill] sm:$0xff] %v16770_v3  ;;  %v19511_v3 = vld [vmem:[#allocation126_spill] sm:$0xff] }
 0x6e1   :  { %v12014_v7 = vpop.f32.mrf.mxu0 }
 0x6e3   :  { %v16776_v59 = vpop.f32.mrf.mxu0  ;;  %v16794_v13 = vpop.eup %12704 }
 0x6e4   :  { %19503 = vst [vmem:[#allocation84_spill] sm:$0xff] %v16776_v59  ;;  %v16780_v26 = vpop.f32.mrf.mxu1  ;;  %v5593_v59 = vsub.f32 %v19511_v3, %v19510_v2  ;;  %v6146_v45 = vsel %vm149_vm0, %v16794_v13, 0.0 }
 0x6e5   :  { %19504 = vst [vmem:[#allocation122_spill] sm:$0xff] %v16780_v26  ;;  %v12015_v43 = vpop.f32.mrf.mxu0  ;;  %v19522_v26 = vld [vmem:[#allocation125_spill] sm:$0xff] }
 0x6e6   :  { %v12020_v19 = vpop.f32.mrf.mxu1  ;;  %v5806_v43 = vmul.f32 1.442695, %v5591_v20  ;;  %v5810_v57 = vmul.f32 1.442695, %v5593_v59 }
 0x6e8   :  { %v16786_v7 = vpop.f32.mrf.mxu1  ;;  %12708 = vpow2.f32 %v5806_v43 }
 0x6e9   :  { %19509 = vst [vmem:[#allocation53_spill] sm:$0xff] %v16786_v7  ;;  %12710 = vpow2.f32 %v5810_v57 }
 0x6ea   :  { %v12021_v23 = vpop.f32.mrf.mxu1  ;;  %12712 = vrcp.f32 %v16530_v62 }
 0x6eb   :  { %v16796_v17 = vpop.eup %12706  ;;  %v5486_v23 = vsel %vm149_vm0, %v19513_v1, -inf  ;;  %12714 = vrcp.f32 %v16524_v15 }
 0x6ec   :  { %v6152_v57 = vsel %vm149_vm0, %v16796_v17, 0.0  ;;  %12716 = vrcp.f32 %v16536_v36 }
 0x6ed   :  { %12718 = vrcp.f32 %v16528_v63 }
 0x6f5   :  { %v16802_v3 = vpop.eup %12708 }
 0x6f6   :  { %v6149_v20 = vsel %vm149_vm0, %v16802_v3, 0.0  ;;  %v16808_v59 = vpop.eup %12710 }
 0x6f7   :  { %5490 = vmax.xlane.f32.xlu0 %v5489_v32  ;;  %v6155_v2 = vsel %vm149_vm0, %v16808_v59, 0.0  ;;  %v12713_v43 = vpop.eup %12712 }
 0x6f8   :  { %v12715_v15 = vpop.eup %12714 }
 0x6fb   :  { %5487 = vmax.xlane.f32.xlu1 %v5486_v23  ;;  %6147 = vadd.xlane.f32.xlu0 %v6146_v45  ;;  %v6467_v23 = vmul.f32 %v12713_v43, %v16254_v28  ;;  %v12717_v45 = vpop.eup %12716 }
 0x6ff   :  { %6150 = vadd.xlane.f32.xlu1 %v6149_v20  ;;  %6153 = vadd.xlane.f32.xlu0 %v6152_v57  ;;  %v6466_v20 = vmul.f32 %v12715_v15, %v16244_v58  ;;  %v12719_v57 = vpop.eup %12718  ;;  %v19517_v15 = vld [vmem:[#allocation123_spill] sm:$0xff] }
 0x700   :  { %v6468_v28 = vmul.f32 %v12719_v57, %v16260_v18 }
 0x701   :  { %v6561_v35 = vpack.c.bf16 %v6467_v23, %v6466_v20  ;;  %v19519_v20 = vld [vmem:[#allocation47_spill] sm:$0xff] }
 0x703   :  { %6156 = vadd.xlane.f32.xlu1 %v6155_v2  ;;  %v6469_v2 = vmul.f32 %v12717_v45, %v16271_v34  ;;  %v19516_v34 = vld [vmem:[#allocation98_spill] sm:$0xff] }
 0x704   :  { %v5594_v23 = vsub.f32 %v19517_v15, %v19516_v34  ;;  %v19525_v15 = vld [vmem:[#allocation67_spill] sm:$0xff] }
 0x705   :  { %v6562_v58 = vpack.c.bf16 %v6469_v2, %v6468_v28 }
 0x706   :  { %v16816_v5 = vpop.xlane.xlu0 %5478  ;;  %v5812_v57 = vmul.f32 1.442695, %v5594_v23 }
 0x707   :  { %19514 = vst [vmem:[#allocation80_spill] sm:$0xff] %v16816_v5 }
 0x708   :  { %12720 = vpow2.f32 %v5812_v57 }
 0x70a   :  { %v16818_v19 = vpop.xlane.xlu1 %5475  ;;  %v16820_v27 = vpop.xlane.xlu0 %6123 }
 0x70b   :  { %19515 = vst [vmem:[#allocation74_spill] sm:$0xff] %v16818_v19 }
 0x70e   :  { %v16822_v32 = vpop.xlane.xlu1 %6126  ;;  %v16824_v62 = vpop.xlane.xlu0 %6129 }
 0x712   :  { %v16828_v36 = vpop.xlane.xlu1 %6132  ;;  %v2019_v63 = vpop.permute.xlu0 %2018 }
 0x713   :  { %12059 = vmatpush3.bf16.msra.mxu0 %v2019_v63 }
 0x714   :  { %2028 = vrot.lane.b32.xlu1 %v19417_v30, %s12951_s29  ;;  %12070 = vmatprep.subr.bf16.mxu0 %v19050_v38 }
 0x715   :  { %2026 = vrot.lane.b32.xlu0 %v19418_v29, %s12951_s29 }
 0x716   :  { %v2021_v43 = vpop.permute.xlu1 %2020  ;;  %12061 = vmatmul.mubr.msk.bf16.vlgmr.msra.gmra.mxu0 %vm149_vm0, %v6561_v35  ;;  %v19520_v35 = vld [vmem:[#allocation128_spill] sm:$0xff] }
 0x717   :  { %12065 = vmatpush3.bf16.msra.mxu1 %v2021_v43  ;;  %12072 = vmatprep.mubr.msk.bf16.mxu0 %vm12946_vm1, %v19050_v38  ;;  %v5596_v63 = vsub.f32 %v19520_v35, %v19519_v20  ;;  %v19521_v43 = vld [vmem:[#allocation100_spill] sm:$0xff] }
 0x718   :  { %12076 = vmatprep.subr.bf16.mxu1 %v19050_v38  ;;  %v5595_v2 = vsub.f32 %v19522_v26, %v19521_v43  ;;  %v19528_v43 = vld [vmem:[#allocation162_spill] sm:$0xff] }
 0x719   :  { %v5816_v1 = vmul.f32 1.442695, %v5596_v63  ;;  %v16866_v63 = vpop.eup %12720 }
 0x71a   :  { %12067 = vmatmul.mubr.msk.bf16.vlgmr.msra.gmra.mxu1 %vm149_vm0, %v6562_v58  ;;  %v5814_v5 = vmul.f32 1.442695, %v5595_v2 }
 0x71b   :  { %12078 = vmatprep.mubr.msk.bf16.mxu1 %vm12946_vm1, %v19050_v38  ;;  %12722 = vpow2.f32 %v5816_v1 }
 0x71c   :  { %12724 = vpow2.f32 %v5814_v5 }
 0x71f   :  { %v16846_v45 = vpop.f32.mrf.mxu0 }
 0x720   :  { %19518 = vst [vmem:[#allocation83_spill] sm:$0xff] %v16846_v45  ;;  %v19538_v45 = vld [vmem:[#allocation129_spill] sm:$0xff] }
 0x721   :  { %v12026_v18 = vpop.f32.mrf.mxu0 }
 0x722   :  { %v19526_v18 = vld [vmem:[#allocation130_spill] sm:$0xff] }
 0x723   :  { %v16852_v28 = vpop.f32.mrf.mxu0  ;;  %v16856_v7 = vpop.f32.mrf.mxu1  ;;  %v5597_v19 = vsub.f32 %v19526_v18, %v19525_v15  ;;  %v6158_v15 = vsel %vm149_vm0, %v16866_v63, 0.0 }
 0x724   :  { %19523 = vst [vmem:[#allocation63_spill] sm:$0xff] %v16852_v28  ;;  %19524 = vst [vmem:[#allocation118_spill] sm:$0xff] %v16856_v7 }
 0x725   :  { %v12027_v49 = vpop.f32.mrf.mxu0  ;;  %v12032_v34 = vpop.f32.mrf.mxu1  ;;  %v5818_v35 = vmul.f32 1.442695, %v5597_v19 }
 0x726   :  { %v5495_v49 = vsel %vm149_vm0, %v19528_v43, -inf  ;;  %v19529_v34 = vld [vmem:[#allocation160_spill] sm:$0xff] }
 0x727   :  { %v16860_v20 = vpop.f32.mrf.mxu1  ;;  %12726 = vpow2.f32 %v5818_v35  ;;  %v5492_v2 = vsel %vm149_vm0, %v19529_v34, -inf }
 0x728   :  { %19527 = vst [vmem:[#allocation60_spill] sm:$0xff] %v16860_v20  ;;  %v16868_v57 = vpop.eup %12722  ;;  %12728 = vrcp.f32 %v16620_v22 }
 0x729   :  { %v12033_v23 = vpop.f32.mrf.mxu1  ;;  %v16874_v18 = vpop.eup %12724  ;;  %v6164_v5 = vsel %vm149_vm0, %v16868_v57, 0.0  ;;  %12730 = vrcp.f32 %v16614_v47 }
 0x72a   :  { %v6161_v1 = vsel %vm149_vm0, %v16874_v18, 0.0  ;;  %12732 = vrcp.f32 %v16626_v46 }
 0x72b   :  { %12734 = vrcp.f32 %v16618_v12 }
 0x734   :  { %5496 = vmax.xlane.f32.xlu0 %v5495_v49  ;;  %v16880_v19 = vpop.eup %12726 }
 0x735   :  { %v6167_v23 = vsel %vm149_vm0, %v16880_v19, 0.0 }
 0x738   :  { %5493 = vmax.xlane.f32.xlu1 %v5492_v2  ;;  %6159 = vadd.xlane.f32.xlu0 %v6158_v15  ;;  %v12729_v15 = vpop.eup %12728 }
 0x739   :  { %v12731_v47 = vpop.eup %12730 }
 0x73a   :  { %v12733_v26 = vpop.eup %12732 }
 0x73b   :  { %v12735_v58 = vpop.eup %12734  ;;  %v6473_v7 = vmul.f32 %v12733_v26, %v16437_v6  ;;  %v19532_v6 = vld [vmem:[#allocation64_spill] sm:$0xff]  ;;  %v19533_v26 = vld [vmem:[#allocation127_spill] sm:$0xff] }
 0x73c   :  { %6162 = vadd.xlane.f32.xlu1 %v6161_v1  ;;  %6165 = vadd.xlane.f32.xlu0 %v6164_v5  ;;  %v6471_v5 = vmul.f32 %v12729_v15, %v16408_v21  ;;  %v6472_v21 = vmul.f32 %v12735_v58, %v16420_v55  ;;  %v19535_v58 = vld [vmem:[#allocation54_spill] sm:$0xff] }
 0x740   :  { %6168 = vadd.xlane.f32.xlu1 %v6167_v23  ;;  %v6470_v23 = vmul.f32 %v12731_v47, %v16400_v39  ;;  %v6564_v39 = vpack.c.bf16 %v6473_v7, %v6472_v21  ;;  %v5598_v47 = vsub.f32 %v19533_v26, %v19532_v6  ;;  %v19541_v26 = vld [vmem:[#allocation87_spill] sm:$0xff] }
 0x742   :  { %v6563_v20 = vpack.c.bf16 %v6471_v5, %v6470_v23 }
 0x743   :  { %v16888_v35 = vpop.xlane.xlu0 %5484 }
 0x744   :  { %19530 = vst [vmem:[#allocation124_spill] sm:$0xff] %v16888_v35 }
 0x747   :  { %v16890_v49 = vpop.xlane.xlu1 %5481  ;;  %v16892_v2 = vpop.xlane.xlu0 %6135 }
 0x748   :  { %19531 = vst [vmem:[#allocation94_spill] sm:$0xff] %v16890_v49 }
 0x74b   :  { %v16894_v1 = vpop.xlane.xlu1 %6138  ;;  %v16896_v22 = vpop.xlane.xlu0 %6141 }
 0x74f   :  { %v16900_v46 = vpop.xlane.xlu1 %6144  ;;  %v2023_v12 = vpop.permute.xlu0 %2022 }
 0x750   :  { %12071 = vmatpush3.bf16.msra.mxu0 %v2023_v12  ;;  %v5820_v12 = vmul.f32 1.442695, %v5598_v47 }
 0x751   :  { %2040 = vrot.lane.b32.xlu1 %v19433_v54, %s12952_s30  ;;  %12082 = vmatprep.subr.bf16.mxu0 %v19050_v38 }
 0x752   :  { %2030 = vrot.lane.b32.xlu0 %v19434_v37, %s12951_s29  ;;  %12736 = vpow2.f32 %v5820_v12  ;;  %v19545_v12 = vld [vmem:[#allocation159_spill] sm:$0xff] }
 0x753   :  { %v2025_v15 = vpop.permute.xlu1 %2024  ;;  %12073 = vmatmul.mubr.msk.bf16.vlgmr.msra.gmra.mxu0 %vm149_vm0, %v6563_v20  ;;  %v19536_v20 = vld [vmem:[#allocation132_spill] sm:$0xff] }
 0x754   :  { %12077 = vmatpush3.bf16.msra.mxu1 %v2025_v15  ;;  %12084 = vmatprep.mubr.msk.bf16.mxu0 %vm12946_vm1, %v19050_v38  ;;  %v5600_v23 = vsub.f32 %v19536_v20, %v19535_v58  ;;  %v19537_v15 = vld [vmem:[#allocation56_spill] sm:$0xff] }
 0x755   :  { %12088 = vmatprep.subr.bf16.mxu1 %v19050_v38  ;;  %v5599_v7 = vsub.f32 %v19538_v45, %v19537_v15  ;;  %v19544_v15 = vld [vmem:[#allocation161_spill] sm:$0xff] }
 0x756   :  { %v5824_v6 = vmul.f32 1.442695, %v5600_v23 }
 0x757   :  { %12079 = vmatmul.mubr.msk.bf16.vlgmr.msra.gmra.mxu1 %vm149_vm0, %v6564_v39  ;;  %v5822_v35 = vmul.f32 1.442695, %v5599_v7  ;;  %v5498_v7 = vsel %vm149_vm0, %v19545_v12, -inf }
 0x758   :  { %12090 = vmatprep.mubr.msk.bf16.mxu1 %vm12946_vm1, %v19050_v38  ;;  %12738 = vpow2.f32 %v5824_v6 }
 0x759   :  { %12740 = vpow2.f32 %v5822_v35 }
 0x75c   :  { %v16918_v5 = vpop.f32.mrf.mxu0 }
 0x75d   :  { %19534 = vst [vmem:[#allocation120_spill] sm:$0xff] %v16918_v5 }
 0x75e   :  { %v12038_v55 = vpop.f32.mrf.mxu0 }
 0x75f   :  { %v19542_v55 = vld [vmem:[#allocation134_spill] sm:$0xff] }
 0x760   :  { %v16924_v21 = vpop.f32.mrf.mxu0  ;;  %v16926_v28 = vpop.f32.mrf.mxu1  ;;  %v5601_v49 = vsub.f32 %v19542_v55, %v19541_v26 }
 0x761   :  { %19539 = vst [vmem:[#allocation42_spill] sm:$0xff] %v16924_v21  ;;  %19540 = vst [vmem:[#allocation126_spill] sm:$0xff] %v16926_v28 }
 0x762   :  { %v12039_v43 = vpop.f32.mrf.mxu0  ;;  %v12044_v34 = vpop.f32.mrf.mxu1  ;;  %v5826_v20 = vmul.f32 1.442695, %v5601_v49 }
 0x763   :  { %v5501_v43 = vsel %vm149_vm0, %v19544_v15, -inf  ;;  %v16938_v34 = vpop.eup %12736  ;;  %v19571_v15 = vld [vmem:[#allocation105_spill] sm:$0xff] }
 0x764   :  { %v16932_v58 = vpop.f32.mrf.mxu1  ;;  %12742 = vpow2.f32 %v5826_v20  ;;  %v6170_v26 = vsel %vm149_vm0, %v16938_v34, 0.0 }
 0x765   :  { %19543 = vst [vmem:[#allocation98_spill] sm:$0xff] %v16932_v58  ;;  %v16940_v23 = vpop.eup %12738  ;;  %12744 = vrcp.f32 %v16750_v4 }
 0x766   :  { %v12045_v47 = vpop.f32.mrf.mxu1  ;;  %v16946_v55 = vpop.eup %12740  ;;  %v6176_v49 = vsel %vm149_vm0, %v16940_v23, 0.0  ;;  %12746 = vrcp.f32 %v16744_v14 }
 0x767   :  { %v6173_v35 = vsel %vm149_vm0, %v16946_v55, 0.0  ;;  %12748 = vrcp.f32 %v16756_v44 }
 0x768   :  { %12750 = vrcp.f32 %v16752_v0 }
 0x771   :  { %5502 = vmax.xlane.f32.xlu0 %v5501_v43  ;;  %v16952_v6 = vpop.eup %12742 }
 0x772   :  { %v6179_v47 = vsel %vm149_vm0, %v16952_v6, 0.0 }
 0x775   :  { %5499 = vmax.xlane.f32.xlu1 %v5498_v7  ;;  %6171 = vadd.xlane.f32.xlu0 %v6170_v26  ;;  %v12745_v26 = vpop.eup %12744 }
 0x776   :  { %v12747_v14 = vpop.eup %12746 }
 0x777   :  { %v12749_v45 = vpop.eup %12748 }
 0x778   :  { %v12751_v39 = vpop.eup %12750  ;;  %v6477_v28 = vmul.f32 %v12749_v45, %v16510_v16  ;;  %v19546_v16 = vld [vmem:[#allocation133_spill] sm:$0xff] }
 0x779   :  { %6174 = vadd.xlane.f32.xlu1 %v6173_v35  ;;  %6177 = vadd.xlane.f32.xlu0 %v6176_v49  ;;  %v6475_v49 = vmul.f32 %v12745_v26, %v16504_v51  ;;  %v6476_v51 = vmul.f32 %v12751_v39, %v16498_v56  ;;  %v5603_v45 = vsub.f32 %v19546_v16, %v16223_v33  ;;  %v19547_v56 = vld [vmem:[#allocation131_spill] sm:$0xff] }
 0x77a   :  { %v5602_v39 = vsub.f32 %v19547_v56, %v16204_v11 }
 0x77d   :  { %6180 = vadd.xlane.f32.xlu1 %v6179_v47  ;;  %v6474_v47 = vmul.f32 %v12747_v14, %v16496_v24  ;;  %v6566_v24 = vpack.c.bf16 %v6477_v28, %v6476_v51 }
 0x77f   :  { %v6565_v58 = vpack.c.bf16 %v6475_v49, %v6474_v47  ;;  %v5830_v49 = vmul.f32 1.442695, %v5603_v45 }
 0x780   :  { %v16960_v20 = vpop.xlane.xlu0 %5490 }
 0x781   :  { %12752 = vpow2.f32 %v5830_v49 }
 0x784   :  { %v16962_v43 = vpop.xlane.xlu1 %5487  ;;  %v16964_v7 = vpop.xlane.xlu0 %6147 }
 0x788   :  { %v16966_v35 = vpop.xlane.xlu1 %6150  ;;  %v16968_v4 = vpop.xlane.xlu0 %6153 }
 0x78c   :  { %v16972_v44 = vpop.xlane.xlu1 %6156  ;;  %v2027_v0 = vpop.permute.xlu0 %2026 }
 0x78d   :  { %12083 = vmatpush3.bf16.msra.mxu0 %v2027_v0  ;;  %v5828_v0 = vmul.f32 1.442695, %v5602_v39 }
 0x78e   :  { %2044 = vrot.lane.b32.xlu1 %v19355_v48, %s12952_s30  ;;  %12094 = vmatprep.subr.bf16.mxu0 %v19050_v38 }
 0x78f   :  { %2042 = vrot.lane.b32.xlu0 %v19358_v41, %s12952_s30  ;;  %12754 = vpow2.f32 %v5828_v0 }
 0x790   :  { %v2029_v26 = vpop.permute.xlu1 %2028  ;;  %12085 = vmatmul.mubr.msk.bf16.vlgmr.msra.gmra.mxu0 %vm149_vm0, %v6565_v58  ;;  %v19548_v58 = vld [vmem:[#allocation136_spill] sm:$0xff] }
 0x791   :  { %12089 = vmatpush3.bf16.msra.mxu1 %v2029_v26  ;;  %12096 = vmatprep.mubr.msk.bf16.mxu0 %vm12946_vm1, %v19050_v38  ;;  %v5604_v14 = vsub.f32 %v19548_v58, %v16206_v61  ;;  %v19550_v26 = vld [vmem:[#allocation51_spill] sm:$0xff] }
 0x792   :  { %12100 = vmatprep.subr.bf16.mxu1 %v19050_v38 }
 0x793   :  { %v5832_v51 = vmul.f32 1.442695, %v5604_v14  ;;  %v17008_v14 = vpop.eup %12752 }
 0x794   :  { %12091 = vmatmul.mubr.msk.bf16.vlgmr.msra.gmra.mxu1 %vm149_vm0, %v6566_v24  ;;  %v19551_v24 = vld [vmem:[#allocation139_spill] sm:$0xff] }
 0x795   :  { %12102 = vmatprep.mubr.msk.bf16.mxu1 %vm12946_vm1, %v19050_v38  ;;  %v5605_v5 = vsub.f32 %v19551_v24, %v19550_v26  ;;  %12756 = vpow2.f32 %v5832_v51 }
 0x797   :  { %v5834_v61 = vmul.f32 1.442695, %v5605_v5 }
 0x799   :  { %v16994_v47 = vpop.f32.mrf.mxu0  ;;  %12758 = vpow2.f32 %v5834_v61 }
 0x79a   :  { %19549 = vst [vmem:[#allocation123_spill] sm:$0xff] %v16994_v47  ;;  %12760 = vrcp.f32 %v16822_v32 }
 0x79b   :  { %v12050_v28 = vpop.f32.mrf.mxu0  ;;  %12762 = vrcp.f32 %v16820_v27 }
 0x79c   :  { %v17010_v49 = vpop.eup %12754  ;;  %v6185_v28 = vsel %vm149_vm0, %v17008_v14, 0.0  ;;  %12764 = vrcp.f32 %v16828_v36 }
 0x79d   :  { %v16998_v33 = vpop.f32.mrf.mxu0  ;;  %v17000_v16 = vpop.f32.mrf.mxu1  ;;  %v6182_v5 = vsel %vm149_vm0, %v17010_v49, 0.0  ;;  %12766 = vrcp.f32 %v16824_v62 }
 0x79e   :  { %19552 = vst [vmem:[#allocation47_spill] sm:$0xff] %v16998_v33  ;;  %19553 = vst [vmem:[#allocation128_spill] sm:$0xff] %v17000_v16  ;;  %v19557_v33 = vld [vmem:[#allocation137_spill] sm:$0xff] }
 0x79f   :  { %v12051_v56 = vpop.f32.mrf.mxu0  ;;  %v12056_v21 = vpop.f32.mrf.mxu1  ;;  %v5607_v16 = vsub.f32 %v19557_v33, %v16250_v8  ;;  %v19561_v33 = vld [vmem:[#allocation62_spill] sm:$0xff] }
 0x7a1   :  { %v17004_v45 = vpop.f32.mrf.mxu1 }
 0x7a2   :  { %19554 = vst [vmem:[#allocation100_spill] sm:$0xff] %v17004_v45  ;;  %v17014_v26 = vpop.eup %12756 }
 0x7a3   :  { %v12057_v58 = vpop.f32.mrf.mxu1  ;;  %v6188_v21 = vsel %vm149_vm0, %v17014_v26, 0.0 }
 0x7a6   :  { %v17020_v0 = vpop.eup %12758 }
 0x7a7   :  { %v6191_v51 = vsel %vm149_vm0, %v17020_v0, 0.0  ;;  %v12761_v58 = vpop.eup %12760 }
 0x7a8   :  { %v6479_v32 = vmul.f32 %v12761_v58, %v16588_v52 }
 0x7ae   :  { %6186 = vadd.xlane.f32.xlu0 %v6185_v28 }
 0x7b2   :  { %6183 = vadd.xlane.f32.xlu1 %v6182_v5  ;;  %6189 = vadd.xlane.f32.xlu0 %v6188_v21  ;;  %v12763_v21 = vpop.eup %12762 }
 0x7b3   :  { %v12765_v27 = vpop.eup %12764  ;;  %v6478_v62 = vmul.f32 %v12763_v21, %v16578_v10 }
 0x7b4   :  { %v12767_v11 = vpop.eup %12766  ;;  %v6481_v39 = vmul.f32 %v12765_v27, %v16598_v60  ;;  %v19558_v60 = vld [vmem:[#allocation141_spill] sm:$0xff]  ;;  %v5838_v27 = vmul.f32 1.442695, %v5607_v16 }
 0x7b5   :  { %v6567_v47 = vpack.c.bf16 %v6479_v32, %v6478_v62  ;;  %v6480_v52 = vmul.f32 %v12767_v11, %v16582_v31  ;;  %v5608_v21 = vsub.f32 %v19558_v60, %v16229_v53  ;;  %v19559_v32 = vld [vmem:[#allocation79_spill] sm:$0xff]  ;;  %v19562_v62 = vld [vmem:[#allocation144_spill] sm:$0xff] }
 0x7b6   :  { %6192 = vadd.xlane.f32.xlu1 %v6191_v51  ;;  %v19560_v31 = vld [vmem:[#allocation135_spill] sm:$0xff]  ;;  %12768 = vpow2.f32 %v5838_v27 }
 0x7b7   :  { %v6568_v10 = vpack.c.bf16 %v6481_v39, %v6480_v52  ;;  %v5606_v11 = vsub.f32 %v19560_v31, %v19559_v32  ;;  %v5840_v8 = vmul.f32 1.442695, %v5608_v21 }
 0x7b9   :  { %12770 = vpow2.f32 %v5840_v8 }
 0x7bd   :  { %v17028_v24 = vpop.xlane.xlu0 %5496 }
 0x7be   :  { %19555 = vst [vmem:[#allocation125_spill] sm:$0xff] %v17028_v24  ;;  %v19575_v24 = vld [vmem:[#allocation140_spill] sm:$0xff] }
 0x7c1   :  { %v17030_v56 = vpop.xlane.xlu1 %5493  ;;  %v17032_v61 = vpop.xlane.xlu0 %6159 }
 0x7c2   :  { %19556 = vst [vmem:[#allocation67_spill] sm:$0xff] %v17030_v56 }
 0x7c3   :  { %v17076_v27 = vpop.eup %12768 }
 0x7c5   :  { %v17034_v28 = vpop.xlane.xlu1 %6162  ;;  %v17036_v5 = vpop.xlane.xlu0 %6165 }
 0x7c6   :  { %v17078_v8 = vpop.eup %12770 }
 0x7c7   :  { %2048 = vrot.lane.b32.xlu1 %v19268_v25, %s12952_s30 }
 0x7c8   :  { %2046 = vrot.lane.b32.xlu0 %v19261_v42, %s12952_s30 }
 0x7c9   :  { %v17044_v36 = vpop.xlane.xlu1 %6168  ;;  %v2031_v51 = vpop.permute.xlu0 %2030 }
 0x7ca   :  { %12095 = vmatpush3.bf16.msra.mxu0 %v2031_v51  ;;  %v5609_v51 = vsub.f32 %v19562_v62, %v19561_v33 }
 0x7cb   :  { %12106 = vmatprep.subr.bf16.mxu0 %v19050_v38 }
 0x7cc   :  { %v5842_v53 = vmul.f32 1.442695, %v5609_v51  ;;  %v6200_v51 = vsel %vm149_vm0, %v17078_v8, 0.0 }
 0x7cd   :  { %v2041_v58 = vpop.permute.xlu1 %2040  ;;  %12097 = vmatmul.mubr.msk.bf16.vlgmr.msra.gmra.mxu0 %vm149_vm0, %v6567_v47  ;;  %v5836_v47 = vmul.f32 1.442695, %v5606_v11 }
 0x7ce   :  { %12101 = vmatpush3.bf16.msra.mxu1 %v2041_v58  ;;  %12108 = vmatprep.mubr.msk.bf16.mxu0 %vm12946_vm1, %v19050_v38 }
 0x7cf   :  { %12112 = vmatprep.subr.bf16.mxu1 %v19050_v38  ;;  %12772 = vpow2.f32 %v5836_v47  ;;  %v6197_v47 = vsel %vm149_vm0, %v17076_v27, 0.0 }
 0x7d0   :  { %12774 = vpow2.f32 %v5842_v53 }
 0x7d1   :  { %12103 = vmatmul.mubr.msk.bf16.vlgmr.msra.gmra.mxu1 %vm149_vm0, %v6568_v10  ;;  %12776 = vrcp.f32 %v16894_v1 }
 0x7d2   :  { %12114 = vmatprep.mubr.msk.bf16.mxu1 %vm12946_vm1, %v19050_v38  ;;  %12778 = vrcp.f32 %v16892_v2 }
 0x7d3   :  { %12780 = vrcp.f32 %v16900_v46 }
 0x7d4   :  { %12782 = vrcp.f32 %v16896_v22 }
 0x7d6   :  { %v17064_v39 = vpop.f32.mrf.mxu0 }
 0x7d7   :  { %19563 = vst [vmem:[#allocation130_spill] sm:$0xff] %v17064_v39  ;;  %v19570_v39 = vld [vmem:[#allocation40_spill] sm:$0xff] }
 0x7d8   :  { %v12062_v52 = vpop.f32.mrf.mxu0 }
 0x7da   :  { %v17066_v58 = vpop.f32.mrf.mxu0  ;;  %v17068_v10 = vpop.f32.mrf.mxu1 }
 0x7db   :  { %19564 = vst [vmem:[#allocation64_spill] sm:$0xff] %v17066_v58  ;;  %19565 = vst [vmem:[#allocation127_spill] sm:$0xff] %v17068_v10  ;;  %v19569_v10 = vld [vmem:[#allocation142_spill] sm:$0xff] }
 0x7dc   :  { %v12063_v60 = vpop.f32.mrf.mxu0  ;;  %v12068_v21 = vpop.f32.mrf.mxu1 }
 0x7dd   :  { %v17082_v33 = vpop.eup %12772 }
 0x7de   :  { %v17072_v32 = vpop.f32.mrf.mxu1  ;;  %v6194_v62 = vsel %vm149_vm0, %v17082_v33, 0.0  ;;  %v17088_v52 = vpop.eup %12774 }
 0x7df   :  { %19566 = vst [vmem:[#allocation54_spill] sm:$0xff] %v17072_v32  ;;  %v6203_v53 = vsel %vm149_vm0, %v17088_v52, 0.0  ;;  %v5611_v32 = vsub.f32 %v19569_v10, %v16429_v40  ;;  %v19576_v10 = vld [vmem:[#allocation49_spill] sm:$0xff] }
 0x7e0   :  { %v12069_v11 = vpop.f32.mrf.mxu1 }
 0x7e7   :  { %6198 = vadd.xlane.f32.xlu0 %v6197_v47  ;;  %v12777_v47 = vpop.eup %12776 }
 0x7e8   :  { %v12779_v46 = vpop.eup %12778  ;;  %v6483_v22 = vmul.f32 %v12777_v47, %v16706_v9  ;;  %v19573_v9 = vld [vmem:[#allocation110_spill] sm:$0xff] }
 0x7eb   :  { %6195 = vadd.xlane.f32.xlu1 %v6194_v62  ;;  %6201 = vadd.xlane.f32.xlu0 %v6200_v51  ;;  %v12781_v62 = vpop.eup %12780  ;;  %v6482_v51 = vmul.f32 %v12779_v46, %v16692_v50  ;;  %v5846_v50 = vmul.f32 1.442695, %v5611_v32  ;;  %v19574_v46 = vld [vmem:[#allocation107_spill] sm:$0xff] }
 0x7ec   :  { %v12783_v16 = vpop.eup %12782  ;;  %v6485_v58 = vmul.f32 %v12781_v62, %v19570_v39  ;;  %v5610_v56 = vsub.f32 %v19575_v24, %v19574_v46 }
 0x7ed   :  { %v6569_v45 = vpack.c.bf16 %v6483_v22, %v6482_v51  ;;  %v6484_v47 = vmul.f32 %v12783_v16, %v19573_v9  ;;  %12784 = vpow2.f32 %v5846_v50  ;;  %v19577_v16 = vld [vmem:[#allocation148_spill] sm:$0xff] }
 0x7ef   :  { %6204 = vadd.xlane.f32.xlu1 %v6203_v53  ;;  %v6570_v40 = vpack.c.bf16 %v6485_v58, %v6484_v47 }
 0x7fa   :  { %v17096_v60 = vpop.xlane.xlu0 %5502  ;;  %v17142_v62 = vpop.eup %12784 }
 0x7fb   :  { %19567 = vst [vmem:[#allocation132_spill] sm:$0xff] %v17096_v60  ;;  %v19572_v60 = vld [vmem:[#allocation146_spill] sm:$0xff]  ;;  %v6209_v50 = vsel %vm149_vm0, %v17142_v62, 0.0 }
 0x7fc   :  { %v5612_v12 = vsub.f32 %v19572_v60, %v19571_v15  ;;  %v5844_v15 = vmul.f32 1.442695, %v5610_v56  ;;  %v19584_v56 = vld [vmem:[#allocation93_spill] sm:$0xff] }
 0x7fe   :  { %v17098_v21 = vpop.xlane.xlu1 %5499  ;;  %v17100_v11 = vpop.xlane.xlu0 %6171  ;;  %v5848_v39 = vmul.f32 1.442695, %v5612_v12 }
 0x7ff   :  { %19568 = vst [vmem:[#allocation56_spill] sm:$0xff] %v17098_v21 }
 0x800   :  { %2052 = vrot.lane.b32.xlu1 %v19417_v30, %s12952_s30  ;;  %12786 = vpow2.f32 %v5848_v39 }
 0x801   :  { %2050 = vrot.lane.b32.xlu0 %v19418_v29, %s12952_s30  ;;  %12788 = vpow2.f32 %v5844_v15 }
 0x802   :  { %v17106_v1 = vpop.xlane.xlu1 %6174  ;;  %v17108_v2 = vpop.xlane.xlu0 %6177 }
 0x806   :  { %v17112_v53 = vpop.xlane.xlu1 %6180  ;;  %v2043_v31 = vpop.permute.xlu0 %2042 }
 0x807   :  { %12107 = vmatpush3.bf16.msra.mxu0 %v2043_v31  ;;  %v5613_v31 = vsub.f32 %v19577_v16, %v19576_v10 }
 0x808   :  { %12118 = vmatprep.subr.bf16.mxu0 %v19050_v38 }
 0x80a   :  { %v2045_v21 = vpop.permute.xlu1 %2044  ;;  %12109 = vmatmul.mubr.msk.bf16.vlgmr.msra.gmra.mxu0 %vm149_vm0, %v6569_v45  ;;  %v5850_v45 = vmul.f32 1.442695, %v5613_v31 }
 0x80b   :  { %12113 = vmatpush3.bf16.msra.mxu1 %v2045_v21  ;;  %12120 = vmatprep.mubr.msk.bf16.mxu0 %vm12946_vm1, %v19050_v38 }
 0x80c   :  { %12124 = vmatprep.subr.bf16.mxu1 %v19050_v38  ;;  %12790 = vpow2.f32 %v5850_v45 }
 0x80d   :  { %v17146_v47 = vpop.eup %12786  ;;  %12792 = vrcp.f32 %v16966_v35 }
 0x80e   :  { %12115 = vmatmul.mubr.msk.bf16.vlgmr.msra.gmra.mxu1 %vm149_vm0, %v6570_v40  ;;  %v17150_v46 = vpop.eup %12788  ;;  %v6212_v39 = vsel %vm149_vm0, %v17146_v47, 0.0  ;;  %12794 = vrcp.f32 %v16964_v7 }
 0x80f   :  { %12126 = vmatprep.mubr.msk.bf16.mxu1 %vm12946_vm1, %v19050_v38  ;;  %v6206_v40 = vsel %vm149_vm0, %v17150_v46, 0.0  ;;  %12796 = vrcp.f32 %v16972_v44 }
 0x810   :  { %12798 = vrcp.f32 %v16968_v4 }
 0x813   :  { %v17132_v24 = vpop.f32.mrf.mxu0 }
 0x814   :  { %19578 = vst [vmem:[#allocation129_spill] sm:$0xff] %v17132_v24  ;;  %v19587_v24 = vld [vmem:[#allocation45_spill] sm:$0xff] }
 0x815   :  { %v12074_v32 = vpop.f32.mrf.mxu0 }
 0x817   :  { %v17134_v58 = vpop.f32.mrf.mxu0  ;;  %v17136_v12 = vpop.f32.mrf.mxu1 }
 0x818   :  { %19579 = vst [vmem:[#allocation87_spill] sm:$0xff] %v17134_v58  ;;  %19580 = vst [vmem:[#allocation134_spill] sm:$0xff] %v17136_v12  ;;  %v19585_v12 = vld [vmem:[#allocation145_spill] sm:$0xff] }
 0x819   :  { %v12075_v60 = vpop.f32.mrf.mxu0  ;;  %v12080_v21 = vpop.f32.mrf.mxu1 }
 0x81a   :  { %v17156_v15 = vpop.eup %12790 }
 0x81b   :  { %v17140_v22 = vpop.f32.mrf.mxu1  ;;  %v6215_v10 = vsel %vm149_vm0, %v17156_v15, 0.0  ;;  %v12793_v31 = vpop.eup %12792 }
 0x81c   :  { %19581 = vst [vmem:[#allocation133_spill] sm:$0xff] %v17140_v22  ;;  %v12795_v35 = vpop.eup %12794  ;;  %v6487_v7 = vmul.f32 %v12793_v31, %v16802_v3  ;;  %v5614_v22 = vsub.f32 %v19585_v12, %v19584_v56  ;;  %v19589_v56 = vld [vmem:[#allocation151_spill] sm:$0xff] }
 0x81d   :  { %v12081_v9 = vpop.f32.mrf.mxu1  ;;  %v12797_v60 = vpop.eup %12796  ;;  %v6486_v44 = vmul.f32 %v12795_v35, %v16794_v13  ;;  %v19586_v35 = vld [vmem:[#allocation96_spill] sm:$0xff] }
 0x81e   :  { %v12799_v9 = vpop.eup %12798  ;;  %v5616_v58 = vsub.f32 %v19587_v24, %v19586_v35 }
 0x81f   :  { %v6571_v51 = vpack.c.bf16 %v6487_v7, %v6486_v44  ;;  %v6488_v3 = vmul.f32 %v12799_v9, %v16796_v17  ;;  %v5852_v7 = vmul.f32 1.442695, %v5614_v22  ;;  %v19588_v17 = vld [vmem:[#allocation85_spill] sm:$0xff] }
 0x820   :  { %6210 = vadd.xlane.f32.xlu0 %v6209_v50  ;;  %v19582_v50 = vld [vmem:[#allocation66_spill] sm:$0xff]  ;;  %v5856_v12 = vmul.f32 1.442695, %v5616_v58 }
 0x824   :  { %6207 = vadd.xlane.f32.xlu1 %v6206_v40  ;;  %6213 = vadd.xlane.f32.xlu0 %v6212_v39  ;;  %v19583_v40 = vld [vmem:[#allocation147_spill] sm:$0xff] }
 0x825   :  { %v5615_v39 = vsub.f32 %v19583_v40, %v19582_v50 }
 0x827   :  { %v5854_v13 = vmul.f32 1.442695, %v5615_v39 }
 0x828   :  { %6216 = vadd.xlane.f32.xlu1 %v6215_v10  ;;  %v6489_v10 = vmul.f32 %v12797_v60, %v16808_v59  ;;  %v5617_v60 = vsub.f32 %v19589_v56, %v19588_v17 }
 0x829   :  { %12800 = vpow2.f32 %v5854_v13 }
 0x82a   :  { %v6572_v59 = vpack.c.bf16 %v6489_v10, %v6488_v3  ;;  %12802 = vpow2.f32 %v5852_v7  ;;  %v5858_v24 = vmul.f32 1.442695, %v5617_v60 }
 0x82b   :  { %12804 = vpow2.f32 %v5856_v12 }
 0x82c   :  { %12806 = vpow2.f32 %v5858_v24 }
 0x82d   :  { %12808 = vrcp.f32 %v17034_v28 }
 0x82e   :  { %12810 = vrcp.f32 %v17032_v61 }
 0x82f   :  { %12812 = vrcp.f32 %v17044_v36 }
 0x830   :  { %12814 = vrcp.f32 %v17036_v5 }
 0x836   :  { %v17202_v9 = vpop.eup %12800 }
 0x837   :  { %v17164_v16 = vpop.xlane.xlu0 %6186  ;;  %v17206_v39 = vpop.eup %12802  ;;  %v6221_v3 = vsel %vm149_vm0, %v17202_v9, 0.0 }
 0x839   :  { %2064 = vrot.lane.b32.xlu1 %v19433_v54, %s12953_s16 }
 0x83a   :  { %2054 = vrot.lane.b32.xlu0 %v19434_v37, %s12952_s30 }
 0x83b   :  { %v17170_v45 = vpop.xlane.xlu1 %6183  ;;  %v17172_v32 = vpop.xlane.xlu0 %6189 }
 0x83f   :  { %v17176_v4 = vpop.xlane.xlu1 %6192  ;;  %v2047_v21 = vpop.permute.xlu0 %2046 }
 0x840   :  { %12119 = vmatpush3.bf16.msra.mxu0 %v2047_v21 }
 0x841   :  { %12130 = vmatprep.subr.bf16.mxu0 %v19050_v38 }
 0x843   :  { %v2049_v31 = vpop.permute.xlu1 %2048  ;;  %12121 = vmatmul.mubr.msk.bf16.vlgmr.msra.gmra.mxu0 %vm149_vm0, %v6571_v51 }
 0x844   :  { %12125 = vmatpush3.bf16.msra.mxu1 %v2049_v31  ;;  %12132 = vmatprep.mubr.msk.bf16.mxu0 %vm12946_vm1, %v19050_v38  ;;  %v17212_v31 = vpop.eup %12804 }
 0x845   :  { %12136 = vmatprep.subr.bf16.mxu1 %v19050_v38  ;;  %v6224_v7 = vsel %vm149_vm0, %v17212_v31, 0.0  ;;  %v17220_v12 = vpop.eup %12806 }
 0x846   :  { %v6227_v17 = vsel %vm149_vm0, %v17220_v12, 0.0  ;;  %v12809_v60 = vpop.eup %12808 }
 0x847   :  { %12127 = vmatmul.mubr.msk.bf16.vlgmr.msra.gmra.mxu1 %vm149_vm0, %v6572_v59  ;;  %v6218_v59 = vsel %vm149_vm0, %v17206_v39, 0.0  ;;  %v12811_v28 = vpop.eup %12810  ;;  %v6491_v61 = vmul.f32 %v12809_v60, %v16874_v18  ;;  %v19597_v60 = vld [vmem:[#allocation149_spill] sm:$0xff] }
 0x848   :  { %12138 = vmatprep.mubr.msk.bf16.mxu1 %vm12946_vm1, %v19050_v38  ;;  %v6490_v36 = vmul.f32 %v12811_v28, %v16866_v63  ;;  %v19596_v63 = vld [vmem:[#allocation72_spill] sm:$0xff] }
 0x849   :  { %v5618_v28 = vsub.f32 %v19597_v60, %v19596_v63 }
 0x84a   :  { %v6573_v13 = vpack.c.bf16 %v6491_v61, %v6490_v36 }
 0x850   :  { %v17196_v51 = vpop.f32.mrf.mxu0 }
 0x851   :  { %19590 = vst [vmem:[#allocation131_spill] sm:$0xff] %v17196_v51 }
 0x852   :  { %v12086_v44 = vpop.f32.mrf.mxu0 }
 0x854   :  { %v17198_v21 = vpop.f32.mrf.mxu0  ;;  %v17200_v22 = vpop.f32.mrf.mxu1 }
 0x855   :  { %19591 = vst [vmem:[#allocation136_spill] sm:$0xff] %v17198_v21  ;;  %19592 = vst [vmem:[#allocation51_spill] sm:$0xff] %v17200_v22 }
 0x856   :  { %v12087_v50 = vpop.f32.mrf.mxu0  ;;  %v12092_v40 = vpop.f32.mrf.mxu1 }
 0x857   :  { %v12813_v50 = vpop.eup %12812 }
 0x858   :  { %v17208_v10 = vpop.f32.mrf.mxu1 }
 0x859   :  { %19593 = vst [vmem:[#allocation139_spill] sm:$0xff] %v17208_v10  ;;  %6222 = vadd.xlane.f32.xlu0 %v6221_v3  ;;  %v12815_v3 = vpop.eup %12814 }
 0x85a   :  { %v12093_v35 = vpop.f32.mrf.mxu1  ;;  %v6492_v58 = vmul.f32 %v12815_v3, %v16868_v57 }
 0x85b   :  { %v19594_v35 = vld [vmem:[#allocation91_spill] sm:$0xff] }
 0x85d   :  { %6219 = vadd.xlane.f32.xlu1 %v6218_v59  ;;  %6225 = vadd.xlane.f32.xlu0 %v6224_v7  ;;  %v19595_v59 = vld [vmem:[#allocation150_spill] sm:$0xff] }
 0x85e   :  { %v5619_v7 = vsub.f32 %v19595_v59, %v19594_v35 }
 0x860   :  { %v5862_v18 = vmul.f32 1.442695, %v5619_v7 }
 0x861   :  { %6228 = vadd.xlane.f32.xlu1 %v6227_v17  ;;  %v6493_v17 = vmul.f32 %v12813_v50, %v16880_v19  ;;  %v5860_v19 = vmul.f32 1.442695, %v5618_v28 }
 0x862   :  { %12816 = vpow2.f32 %v5862_v18  ;;  %v19602_v18 = vld [vmem:[#allocation121_spill] sm:$0xff] }
 0x863   :  { %v6574_v35 = vpack.c.bf16 %v6493_v17, %v6492_v58  ;;  %12818 = vpow2.f32 %v5860_v19 }
 0x864   :  { %12820 = vrcp.f32 %v17106_v1 }
 0x865   :  { %12822 = vrcp.f32 %v17100_v11  ;;  %v19601_v11 = vld [vmem:[#allocation48_spill] sm:$0xff] }
 0x866   :  { %12824 = vrcp.f32 %v17112_v53 }
 0x867   :  { %12826 = vrcp.f32 %v17108_v2 }
 0x870   :  { %v17228_v56 = vpop.xlane.xlu0 %6198 }
 0x872   :  { %2068 = vrot.lane.b32.xlu1 %v19355_v48, %s12953_s16 }
 0x873   :  { %2066 = vrot.lane.b32.xlu0 %v19358_v41, %s12953_s16 }
 0x874   :  { %v17234_v24 = vpop.xlane.xlu1 %6195  ;;  %v17236_v44 = vpop.xlane.xlu0 %6201 }
 0x878   :  { %v17240_v5 = vpop.xlane.xlu1 %6204  ;;  %v2051_v40 = vpop.permute.xlu0 %2050 }
 0x879   :  { %12131 = vmatpush3.bf16.msra.mxu0 %v2051_v40 }
 0x87a   :  { %12142 = vmatprep.subr.bf16.mxu0 %v19050_v38 }
 0x87c   :  { %v2053_v22 = vpop.permute.xlu1 %2052  ;;  %12133 = vmatmul.mubr.msk.bf16.vlgmr.msra.gmra.mxu0 %vm149_vm0, %v6573_v13  ;;  %v17258_v13 = vpop.eup %12816 }
 0x87d   :  { %12137 = vmatpush3.bf16.msra.mxu1 %v2053_v22  ;;  %12144 = vmatprep.mubr.msk.bf16.mxu0 %vm12946_vm1, %v19050_v38  ;;  %v6233_v58 = vsel %vm149_vm0, %v17258_v13, 0.0  ;;  %v17266_v36 = vpop.eup %12818 }
 0x87e   :  { %12148 = vmatprep.subr.bf16.mxu1 %v19050_v38  ;;  %v6230_v17 = vsel %vm149_vm0, %v17266_v36, 0.0  ;;  %v12821_v28 = vpop.eup %12820 }
 0x87f   :  { %v12823_v1 = vpop.eup %12822  ;;  %v6495_v53 = vmul.f32 %v12821_v28, %v16946_v55 }
 0x880   :  { %12139 = vmatmul.mubr.msk.bf16.vlgmr.msra.gmra.mxu1 %vm149_vm0, %v6574_v35  ;;  %v12825_v2 = vpop.eup %12824 }
 0x881   :  { %12150 = vmatprep.mubr.msk.bf16.mxu1 %vm12946_vm1, %v19050_v38  ;;  %v6497_v10 = vmul.f32 %v12825_v2, %v16952_v6 }
 0x88d   :  { %v17256_v57 = vpop.f32.mrf.mxu0 }
 0x88e   :  { %19598 = vst [vmem:[#allocation137_spill] sm:$0xff] %v17256_v57  ;;  %v19603_v57 = vld [vmem:[#allocation153_spill] sm:$0xff] }
 0x88f   :  { %v12098_v61 = vpop.f32.mrf.mxu0 }
 0x890   :  { %v19600_v61 = vld [vmem:[#allocation114_spill] sm:$0xff] }
 0x891   :  { %v17260_v22 = vpop.f32.mrf.mxu0  ;;  %v17262_v50 = vpop.f32.mrf.mxu1 }
 0x892   :  { %19599 = vst [vmem:[#allocation141_spill] sm:$0xff] %v17260_v22  ;;  %6234 = vadd.xlane.f32.xlu0 %v6233_v58  ;;  %v5621_v58 = vsub.f32 %v19601_v11, %v19600_v61  ;;  %v5620_v22 = vsub.f32 %v19603_v57, %v19602_v18 }
 0x893   :  { %v12099_v3 = vpop.f32.mrf.mxu0  ;;  %v12104_v59 = vpop.f32.mrf.mxu1 }
 0x894   :  { %v6494_v3 = vmul.f32 %v12823_v1, %v16938_v34  ;;  %v5866_v40 = vmul.f32 1.442695, %v5621_v58  ;;  %v5864_v34 = vmul.f32 1.442695, %v5620_v22 }
 0x895   :  { %v17270_v7 = vpop.f32.mrf.mxu1 }
 0x896   :  { %6231 = vadd.xlane.f32.xlu1 %v6230_v17  ;;  %v6575_v51 = vpack.c.bf16 %v6495_v53, %v6494_v3  ;;  %12828 = vpow2.f32 %v5866_v40 }
 0x897   :  { %v12105_v63 = vpop.f32.mrf.mxu1  ;;  %12830 = vpow2.f32 %v5864_v34 }
 0x898   :  { %v12827_v63 = vpop.eup %12826  ;;  %12832 = vrcp.f32 %v17170_v45 }
 0x899   :  { %v6496_v61 = vmul.f32 %v12827_v63, %v16940_v23  ;;  %12834 = vrcp.f32 %v17164_v16  ;;  %v19604_v63 = vld [vmem:[#allocation80_spill] sm:$0xff] }
 0x89a   :  { %12836 = vrcp.f32 %v17176_v4 }
 0x89b   :  { %v6576_v28 = vpack.c.bf16 %v6497_v10, %v6496_v61  ;;  %12838 = vrcp.f32 %v17172_v32  ;;  %v19605_v61 = vld [vmem:[#allocation154_spill] sm:$0xff] }
 0x8a3   :  { %v17308_v6 = vpop.eup %12828 }
 0x8a4   :  { %v6239_v23 = vsel %vm149_vm0, %v17308_v6, 0.0 }
 0x8a7   :  { %2072 = vrot.lane.b32.xlu1 %v19268_v25, %s12953_s16 }
 0x8a8   :  { %2070 = vrot.lane.b32.xlu0 %v19261_v42, %s12953_s16 }
 0x8a9   :  { %v17284_v60 = vpop.xlane.xlu0 %6210 }
 0x8ad   :  { %v17286_v35 = vpop.xlane.xlu1 %6207  ;;  %v17288_v19 = vpop.xlane.xlu0 %6213 }
 0x8b1   :  { %v17294_v59 = vpop.xlane.xlu1 %6216  ;;  %v2055_v17 = vpop.permute.xlu0 %2054 }
 0x8b2   :  { %12143 = vmatpush3.bf16.msra.mxu0 %v2055_v17 }
 0x8b3   :  { %12154 = vmatprep.subr.bf16.mxu0 %v19050_v38 }
 0x8b5   :  { %v2065_v55 = vpop.permute.xlu1 %2064  ;;  %12145 = vmatmul.mubr.msk.bf16.vlgmr.msra.gmra.mxu0 %vm149_vm0, %v6575_v51  ;;  %v17312_v51 = vpop.eup %12830 }
 0x8b6   :  { %12149 = vmatpush3.bf16.msra.mxu1 %v2065_v55  ;;  %12156 = vmatprep.mubr.msk.bf16.mxu0 %vm12946_vm1, %v19050_v38  ;;  %v6236_v10 = vsel %vm149_vm0, %v17312_v51, 0.0  ;;  %v5623_v55 = vsub.f32 %v19605_v61, %v19604_v63  ;;  %v12833_v34 = vpop.eup %12832 }
 0x8b7   :  { %12160 = vmatprep.subr.bf16.mxu1 %v19050_v38  ;;  %v12835_v16 = vpop.eup %12834 }
 0x8b8   :  { %v5870_v4 = vmul.f32 1.442695, %v5623_v55  ;;  %v6499_v32 = vmul.f32 %v12835_v16, %v17008_v14 }
 0x8b9   :  { %12151 = vmatmul.mubr.msk.bf16.vlgmr.msra.gmra.mxu1 %vm149_vm0, %v6576_v28 }
 0x8ba   :  { %12162 = vmatprep.mubr.msk.bf16.mxu1 %vm12946_vm1, %v19050_v38  ;;  %12840 = vpow2.f32 %v5870_v4 }
 0x8c7   :  { %6240 = vadd.xlane.f32.xlu0 %v6239_v23  ;;  %v19606_v23 = vld [vmem:[#allocation74_spill] sm:$0xff] }
 0x8ca   :  { %v17314_v57 = vpop.f32.mrf.mxu0 }
 0x8cb   :  { %6237 = vadd.xlane.f32.xlu1 %v6236_v10  ;;  %v19607_v10 = vld [vmem:[#allocation152_spill] sm:$0xff] }
 0x8cc   :  { %v12110_v22 = vpop.f32.mrf.mxu0 }
 0x8cd   :  { %v5622_v22 = vsub.f32 %v19607_v10, %v19606_v23 }
 0x8ce   :  { %v17318_v40 = vpop.f32.mrf.mxu0  ;;  %v17320_v18 = vpop.f32.mrf.mxu1 }
 0x8cf   :  { %v5868_v63 = vmul.f32 1.442695, %v5622_v22 }
 0x8d0   :  { %v12111_v11 = vpop.f32.mrf.mxu0  ;;  %v12116_v58 = vpop.f32.mrf.mxu1 }
 0x8d1   :  { %v6498_v11 = vmul.f32 %v12833_v34, %v17010_v49  ;;  %v12837_v58 = vpop.eup %12836  ;;  %12842 = vpow2.f32 %v5868_v63  ;;  %v19608_v63 = vld [vmem:[#allocation124_spill] sm:$0xff] }
 0x8d2   :  { %v17324_v53 = vpop.f32.mrf.mxu1  ;;  %v12839_v1 = vpop.eup %12838  ;;  %v6501_v61 = vmul.f32 %v12837_v58, %v17020_v0  ;;  %12844 = vrcp.f32 %v17234_v24 }
 0x8d3   :  { %v6577_v21 = vpack.c.bf16 %v6499_v32, %v6498_v11  ;;  %v6500_v55 = vmul.f32 %v12839_v1, %v17014_v26  ;;  %v17360_v49 = vpop.eup %12840  ;;  %12846 = vrcp.f32 %v17228_v56  ;;  %v19611_v56 = vld [vmem:[#allocation156_spill] sm:$0xff] }
 0x8d4   :  { %v12117_v3 = vpop.f32.mrf.mxu1  ;;  %v6245_v26 = vsel %vm149_vm0, %v17360_v49, 0.0  ;;  %12848 = vrcp.f32 %v17240_v5 }
 0x8d5   :  { %v6578_v14 = vpack.c.bf16 %v6501_v61, %v6500_v55  ;;  %12850 = vrcp.f32 %v17236_v44  ;;  %v19609_v61 = vld [vmem:[#allocation158_spill] sm:$0xff] }
 0x8d6   :  { %v5625_v55 = vsub.f32 %v19609_v61, %v19608_v63  ;;  %v19612_v63 = vld [vmem:[#allocation155_spill] sm:$0xff] }
 0x8d7   :  { %v5626_v61 = vsub.f32 %v19612_v63, %v16962_v43 }
 0x8dc   :  { %2076 = vrot.lane.b32.xlu1 %v19417_v30, %s12953_s16 }
 0x8dd   :  { %2074 = vrot.lane.b32.xlu0 %v19418_v29, %s12953_s16 }
 0x8de   :  { %v17364_v0 = vpop.eup %12842 }
 0x8e2   :  { %v17336_v17 = vpop.xlane.xlu0 %6222 }
 0x8e6   :  { %v17340_v28 = vpop.xlane.xlu1 %6219  ;;  %v17342_v45 = vpop.xlane.xlu0 %6225 }
 0x8ea   :  { %v17348_v3 = vpop.xlane.xlu1 %6228  ;;  %v2067_v2 = vpop.permute.xlu0 %2066 }
 0x8eb   :  { %12155 = vmatpush3.bf16.msra.mxu0 %v2067_v2 }
 0x8ec   :  { %12166 = vmatprep.subr.bf16.mxu0 %v19050_v38 }
 0x8ee   :  { %v2069_v23 = vpop.permute.xlu1 %2068  ;;  %12157 = vmatmul.mubr.msk.bf16.vlgmr.msra.gmra.mxu0 %vm149_vm0, %v6577_v21  ;;  %v6242_v21 = vsel %vm149_vm0, %v17364_v0, 0.0 }
 0x8ef   :  { %12161 = vmatpush3.bf16.msra.mxu1 %v2069_v23  ;;  %12168 = vmatprep.mubr.msk.bf16.mxu0 %vm12946_vm1, %v19050_v38  ;;  %v12845_v23 = vpop.eup %12844 }
 0x8f0   :  { %12172 = vmatprep.subr.bf16.mxu1 %v19050_v38  ;;  %v12847_v24 = vpop.eup %12846  ;;  %v6502_v5 = vmul.f32 %v12845_v23, %v17082_v33 }
 0x8f2   :  { %12163 = vmatmul.mubr.msk.bf16.vlgmr.msra.gmra.mxu1 %vm149_vm0, %v6578_v14 }
 0x8f3   :  { %12174 = vmatprep.mubr.msk.bf16.mxu1 %vm12946_vm1, %v19050_v38 }
 0x8fc   :  { %6246 = vadd.xlane.f32.xlu0 %v6245_v26  ;;  %v5874_v26 = vmul.f32 1.442695, %v5625_v55 }
 0x8fe   :  { %12852 = vpow2.f32 %v5874_v26  ;;  %v5876_v26 = vmul.f32 1.442695, %v5626_v61 }
 0x900   :  { %6243 = vadd.xlane.f32.xlu1 %v6242_v21  ;;  %v19610_v21 = vld [vmem:[#allocation94_spill] sm:$0xff] }
 0x903   :  { %v17368_v1 = vpop.f32.mrf.mxu0 }
 0x905   :  { %v12122_v2 = vpop.f32.mrf.mxu0 }
 0x906   :  { %v5624_v2 = vsub.f32 %v19611_v56, %v19610_v21 }
 0x907   :  { %v17370_v34 = vpop.f32.mrf.mxu0  ;;  %v17372_v16 = vpop.f32.mrf.mxu1 }
 0x908   :  { %v5872_v58 = vmul.f32 1.442695, %v5624_v2 }
 0x909   :  { %v12123_v10 = vpop.f32.mrf.mxu0  ;;  %v12128_v22 = vpop.f32.mrf.mxu1 }
 0x90a   :  { %v12849_v10 = vpop.eup %12848  ;;  %12854 = vpow2.f32 %v5872_v58 }
 0x90b   :  { %v17376_v11 = vpop.f32.mrf.mxu1  ;;  %v12851_v44 = vpop.eup %12850  ;;  %v6505_v55 = vmul.f32 %v12849_v10, %v17088_v52  ;;  %12856 = vpow2.f32 %v5876_v26  ;;  %v19615_v26 = vld [vmem:[#allocation160_spill] sm:$0xff] }
 0x90c   :  { %v6504_v33 = vmul.f32 %v12851_v44, %v17078_v8  ;;  %v17412_v8 = vpop.eup %12852 }
 0x90d   :  { %v12129_v32 = vpop.f32.mrf.mxu1 }
 0x90e   :  { %v6580_v43 = vpack.c.bf16 %v6505_v55, %v6504_v33 }
 0x911   :  { %2088 = vrot.lane.b32.xlu1 %v19433_v54, %s12947_s6  ;;  %v6503_v54 = vmul.f32 %v12847_v24, %v17076_v27  ;;  %v19613_v27 = vld [vmem:[#allocation157_spill] sm:$0xff] }
 0x912   :  { %2078 = vrot.lane.b32.xlu0 %v19434_v37, %s12953_s16  ;;  %v5627_v24 = vsub.f32 %v19613_v27, %v16960_v20  ;;  %v6251_v20 = vsel %vm149_vm0, %v17412_v8, 0.0 }
 0x913   :  { %v6579_v4 = vpack.c.bf16 %v6503_v54, %v6502_v5 }
 0x914   :  { %v5878_v52 = vmul.f32 1.442695, %v5627_v24  ;;  %v19614_v24 = vld [vmem:[#allocation67_spill] sm:$0xff] }
 0x916   :  { %12858 = vpow2.f32 %v5878_v52 }
 0x917   :  { %12860 = vrcp.f32 %v17286_v35  ;;  %v5628_v35 = vsub.f32 %v19615_v26, %v19614_v24  ;;  %v19618_v26 = vld [vmem:[#allocation56_spill] sm:$0xff] }
 0x918   :  { %12862 = vrcp.f32 %v17284_v60 }
 0x919   :  { %12864 = vrcp.f32 %v17294_v59 }
 0x91a   :  { %12866 = vrcp.f32 %v17288_v19 }
 0x91b   :  { %v17390_v14 = vpop.xlane.xlu0 %6234 }
 0x91f   :  { %v17396_v22 = vpop.xlane.xlu1 %6231  ;;  %v2071_v32 = vpop.permute.xlu0 %2070 }
 0x920   :  { %12167 = vmatpush3.bf16.msra.mxu0 %v2071_v32 }
 0x921   :  { %12178 = vmatprep.subr.bf16.mxu0 %v19050_v38 }
 0x923   :  { %v2073_v23 = vpop.permute.xlu1 %2072  ;;  %12169 = vmatmul.mubr.msk.bf16.vlgmr.msra.gmra.mxu0 %vm149_vm0, %v6579_v4  ;;  %v17416_v4 = vpop.eup %12854 }
 0x924   :  { %12173 = vmatpush3.bf16.msra.mxu1 %v2073_v23  ;;  %12180 = vmatprep.mubr.msk.bf16.mxu0 %vm12946_vm1, %v19050_v38  ;;  %v6248_v58 = vsel %vm149_vm0, %v17416_v4, 0.0  ;;  %v17420_v21 = vpop.eup %12856 }
 0x925   :  { %12184 = vmatprep.subr.bf16.mxu1 %v19050_v38  ;;  %v6254_v56 = vsel %vm149_vm0, %v17420_v21, 0.0  ;;  %v17424_v2 = vpop.eup %12858 }
 0x926   :  { %v6257_v10 = vsel %vm149_vm0, %v17424_v2, 0.0  ;;  %v12861_v60 = vpop.eup %12860 }
 0x927   :  { %12175 = vmatmul.mubr.msk.bf16.vlgmr.msra.gmra.mxu1 %vm149_vm0, %v6580_v43  ;;  %v12863_v52 = vpop.eup %12862 }
 0x928   :  { %12186 = vmatprep.mubr.msk.bf16.mxu1 %vm12946_vm1, %v19050_v38  ;;  %v12865_v59 = vpop.eup %12864 }
 0x929   :  { %v12867_v19 = vpop.eup %12866 }
 0x931   :  { %6252 = vadd.xlane.f32.xlu0 %v6251_v20  ;;  %v5880_v20 = vmul.f32 1.442695, %v5628_v35  ;;  %v19619_v35 = vld [vmem:[#allocation159_spill] sm:$0xff] }
 0x933   :  { %12868 = vpow2.f32 %v5880_v20 }
 0x935   :  { %6249 = vadd.xlane.f32.xlu1 %v6248_v58  ;;  %v6506_v58 = vmul.f32 %v12861_v60, %v17150_v46  ;;  %v19616_v46 = vld [vmem:[#allocation125_spill] sm:$0xff]  ;;  %v5630_v60 = vsub.f32 %v19619_v35, %v19618_v26 }
 0x939   :  { %6255 = vadd.xlane.f32.xlu1 %v6254_v56  ;;  %v6507_v56 = vmul.f32 %v12863_v52, %v17142_v62  ;;  %v19621_v52 = vld [vmem:[#allocation161_spill] sm:$0xff] }
 0x93c   :  { %v17426_v5 = vpop.f32.mrf.mxu0 }
 0x93d   :  { %6258 = vadd.xlane.f32.xlu1 %v6257_v10 }
 0x93e   :  { %v12134_v54 = vpop.f32.mrf.mxu0 }
 0x93f   :  { %v6509_v54 = vmul.f32 %v12865_v59, %v17156_v15 }
 0x940   :  { %v17430_v32 = vpop.f32.mrf.mxu0  ;;  %v17432_v44 = vpop.f32.mrf.mxu1 }
 0x941   :  { %v9453_v63 = vpack.c.bf16 %v17430_v32, %v17426_v5  ;;  %v17472_v59 = vpop.eup %12868  ;;  %v19703_v5 = vld [vmem:[#allocation73_spill] sm:$0xff]  ;;  %v19704_v32 = vld [vmem:[#allocation119_spill] sm:$0xff] }
 0x942   :  { %v12135_v61 = vpop.f32.mrf.mxu0  ;;  %v12140_v55 = vpop.f32.mrf.mxu1 }
 0x943   :  { %v6581_v61 = vpack.c.bf16 %v6507_v56, %v6506_v58  ;;  %v5884_v58 = vmul.f32 1.442695, %v5630_v60 }
 0x944   :  { %v17438_v33 = vpop.f32.mrf.mxu1 }
 0x945   :  { %v9454_v23 = vpack.c.bf16 %v17438_v33, %v17432_v44  ;;  %v19724_v44 = vld [vmem:[#allocation58_spill] sm:$0xff]  ;;  %v19725_v33 = vld [vmem:[#allocation44_spill] sm:$0xff] }
 0x946   :  { %v12141_v27 = vpop.f32.mrf.mxu1 }
 0x947   :  { %2090 = vrot.lane.b32.xlu0 %v19358_v41, %s12947_s6  ;;  %v19617_v27 = vld [vmem:[#allocation162_spill] sm:$0xff] }
 0x948   :  { %v5629_v24 = vsub.f32 %v19617_v27, %v19616_v46 }
 0x94a   :  { %v5882_v15 = vmul.f32 1.442695, %v5629_v24 }
 0x94c   :  { %12870 = vpow2.f32 %v5882_v15 }
 0x94d   :  { %12872 = vpow2.f32 %v5884_v58 }
 0x94e   :  { %2092 = vrot.lane.b32.xlu1 %v19355_v48, %s12947_s6  ;;  %v6508_v48 = vmul.f32 %v12867_v19, %v17146_v47  ;;  %v19620_v47 = vld [vmem:[#allocation132_spill] sm:$0xff] }
 0x94f   :  { %v5631_v20 = vsub.f32 %v19621_v52, %v19620_v47 }
 0x950   :  { %v17450_v43 = vpop.xlane.xlu0 %6240  ;;  %v6582_v62 = vpack.c.bf16 %v6509_v54, %v6508_v48 }
 0x951   :  { %v5886_v56 = vmul.f32 1.442695, %v5631_v20 }
 0x953   :  { %12874 = vpow2.f32 %v5886_v56 }
 0x954   :  { %v17454_v10 = vpop.xlane.xlu1 %6237  ;;  %v2075_v41 = vpop.permute.xlu0 %2074  ;;  %12876 = vrcp.f32 %v17340_v28 }
 0x955   :  { %12179 = vmatpush3.bf16.msra.mxu0 %v2075_v41  ;;  %v6260_v41 = vsel %vm149_vm0, %v17472_v59, 0.0  ;;  %12878 = vrcp.f32 %v17336_v17 }
 0x956   :  { %12190 = vmatprep.subr.bf16.mxu0 %v19050_v38  ;;  %12880 = vrcp.f32 %v17348_v3 }
 0x957   :  { %12882 = vrcp.f32 %v17342_v45 }
 0x958   :  { %v2077_v55 = vpop.permute.xlu1 %2076  ;;  %12181 = vmatmul.mubr.msk.bf16.vlgmr.msra.gmra.mxu0 %vm149_vm0, %v6581_v61  ;;  %12884 = vrcp.f32 %v17396_v22 }
 0x959   :  { %12185 = vmatpush3.bf16.msra.mxu1 %v2077_v55  ;;  %12192 = vmatprep.mubr.msk.bf16.mxu0 %vm12946_vm1, %v19050_v38  ;;  %v17476_v19 = vpop.eup %12870  ;;  %12886 = vrcp.f32 %v17390_v14 }
 0x95a   :  { %12196 = vmatprep.subr.bf16.mxu1 %v19050_v38  ;;  %v6263_v54 = vsel %vm149_vm0, %v17476_v19, 0.0  ;;  %v17480_v61 = vpop.eup %12872  ;;  %12888 = vrcp.f32 %v17454_v10 }
 0x95b   :  { %v6266_v55 = vsel %vm149_vm0, %v17480_v61, 0.0  ;;  %12890 = vrcp.f32 %v17450_v43 }
 0x95c   :  { %12187 = vmatmul.mubr.msk.bf16.vlgmr.msra.gmra.mxu1 %vm149_vm0, %v6582_v62 }
 0x95d   :  { %12198 = vmatprep.mubr.msk.bf16.mxu1 %vm12946_vm1, %v19050_v38 }
 0x960   :  { %v17486_v46 = vpop.eup %12874 }
 0x961   :  { %v6269_v15 = vsel %vm149_vm0, %v17486_v46, 0.0  ;;  %v12877_v47 = vpop.eup %12876 }
 0x962   :  { %v12879_v20 = vpop.eup %12878  ;;  %v6510_v3 = vmul.f32 %v12877_v47, %v17206_v39  ;;  %v19622_v39 = vld [vmem:[#allocation109_spill] sm:$0xff]  ;;  %v19632_v47 = vld [vmem:[#allocation128_spill] sm:$0xff] }
 0x963   :  { %v12881_v58 = vpop.eup %12880 }
 0x966   :  { %6261 = vadd.xlane.f32.xlu0 %v6260_v41  ;;  %v12883_v41 = vpop.eup %12882 }
 0x967   :  { %v12885_v14 = vpop.eup %12884 }
 0x972   :  { %6264 = vadd.xlane.f32.xlu1 %v6263_v54  ;;  %v19623_v54 = vld [vmem:[#allocation104_spill] sm:$0xff] }
 0x975   :  { %v17482_v48 = vpop.f32.mrf.mxu0 }
 0x976   :  { %6267 = vadd.xlane.f32.xlu1 %v6266_v55  ;;  %v19624_v55 = vpack.c.bf16 %v19622_v39, %v19623_v54  ;;  %v19641_v54 = vpack.c.bf16 %v17318_v40, %v17314_v57 }
 0x977   :  { %v12146_v27 = vpop.f32.mrf.mxu0 }
 0x979   :  { %v17490_v24 = vpop.f32.mrf.mxu0  ;;  %v8741_v62 = vpop.f32.mrf.mxu1 }
 0x97a   :  { %v9455_v26 = vpack.c.bf16 %v17490_v24, %v17482_v48  ;;  %6270 = vadd.xlane.f32.xlu1 %v6269_v15 }
 0x97b   :  { %v12147_v35 = vpop.f32.mrf.mxu0  ;;  %v12152_v60 = vpop.f32.mrf.mxu1 }
 0x97c   :  { %2094 = vrot.lane.b32.xlu0 %v19261_v42, %s12947_s6  ;;  %v6511_v42 = vmul.f32 %v12879_v20, %v17202_v9  ;;  %v19628_v35 = vld [vmem:[#allocation41_spill] sm:$0xff]  ;;  %v19629_v60 = vld [vmem:[#allocation50_spill] sm:$0xff] }
 0x97d   :  { %v8744_v17 = vpop.f32.mrf.mxu1 }
 0x97f   :  { %v12153_v28 = vpop.f32.mrf.mxu1 }
 0x980   :  { %2098 = vrot.lane.b32.xlu0 %v19418_v29, %s12947_s6  ;;  %v6513_v29 = vmul.f32 %v12881_v58, %v17220_v12  ;;  %v19625_v12 = vld [vmem:[#allocation108_spill] sm:$0xff]  ;;  %v19630_v28 = vpack.c.bf16 %v19628_v35, %v19629_v60  ;;  %v9456_v58 = vpack.c.bf16 %v8744_v17, %v8741_v62 }
 0x984   :  { %2100 = vrot.lane.b32.xlu0 %v19417_v30, %s12947_s6  ;;  %v6583_v30 = vpack.c.bf16 %v6511_v42, %v6510_v3  ;;  %v19634_v3 = vpack.c.bf16 %v17270_v7, %v17262_v50  ;;  %v19635_v42 = vld [vmem:[#allocation111_spill] sm:$0xff] }
 0x985   :  { %v17504_v52 = vpop.xlane.xlu0 %6246 }
 0x988   :  { %2102 = vrot.lane.b32.xlu0 %v19434_v37, %s12947_s6  ;;  %v6512_v37 = vmul.f32 %v12883_v41, %v17212_v31  ;;  %v19631_v31 = vld [vmem:[#allocation100_spill] sm:$0xff] }
 0x989   :  { %v17510_v45 = vpop.xlane.xlu1 %6243  ;;  %v2079_v56 = vpop.permute.xlu0 %2078  ;;  %v19633_v20 = vpack.c.bf16 %v19631_v31, %v19632_v47 }
 0x98a   :  { %12191 = vmatpush3.bf16.msra.mxu0 %v2079_v56  ;;  %v6584_v15 = vpack.c.bf16 %v6513_v29, %v6512_v37  ;;  %v19636_v56 = vld [vmem:[#allocation103_spill] sm:$0xff]  ;;  %v19638_v29 = vld [vmem:[#allocation84_spill] sm:$0xff]  ;;  %12892 = vrcp.f32 %v17510_v45 }
 0x98b   :  { %2096 = vrot.lane.b32.xlu1 %v19268_v25, %s12947_s6  ;;  %12202 = vmatprep.subr.bf16.mxu0 %v19050_v38  ;;  %v19626_v25 = vld [vmem:[#allocation113_spill] sm:$0xff]  ;;  %v19637_v41 = vpack.c.bf16 %v19635_v42, %v19636_v56  ;;  %12894 = vrcp.f32 %v17504_v52 }
 0x98c   :  { %9480 = vrot.lane.b32.xlu0 %v19624_v55, %s12947_s6  ;;  %v19627_v27 = vpack.c.bf16 %v19625_v12, %v19626_v25  ;;  %v12887_v25 = vpop.eup %12886 }
 0x98d   :  { %v2089_v9 = vpop.permute.xlu1 %2088  ;;  %12193 = vmatmul.mubr.msk.bf16.vlgmr.msra.gmra.mxu0 %vm149_vm0, %v6583_v30  ;;  %v19639_v30 = vld [vmem:[#allocation116_spill] sm:$0xff]  ;;  %v12889_v10 = vpop.eup %12888 }
 0x98e   :  { %12197 = vmatpush3.bf16.msra.mxu1 %v2089_v9  ;;  %12204 = vmatprep.mubr.msk.bf16.mxu0 %vm12946_vm1, %v19050_v38  ;;  %v19640_v39 = vpack.c.bf16 %v19638_v29, %v19639_v30  ;;  %v12891_v47 = vpop.eup %12890 }
 0x98f   :  { %9504 = vrot.lane.b32.xlu1 %v19627_v27, %s12953_s16  ;;  %12208 = vmatprep.subr.bf16.mxu1 %v19050_v38  ;;  %v6514_v27 = vmul.f32 %v12885_v14, %v17266_v36  ;;  %v6517_v36 = vmul.f32 %v12891_v47, %v17308_v6 }
 0x990   :  { %9528 = vrot.lane.b32.xlu0 %v19630_v28, %s12952_s30 }
 0x991   :  { %12199 = vmatmul.mubr.msk.bf16.vlgmr.msra.gmra.mxu1 %vm149_vm0, %v6584_v15  ;;  %v6515_v15 = vmul.f32 %v12887_v25, %v17258_v13 }
 0x992   :  { %12210 = vmatprep.mubr.msk.bf16.mxu1 %vm12946_vm1, %v19050_v38 }
 0x993   :  { %9552 = vrot.lane.b32.xlu1 %v19633_v20, %s12951_s29  ;;  %v6585_v28 = vpack.c.bf16 %v6515_v15, %v6514_v27  ;;  %v6516_v20 = vmul.f32 %v12889_v10, %v17312_v51  ;;  %v19642_v10 = vmov 0  }
 0x994   :  { %9576 = vrot.lane.b32.xlu0 %v19634_v3, %s12950_s28 }
 0x995   :  { %v6586_v3 = vpack.c.bf16 %v6517_v36, %v6516_v20 }
 0x997   :  { %9600 = vrot.lane.b32.xlu1 %v9456_v58, %s12949_s27 }
 0x99b   :  { %9482 = vrot.lane.b32.xlu1 %v19637_v41, %s12947_s6 }
 0x99f   :  { %9530 = vrot.lane.b32.xlu1 %v19640_v39, %s12952_s30  ;;  %v12893_v39 = vpop.eup %12892 }
 0x9a3   :  { %9578 = vrot.lane.b32.xlu1 %v19641_v54, %s12950_s28 }
 0x9ae   :  { %v17559_v50 = vpop.f32.mrf.mxu0 }
 0x9b0   :  { %v12158_v7 = vpop.f32.mrf.mxu0 }
 0x9b1   :  { %v12895_v7 = vpop.eup %12894 }
 0x9b2   :  { %v17561_v62 = vpop.f32.mrf.mxu0  ;;  %v17563_v17 = vpop.f32.mrf.mxu1 }
 0x9b3   :  { %v9457_v55 = vpack.c.bf16 %v17561_v62, %v17559_v50 }
 0x9b4   :  { %v12159_v37 = vpop.f32.mrf.mxu0  ;;  %v12164_v9 = vpop.f32.mrf.mxu1 }
 0x9b5   :  { %v6518_v37 = vmul.f32 %v12893_v39, %v17364_v0  ;;  %v6519_v9 = vmul.f32 %v12895_v7, %v17360_v49 }
 0x9b6   :  { %v17567_v12 = vpop.f32.mrf.mxu1 }
 0x9b7   :  { %v9458_v57 = vpack.c.bf16 %v17567_v12, %v17563_v17  ;;  %v6587_v14 = vpack.c.bf16 %v6519_v9, %v6518_v37  ;;  %v19671_v17 = vld [vmem:[#allocation87_spill] sm:$0xff]  ;;  %v19672_v12 = vld [vmem:[#allocation129_spill] sm:$0xff] }
 0x9b8   :  { %v12165_v40 = vpop.f32.mrf.mxu1 }
 0x9ba   :  { %v6253_v22 = vpop.xlane.xlu0 %6252 }
 0x9be   :  { %v6250_v35 = vpop.xlane.xlu1 %6249  ;;  %v2091_v60 = vpop.permute.xlu0 %2090 }
 0x9bf   :  { %12203 = vmatpush3.bf16.msra.mxu0 %v2091_v60 }
 0x9c0   :  { %12214 = vmatprep.subr.bf16.mxu0 %v19050_v38 }
 0x9c2   :  { %v6256_v31 = vpop.xlane.xlu1 %6255  ;;  %12205 = vmatmul.mubr.msk.bf16.vlgmr.msra.gmra.mxu0 %vm149_vm0, %v6585_v28 }
 0x9c3   :  { %12216 = vmatprep.mubr.msk.bf16.mxu0 %vm12946_vm1, %v19050_v38 }
 0x9c6   :  { %v6259_v43 = vpop.xlane.xlu1 %6258 }
 0x9c7   :  { %12896 = vrcp.f32 %v6259_v43 }
 0x9c8   :  { %12898 = vrcp.f32 %v6256_v31 }
 0x9c9   :  { %12900 = vrcp.f32 %v6250_v35 }
 0x9ca   :  { %v2093_v13 = vpop.permute.xlu1 %2092  ;;  %12902 = vrcp.f32 %v6253_v22 }
 0x9cb   :  { %12209 = vmatpush3.bf16.msra.mxu1 %v2093_v13 }
 0x9cc   :  { %12220 = vmatprep.subr.bf16.mxu1 %v19050_v38 }
 0x9ce   :  { %12211 = vmatmul.mubr.msk.bf16.vlgmr.msra.gmra.mxu1 %vm149_vm0, %v6586_v3 }
 0x9cf   :  { %12222 = vmatprep.mubr.msk.bf16.mxu1 %vm12946_vm1, %v19050_v38 }
 0x9d4   :  { %v12897_v25 = vpop.eup %12896 }
 0x9d5   :  { %v12899_v15 = vpop.eup %12898  ;;  %v6523_v0 = vmul.f32 %v12897_v25, %v17424_v2 }
 0x9d6   :  { %v6522_v49 = vmul.f32 %v12899_v15, %v17420_v21  ;;  %v12901_v2 = vpop.eup %12900  ;;  %v12297_v15 = vld [vmem:[%s18652_s7 + $0x74] ss:$8 sps:$4 sm:$0xff]  }
 0x9d7   :  { %v12903_v47 = vpop.eup %12902  ;;  %v6520_v21 = vmul.f32 %v12901_v2, %v17416_v4  ;;  %v12309_v2 = vld [vmem:[%s18652_s7 + $0x34] ss:$8 sps:$4 sm:$0xff]  }
 0x9d8   :  { %v6589_v28 = vpack.c.bf16 %v6523_v0, %v6522_v49  ;;  %v6521_v20 = vmul.f32 %v12903_v47, %v17412_v8  ;;  %v12298_v0 = vld [vmem:[%s18652_s7 + $0x60] ss:$8 sps:$4 sm:$0xff]   ;;  %v12300_v49 = vld [vmem:[%s18652_s7 + $0x64] ss:$8 sps:$4 sm:$0xff]  }
 0x9d9   :  { %v12312_v47 = vld [vmem:[%s18652_s7 + $0x24] ss:$8 sps:$4 sm:$0xff]  }
 0x9da   :  { %v6588_v13 = vpack.c.bf16 %v6521_v20, %v6520_v21  ;;  %v12313_v21 = vld [vmem:[%s18652_s7 + $0x10] ss:$8 sps:$4 sm:$0xff]   ;;  %v12315_v20 = vld [vmem:[%s18652_s7 + $0x14] ss:$8 sps:$4 sm:$0xff]  }
 0x9e3   :  { %v17587_v58 = vpop.f32.mrf.mxu0 }
 0x9e5   :  { %v12170_v42 = vpop.f32.mrf.mxu0 }
 0x9e7   :  { %v17589_v51 = vpop.f32.mrf.mxu0  ;;  %v17591_v6 = vpop.f32.mrf.mxu1 }
 0x9e8   :  { %v9459_v56 = vpack.c.bf16 %v17589_v51, %v17587_v58 }
 0x9e9   :  { %v12171_v41 = vpop.f32.mrf.mxu0  ;;  %v12176_v29 = vpop.f32.mrf.mxu1 }
 0x9eb   :  { %v17595_v30 = vpop.f32.mrf.mxu1 }
 0x9ec   :  { %v9460_v45 = vpack.c.bf16 %v17595_v30, %v17591_v6  ;;  %v19695_v6 = vld [vmem:[#allocation120_spill] sm:$0xff] }
 0x9ed   :  { %v12177_v52 = vpop.f32.mrf.mxu1 }
 0x9ef   :  { %v6262_v54 = vpop.xlane.xlu0 %6261 }
 0x9f3   :  { %v2095_v40 = vpop.permute.xlu0 %2094 }
 0x9f4   :  { %12215 = vmatpush3.bf16.msra.mxu0 %v2095_v40 }
 0x9f5   :  { %12226 = vmatprep.subr.bf16.mxu0 %v19050_v38 }
 0x9f7   :  { %12217 = vmatmul.mubr.msk.bf16.vlgmr.msra.gmra.mxu0 %vm149_vm0, %v6587_v14  ;;  %v2099_v27 = vpop.permute.xlu0 %2098 }
 0x9f8   :  { %12227 = vmatpush3.bf16.msra.mxu0 %v2099_v27  ;;  %12228 = vmatprep.mubr.msk.bf16.mxu0 %vm12946_vm1, %v19050_v38  ;;  %v12295_v27 = vld [vmem:[%s18652_s7 + $0x70] ss:$8 sps:$4 sm:$0xff]  }
 0x9f9   :  { %12238 = vmatprep.subr.bf16.mxu0 %v19050_v38 }
 0x9fb   :  { %v6265_v35 = vpop.xlane.xlu1 %6264  ;;  %v2101_v60 = vpop.permute.xlu0 %2100 }
 0x9fc   :  { %12904 = vrcp.f32 %v6265_v35  ;;  %v12303_v35 = vld [vmem:[%s18652_s7 + $0x54] ss:$8 sps:$4 sm:$0xff]  }
 0x9fd   :  { %12906 = vrcp.f32 %v6262_v54 }
 0x9ff   :  { %v6268_v22 = vpop.xlane.xlu1 %6267  ;;  %12229 = vmatmul.mubr.msk.bf16.vlgmr.msra.gmra.mxu0 %vm149_vm0, %v6589_v28  ;;  %v2103_v31 = vpop.permute.xlu0 %2102  ;;  %v12304_v28 = vld [vmem:[%s18652_s7 + $0x40] ss:$8 sps:$4 sm:$0xff]  }
 0xa00   :  { %12239 = vmatpush3.bf16.msra.mxu0 %v2103_v31  ;;  %12240 = vmatprep.mubr.msk.bf16.mxu0 %vm12946_vm1, %v19050_v38  ;;  %12908 = vrcp.f32 %v6268_v22  ;;  %v12306_v22 = vld [vmem:[%s18652_s7 + $0x44] ss:$8 sps:$4 sm:$0xff]   ;;  %v12307_v31 = vld [vmem:[%s18652_s7 + $0x30] ss:$8 sps:$4 sm:$0xff]  }
 0xa01   :  { %10570 = vmatprep.subr.bf16.mxu0 %v19642_v10 }
 0xa03   :  { %v6271_v43 = vpop.xlane.xlu1 %6270 }
 0xa04   :  { %12910 = vrcp.f32 %v6271_v43  ;;  %v12310_v43 = vld [vmem:[%s18652_s7 + $0x20] ss:$8 sps:$4 sm:$0xff]  }
 0xa07   :  { %v2097_v36 = vpop.permute.xlu1 %2096 }
 0xa08   :  { %12221 = vmatpush3.bf16.msra.mxu1 %v2097_v36  ;;  %v12318_v36 = vld [vmem:[%s18652_s7 + $0x4] ss:$8 sps:$4 sm:$0xff]  }
 0xa09   :  { %12232 = vmatprep.subr.bf16.mxu1 %v19050_v38  ;;  %v12905_v3 = vpop.eup %12904 }
 0xa0a   :  { %v12907_v42 = vpop.eup %12906  ;;  %v6525_v41 = vmul.f32 %v12905_v3, %v17476_v19 }
 0xa0b   :  { %12223 = vmatmul.mubr.msk.bf16.vlgmr.msra.gmra.mxu1 %vm149_vm0, %v6588_v13  ;;  %v6524_v4 = vmul.f32 %v12907_v42, %v17472_v59  ;;  %v12316_v13 = vld [vmem:[%s18652_s7] ss:$8 sps:$4 sm:$0xff]   ;;  %v9505_v58 = vpop.permute.xlu1 %9504 }
 0xa0c   :  { %12233 = vmatpush3.bf16.msra.mxu1 %v2101_v60  ;;  %12234 = vmatprep.mubr.msk.bf16.mxu1 %vm12946_vm1, %v19050_v38  ;;  %v12301_v60 = vld [vmem:[%s18652_s7 + $0x50] ss:$8 sps:$4 sm:$0xff]  }
 0xa0d   :  { %v12909_v29 = vpop.eup %12908  ;;  %v6590_v8 = vpack.c.bf16 %v6525_v41, %v6524_v4  ;;  %9882 = vmatprep.subr.bf16.mxu1 %v12297_v15 }
 0xa0e   :  { %v6526_v39 = vmul.f32 %v12909_v29, %v17480_v61 }
 0xa11   :  { %v12911_v52 = vpop.eup %12910 }
 0xa12   :  { %v6527_v54 = vmul.f32 %v12911_v52, %v17486_v46 }
 0xa13   :  { %12235 = vmatmul.mubr.msk.bf16.vlgmr.msra.gmra.mxu1 %vm149_vm0, %v6590_v8 }
 0xa14   :  { %v6591_v7 = vpack.c.bf16 %v6527_v54, %v6526_v39  ;;  %9914 = vmatprep.mubr.bf16.mxu1 %v19642_v10  ;;  %9883 = vmatpush1.bf16.msra.mxu1 %v12295_v27  ;;  %v19647_v27 = vld [vmem:[#allocation130_spill] sm:$0xff] }
 0xa15   :  { %9884 = vmatprep.subr.bf16.mxu1 %v12300_v49  ;;  %v19650_v49 = vld [vmem:[#allocation102_spill] sm:$0xff] }
 0xa16   :  { %12241 = vmatmul.mubr.msk.bf16.vlgmr.msra.gmra.mxu0 %vm149_vm0, %v6591_v7 }
 0xa18   :  { %v17625_v37 = vpop.f32.mrf.mxu0  ;;  %9885 = vmatpush1.bf16.msra.mxu1 %v12298_v0  ;;  %v19649_v0 = vld [vmem:[#allocation61_spill] sm:$0xff] }
 0xa19   :  { %9886 = vmatprep.subr.bf16.mxu1 %v12303_v35  ;;  %v19651_v35 = vpack.c.bf16 %v19649_v0, %v19650_v49  ;;  %v19674_v0 = vpack.c.bf16 %v17370_v34, %v17368_v1  ;;  %v19675_v49 = vld [vmem:[#allocation2_spill] sm:$0xff]  ;;  %v19681_v1 = vpack.c.bf16 %v17376_v11, %v17372_v16 }
 0xa1a   :  { %v12182_v38 = vpop.f32.mrf.mxu0 }
 0xa1b   :  { %v19643_v38 = vld [vmem:[#allocation46_spill] sm:$0xff] }
 0xa1c   :  { %v17627_v19 = vpop.f32.mrf.mxu0  ;;  %v17629_v9 = vpop.f32.mrf.mxu1  ;;  %9887 = vmatpush1.bf16.msra.mxu1 %v12301_v60  ;;  %v19652_v60 = vld [vmem:[#allocation53_spill] sm:$0xff] }
 0xa1d   :  { %v9461_v59 = vpack.c.bf16 %v17627_v19, %v17625_v37  ;;  %9888 = vmatprep.subr.bf16.mxu1 %v12306_v22  ;;  %v19713_v37 = vld [vmem:[#allocation126_spill] sm:$0xff] }
 0xa1e   :  { %v12183_v61 = vpop.f32.mrf.mxu0  ;;  %v12188_v40 = vpop.f32.mrf.mxu1 }
 0xa1f   :  { %v19644_v61 = vld [vmem:[#allocation115_spill] sm:$0xff] }
 0xa20   :  { %v17633_v46 = vpop.f32.mrf.mxu1  ;;  %9889 = vmatpush1.bf16.msra.mxu1 %v12304_v28  ;;  %v19645_v40 = vpack.c.bf16 %v19643_v38, %v19644_v61  ;;  %v19653_v28 = vld [vmem:[#allocation122_spill] sm:$0xff]  ;;  %v19665_v38 = vld [vmem:[#allocation71_spill] sm:$0xff]  ;;  %v19666_v61 = vld [vmem:[#allocation65_spill] sm:$0xff] }
 0xa21   :  { %v9462_v14 = vpack.c.bf16 %v17633_v46, %v17629_v9  ;;  %9890 = vmatprep.subr.bf16.mxu1 %v12309_v2  ;;  %v19654_v22 = vpack.c.bf16 %v19652_v60, %v19653_v28  ;;  %v19678_v28 = vld [vmem:[#allocation60_spill] sm:$0xff]  ;;  %v19718_v9 = vld [vmem:[#allocation47_spill] sm:$0xff] }
 0xa22   :  { %v12189_v25 = vpop.f32.mrf.mxu1  ;;  %v19719_v46 = vld [vmem:[#allocation123_spill] sm:$0xff] }
 0xa23   :  { %v19646_v25 = vld [vmem:[#allocation64_spill] sm:$0xff] }
 0xa24   :  { %9891 = vmatpush1.bf16.msra.mxu1 %v12307_v31  ;;  %v19648_v15 = vpack.c.bf16 %v19646_v25, %v19647_v27  ;;  %v19655_v31 = vpack.c.bf16 %v17324_v53, %v17320_v18  ;;  %v19668_v25 = vld [vmem:[#allocation63_spill] sm:$0xff] }
 0xa25   :  { %9892 = vmatprep.subr.bf16.mxu1 %v12312_v47  ;;  %v19669_v27 = vld [vmem:[#allocation83_spill] sm:$0xff] }
 0xa28   :  { %9893 = vmatpush1.bf16.msra.mxu1 %v12310_v43 }
 0xa29   :  { %9894 = vmatprep.subr.bf16.mxu1 %v12315_v20 }
 0xa2c   :  { %9895 = vmatpush1.bf16.msra.mxu1 %v12313_v21  ;;  %v19657_v21 = vld [vmem:[#allocation59_spill] sm:$0xff] }
 0xa2d   :  { %9896 = vmatprep.subr.bf16.mxu1 %v12318_v36 }
 0xa30   :  { %9897 = vmatpush1.bf16.msra.mxu1 %v12316_v13 }
 0xa4d   :  { %v17685_v3 = vpop.f32.mrf.mxu0 }
 0xa4f   :  { %v12194_v42 = vpop.f32.mrf.mxu0 }
 0xa50   :  { %v19659_v42 = vld [vmem:[#allocation54_spill] sm:$0xff] }
 0xa51   :  { %v17687_v41 = vpop.f32.mrf.mxu0  ;;  %v9093_v29 = vpop.f32.mrf.mxu1 }
 0xa52   :  { %v9463_v4 = vpack.c.bf16 %v17687_v41, %v17685_v3 }
 0xa53   :  { %v12195_v52 = vpop.f32.mrf.mxu0  ;;  %v12200_v8 = vpop.f32.mrf.mxu1 }
 0xa55   :  { %v9096_v39 = vpop.f32.mrf.mxu1 }
 0xa56   :  { %v9464_v54 = vpack.c.bf16 %v9096_v39, %v9093_v29  ;;  %v19660_v29 = vld [vmem:[#allocation127_spill] sm:$0xff]  ;;  %v19662_v39 = vld [vmem:[#allocation78_spill] sm:$0xff] }
 0xa57   :  { %v12201_v7 = vpop.f32.mrf.mxu1  ;;  %v19661_v52 = vpack.c.bf16 %v19659_v42, %v19660_v29  ;;  %v19685_v42 = vld [vmem:[#allocation77_spill] sm:$0xff]  ;;  %v19686_v29 = vld [vmem:[#allocation38_spill] sm:$0xff] }
 0xa58   :  { %9624 = vrot.lane.b32.xlu0 %v9464_v54, %s12948_s26  ;;  %v19663_v54 = vld [vmem:[#allocation55_spill] sm:$0xff] }
 0xa59   :  { %v19664_v7 = vpack.c.bf16 %v19662_v39, %v19663_v54 }
 0xa5c   :  { %9506 = vrot.lane.b32.xlu0 %v19645_v40, %s12953_s16  ;;  %v19667_v40 = vpack.c.bf16 %v19665_v38, %v19666_v61  ;;  %v19689_v38 = vld [vmem:[#allocation134_spill] sm:$0xff] }
 0xa60   :  { %9554 = vrot.lane.b32.xlu0 %v19648_v15, %s12951_s29  ;;  %v19670_v15 = vpack.c.bf16 %v19668_v25, %v19669_v27 }
 0xa64   :  { %9602 = vrot.lane.b32.xlu0 %v9457_v55, %s12949_s27  ;;  %v19656_v55 = vld [vmem:[#allocation43_spill] sm:$0xff] }
 0xa65   :  { %v19658_v20 = vpack.c.bf16 %v19656_v55, %v19657_v21  ;;  %v19682_v55 = vld [vmem:[#allocation88_spill] sm:$0xff]  ;;  %v19683_v21 = vld [vmem:[#allocation82_spill] sm:$0xff] }
 0xa68   :  { %9484 = vrot.lane.b32.xlu0 %v19651_v35, %s12947_s6  ;;  %v19676_v35 = vld [vmem:[#allocation81_spill] sm:$0xff] }
 0xa69   :  { %v19677_v60 = vpack.c.bf16 %v19675_v49, %v19676_v35  ;;  %v19692_v49 = vld [vmem:[#allocation99_spill] sm:$0xff] }
 0xa6c   :  { %9532 = vrot.lane.b32.xlu0 %v19654_v22, %s12952_s30  ;;  %v19679_v22 = vld [vmem:[#allocation118_spill] sm:$0xff] }
 0xa70   :  { %9580 = vrot.lane.b32.xlu0 %v19655_v31, %s12950_s28  ;;  %v19680_v31 = vpack.c.bf16 %v19678_v28, %v19679_v22 }
 0xa82   :  { %v9137_v2 = vpop.f32.mrf.mxu0 }
 0xa84   :  { %v12206_v43 = vpop.f32.mrf.mxu0 }
 0xa85   :  { %v9481_v43 = vpop.permute.xlu0 %9480 }
 0xa86   :  { %v9140_v47 = vpop.f32.mrf.mxu0 }
 0xa87   :  { %v9465_v50 = vpack.c.bf16 %v9140_v47, %v9137_v2 }
 0xa88   :  { %v12207_v62 = vpop.f32.mrf.mxu0 }
 0xa89   :  { %9626 = vrot.lane.b32.xlu1 %v9465_v50, %s12948_s26  ;;  %v9529_v62 = vpop.permute.xlu0 %9528 }
 0xa8d   :  { %9508 = vrot.lane.b32.xlu1 %v19658_v20, %s12953_s16  ;;  %v19684_v20 = vpack.c.bf16 %v19682_v55, %v19683_v21  ;;  %v9577_v39 = vpop.permute.xlu0 %9576  ;;  %v19700_v21 = vld [vmem:[#allocation136_spill] sm:$0xff] }
 0xa8e   :  { %v9181_v36 = vpop.f32.mrf.mxu1 }
 0xa90   :  { %v12212_v13 = vpop.f32.mrf.mxu1 }
 0xa91   :  { %9556 = vrot.lane.b32.xlu1 %v19661_v52, %s12951_s29  ;;  %v9553_v13 = vpop.permute.xlu1 %9552  ;;  %v19687_v52 = vpack.c.bf16 %v19685_v42, %v19686_v29  ;;  %v19709_v42 = vld [vmem:[#allocation57_spill] sm:$0xff]  ;;  %v19710_v29 = vld [vmem:[#allocation68_spill] sm:$0xff] }
 0xa92   :  { %v9184_v18 = vpop.f32.mrf.mxu1 }
 0xa93   :  { %v9466_v53 = vpack.c.bf16 %v9184_v18, %v9181_v36  ;;  %v9642_v36 = vsel %vm149_vm0, %v19684_v20, %v9481_v43  ;;  %v19698_v43 = vld [vmem:[#allocation117_spill] sm:$0xff]  ;;  %v19701_v20 = vld [vmem:[#allocation131_spill] sm:$0xff] }
 0xa94   :  { %v12213_v8 = vpop.f32.mrf.mxu1  ;;  %v9666_v11 = vsel %vm9664_vm2, %v9642_v36, %v9505_v58  ;;  %v19702_v36 = vpack.c.bf16 %v19700_v21, %v19701_v20 }
 0xa95   :  { %9604 = vrot.lane.b32.xlu1 %v9458_v57, %s12949_s27  ;;  %9628 = vrot.lane.b32.xlu0 %v9466_v53, %s12948_s26  ;;  %v19673_v57 = vpack.c.bf16 %v19671_v17, %v19672_v12  ;;  %v9683_v53 = vsel %vm9681_vm3, %v9666_v11, %v9529_v62 }
 0xa96   :  { %v9700_v54 = vsel %vm9698_vm4, %v9683_v53, %v9553_v13  ;;  %v19712_v53 = vld [vmem:[#allocation98_spill] sm:$0xff] }
 0xa97   :  { %v9717_v25 = vsel %vm9715_vm5, %v9700_v54, %v9577_v39  ;;  %v19714_v19 = vpack.c.bf16 %v19712_v53, %v19713_v37 }
 0xa99   :  { %9486 = vrot.lane.b32.xlu1 %v19664_v7, %s12947_s6  ;;  %9510 = vrot.lane.b32.xlu0 %v19667_v40, %s12953_s16  ;;  %v19688_v7 = vld [vmem:[#allocation133_spill] sm:$0xff]  ;;  %v9601_v40 = vpop.permute.xlu1 %9600 }
 0xa9a   :  { %v19690_v61 = vpack.c.bf16 %v19688_v7, %v19689_v38  ;;  %v9734_v27 = vsel %vm9732_vm6, %v9717_v25, %v9601_v40  ;;  %v19721_v25 = vld [vmem:[#allocation97_spill] sm:$0xff] }
 0xa9d   :  { %9534 = vrot.lane.b32.xlu1 %v19670_v15, %s12952_s30  ;;  %9558 = vrot.lane.b32.xlu0 %v19673_v57, %s12951_s29  ;;  %v9483_v54 = vpop.permute.xlu1 %9482 }
 0xaa1   :  { %9582 = vrot.lane.b32.xlu1 %v19674_v0, %s12950_s28  ;;  %9606 = vrot.lane.b32.xlu0 %v9459_v56, %s12949_s27  ;;  %v19691_v0 = vld [vmem:[#allocation70_spill] sm:$0xff] }
 0xaa2   :  { %v19693_v35 = vpack.c.bf16 %v19691_v0, %v19692_v49  ;;  %v19727_v49 = vld [vmem:[#allocation141_spill] sm:$0xff] }
 0xaa5   :  { %9488 = vrot.lane.b32.xlu0 %v19677_v60, %s12947_s6 }
 0xaa9   :  { %9536 = vrot.lane.b32.xlu0 %v19680_v31, %s12952_s30  ;;  %v19694_v31 = vld [vmem:[#allocation42_spill] sm:$0xff] }
 0xaaa   :  { %v19696_v30 = vpack.c.bf16 %v19694_v31, %v19695_v6 }
 0xaad   :  { %9584 = vrot.lane.b32.xlu0 %v19681_v1, %s12950_s28 }
 0xab7   :  { %v9225_v34 = vpop.f32.mrf.mxu0 }
 0xab9   :  { %v12218_v2 = vpop.f32.mrf.mxu0 }
 0xaba   :  { %v19697_v2 = vld [vmem:[#allocation112_spill] sm:$0xff] }
 0xabb   :  { %v9228_v51 = vpop.f32.mrf.mxu0  ;;  %v19699_v58 = vpack.c.bf16 %v19697_v2, %v19698_v43 }
 0xabc   :  { %v9467_v56 = vpack.c.bf16 %v9228_v51, %v9225_v34 }
 0xabd   :  { %v12219_v47 = vpop.f32.mrf.mxu0 }
 0xabe   :  { %9630 = vrot.lane.b32.xlu1 %v9467_v56, %s12948_s26 }
 0xabf   :  { %v9313_v50 = vpop.f32.mrf.mxu0 }
 0xac1   :  { %v12230_v16 = vpop.f32.mrf.mxu0 }
 0xac2   :  { %9512 = vrot.lane.b32.xlu1 %v19687_v52, %s12953_s16  ;;  %v19707_v16 = vld [vmem:[#allocation51_spill] sm:$0xff]  ;;  %v19711_v52 = vpack.c.bf16 %v19709_v42, %v19710_v29 }
 0xac3   :  { %v9316_v18 = vpop.f32.mrf.mxu0 }
 0xac4   :  { %v9469_v56 = vpack.c.bf16 %v9316_v18, %v9313_v50  ;;  %v19706_v50 = vld [vmem:[#allocation139_spill] sm:$0xff] }
 0xac5   :  { %v12231_v8 = vpop.f32.mrf.mxu0  ;;  %v19708_v11 = vpack.c.bf16 %v19706_v50, %v19707_v16 }
 0xac6   :  { %9560 = vrot.lane.b32.xlu1 %v19690_v61, %s12951_s29  ;;  %v19716_v8 = vld [vmem:[#allocation75_spill] sm:$0xff]  ;;  %v9531_v61 = vpop.permute.xlu1 %9530 }
 0xaca   :  { %9608 = vrot.lane.b32.xlu1 %v9460_v45, %s12949_s27  ;;  %v9625_v15 = vpop.permute.xlu0 %9624 }
 0xacb   :  { %v9751_v17 = vsel %vm9749_vm7, %v9734_v27, %v9625_v15  ;;  %v9269_v12 = vpop.f32.mrf.mxu1  ;;  %v19722_v27 = vld [vmem:[#allocation92_spill] sm:$0xff] }
 0xacc   :  { %9915 = vmatmul.mubr.bf16.vlgmr.msra.gmra.mxu1 %v9751_v17  ;;  %v19723_v15 = vpack.c.bf16 %v19721_v25, %v19722_v27 }
 0xacd   :  { %v12224_v57 = vpop.f32.mrf.mxu1  ;;  %9924 = vmatprep.mubr.bf16.mxu1 %v19642_v10 }
 0xace   :  { %9490 = vrot.lane.b32.xlu1 %v19693_v35, %s12947_s6  ;;  %v9507_v18 = vpop.permute.xlu0 %9506  ;;  %v9645_v17 = vsel %vm149_vm0, %v19723_v15, %v9483_v54  ;;  %v19728_v35 = vld [vmem:[#allocation137_spill] sm:$0xff] }
 0xacf   :  { %v9272_v60 = vpop.f32.mrf.mxu1 }
 0xad0   :  { %v9468_v28 = vpack.c.bf16 %v9272_v60, %v9269_v12  ;;  %v9668_v12 = vsel %vm9664_vm2, %v9645_v17, %v9507_v18  ;;  %v19729_v60 = vpack.c.bf16 %v19727_v49, %v19728_v35  ;;  %v19740_v49 = vld [vmem:[#allocation86_spill] sm:$0xff] }
 0xad1   :  { %v12225_v22 = vpop.f32.mrf.mxu1  ;;  %v9685_v0 = vsel %vm9681_vm3, %v9668_v12, %v9531_v61 }
 0xad2   :  { %9538 = vrot.lane.b32.xlu1 %v19696_v30, %s12952_s30  ;;  %9632 = vrot.lane.b32.xlu0 %v9468_v28, %s12948_s26  ;;  %v9555_v7 = vpop.permute.xlu0 %9554  ;;  %v9579_v28 = vpop.permute.xlu1 %9578 }
 0xad3   :  { %v9357_v45 = vpop.f32.mrf.mxu1  ;;  %v9702_v48 = vsel %vm9698_vm4, %v9685_v0, %v9555_v7  ;;  %v19739_v0 = vld [vmem:[#allocation90_spill] sm:$0xff] }
 0xad4   :  { %v19741_v35 = vpack.c.bf16 %v19739_v0, %v19740_v49 }
 0xad5   :  { %v12236_v1 = vpop.f32.mrf.mxu1 }
 0xad6   :  { %v9401_v34 = vpop.f32.mrf.mxu0  ;;  %9586 = vrot.lane.b32.xlu1 %v9453_v63, %s12950_s28  ;;  %9514 = vrot.lane.b32.xlu0 %v19699_v58, %s12953_s16  ;;  %v19705_v63 = vpack.c.bf16 %v19703_v5, %v19704_v32  ;;  %v9603_v40 = vpop.permute.xlu0 %9602  ;;  %v19731_v1 = vld [vmem:[#allocation69_spill] sm:$0xff]  ;;  %v19733_v5 = vld [vmem:[#allocation143_spill] sm:$0xff]  ;;  %v19734_v32 = vld [vmem:[#allocation138_spill] sm:$0xff] }
 0xad7   :  { %v9360_v51 = vpop.f32.mrf.mxu1 }
 0xad8   :  { %v12242_v47 = vpop.f32.mrf.mxu0  ;;  %v9470_v38 = vpack.c.bf16 %v9360_v51, %v9357_v45  ;;  %v19730_v45 = vld [vmem:[#allocation39_spill] sm:$0xff] }
 0xad9   :  { %v12237_v62 = vpop.f32.mrf.mxu1 }
 0xada   :  { %v9404_v55 = vpop.f32.mrf.mxu0  ;;  %9634 = vrot.lane.b32.xlu1 %v9469_v56, %s12948_s26  ;;  %9562 = vrot.lane.b32.xlu0 %v19702_v36, %s12951_s29  ;;  %v9485_v24 = vpop.permute.xlu0 %9484 }
 0xadb   :  { %v9471_v57 = vpack.c.bf16 %v9404_v55, %v9401_v34  ;;  %v19732_v34 = vpack.c.bf16 %v19730_v45, %v19731_v1 }
 0xadc   :  { %v12243_v13 = vpop.f32.mrf.mxu0 }
 0xadd   :  { %v9648_v2 = vsel %vm149_vm0, %v19732_v34, %v9485_v24 }
 0xade   :  { %9516 = vrot.lane.b32.xlu1 %v19705_v63, %s12953_s16  ;;  %9610 = vrot.lane.b32.xlu0 %v9461_v59, %s12949_s27  ;;  %v19715_v59 = vld [vmem:[#allocation106_spill] sm:$0xff]  ;;  %v9533_v30 = vpop.permute.xlu0 %9532  ;;  %v19735_v63 = vpack.c.bf16 %v19733_v5, %v19734_v32 }
 0xadf   :  { %v19717_v39 = vpack.c.bf16 %v19715_v59, %v19716_v8 }
 0xae2   :  { %9564 = vrot.lane.b32.xlu1 %v19708_v11, %s12951_s29  ;;  %9492 = vrot.lane.b32.xlu0 %v19711_v52, %s12947_s6  ;;  %v9581_v51 = vpop.permute.xlu0 %9580 }
 0xae6   :  { %9612 = vrot.lane.b32.xlu1 %v9462_v14, %s12949_s27  ;;  %9540 = vrot.lane.b32.xlu0 %v19714_v19, %s12952_s30  ;;  %v19720_v14 = vpack.c.bf16 %v19718_v9, %v19719_v46  ;;  %v19737_v9 = vld [vmem:[#allocation37_spill] sm:$0xff] }
 0xaea   :  { %9494 = vrot.lane.b32.xlu1 %v19717_v39, %s12947_s6  ;;  %9588 = vrot.lane.b32.xlu0 %v9454_v23, %s12950_s28  ;;  %v19726_v23 = vpack.c.bf16 %v19724_v44, %v19725_v33 }
 0xaee   :  { %9542 = vrot.lane.b32.xlu1 %v19720_v14, %s12952_s30  ;;  %9636 = vrot.lane.b32.xlu0 %v9470_v38, %s12948_s26  ;;  %v19736_v38 = vld [vmem:[#allocation95_spill] sm:$0xff] }
 0xaef   :  { %v19738_v46 = vpack.c.bf16 %v19736_v38, %v19737_v9  ;;  %v9790_v9 = vld [vmem:[%s18653_s8] sm:$0x3] }
 0xaf2   :  { %9590 = vrot.lane.b32.xlu1 %v9455_v26, %s12950_s28  ;;  %9518 = vrot.lane.b32.xlu0 %v19726_v23, %s12953_s16  ;;  %v9719_v26 = vsel %vm9715_vm5, %v9702_v48, %v9579_v28 }
 0xaf3   :  { %v9736_v22 = vsel %vm9732_vm6, %v9719_v26, %v9603_v40 }
 0xaf6   :  { %9638 = vrot.lane.b32.xlu1 %v9471_v57, %s12948_s26  ;;  %9566 = vrot.lane.b32.xlu0 %v19729_v60, %s12951_s29 }
 0xafa   :  { %9614 = vrot.lane.b32.xlu0 %v9463_v4, %s12949_s27 }
 0xafb   :  { %v9627_v31 = vpop.permute.xlu1 %9626 }
 0xafc   :  { %v9754_v6 = vsel %vm9749_vm7, %v9736_v22, %v9627_v31 }
 0xafd   :  { %9925 = vmatmul.mubr.bf16.gmra.mxu1 %v9754_v6 }
 0xafe   :  { %9934 = vmatprep.mubr.bf16.mxu1 %v19642_v10 }
 0xaff   :  { %v9509_v43 = vpop.permute.xlu1 %9508 }
 0xb00   :  { %v9670_v58 = vsel %vm9664_vm2, %v9648_v2, %v9509_v43 }
 0xb01   :  { %v9687_v41 = vsel %vm9681_vm3, %v9670_v58, %v9533_v30 }
 0xb03   :  { %v9557_v3 = vpop.permute.xlu1 %9556 }
 0xb04   :  { %v9704_v4 = vsel %vm9698_vm4, %v9687_v41, %v9557_v3  ;;  %v19743_v3 = vld [vmem:[#allocation89_spill] sm:$0xff] }
 0xb05   :  { %v9721_v47 = vsel %vm9715_vm5, %v9704_v4, %v9581_v51  ;;  %v19742_v51 = vld [vmem:[#allocation101_spill] sm:$0xff] }
 0xb06   :  { %v19744_v41 = vpack.c.bf16 %v19742_v51, %v19743_v3  ;;  %v12319_v3 = vld [vmem:[%s18654_s11 + $0x38] sm:$0xff]  }
 0xb07   :  { %v9605_v56 = vpop.permute.xlu1 %9604  ;;  %v9629_v62 = vpop.permute.xlu0 %9628  ;;  %10571 = vmatpush1.bf16.msra.mxu0 %v12319_v3  ;;  %v19761_v3 = vld [vmem:[#allocation13_spill] sm:$0xff] }
 0xb08   :  { %v9738_v55 = vsel %vm9732_vm6, %v9721_v47, %v9605_v56  ;;  %10572 = vmatprep.subr.bf16.mxu0 %v19642_v10 }
 0xb09   :  { %v9757_v21 = vsel %vm9749_vm7, %v9738_v55, %v9629_v62 }
 0xb0a   :  { %9935 = vmatmul.mubr.bf16.gmra.mxu1 %v9757_v21 }
 0xb0b   :  { %9944 = vmatprep.mubr.bf16.mxu1 %v19642_v10  ;;  %v9487_v20 = vpop.permute.xlu1 %9486  ;;  %v9511_v36 = vpop.permute.xlu0 %9510 }
 0xb0c   :  { %v9651_v50 = vsel %vm149_vm0, %v19735_v63, %v9487_v20 }
 0xb0d   :  { %v9672_v11 = vsel %vm9664_vm2, %v9651_v50, %v9511_v36 }
 0xb0f   :  { %v9535_v13 = vpop.permute.xlu1 %9534  ;;  %v9559_v16 = vpop.permute.xlu0 %9558 }
 0xb10   :  { %v9689_v42 = vsel %vm9681_vm3, %v9672_v11, %v9535_v13  ;;  %v19746_v11 = vld [vmem:[#allocation52_spill] sm:$0xff] }
 0xb11   :  { %v9706_v52 = vsel %vm9698_vm4, %v9689_v42, %v9559_v16  ;;  %v19745_v16 = vld [vmem:[#allocation76_spill] sm:$0xff] }
 0xb12   :  { %v19747_v42 = vpack.c.bf16 %v19745_v16, %v19746_v11  ;;  %v19755_v16 = vld [vmem:[#allocation10_spill] sm:$0xff] }
 0xb13   :  { %v9583_v29 = vpop.permute.xlu1 %9582  ;;  %v9607_v53 = vpop.permute.xlu0 %9606 }
 0xb14   :  { %v9723_v18 = vsel %vm9715_vm5, %v9706_v52, %v9583_v29 }
 0xb15   :  { %v9740_v37 = vsel %vm9732_vm6, %v9723_v18, %v9607_v53 }
 0xb17   :  { %v9489_v8 = vpop.permute.xlu0 %9488 }
 0xb18   :  { %v9654_v14 = vsel %vm149_vm0, %v19738_v46, %v9489_v8  ;;  %v19748_v46 = vld [vmem:[#allocation35_spill] sm:$0xff] }
 0xb1b   :  { %v9537_v7 = vpop.permute.xlu0 %9536 }
 0xb1f   :  { %v9585_v27 = vpop.permute.xlu0 %9584 }
 0xb30   :  { %v9631_v19 = vpop.permute.xlu1 %9630 }
 0xb31   :  { %v9760_v59 = vsel %vm9749_vm7, %v9740_v37, %v9631_v19 }
 0xb32   :  { %9945 = vmatmul.mubr.bf16.gmra.mxu1 %v9760_v59 }
 0xb33   :  { %9954 = vmatprep.mubr.bf16.mxu1 %v19642_v10 }
 0xb34   :  { %v9513_v39 = vpop.permute.xlu1 %9512 }
 0xb35   :  { %v9674_v61 = vsel %vm9664_vm2, %v9654_v14, %v9513_v39  ;;  %v17947_v14 = vrot.slane %v9790_v9, %v19748_v46 }
 0xb36   :  { %v9691_v25 = vsel %vm9681_vm3, %v9674_v61, %v9537_v7  ;;  %v19749_v61 = vld [vmem:[#allocation36_spill] sm:$0xff] }
 0xb38   :  { %v9561_v54 = vpop.permute.xlu1 %9560 }
 0xb39   :  { %v9708_v15 = vsel %vm9698_vm4, %v9691_v25, %v9561_v54 }
 0xb3a   :  { %v9725_v44 = vsel %vm9715_vm5, %v9708_v15, %v9585_v27 }
 0xb3c   :  { %v9609_v40 = vpop.permute.xlu1 %9608 }
 0xb3d   :  { %v9742_v33 = vsel %vm9732_vm6, %v9725_v44, %v9609_v40  ;;  %v17950_v40 = vrot.slane %v9790_v9, %v19749_v61 }
 0xb40   :  { %v9491_v17 = vpop.permute.xlu1 %9490 }
 0xb41   :  { %v9657_v60 = vsel %vm149_vm0, %v19741_v35, %v9491_v17 }
 0xb44   :  { %v9539_v23 = vpop.permute.xlu1 %9538  ;;  %v9633_v12 = vpop.permute.xlu0 %9632 }
 0xb45   :  { %v9763_v57 = vsel %vm9749_vm7, %v9742_v33, %v9633_v12  ;;  %v19750_v33 = vld [vmem:[#allocation4_spill] sm:$0xff]  ;;  %v19751_v12 = vld [vmem:[#allocation6_spill] sm:$0xff] }
 0xb46   :  { %9955 = vmatmul.mubr.bf16.gmra.mxu1 %v9763_v57 }
 0xb47   :  { %9964 = vmatprep.mubr.bf16.mxu1 %v19642_v10 }
 0xb48   :  { %v9587_v28 = vpop.permute.xlu1 %9586  ;;  %v9515_v48 = vpop.permute.xlu0 %9514 }
 0xb49   :  { %v9676_v24 = vsel %vm9664_vm2, %v9657_v60, %v9515_v48 }
 0xb4a   :  { %v9693_v22 = vsel %vm9681_vm3, %v9676_v24, %v9539_v23  ;;  %v19752_v24 = vld [vmem:[#allocation3_spill] sm:$0xff] }
 0xb4c   :  { %v9635_v26 = vpop.permute.xlu1 %9634  ;;  %v9563_v31 = vpop.permute.xlu0 %9562 }
 0xb4d   :  { %v9710_v6 = vsel %vm9698_vm4, %v9693_v22, %v9563_v31  ;;  %v19753_v31 = vld [vmem:[#allocation5_spill] sm:$0xff] }
 0xb4e   :  { %v9727_v45 = vsel %vm9715_vm5, %v9710_v6, %v9587_v28 }
 0xb50   :  { %v9517_v30 = vpop.permute.xlu1 %9516  ;;  %v9611_v1 = vpop.permute.xlu0 %9610 }
 0xb51   :  { %v9744_v34 = vsel %vm9732_vm6, %v9727_v45, %v9611_v1 }
 0xb52   :  { %v9766_v2 = vsel %vm9749_vm7, %v9744_v34, %v9635_v26 }
 0xb53   :  { %9965 = vmatmul.mubr.bf16.gmra.mxu1 %v9766_v2 }
 0xb54   :  { %v9565_v43 = vpop.permute.xlu1 %9564  ;;  %v9493_v58 = vpop.permute.xlu0 %9492  ;;  %9974 = vmatprep.mubr.bf16.mxu1 %v19642_v10 }
 0xb55   :  { %v9660_v4 = vsel %vm149_vm0, %v19744_v41, %v9493_v58  ;;  %v12320_v41 = vld [vmem:[%s18654_s11 + $0x30] sm:$0xff]  }
 0xb56   :  { %v9678_v47 = vsel %vm9664_vm2, %v9660_v4, %v9517_v30  ;;  %10573 = vmatpush1.bf16.msra.mxu0 %v12320_v41  ;;  %v12321_v4 = vld [vmem:[%s18654_s11 + $0x28] sm:$0xff]  }
 0xb57   :  { %10574 = vmatprep.subr.bf16.mxu0 %v19642_v10 }
 0xb58   :  { %v9613_v56 = vpop.permute.xlu1 %9612  ;;  %v9541_v62 = vpop.permute.xlu0 %9540 }
 0xb59   :  { %v9695_v55 = vsel %vm9681_vm3, %v9678_v47, %v9541_v62  ;;  %v12323_v47 = vld [vmem:[%s18654_s11 + $0x18] sm:$0xff]   ;;  %v12324_v62 = vld [vmem:[%s18654_s11 + $0x10] sm:$0xff]  }
 0xb5a   :  { %v9712_v20 = vsel %vm9698_vm4, %v9695_v55, %v9565_v43  ;;  %10575 = vmatpush1.bf16.msra.mxu0 %v12321_v4  ;;  %v12325_v55 = vld [vmem:[%s18654_s11 + $0x8] sm:$0xff]  }
 0xb5b   :  { %10576 = vmatprep.subr.bf16.mxu0 %v19642_v10 }
 0xb5c   :  { %v9495_v21 = vpop.permute.xlu1 %9494  ;;  %v9589_v36 = vpop.permute.xlu0 %9588 }
 0xb5d   :  { %v9729_v13 = vsel %vm9715_vm5, %v9712_v20, %v9589_v36  ;;  %v9663_v29 = vsel %vm149_vm0, %v19747_v42, %v9495_v21 }
 0xb5e   :  { %v9746_v5 = vsel %vm9732_vm6, %v9729_v13, %v9613_v56  ;;  %v12322_v56 = vld [vmem:[%s18654_s11 + $0x20] sm:$0xff]  }
 0xb5f   :  { %10577 = vmatpush1.bf16.msra.mxu0 %v12322_v56 }
 0xb60   :  { %v9637_v32 = vpop.permute.xlu0 %9636  ;;  %v9543_v63 = vpop.permute.xlu1 %9542  ;;  %10578 = vmatprep.subr.bf16.mxu0 %v19642_v10 }
 0xb61   :  { %v9769_v50 = vsel %vm9749_vm7, %v9746_v5, %v9637_v32  ;;  %v12326_v5 = vld [vmem:[%s18654_s11] sm:$0xff]  }
 0xb62   :  { %9975 = vmatmul.mubr.bf16.gmra.mxu1 %v9769_v50 }
 0xb63   :  { %9984 = vmatprep.mubr.bf16.mxu1 %v19642_v10  ;;  %10579 = vmatpush1.bf16.msra.mxu0 %v12323_v47 }
 0xb64   :  { %v9519_v52 = vpop.permute.xlu0 %9518  ;;  %v9591_v53 = vpop.permute.xlu1 %9590  ;;  %10580 = vmatprep.subr.bf16.mxu0 %v19642_v10 }
 0xb65   :  { %v9680_v18 = vsel %vm9664_vm2, %v9663_v29, %v9519_v52 }
 0xb66   :  { %v9697_v37 = vsel %vm9681_vm3, %v9680_v18, %v9543_v63  ;;  %v19754_v63 = vld [vmem:[#allocation8_spill] sm:$0xff] }
 0xb67   :  { %10581 = vmatpush1.bf16.msra.mxu0 %v12324_v62 }
 0xb68   :  { %v9567_v19 = vpop.permute.xlu0 %9566  ;;  %v9639_v54 = vpop.permute.xlu1 %9638  ;;  %10582 = vmatprep.subr.bf16.mxu0 %v19642_v10 }
 0xb69   :  { %v9714_v59 = vsel %vm9698_vm4, %v9697_v37, %v9567_v19  ;;  %v12327_v37 = vld [vmem:[%s18654_s11 + $0x40] sm:$0xff]  }
 0xb6a   :  { %v9731_v8 = vsel %vm9715_vm5, %v9714_v59, %v9591_v53  ;;  %v19756_v59 = vld [vmem:[#allocation7_spill] sm:$0xff] }
 0xb6b   :  { %10583 = vmatpush1.bf16.msra.mxu0 %v12325_v55 }
 0xb6c   :  { %v9615_v39 = vpop.permute.xlu0 %9614  ;;  %10584 = vmatprep.subr.bf16.mxu0 %v19642_v10 }
 0xb6d   :  { %v9748_v7 = vsel %vm9732_vm6, %v9731_v8, %v9615_v39 }
 0xb6e   :  { %v9772_v38 = vsel %vm9749_vm7, %v9748_v7, %v9639_v54  ;;  %v19757_v54 = vld [vmem:[#allocation9_spill] sm:$0xff] }
 0xb6f   :  { %9985 = vmatmul.mubr.bf16.gmra.mxu1 %v9772_v38  ;;  %10585 = vmatpush1.bf16.msra.mxu0 %v12326_v5 }
 0xb70   :  { %10797 = vmatprep.mubr.bf16.mxu1 %v19642_v10  ;;  %10600 = vmatprep.subr.bf16.mxu0 %v19642_v10 }
 0xb73   :  { %10601 = vmatpush2.bf16.msra.mxu0 %v12327_v37 }
 0xb8c   :  { %v9916_v25 = vpop.f32.mrf.mxu1 }
 0xb8d   :  { %v9917_v27 = vadd.f32 %v9916_v25, %v17947_v14 }
 0xb8e   :  { %v9918_v15 = vpop.f32.mrf.mxu1 }
 0xb8f   :  { %v9919_v17 = vadd.f32 %v9918_v15, %v17950_v40  ;;  %v17958_v57 = vadd.f32 %v9917_v27, %v19751_v12 }
 0xb90   :  { %v9920_v44 = vpop.f32.mrf.mxu1 }
 0xb91   :  { %v17955_v23 = vadd.f32 %v9919_v17, %v19750_v33  ;;  %v9921_v0 = vadd.f32 %v9920_v44, %v17947_v14  ;;  %v10109_v30 = vmul.f32 %v17958_v57, %v17958_v57 }
 0xb92   :  { %v9922_v49 = vpop.f32.mrf.mxu1 }
 0xb93   :  { %v9923_v35 = vadd.f32 %v9922_v49, %v17950_v40  ;;  %v10029_v60 = vsel %vm149_vm0, %v17955_v23, 0.0  ;;  %v10110_v28 = vmul.f32 %v17955_v23, %v17955_v23  ;;  %v17972_v6 = vadd.f32 %v9921_v0, %v19753_v31 }
 0xb94   :  { %v10030_v48 = vadd.f32 %v10029_v60, %v17958_v57 }
 0xb95   :  { %v17968_v26 = vadd.f32 %v9923_v35, %v19752_v24  ;;  %v10141_v22 = vsel %vm149_vm0, %v10110_v28, 0.0  ;;  %v10111_v58 = vmul.f32 %v17972_v6, %v17972_v6  ;;  %v19758_v28 = vld [vmem:[#allocation12_spill] sm:$0xff]  ;;  %v19759_v24 = vld [vmem:[#allocation14_spill] sm:$0xff] }
 0xb96   :  { %10031 = vadd.xlane.f32.xlu0 %v10030_v48  ;;  %v10142_v2 = vadd.f32 %v10141_v22, %v10109_v30 }
 0xb97   :  { %v10033_v45 = vsel %vm149_vm0, %v17968_v26, 0.0  ;;  %v10112_v1 = vmul.f32 %v17968_v26, %v17968_v26 }
 0xb98   :  { %v10034_v34 = vadd.f32 %v10033_v45, %v17972_v6 }
 0xb99   :  { %v10145_v43 = vsel %vm149_vm0, %v10112_v1, 0.0 }
 0xb9a   :  { %10035 = vadd.xlane.f32.xlu1 %v10034_v34  ;;  %10143 = vadd.xlane.f32.xlu0 %v10142_v2  ;;  %v10146_v51 = vadd.f32 %v10145_v43, %v10111_v58  ;;  %v19760_v43 = vld [vmem:[#allocation11_spill] sm:$0xff] }
 0xb9e   :  { %10147 = vadd.xlane.f32.xlu0 %v10146_v51 }
 0xbbd   :  { %v9926_v21 = vpop.f32.mrf.mxu1 }
 0xbbe   :  { %v9927_v20 = vadd.f32 %v9926_v21, %v17947_v14 }
 0xbbf   :  { %v9928_v36 = vpop.f32.mrf.mxu1 }
 0xbc0   :  { %v9929_v13 = vadd.f32 %v9928_v36, %v17950_v40  ;;  %v18021_v11 = vadd.f32 %v9927_v20, %v19755_v16 }
 0xbc1   :  { %v9930_v32 = vpop.f32.mrf.mxu1 }
 0xbc2   :  { %v18018_v50 = vadd.f32 %v9929_v13, %v19754_v63  ;;  %v9931_v42 = vadd.f32 %v9930_v32, %v17947_v14  ;;  %v10113_v38 = vmul.f32 %v18021_v11, %v18021_v11 }
 0xbc3   :  { %v9932_v29 = vpop.f32.mrf.mxu1 }
 0xbc4   :  { %v9933_v52 = vadd.f32 %v9932_v29, %v17950_v40  ;;  %v10037_v18 = vsel %vm149_vm0, %v18018_v50, 0.0  ;;  %v10114_v53 = vmul.f32 %v18018_v50, %v18018_v50  ;;  %v18039_v7 = vadd.f32 %v9931_v42, %v19757_v54  ;;  %v19762_v42 = vld [vmem:[#allocation16_spill] sm:$0xff] }
 0xbc5   :  { %v10038_v19 = vadd.f32 %v10037_v18, %v18021_v11 }
 0xbc6   :  { %v18035_v8 = vadd.f32 %v9933_v52, %v19756_v59  ;;  %v10149_v39 = vsel %vm149_vm0, %v10114_v53, 0.0  ;;  %v10115_v33 = vmul.f32 %v18039_v7, %v18039_v7  ;;  %v19763_v52 = vld [vmem:[#allocation18_spill] sm:$0xff] }
 0xbc7   :  { %10039 = vadd.xlane.f32.xlu1 %v10038_v19  ;;  %v10150_v27 = vadd.f32 %v10149_v39, %v10113_v38  ;;  %v19764_v38 = vld [vmem:[#allocation15_spill] sm:$0xff] }
 0xbc8   :  { %v10041_v9 = vsel %vm149_vm0, %v18035_v8, 0.0  ;;  %v10116_v25 = vmul.f32 %v18035_v8, %v18035_v8 }
 0xbc9   :  { %v10042_v15 = vadd.f32 %v10041_v9, %v18039_v7 }
 0xbca   :  { %v9936_v17 = vpop.f32.mrf.mxu1  ;;  %v10153_v44 = vsel %vm149_vm0, %v10116_v25, 0.0 }
 0xbcb   :  { %10151 = vadd.xlane.f32.xlu1 %v10150_v27  ;;  %10043 = vadd.xlane.f32.xlu0 %v10042_v15  ;;  %v9937_v12 = vadd.f32 %v9936_v17, %v17947_v14  ;;  %v10154_v35 = vadd.f32 %v10153_v44, %v10115_v33  ;;  %v19765_v27 = vld [vmem:[#allocation17_spill] sm:$0xff] }
 0xbcc   :  { %v9938_v0 = vpop.f32.mrf.mxu1 }
 0xbcd   :  { %v9939_v49 = vadd.f32 %v9938_v0, %v17950_v40  ;;  %v18057_v22 = vadd.f32 %v9937_v12, %v19759_v24 }
 0xbce   :  { %v9940_v60 = vpop.f32.mrf.mxu1 }
 0xbcf   :  { %v18054_v48 = vadd.f32 %v9939_v49, %v19758_v28  ;;  %10155 = vadd.xlane.f32.xlu0 %v10154_v35  ;;  %v9941_v31 = vadd.f32 %v9940_v60, %v17947_v14  ;;  %v10117_v4 = vmul.f32 %v18057_v22, %v18057_v22 }
 0xbd0   :  { %v9942_v30 = vpop.f32.mrf.mxu1 }
 0xbd1   :  { %v9943_v45 = vadd.f32 %v9942_v30, %v17950_v40  ;;  %v10045_v1 = vsel %vm149_vm0, %v18054_v48, 0.0  ;;  %v10118_v34 = vmul.f32 %v18054_v48, %v18054_v48  ;;  %v18071_v41 = vadd.f32 %v9941_v31, %v19761_v3 }
 0xbd2   :  { %v10046_v2 = vadd.f32 %v10045_v1, %v18057_v22  ;;  %v19766_v1 = vld [vmem:[#allocation20_spill] sm:$0xff] }
 0xbd3   :  { %v18067_v58 = vadd.f32 %v9943_v45, %v19760_v43  ;;  %v10157_v51 = vsel %vm149_vm0, %v10118_v34, 0.0  ;;  %v10119_v20 = vmul.f32 %v18071_v41, %v18071_v41 }
 0xbd4   :  { %10047 = vadd.xlane.f32.xlu1 %v10046_v2  ;;  %v10158_v62 = vadd.f32 %v10157_v51, %v10117_v4  ;;  %v19767_v2 = vld [vmem:[#allocation22_spill] sm:$0xff] }
 0xbd5   :  { %v10049_v56 = vsel %vm149_vm0, %v18067_v58, 0.0  ;;  %v10120_v47 = vmul.f32 %v18067_v58, %v18067_v58 }
 0xbd6   :  { %v10050_v55 = vadd.f32 %v10049_v56, %v18071_v41 }
 0xbd7   :  { %v10161_v21 = vsel %vm149_vm0, %v10120_v47, 0.0 }
 0xbd8   :  { %10159 = vadd.xlane.f32.xlu1 %v10158_v62  ;;  %10051 = vadd.xlane.f32.xlu0 %v10050_v55  ;;  %v10162_v36 = vadd.f32 %v10161_v21, %v10119_v20  ;;  %v19768_v55 = vld [vmem:[#allocation19_spill] sm:$0xff] }
 0xbdc   :  { %10163 = vadd.xlane.f32.xlu0 %v10162_v36  ;;  %v19769_v36 = vld [vmem:[#allocation21_spill] sm:$0xff] }
 0xbf2   :  { %v9946_v13 = vpop.f32.mrf.mxu1 }
 0xbf3   :  { %v9947_v5 = vadd.f32 %v9946_v13, %v17947_v14 }
 0xbf4   :  { %v9948_v32 = vpop.f32.mrf.mxu1 }
 0xbf5   :  { %v9949_v63 = vadd.f32 %v9948_v32, %v17950_v40  ;;  %v18089_v18 = vadd.f32 %v9947_v5, %v19763_v52 }
 0xbf6   :  { %v9950_v16 = vpop.f32.mrf.mxu1 }
 0xbf7   :  { %v18086_v29 = vadd.f32 %v9949_v63, %v19762_v42  ;;  %v9951_v53 = vadd.f32 %v9950_v16, %v17947_v14  ;;  %v10121_v17 = vmul.f32 %v18089_v18, %v18089_v18 }
 0xbf8   :  { %v9952_v37 = vpop.f32.mrf.mxu1 }
 0xbf9   :  { %v9953_v19 = vadd.f32 %v9952_v37, %v17950_v40  ;;  %v10053_v59 = vsel %vm149_vm0, %v18086_v29, 0.0  ;;  %v10122_v39 = vmul.f32 %v18086_v29, %v18086_v29  ;;  %v18103_v15 = vadd.f32 %v9951_v53, %v19765_v27 }
 0xbfa   :  { %v10054_v54 = vadd.f32 %v10053_v59, %v18089_v18 }
 0xbfb   :  { %v18099_v9 = vadd.f32 %v9953_v19, %v19764_v38  ;;  %v10165_v25 = vsel %vm149_vm0, %v10122_v39, 0.0  ;;  %v10123_v35 = vmul.f32 %v18103_v15, %v18103_v15 }
 0xbfc   :  { %10055 = vadd.xlane.f32.xlu1 %v10054_v54  ;;  %v10166_v12 = vadd.f32 %v10165_v25, %v10121_v17  ;;  %v19770_v25 = vld [vmem:[#allocation24_spill] sm:$0xff]  ;;  %v19771_v17 = vld [vmem:[#allocation26_spill] sm:$0xff] }
 0xbfd   :  { %v10057_v44 = vsel %vm149_vm0, %v18099_v9, 0.0  ;;  %v10124_v33 = vmul.f32 %v18099_v9, %v18099_v9 }
 0xbfe   :  { %v10058_v0 = vadd.f32 %v10057_v44, %v18103_v15 }
 0xbff   :  { %v10169_v49 = vsel %vm149_vm0, %v10124_v33, 0.0 }
 0xc00   :  { %10167 = vadd.xlane.f32.xlu1 %v10166_v12  ;;  %10059 = vadd.xlane.f32.xlu0 %v10058_v0  ;;  %v10170_v60 = vadd.f32 %v10169_v49, %v10123_v35 }
 0xc04   :  { %10171 = vadd.xlane.f32.xlu0 %v10170_v60 }
 0xc06   :  { %v9956_v28 = vpop.f32.mrf.mxu1 }
 0xc07   :  { %v9957_v24 = vadd.f32 %v9956_v28, %v17947_v14  ;;  %v19772_v28 = vld [vmem:[#allocation23_spill] sm:$0xff] }
 0xc08   :  { %v9958_v31 = vpop.f32.mrf.mxu1 }
 0xc09   :  { %v9959_v30 = vadd.f32 %v9958_v31, %v17950_v40  ;;  %v18121_v43 = vadd.f32 %v9957_v24, %v19767_v2 }
 0xc0a   :  { %v9960_v45 = vpop.f32.mrf.mxu1 }
 0xc0b   :  { %v18118_v34 = vadd.f32 %v9959_v30, %v19766_v1  ;;  %v9961_v51 = vadd.f32 %v9960_v45, %v17947_v14  ;;  %v10125_v5 = vmul.f32 %v18121_v43, %v18121_v43  ;;  %v19773_v30 = vld [vmem:[#allocation25_spill] sm:$0xff] }
 0xc0c   :  { %v9962_v3 = vpop.f32.mrf.mxu1 }
 0xc0d   :  { %v9963_v4 = vadd.f32 %v9962_v3, %v17950_v40  ;;  %v10061_v56 = vsel %vm149_vm0, %v18118_v34, 0.0  ;;  %v10126_v47 = vmul.f32 %v18118_v34, %v18118_v34  ;;  %v18135_v13 = vadd.f32 %v9961_v51, %v19769_v36 }
 0xc0e   :  { %v10062_v62 = vadd.f32 %v10061_v56, %v18121_v43 }
 0xc0f   :  { %v18131_v21 = vadd.f32 %v9963_v4, %v19768_v55  ;;  %v10173_v20 = vsel %vm149_vm0, %v10126_v47, 0.0  ;;  %v10127_v37 = vmul.f32 %v18135_v13, %v18135_v13 }
 0xc10   :  { %10063 = vadd.xlane.f32.xlu1 %v10062_v62  ;;  %v10174_v16 = vadd.f32 %v10173_v20, %v10125_v5 }
 0xc11   :  { %v10065_v32 = vsel %vm149_vm0, %v18131_v21, 0.0  ;;  %v10128_v63 = vmul.f32 %v18131_v21, %v18131_v21 }
 0xc12   :  { %v10066_v42 = vadd.f32 %v10065_v32, %v18135_v13 }
 0xc13   :  { %v9966_v52 = vpop.f32.mrf.mxu1  ;;  %v10177_v53 = vsel %vm149_vm0, %v10128_v63, 0.0 }
 0xc14   :  { %10175 = vadd.xlane.f32.xlu1 %v10174_v16  ;;  %10067 = vadd.xlane.f32.xlu0 %v10066_v42  ;;  %v9967_v19 = vadd.f32 %v9966_v52, %v17947_v14  ;;  %v10178_v54 = vadd.f32 %v10177_v53, %v10127_v37 }
 0xc15   :  { %v9968_v59 = vpop.f32.mrf.mxu1 }
 0xc16   :  { %v9969_v39 = vadd.f32 %v9968_v59, %v17950_v40  ;;  %v18153_v44 = vadd.f32 %v9967_v19, %v19771_v17 }
 0xc17   :  { %v9970_v38 = vpop.f32.mrf.mxu1 }
 0xc18   :  { %v18150_v27 = vadd.f32 %v9969_v39, %v19770_v25  ;;  %10179 = vadd.xlane.f32.xlu0 %v10178_v54  ;;  %v9971_v33 = vadd.f32 %v9970_v38, %v17947_v14  ;;  %v10129_v1 = vmul.f32 %v18153_v44, %v18153_v44  ;;  %v19774_v39 = vld [vmem:[#allocation30_spill] sm:$0xff]  ;;  %v19775_v38 = vld [vmem:[#allocation28_spill] sm:$0xff] }
 0xc19   :  { %v9972_v12 = vpop.f32.mrf.mxu1 }
 0xc1a   :  { %v9973_v0 = vadd.f32 %v9972_v12, %v17950_v40  ;;  %v10069_v49 = vsel %vm149_vm0, %v18150_v27, 0.0  ;;  %v10130_v35 = vmul.f32 %v18150_v27, %v18150_v27  ;;  %v18167_v45 = vadd.f32 %v9971_v33, %v19773_v30 }
 0xc1b   :  { %v10070_v60 = vadd.f32 %v10069_v49, %v18153_v44 }
 0xc1c   :  { %v18163_v24 = vadd.f32 %v9973_v0, %v19772_v28  ;;  %v10181_v31 = vsel %vm149_vm0, %v10130_v35, 0.0  ;;  %v10131_v55 = vmul.f32 %v18167_v45, %v18167_v45 }
 0xc1d   :  { %10071 = vadd.xlane.f32.xlu1 %v10070_v60  ;;  %v10182_v4 = vadd.f32 %v10181_v31, %v10129_v1 }
 0xc1e   :  { %v10073_v2 = vsel %vm149_vm0, %v18163_v24, 0.0  ;;  %v10132_v51 = vmul.f32 %v18163_v24, %v18163_v24 }
 0xc1f   :  { %v10032_v3 = vpop.xlane.xlu0 %10031  ;;  %v10074_v56 = vadd.f32 %v10073_v2, %v18167_v45 }
 0xc20   :  { %v18176_v47 = vmul.f32 0.0069444445, %v10032_v3  ;;  %v10185_v62 = vsel %vm149_vm0, %v10132_v51, 0.0  ;;  %v19776_v51 = vld [vmem:[#allocation27_spill] sm:$0xff] }
 0xc21   :  { %10183 = vadd.xlane.f32.xlu1 %v10182_v4  ;;  %10075 = vadd.xlane.f32.xlu0 %v10074_v56  ;;  %v10186_v63 = vadd.f32 %v10185_v62, %v10131_v55  ;;  %v19777_v56 = vld [vmem:[#allocation29_spill] sm:$0xff] }
 0xc22   :  { %v9976_v20 = vpop.f32.mrf.mxu1  ;;  %v10221_v42 = vmul.f32 %v18176_v47, %v18176_v47 }
 0xc23   :  { %v9977_v36 = vadd.f32 %v9976_v20, %v17947_v14  ;;  %v10036_v5 = vpop.xlane.xlu1 %10035  ;;  %v10144_v32 = vpop.xlane.xlu0 %10143 }
 0xc24   :  { %v18182_v16 = vmul.f32 0.0069444445, %v10036_v5  ;;  %v10205_v52 = vmul.f32 0.0069444445, %v10144_v32  ;;  %v9978_v53 = vpop.f32.mrf.mxu1 }
 0xc25   :  { %v9979_v37 = vadd.f32 %v9978_v53, %v17950_v40  ;;  %10187 = vadd.xlane.f32.xlu0 %v10186_v63  ;;  %v18188_v54 = vadd.f32 %v9977_v36, %v19774_v39 }
 0xc26   :  { %v10237_v19 = vsub.f32 %v10205_v52, %v10221_v42  ;;  %v9980_v59 = vpop.f32.mrf.mxu1  ;;  %v10222_v0 = vmul.f32 %v18182_v16, %v18182_v16 }
 0xc27   :  { %v18191_v25 = vadd.f32 %v9979_v37, %v19775_v38  ;;  %v10148_v17 = vpop.xlane.xlu0 %10147  ;;  %v9981_v12 = vadd.f32 %v9980_v59, %v17947_v14  ;;  %v10133_v20 = vmul.f32 %v18188_v54, %v18188_v54 }
 0xc28   :  { %v10253_v33 = vmax.f32 %v10237_v19, 0.0  ;;  %v10206_v49 = vmul.f32 0.0069444445, %v10148_v17  ;;  %v9982_v35 = vpop.f32.mrf.mxu1 }
 0xc29   :  { %v9983_v60 = vadd.f32 %v9982_v35, %v17950_v40  ;;  %v10077_v28 = vsel %vm149_vm0, %v18191_v25, 0.0  ;;  %v10134_v31 = vmul.f32 %v18191_v25, %v18191_v25  ;;  %v18207_v62 = vadd.f32 %v9981_v12, %v19777_v56 }
 0xc2a   :  { %v10301_v30 = vadd.f32 1e-05, %v10253_v33  ;;  %v10238_v1 = vsub.f32 %v10206_v49, %v10222_v0  ;;  %v10078_v2 = vadd.f32 %v10077_v28, %v18188_v54  ;;  %v19778_v33 = vld [vmem:[#allocation32_spill] sm:$0xff]  ;;  %v19779_v0 = vld [vmem:[#allocation34_spill] sm:$0xff] }
 0xc2b   :  { %v18203_v3 = vadd.f32 %v9983_v60, %v19776_v51  ;;  %v10189_v4 = vsel %vm149_vm0, %v10134_v31, 0.0  ;;  %v10135_v37 = vmul.f32 %v18207_v62, %v18207_v62  ;;  %v10269_v51 = vsub.f32 %v17958_v57, %v18176_v47 }
 0xc2c   :  { %12912 = vrsqrt.f32 %v10301_v30  ;;  %v10254_v55 = vmax.f32 %v10238_v1, 0.0  ;;  %10079 = vadd.xlane.f32.xlu1 %v10078_v2  ;;  %v10190_v63 = vadd.f32 %v10189_v4, %v10133_v20  ;;  %v10027_v1 = vld [vmem:[%s18655_s9] sm:$0x3]  ;;  %v19780_v4 = vld [vmem:[#allocation31_spill] sm:$0xff]  ;;  %v19781_v20 = vld [vmem:[#allocation33_spill] sm:$0xff] }
 0xc2d   :  { %v10081_v36 = vsel %vm149_vm0, %v18203_v3, 0.0  ;;  %v10136_v5 = vmul.f32 %v18203_v3, %v18203_v3 }
 0xc2e   :  { %v10302_v32 = vadd.f32 1e-05, %v10254_v55  ;;  %v10082_v42 = vadd.f32 %v10081_v36, %v18207_v62 }
 0xc2f   :  { %v9986_v52 = vpop.f32.mrf.mxu1  ;;  %v10193_v53 = vsel %vm149_vm0, %v10136_v5, 0.0 }
 0xc30   :  { %12914 = vrsqrt.f32 %v10302_v32  ;;  %10191 = vadd.xlane.f32.xlu1 %v10190_v63  ;;  %10083 = vadd.xlane.f32.xlu0 %v10082_v42  ;;  %v9987_v19 = vadd.f32 %v9986_v52, %v17947_v14  ;;  %v10194_v38 = vadd.f32 %v10193_v53, %v10135_v37  ;;  %v18251_v32 = vrot.slane %v10027_v1, %v19748_v46  ;;  %v10028_v52 = vld [vmem:[%s18656_s10] sm:$0x3] }
 0xc31   :  { %v9988_v59 = vpop.f32.mrf.mxu1  ;;  %v18254_v63 = vrot.slane %v10027_v1, %v19749_v61 }
 0xc32   :  { %v9989_v39 = vadd.f32 %v9988_v59, %v17950_v40  ;;  %v18225_v49 = vadd.f32 %v9987_v19, %v19779_v0 }
 0xc33   :  { %v9990_v17 = vpop.f32.mrf.mxu1 }
 0xc34   :  { %v18222_v12 = vadd.f32 %v9989_v39, %v19778_v33  ;;  %10195 = vadd.xlane.f32.xlu0 %v10194_v38  ;;  %v9991_v35 = vadd.f32 %v9990_v17, %v17947_v14  ;;  %v10270_v14 = vsub.f32 %v17955_v23, %v18176_v47  ;;  %v10137_v5 = vmul.f32 %v18225_v49, %v18225_v49 }
 0xc35   :  { %v9992_v60 = vpop.f32.mrf.mxu1  ;;  %v10271_v39 = vsub.f32 %v17972_v6, %v18182_v16  ;;  %v10272_v38 = vsub.f32 %v17968_v26, %v18182_v16 }
 0xc36   :  { %v9993_v28 = vadd.f32 %v9992_v60, %v17950_v40  ;;  %v10085_v31 = vsel %vm149_vm0, %v18222_v12, 0.0  ;;  %v10138_v30 = vmul.f32 %v18222_v12, %v18222_v12  ;;  %v18246_v36 = vadd.f32 %v9991_v35, %v19781_v20 }
 0xc37   :  { %v10086_v2 = vadd.f32 %v10085_v31, %v18225_v49  ;;  %v18272_v35 = vrot.slane %v10028_v52, %v19748_v46  ;;  %v18275_v60 = vrot.slane %v10028_v52, %v19749_v61 }
 0xc38   :  { %v18242_v40 = vadd.f32 %v9993_v28, %v19780_v4  ;;  %v10197_v56 = vsel %vm149_vm0, %v10138_v30, 0.0  ;;  %v10139_v0 = vmul.f32 %v18246_v36, %v18246_v36 }
 0xc39   :  { %v12913_v55 = vpop.eup %12912  ;;  %10087 = vadd.xlane.f32.xlu1 %v10086_v2  ;;  %v10198_v19 = vadd.f32 %v10197_v56, %v10137_v5 }
 0xc3a   :  { %v10089_v47 = vsel %vm149_vm0, %v18242_v40, 0.0  ;;  %v10140_v42 = vmul.f32 %v18242_v40, %v18242_v40  ;;  %v10334_v53 = vmul.f32 %v12913_v55, %v10270_v14  ;;  %v10333_v37 = vmul.f32 %v12913_v55, %v10269_v51 }
 0xc3b   :  { %v10090_v59 = vadd.f32 %v10089_v47, %v18246_v36 }
 0xc3c   :  { %v10201_v17 = vsel %vm149_vm0, %v10140_v42, 0.0  ;;  %v10377_v31 = vmul.f32 %v18254_v63, %v10334_v53  ;;  %v10376_v16 = vmul.f32 %v18251_v32, %v10333_v37 }
 0xc3d   :  { %v12915_v33 = vpop.eup %12914  ;;  %10199 = vadd.xlane.f32.xlu1 %v10198_v19  ;;  %10091 = vadd.xlane.f32.xlu0 %v10090_v59  ;;  %v10202_v1 = vadd.f32 %v10201_v17, %v10139_v0 }
 0xc3e   :  { %v10336_v28 = vmul.f32 %v12915_v33, %v10272_v38  ;;  %v10335_v30 = vmul.f32 %v12915_v33, %v10271_v39  ;;  %v10420_v14 = vadd.f32 %v18275_v60, %v10377_v31  ;;  %v10419_v56 = vadd.f32 %v18272_v35, %v10376_v16 }
 0xc40   :  { %v10379_v2 = vmul.f32 %v18254_v63, %v10336_v28  ;;  %v10378_v51 = vmul.f32 %v18251_v32, %v10335_v30 }
 0xc41   :  { %10203 = vadd.xlane.f32.xlu0 %v10202_v1 }
 0xc42   :  { %v10422_v4 = vadd.f32 %v18275_v60, %v10379_v2  ;;  %v10421_v55 = vadd.f32 %v18272_v35, %v10378_v51 }
 0xc44   :  { %v10452_v20 = vpack.c.bf16 %v10422_v4, %v10420_v14  ;;  %v10451_v5 = vpack.c.bf16 %v10421_v55, %v10419_v56 }
 0xc46   :  { %11149 = vmatprep.mubr.msk.bf16.mxu0 %vm149_vm0, %v10452_v20 }
 0xc47   :  { %10603 = vmatmul.mubr.bf16.vlgmr.msra.gmra.mxu0 %v10451_v5 }
 0xc50   :  { %v10040_v47 = vpop.xlane.xlu1 %10039 }
 0xc51   :  { %v10095_v42 = vmul.f32 0.0069444445, %v10040_v47 }
 0xc53   :  { %v10223_v37 = vmul.f32 %v10095_v42, %v10095_v42 }
 0xc54   :  { %v10152_v52 = vpop.xlane.xlu1 %10151  ;;  %v10044_v53 = vpop.xlane.xlu0 %10043 }
 0xc55   :  { %v10207_v19 = vmul.f32 0.0069444445, %v10152_v52  ;;  %v10096_v59 = vmul.f32 0.0069444445, %v10044_v53 }
 0xc57   :  { %v10239_v39 = vsub.f32 %v10207_v19, %v10223_v37  ;;  %v10224_v33 = vmul.f32 %v10096_v59, %v10096_v59 }
 0xc58   :  { %v10156_v38 = vpop.xlane.xlu0 %10155 }
 0xc59   :  { %v10255_v17 = vmax.f32 %v10239_v39, 0.0  ;;  %v10208_v0 = vmul.f32 0.0069444445, %v10156_v38  ;;  %v10273_v39 = vsub.f32 %v18021_v11, %v10095_v42  ;;  %v10274_v38 = vsub.f32 %v18018_v50, %v10095_v42 }
 0xc5b   :  { %v10303_v28 = vadd.f32 1e-05, %v10255_v17  ;;  %v10240_v31 = vsub.f32 %v10208_v0, %v10224_v33 }
 0xc5d   :  { %12916 = vrsqrt.f32 %v10303_v28  ;;  %v10256_v30 = vmax.f32 %v10240_v31, 0.0  ;;  %v10048_v16 = vpop.xlane.xlu1 %10047  ;;  %v10695_v31 = vld [vmem:[%s18657_s13 + $0x20] sm:$0x33] }
 0xc5e   :  { %v10097_v1 = vmul.f32 0.0069444445, %v10048_v16  ;;  %v11162_v16 = vcombine.high %v10695_v31, %v10695_v31 }
 0xc5f   :  { %v10304_v2 = vadd.f32 1e-05, %v10256_v30 }
 0xc60   :  { %v10225_v4 = vmul.f32 %v10097_v1, %v10097_v1  ;;  %11163 = vmatprep.subr.msk.bf16.mxu1 %vm10758_vm8, %v11162_v16 }
 0xc61   :  { %12918 = vrsqrt.f32 %v10304_v2  ;;  %v10160_v51 = vpop.xlane.xlu1 %10159  ;;  %v10052_v14 = vpop.xlane.xlu0 %10051  ;;  %v10275_v2 = vsub.f32 %v18039_v7, %v10096_v59 }
 0xc62   :  { %v10209_v56 = vmul.f32 0.0069444445, %v10160_v51  ;;  %v10098_v55 = vmul.f32 0.0069444445, %v10052_v14  ;;  %v10276_v51 = vsub.f32 %v18035_v8, %v10096_v59 }
 0xc64   :  { %v10241_v20 = vsub.f32 %v10209_v56, %v10225_v4  ;;  %v10226_v52 = vmul.f32 %v10098_v55, %v10098_v55  ;;  %v10280_v16 = vsub.f32 %v18067_v58, %v10098_v55 }
 0xc65   :  { %v10164_v5 = vpop.xlane.xlu0 %10163 }
 0xc66   :  { %v10257_v47 = vmax.f32 %v10241_v20, 0.0  ;;  %v10210_v53 = vmul.f32 0.0069444445, %v10164_v5 }
 0xc68   :  { %v10305_v37 = vadd.f32 1e-05, %v10257_v47  ;;  %v10242_v19 = vsub.f32 %v10210_v53, %v10226_v52 }
 0xc6a   :  { %v12917_v17 = vpop.eup %12916  ;;  %12920 = vrsqrt.f32 %v10305_v37  ;;  %v10258_v33 = vmax.f32 %v10242_v19, 0.0 }
 0xc6b   :  { %v10338_v0 = vmul.f32 %v12917_v17, %v10274_v38  ;;  %v10337_v28 = vmul.f32 %v12917_v17, %v10273_v39  ;;  %v10277_v38 = vsub.f32 %v18057_v22, %v10097_v1  ;;  %v10278_v17 = vsub.f32 %v18054_v48, %v10097_v1 }
 0xc6c   :  { %v10306_v30 = vadd.f32 1e-05, %v10258_v33 }
 0xc6d   :  { %v10381_v4 = vmul.f32 %v18254_v63, %v10338_v0  ;;  %v10380_v20 = vmul.f32 %v18251_v32, %v10337_v28 }
 0xc6e   :  { %v12919_v14 = vpop.eup %12918  ;;  %12922 = vrsqrt.f32 %v10306_v30  ;;  %v10279_v30 = vsub.f32 %v18071_v41, %v10098_v55 }
 0xc6f   :  { %v10340_v42 = vmul.f32 %v12919_v14, %v10276_v51  ;;  %v10339_v56 = vmul.f32 %v12919_v14, %v10275_v2  ;;  %v10424_v52 = vadd.f32 %v18275_v60, %v10381_v4  ;;  %v10423_v59 = vadd.f32 %v18272_v35, %v10380_v20 }
 0xc71   :  { %v10383_v5 = vmul.f32 %v18254_v63, %v10340_v42  ;;  %v10382_v47 = vmul.f32 %v18251_v32, %v10339_v56 }
 0xc73   :  { %v10426_v53 = vadd.f32 %v18275_v60, %v10383_v5  ;;  %v10425_v37 = vadd.f32 %v18272_v35, %v10382_v47 }
 0xc75   :  { %v10454_v19 = vpack.c.bf16 %v10426_v53, %v10424_v52  ;;  %v10453_v39 = vpack.c.bf16 %v10425_v37, %v10423_v59 }
 0xc77   :  { %v12921_v33 = vpop.eup %12920  ;;  %11150 = vmatprep.mubr.msk.bf16.mxu0 %vm149_vm0, %v10454_v19  ;;  %v11161_v19 = vcombine.low %v10695_v31, %v10695_v31 }
 0xc78   :  { %10611 = vmatmul.mubr.bf16.gmra.mxu0 %v10453_v39  ;;  %v10342_v0 = vmul.f32 %v12921_v33, %v10278_v17  ;;  %v10341_v28 = vmul.f32 %v12921_v33, %v10277_v38 }
 0xc7a   :  { %v10385_v14 = vmul.f32 %v18254_v63, %v10342_v0  ;;  %v10384_v4 = vmul.f32 %v18251_v32, %v10341_v28  ;;  %v10760_v28 = vsel %vm10758_vm8, %v11161_v19, 0 }
 0xc7b   :  { %v12923_v2 = vpop.eup %12922  ;;  %10776 = vmatpush1.bf16.msra.mxu1 %v10760_v28 }
 0xc7c   :  { %v10344_v51 = vmul.f32 %v12923_v2, %v10280_v16  ;;  %v10343_v42 = vmul.f32 %v12923_v2, %v10279_v30  ;;  %v10428_v20 = vadd.f32 %v18275_v60, %v10385_v14  ;;  %v10427_v47 = vadd.f32 %v18272_v35, %v10384_v4  ;;  %v12330_v30 = vld [vmem:[%s18657_s13 + $0x10] ss:$8 sps:$4 sm:$0xff]   ;;  %v12332_v16 = vld [vmem:[%s18657_s13 + $0x14] ss:$8 sps:$4 sm:$0xff]  }
 0xc7d   :  { %10777 = vmatprep.subr.bf16.mxu1 %v12332_v16 }
 0xc7e   :  { %v10387_v56 = vmul.f32 %v18254_v63, %v10344_v51  ;;  %v10386_v1 = vmul.f32 %v18251_v32, %v10343_v42 }
 0xc7f   :  { %10778 = vmatpush1.bf16.msra.mxu1 %v12330_v30 }
 0xc80   :  { %v10430_v5 = vadd.f32 %v18275_v60, %v10387_v56  ;;  %v10429_v52 = vadd.f32 %v18272_v35, %v10386_v1  ;;  %v12333_v1 = vld [vmem:[%s18657_s13] ss:$8 sps:$4 sm:$0xff]  }
 0xc82   :  { %v10456_v55 = vpack.c.bf16 %v10430_v5, %v10428_v20  ;;  %v10455_v53 = vpack.c.bf16 %v10429_v52, %v10427_v47  ;;  %v12335_v20 = vld [vmem:[%s18657_s13 + $0x4] ss:$8 sps:$4 sm:$0xff]  }
 0xc83   :  { %10779 = vmatprep.subr.bf16.mxu1 %v12335_v20 }
 0xc84   :  { %11151 = vmatprep.mubr.msk.bf16.mxu0 %vm149_vm0, %v10456_v55  ;;  %10780 = vmatpush1.bf16.msra.mxu1 %v12333_v1 }
 0xc85   :  { %v10056_v59 = vpop.xlane.xlu1 %10055  ;;  %10619 = vmatmul.mubr.bf16.gmra.mxu0 %v10455_v53 }
 0xc86   :  { %v10099_v37 = vmul.f32 0.0069444445, %v10056_v59 }
 0xc88   :  { %v10227_v17 = vmul.f32 %v10099_v37, %v10099_v37  ;;  %v10282_v28 = vsub.f32 %v18086_v29, %v10099_v37 }
 0xc89   :  { %v10168_v39 = vpop.xlane.xlu1 %10167  ;;  %v10060_v38 = vpop.xlane.xlu0 %10059 }
 0xc8a   :  { %v10211_v33 = vmul.f32 0.0069444445, %v10168_v39  ;;  %v10100_v0 = vmul.f32 0.0069444445, %v10060_v38 }
 0xc8c   :  { %v10243_v2 = vsub.f32 %v10211_v33, %v10227_v17  ;;  %v10228_v14 = vmul.f32 %v10100_v0, %v10100_v0  ;;  %v10281_v33 = vsub.f32 %v18089_v18, %v10099_v37  ;;  %v10283_v16 = vsub.f32 %v18103_v15, %v10100_v0 }
 0xc8d   :  { %v10172_v51 = vpop.xlane.xlu0 %10171 }
 0xc8e   :  { %v10259_v31 = vmax.f32 %v10243_v2, 0.0  ;;  %v10212_v42 = vmul.f32 0.0069444445, %v10172_v51 }
 0xc90   :  { %v10307_v4 = vadd.f32 1e-05, %v10259_v31  ;;  %v10244_v56 = vsub.f32 %v10212_v42, %v10228_v14  ;;  %v10284_v14 = vsub.f32 %v18099_v9, %v10100_v0 }
 0xc92   :  { %12924 = vrsqrt.f32 %v10307_v4  ;;  %v10260_v5 = vmax.f32 %v10244_v56, 0.0 }
 0xc94   :  { %v10308_v47 = vadd.f32 1e-05, %v10260_v5 }
 0xc96   :  { %12926 = vrsqrt.f32 %v10308_v47 }
 0xc99   :  { %v10064_v52 = vpop.xlane.xlu1 %10063 }
 0xc9a   :  { %v10101_v55 = vmul.f32 0.0069444445, %v10064_v52 }
 0xc9c   :  { %v10229_v19 = vmul.f32 %v10101_v55, %v10101_v55 }
 0xc9d   :  { %v10176_v53 = vpop.xlane.xlu1 %10175  ;;  %v10068_v59 = vpop.xlane.xlu0 %10067 }
 0xc9e   :  { %v10213_v39 = vmul.f32 0.0069444445, %v10176_v53  ;;  %v18329_v38 = vmul.f32 0.0069444445, %v10068_v59 }
 0xc9f   :  { %v12925_v17 = vpop.eup %12924 }
 0xca0   :  { %v10245_v30 = vsub.f32 %v10213_v39, %v10229_v19  ;;  %v10346_v51 = vmul.f32 %v12925_v17, %v10282_v28  ;;  %v10345_v31 = vmul.f32 %v12925_v17, %v10281_v33  ;;  %v10230_v4 = vmul.f32 %v18329_v38, %v18329_v38 }
 0xca1   :  { %v10180_v2 = vpop.xlane.xlu0 %10179 }
 0xca2   :  { %v10261_v42 = vmax.f32 %v10245_v30, 0.0  ;;  %v10214_v56 = vmul.f32 0.0069444445, %v10180_v2  ;;  %v10389_v20 = vmul.f32 %v18254_v63, %v10346_v51  ;;  %v10388_v5 = vmul.f32 %v18251_v32, %v10345_v31 }
 0xca3   :  { %v12927_v1 = vpop.eup %12926 }
 0xca4   :  { %v10309_v47 = vadd.f32 1e-05, %v10261_v42  ;;  %v10246_v37 = vsub.f32 %v10214_v56, %v10230_v4  ;;  %v10348_v52 = vmul.f32 %v12927_v1, %v10284_v14  ;;  %v10347_v53 = vmul.f32 %v12927_v1, %v10283_v16 }
 0xca5   :  { %v10432_v33 = vadd.f32 %v18275_v60, %v10389_v20  ;;  %v10431_v2 = vadd.f32 %v18272_v35, %v10388_v5 }
 0xca6   :  { %12928 = vrsqrt.f32 %v10309_v47  ;;  %v10262_v59 = vmax.f32 %v10246_v37, 0.0  ;;  %v10072_v19 = vpop.xlane.xlu1 %10071  ;;  %v10391_v39 = vmul.f32 %v18254_v63, %v10348_v52  ;;  %v10390_v0 = vmul.f32 %v18251_v32, %v10347_v53 }
 0xca7   :  { %v18341_v17 = vmul.f32 0.0069444445, %v10072_v19 }
 0xca8   :  { %v10310_v28 = vadd.f32 1e-05, %v10262_v59  ;;  %v10434_v30 = vadd.f32 %v18275_v60, %v10391_v39  ;;  %v10433_v51 = vadd.f32 %v18272_v35, %v10390_v0  ;;  %v10285_v39 = vsub.f32 %v18121_v43, %v10101_v55 }
 0xca9   :  { %v10231_v4 = vmul.f32 %v18341_v17, %v18341_v17  ;;  %v10286_v0 = vsub.f32 %v18118_v34, %v10101_v55 }
 0xcaa   :  { %12930 = vrsqrt.f32 %v10310_v28  ;;  %v10184_v16 = vpop.xlane.xlu1 %10183  ;;  %v10076_v31 = vpop.xlane.xlu0 %10075  ;;  %v10458_v14 = vpack.c.bf16 %v10434_v30, %v10432_v33  ;;  %v10457_v42 = vpack.c.bf16 %v10433_v51, %v10431_v2 }
 0xcab   :  { %v10215_v56 = vmul.f32 0.0069444445, %v10184_v16  ;;  %v18349_v1 = vmul.f32 0.0069444445, %v10076_v31  ;;  %v10288_v16 = vsub.f32 %v18131_v21, %v18329_v38 }
 0xcac   :  { %11152 = vmatprep.mubr.msk.bf16.mxu0 %vm149_vm0, %v10458_v14 }
 0xcad   :  { %v10247_v20 = vsub.f32 %v10215_v56, %v10231_v4  ;;  %10627 = vmatmul.mubr.bf16.gmra.mxu0 %v10457_v42  ;;  %v10232_v5 = vmul.f32 %v18349_v1, %v18349_v1  ;;  %v10287_v42 = vsub.f32 %v18135_v13, %v18329_v38 }
 0xcae   :  { %v10188_v47 = vpop.xlane.xlu0 %10187 }
 0xcaf   :  { %v10263_v37 = vmax.f32 %v10247_v20, 0.0  ;;  %v10216_v52 = vmul.f32 0.0069444445, %v10188_v47 }
 0xcb1   :  { %v10311_v53 = vadd.f32 1e-05, %v10263_v37  ;;  %v10248_v59 = vsub.f32 %v10216_v52, %v10232_v5 }
 0xcb3   :  { %v12929_v19 = vpop.eup %12928  ;;  %12932 = vrsqrt.f32 %v10311_v53  ;;  %v10264_v33 = vmax.f32 %v10248_v59, 0.0 }
 0xcb4   :  { %v10350_v2 = vmul.f32 %v12929_v19, %v10286_v0  ;;  %v10349_v51 = vmul.f32 %v12929_v19, %v10285_v39 }
 0xcb5   :  { %v10312_v28 = vadd.f32 1e-05, %v10264_v33  ;;  %v10080_v30 = vpop.xlane.xlu1 %10079 }
 0xcb6   :  { %v18358_v31 = vmul.f32 0.0069444445, %v10080_v30  ;;  %v10393_v55 = vmul.f32 %v18254_v63, %v10350_v2  ;;  %v10392_v37 = vmul.f32 %v18251_v32, %v10349_v51 }
 0xcb7   :  { %v12931_v14 = vpop.eup %12930  ;;  %12934 = vrsqrt.f32 %v10312_v28 }
 0xcb8   :  { %v10352_v4 = vmul.f32 %v12931_v14, %v10288_v16  ;;  %v10351_v47 = vmul.f32 %v12931_v14, %v10287_v42  ;;  %v10233_v5 = vmul.f32 %v18358_v31, %v18358_v31  ;;  %v10436_v0 = vadd.f32 %v18275_v60, %v10393_v55 }
 0xcb9   :  { %v10192_v56 = vpop.xlane.xlu1 %10191  ;;  %v10084_v20 = vpop.xlane.xlu0 %10083  ;;  %v10435_v28 = vadd.f32 %v18272_v35, %v10392_v37 }
 0xcba   :  { %v10217_v52 = vmul.f32 0.0069444445, %v10192_v56  ;;  %v18366_v53 = vmul.f32 0.0069444445, %v10084_v20  ;;  %v10395_v59 = vmul.f32 %v18254_v63, %v10352_v4  ;;  %v10394_v19 = vmul.f32 %v18251_v32, %v10351_v47 }
 0xcbb   :  { %v10289_v56 = vsub.f32 %v18153_v44, %v18341_v17  ;;  %v10290_v20 = vsub.f32 %v18150_v27, %v18341_v17 }
 0xcbc   :  { %v10249_v38 = vsub.f32 %v10217_v52, %v10233_v5  ;;  %v10438_v33 = vadd.f32 %v18275_v60, %v10395_v59  ;;  %v10437_v30 = vadd.f32 %v18272_v35, %v10394_v19  ;;  %v10234_v51 = vmul.f32 %v18366_v53, %v18366_v53 }
 0xcbd   :  { %v10196_v39 = vpop.xlane.xlu0 %10195  ;;  %v10292_v19 = vsub.f32 %v18163_v24, %v18349_v1 }
 0xcbe   :  { %v10265_v2 = vmax.f32 %v10249_v38, 0.0  ;;  %v10218_v16 = vmul.f32 0.0069444445, %v10196_v39  ;;  %v10460_v14 = vpack.c.bf16 %v10438_v33, %v10436_v0  ;;  %v10459_v42 = vpack.c.bf16 %v10437_v30, %v10435_v28 }
 0xcbf   :  { %v10291_v0 = vsub.f32 %v18167_v45, %v18349_v1 }
 0xcc0   :  { %v12933_v4 = vpop.eup %12932  ;;  %v10313_v55 = vadd.f32 1e-05, %v10265_v2  ;;  %v10250_v47 = vsub.f32 %v10218_v16, %v10234_v51  ;;  %11153 = vmatprep.mubr.msk.bf16.mxu0 %vm149_vm0, %v10460_v14 }
 0xcc1   :  { %10635 = vmatmul.mubr.bf16.gmra.mxu0 %v10459_v42  ;;  %v10354_v52 = vmul.f32 %v12933_v4, %v10290_v20  ;;  %v10353_v59 = vmul.f32 %v12933_v4, %v10289_v56 }
 0xcc2   :  { %12936 = vrsqrt.f32 %v10313_v55  ;;  %v10266_v37 = vmax.f32 %v10250_v47, 0.0  ;;  %v10088_v5 = vpop.xlane.xlu1 %10087 }
 0xcc3   :  { %v10107_v38 = vmul.f32 0.0069444445, %v10088_v5  ;;  %v10397_v2 = vmul.f32 %v18254_v63, %v10354_v52  ;;  %v10396_v16 = vmul.f32 %v18251_v32, %v10353_v59 }
 0xcc4   :  { %v12935_v39 = vpop.eup %12934  ;;  %v10314_v33 = vadd.f32 1e-05, %v10266_v37 }
 0xcc5   :  { %v10356_v17 = vmul.f32 %v12935_v39, %v10292_v19  ;;  %v10355_v51 = vmul.f32 %v12935_v39, %v10291_v0  ;;  %v10235_v14 = vmul.f32 %v10107_v38, %v10107_v38  ;;  %v10440_v1 = vadd.f32 %v18275_v60, %v10397_v2 }
 0xcc6   :  { %12938 = vrsqrt.f32 %v10314_v33  ;;  %v10200_v28 = vpop.xlane.xlu1 %10199  ;;  %v10092_v30 = vpop.xlane.xlu0 %10091  ;;  %v10439_v5 = vadd.f32 %v18272_v35, %v10396_v16 }
 0xcc7   :  { %v10219_v42 = vmul.f32 0.0069444445, %v10200_v28  ;;  %v10108_v4 = vmul.f32 0.0069444445, %v10092_v30  ;;  %v10399_v56 = vmul.f32 %v18254_v63, %v10356_v17  ;;  %v10398_v20 = vmul.f32 %v18251_v32, %v10355_v51 }
 0xcc8   :  { %v10293_v17 = vsub.f32 %v18188_v54, %v18358_v31  ;;  %v10294_v51 = vsub.f32 %v18191_v25, %v18358_v31 }
 0xcc9   :  { %v10251_v55 = vsub.f32 %v10219_v42, %v10235_v14  ;;  %v10442_v37 = vadd.f32 %v18275_v60, %v10399_v56  ;;  %v10441_v52 = vadd.f32 %v18272_v35, %v10398_v20  ;;  %v10236_v39 = vmul.f32 %v10108_v4, %v10108_v4 }
 0xcca   :  { %v10204_v47 = vpop.xlane.xlu0 %10203  ;;  %v10295_v20 = vsub.f32 %v18207_v62, %v18366_v53 }
 0xccb   :  { %v10267_v19 = vmax.f32 %v10251_v55, 0.0  ;;  %v10220_v59 = vmul.f32 0.0069444445, %v10204_v47  ;;  %v10462_v0 = vpack.c.bf16 %v10442_v37, %v10440_v1  ;;  %v10461_v33 = vpack.c.bf16 %v10441_v52, %v10439_v5 }
 0xccc   :  { %v10296_v55 = vsub.f32 %v18203_v3, %v18366_v53 }
 0xccd   :  { %v10315_v28 = vadd.f32 1e-05, %v10267_v19  ;;  %v10252_v30 = vsub.f32 %v10220_v59, %v10236_v39  ;;  %11154 = vmatprep.mubr.msk.bf16.mxu0 %vm149_vm0, %v10462_v0 }
 0xcce   :  { %10643 = vmatmul.mubr.bf16.gmra.mxu0 %v10461_v33 }
 0xccf   :  { %v12937_v2 = vpop.eup %12936  ;;  %12940 = vrsqrt.f32 %v10315_v28  ;;  %v10268_v16 = vmax.f32 %v10252_v30, 0.0  ;;  %v10297_v30 = vsub.f32 %v18225_v49, %v10107_v38 }
 0xcd0   :  { %v10358_v14 = vmul.f32 %v12937_v2, %v10294_v51  ;;  %v10357_v42 = vmul.f32 %v12937_v2, %v10293_v17  ;;  %v10298_v17 = vsub.f32 %v18222_v12, %v10107_v38 }
 0xcd1   :  { %v10316_v56 = vadd.f32 1e-05, %v10268_v16 }
 0xcd2   :  { %v10401_v31 = vmul.f32 %v18254_v63, %v10358_v14  ;;  %v10400_v5 = vmul.f32 %v18251_v32, %v10357_v42  ;;  %v10299_v14 = vsub.f32 %v18246_v36, %v10108_v4  ;;  %v10300_v42 = vsub.f32 %v18242_v40, %v10108_v4 }
 0xcd3   :  { %v12939_v47 = vpop.eup %12938  ;;  %12942 = vrsqrt.f32 %v10316_v56 }
 0xcd4   :  { %v10360_v1 = vmul.f32 %v12939_v47, %v10296_v55  ;;  %v10359_v37 = vmul.f32 %v12939_v47, %v10295_v20  ;;  %v10444_v39 = vadd.f32 %v18275_v60, %v10401_v31  ;;  %v10443_v0 = vadd.f32 %v18272_v35, %v10400_v5 }
 0xcd6   :  { %v10403_v52 = vmul.f32 %v18254_v63, %v10360_v1  ;;  %v10402_v19 = vmul.f32 %v18251_v32, %v10359_v37 }
 0xcd8   :  { %v10446_v59 = vadd.f32 %v18275_v60, %v10403_v52  ;;  %v10445_v53 = vadd.f32 %v18272_v35, %v10402_v19 }
 0xcda   :  { %v10464_v33 = vpack.c.bf16 %v10446_v59, %v10444_v39  ;;  %v10463_v28 = vpack.c.bf16 %v10445_v53, %v10443_v0  ;;  %v18427_v59 = vld [vmem:[%s18658_s12] ss:$0 sm:$0xff] }
 0xcdc   :  { %v12941_v51 = vpop.eup %12940  ;;  %11155 = vmatprep.mubr.msk.bf16.mxu0 %vm149_vm0, %v10464_v33 }
 0xcdd   :  { %10651 = vmatmul.mubr.bf16.gmra.mxu0 %v10463_v28  ;;  %v10362_v2 = vmul.f32 %v12941_v51, %v10298_v17  ;;  %v10361_v16 = vmul.f32 %v12941_v51, %v10297_v30 }
 0xcdf   :  { %v10405_v55 = vmul.f32 %v18254_v63, %v10362_v2  ;;  %v10404_v1 = vmul.f32 %v18251_v32, %v10361_v16 }
 0xce0   :  { %v12943_v56 = vpop.eup %12942 }
 0xce1   :  { %v10364_v20 = vmul.f32 %v12943_v56, %v10300_v42  ;;  %v10363_v47 = vmul.f32 %v12943_v56, %v10299_v14  ;;  %v10448_v37 = vadd.f32 %v18275_v60, %v10405_v55  ;;  %v10447_v52 = vadd.f32 %v18272_v35, %v10404_v1 }
 0xce3   :  { %v10407_v31 = vmul.f32 %v18254_v63, %v10364_v20  ;;  %v10406_v38 = vmul.f32 %v18251_v32, %v10363_v47 }
 0xce5   :  { %v10450_v5 = vadd.f32 %v18275_v60, %v10407_v31  ;;  %v10449_v19 = vadd.f32 %v18272_v35, %v10406_v38 }
 0xce7   :  { %v10466_v4 = vpack.c.bf16 %v10450_v5, %v10448_v37  ;;  %v10465_v39 = vpack.c.bf16 %v10449_v19, %v10447_v52 }
 0xce9   :  { %11156 = vmatprep.mubr.msk.bf16.mxu0 %vm149_vm0, %v10466_v4 }
 0xcea   :  { %10659 = vmatmul.mubr.bf16.gmra.mxu0 %v10465_v39 }
 0xd07   :  { %v10604_v63 = vpop.f32.mrf.mxu0 }
 0xd08   :  { %v10605_v0 = vadd.f32 %v18427_v59, %v10604_v63 }
 0xd09   :  { %v10606_v32 = vpop.f32.mrf.mxu0 }
 0xd0a   :  { %v10667_v28 = vmax.f32 %v10605_v0, 0.0 }
 0xd0b   :  { %v10607_v53 = vpop.f32.mrf.mxu0 }
 0xd0c   :  { %v10608_v60 = vadd.f32 %v18427_v59, %v10607_v53 }
 0xd0d   :  { %v10609_v33 = vpop.f32.mrf.mxu0 }
 0xd0e   :  { %v10668_v35 = vmax.f32 %v10608_v60, 0.0 }
 0xd10   :  { %v10683_v30 = vpack.c.bf16 %v10668_v35, %v10667_v28 }
 0xd12   :  { %11164 = vmatmul.mubr.msk.bf16.vlgmr.msra.gmra.mxu1 %vm10733_vm9, %v10683_v30 }
 0xd13   :  { %10807 = vmatprep.mubr.bf16.mxu1 %v19642_v10 }
 0xd38   :  { %v10612_v17 = vpop.f32.mrf.mxu0 }
 0xd39   :  { %v10613_v2 = vadd.f32 %v18427_v59, %v10612_v17 }
 0xd3a   :  { %v10614_v51 = vpop.f32.mrf.mxu0 }
 0xd3b   :  { %v10669_v56 = vmax.f32 %v10613_v2, 0.0 }
 0xd3c   :  { %v10615_v16 = vpop.f32.mrf.mxu0 }
 0xd3d   :  { %v10616_v14 = vadd.f32 %v18427_v59, %v10615_v16 }
 0xd3e   :  { %v10617_v42 = vpop.f32.mrf.mxu0 }
 0xd3f   :  { %v10670_v20 = vmax.f32 %v10616_v14, 0.0 }
 0xd41   :  { %v10684_v55 = vpack.c.bf16 %v10670_v20, %v10669_v56 }
 0xd43   :  { %11165 = vmatmul.mubr.msk.bf16.gmra.mxu1 %vm10733_vm9, %v10684_v55 }
 0xd44   :  { %10817 = vmatprep.mubr.bf16.mxu1 %v19642_v10 }
 0xd45   :  { %v10620_v47 = vpop.f32.mrf.mxu0 }
 0xd46   :  { %v10621_v31 = vadd.f32 %v18427_v59, %v10620_v47 }
 0xd47   :  { %v10622_v1 = vpop.f32.mrf.mxu0 }
 0xd48   :  { %v10671_v52 = vmax.f32 %v10621_v31, 0.0 }
 0xd49   :  { %v10623_v38 = vpop.f32.mrf.mxu0 }
 0xd4a   :  { %v10624_v37 = vadd.f32 %v18427_v59, %v10623_v38 }
 0xd4b   :  { %v10625_v5 = vpop.f32.mrf.mxu0 }
 0xd4c   :  { %v10672_v19 = vmax.f32 %v10624_v37, 0.0 }
 0xd4e   :  { %v10685_v4 = vpack.c.bf16 %v10672_v19, %v10671_v52 }
 0xd50   :  { %11166 = vmatmul.mubr.msk.bf16.gmra.mxu1 %vm10733_vm9, %v10685_v4 }
 0xd51   :  { %10827 = vmatprep.mubr.bf16.mxu1 %v19642_v10 }
 0xd6d   :  { %v10628_v39 = vpop.f32.mrf.mxu0 }
 0xd6e   :  { %v10629_v32 = vadd.f32 %v18427_v59, %v10628_v39 }
 0xd6f   :  { %v10630_v63 = vpop.f32.mrf.mxu0 }
 0xd70   :  { %v10673_v33 = vmax.f32 %v10629_v32, 0.0 }
 0xd71   :  { %v10631_v0 = vpop.f32.mrf.mxu0 }
 0xd72   :  { %v10632_v53 = vadd.f32 %v18427_v59, %v10631_v0 }
 0xd73   :  { %v10633_v60 = vpop.f32.mrf.mxu0 }
 0xd74   :  { %v10674_v28 = vmax.f32 %v10632_v53, 0.0 }
 0xd76   :  { %v10686_v35 = vpack.c.bf16 %v10674_v28, %v10673_v33 }
 0xd78   :  { %11167 = vmatmul.mubr.msk.bf16.gmra.mxu1 %vm10733_vm9, %v10686_v35 }
 0xd79   :  { %10837 = vmatprep.mubr.bf16.mxu1 %v19642_v10 }
 0xd81   :  { %v10636_v30 = vpop.f32.mrf.mxu0 }
 0xd82   :  { %v10637_v51 = vadd.f32 %v18427_v59, %v10636_v30 }
 0xd83   :  { %v10638_v17 = vpop.f32.mrf.mxu0 }
 0xd84   :  { %v10675_v42 = vmax.f32 %v10637_v51, 0.0 }
 0xd85   :  { %v10639_v2 = vpop.f32.mrf.mxu0 }
 0xd86   :  { %v10640_v16 = vadd.f32 %v18427_v59, %v10639_v2 }
 0xd87   :  { %v10641_v14 = vpop.f32.mrf.mxu0 }
 0xd88   :  { %v10676_v56 = vmax.f32 %v10640_v16, 0.0 }
 0xd8a   :  { %v10687_v20 = vpack.c.bf16 %v10676_v56, %v10675_v42 }
 0xd8c   :  { %11168 = vmatmul.mubr.msk.bf16.gmra.mxu1 %vm10733_vm9, %v10687_v20  ;;  %v10696_v20 = vld [vmem:[%s18659_s14] sm:$0x3] }
 0xd8d   :  { %10847 = vmatprep.mubr.bf16.mxu1 %v19642_v10 }
 0xd8e   :  { %v10644_v55 = vpop.f32.mrf.mxu0 }
 0xd8f   :  { %v10645_v1 = vadd.f32 %v18427_v59, %v10644_v55  ;;  %v18464_v55 = vrot.slane %v10696_v20, %v19748_v46 }
 0xd90   :  { %v10646_v47 = vpop.f32.mrf.mxu0 }
 0xd91   :  { %v10677_v5 = vmax.f32 %v10645_v1, 0.0 }
 0xd92   :  { %v10647_v31 = vpop.f32.mrf.mxu0 }
 0xd93   :  { %v10648_v38 = vadd.f32 %v18427_v59, %v10647_v31 }
 0xd94   :  { %v10649_v37 = vpop.f32.mrf.mxu0 }
 0xd95   :  { %v10678_v52 = vmax.f32 %v10648_v38, 0.0 }
 0xd97   :  { %v10688_v19 = vpack.c.bf16 %v10678_v52, %v10677_v5 }
 0xd99   :  { %11169 = vmatmul.mubr.msk.bf16.gmra.mxu1 %vm10733_vm9, %v10688_v19 }
 0xd9a   :  { %10857 = vmatprep.mubr.bf16.mxu1 %v19642_v10 }
 0xd9d   :  { %v10652_v4 = vpop.f32.mrf.mxu0 }
 0xd9e   :  { %v10653_v63 = vadd.f32 %v18427_v59, %v10652_v4 }
 0xd9f   :  { %v10654_v39 = vpop.f32.mrf.mxu0 }
 0xda0   :  { %v10679_v60 = vmax.f32 %v10653_v63, 0.0 }
 0xda1   :  { %v10655_v32 = vpop.f32.mrf.mxu0 }
 0xda2   :  { %v10656_v0 = vadd.f32 %v18427_v59, %v10655_v32 }
 0xda3   :  { %v10657_v53 = vpop.f32.mrf.mxu0 }
 0xda4   :  { %v10680_v33 = vmax.f32 %v10656_v0, 0.0 }
 0xda6   :  { %v10689_v28 = vpack.c.bf16 %v10680_v33, %v10679_v60 }
 0xda8   :  { %11170 = vmatmul.mubr.msk.bf16.gmra.mxu1 %vm10733_vm9, %v10689_v28 }
 0xda9   :  { %10867 = vmatprep.mubr.bf16.mxu1 %v19642_v10  ;;  %v18467_v10 = vrot.slane %v10696_v20, %v19749_v61 }
 0xdaa   :  { %v10660_v35 = vpop.f32.mrf.mxu0 }
 0xdab   :  { %v10661_v17 = vadd.f32 %v18427_v59, %v10660_v35 }
 0xdac   :  { %v10662_v30 = vpop.f32.mrf.mxu0 }
 0xdad   :  { %v10681_v14 = vmax.f32 %v10661_v17, 0.0 }
 0xdae   :  { %v10663_v51 = vpop.f32.mrf.mxu0 }
 0xdaf   :  { %v10664_v2 = vadd.f32 %v18427_v59, %v10663_v51 }
 0xdb0   :  { %v10665_v16 = vpop.f32.mrf.mxu0 }
 0xdb1   :  { %v10682_v42 = vmax.f32 %v10664_v2, 0.0 }
 0xdb3   :  { %v10690_v56 = vpack.c.bf16 %v10682_v42, %v10681_v14 }
 0xdb5   :  { %11171 = vmatmul.mubr.msk.bf16.gmra.mxu1 %vm10733_vm9, %v10690_v56 }
 0xdd2   :  { %v10799_v47 = vpop.f32.mrf.mxu1 }
 0xdd3   :  { %v10800_v1 = vadd.f32 %v10799_v47, %v18464_v55 }
 0xdd4   :  { %v10801_v59 = vpop.f32.mrf.mxu1 }
 0xdd5   :  { %v10878_v31 = vadd.f32 %v10800_v1, %v17958_v57  ;;  %v10802_v38 = vadd.f32 %v10801_v59, %v18467_v10 }
 0xdd6   :  { %v10803_v37 = vpop.f32.mrf.mxu1 }
 0xdd7   :  { %10910 = vst [vmem:[%s18660_s15] sm:$0xff] %v10878_v31  ;;  %v10879_v5 = vadd.f32 %v10802_v38, %v17955_v23  ;;  %v10804_v46 = vadd.f32 %v10803_v37, %v18464_v55 }
 0xdd8   :  { %v10805_v52 = vpop.f32.mrf.mxu1 }
 0xdd9   :  { %10911 = vst.msk [vmem:[%s18660_s15 + $0x8] sm:$0xff] %vm149_vm0, %v10879_v5  ;;  %v10880_v61 = vadd.f32 %v10804_v46, %v17972_v6  ;;  %v10806_v57 = vadd.f32 %v10805_v52, %v18467_v10 }
 0xddb   :  { %10912 = vst [vmem:[%s18660_s15 + $0x10] sm:$0xff] %v10880_v61  ;;  %v10881_v19 = vadd.f32 %v10806_v57, %v17968_v26 }
 0xddd   :  { %10913 = vst.msk [vmem:[%s18660_s15 + $0x18] sm:$0xff] %vm149_vm0, %v10881_v19 }
 0xe03   :  { %v10809_v23 = vpop.f32.mrf.mxu1 }
 0xe04   :  { %v10810_v4 = vadd.f32 %v10809_v23, %v18464_v55 }
 0xe05   :  { %v10811_v39 = vpop.f32.mrf.mxu1 }
 0xe06   :  { %v10882_v63 = vadd.f32 %v10810_v4, %v18021_v11  ;;  %v10812_v6 = vadd.f32 %v10811_v39, %v18467_v10 }
 0xe07   :  { %v10813_v32 = vpop.f32.mrf.mxu1 }
 0xe08   :  { %10914 = vst [vmem:[%s18660_s15 + $0x20] sm:$0xff] %v10882_v63  ;;  %v10883_v26 = vadd.f32 %v10812_v6, %v18018_v50  ;;  %v10814_v0 = vadd.f32 %v10813_v32, %v18464_v55 }
 0xe09   :  { %v10815_v53 = vpop.f32.mrf.mxu1 }
 0xe0a   :  { %10915 = vst.msk [vmem:[%s18660_s15 + $0x28] sm:$0xff] %vm149_vm0, %v10883_v26  ;;  %v10884_v60 = vadd.f32 %v10814_v0, %v18039_v7  ;;  %v10816_v11 = vadd.f32 %v10815_v53, %v18467_v10 }
 0xe0c   :  { %10916 = vst [vmem:[%s18660_s15 + $0x30] sm:$0xff] %v10884_v60  ;;  %v10885_v33 = vadd.f32 %v10816_v11, %v18035_v8 }
 0xe0e   :  { %10917 = vst.msk [vmem:[%s18660_s15 + $0x38] sm:$0xff] %vm149_vm0, %v10885_v33 }
 0xe10   :  { %v10819_v50 = vpop.f32.mrf.mxu1 }
 0xe11   :  { %v10820_v28 = vadd.f32 %v10819_v50, %v18464_v55 }
 0xe12   :  { %v10821_v35 = vpop.f32.mrf.mxu1 }
 0xe13   :  { %v10886_v30 = vadd.f32 %v10820_v28, %v18057_v22  ;;  %v10822_v7 = vadd.f32 %v10821_v35, %v18467_v10 }
 0xe14   :  { %v10823_v17 = vpop.f32.mrf.mxu1 }
 0xe15   :  { %10918 = vst [vmem:[%s18660_s15 + $0x40] sm:$0xff] %v10886_v30  ;;  %v10887_v8 = vadd.f32 %v10822_v7, %v18054_v48  ;;  %v10824_v51 = vadd.f32 %v10823_v17, %v18464_v55 }
 0xe16   :  { %v10825_v2 = vpop.f32.mrf.mxu1 }
 0xe17   :  { %10919 = vst.msk [vmem:[%s18660_s15 + $0x48] sm:$0xff] %vm149_vm0, %v10887_v8  ;;  %v10888_v16 = vadd.f32 %v10824_v51, %v18071_v41  ;;  %v10826_v22 = vadd.f32 %v10825_v2, %v18467_v10 }
 0xe19   :  { %10920 = vst [vmem:[%s18660_s15 + $0x50] sm:$0xff] %v10888_v16  ;;  %v10889_v14 = vadd.f32 %v10826_v22, %v18067_v58 }
 0xe1b   :  { %10921 = vst.msk [vmem:[%s18660_s15 + $0x58] sm:$0xff] %vm149_vm0, %v10889_v14 }
 0xe38   :  { %v10829_v48 = vpop.f32.mrf.mxu1 }
 0xe39   :  { %v10830_v42 = vadd.f32 %v10829_v48, %v18464_v55 }
 0xe3a   :  { %v10831_v56 = vpop.f32.mrf.mxu1 }
 0xe3b   :  { %v10890_v20 = vadd.f32 %v10830_v42, %v18089_v18  ;;  %v10832_v41 = vadd.f32 %v10831_v56, %v18467_v10 }
 0xe3c   :  { %v10833_v47 = vpop.f32.mrf.mxu1 }
 0xe3d   :  { %10922 = vst [vmem:[%s18660_s15 + $0x60] sm:$0xff] %v10890_v20  ;;  %v10891_v58 = vadd.f32 %v10832_v41, %v18086_v29  ;;  %v10834_v1 = vadd.f32 %v10833_v47, %v18464_v55 }
 0xe3e   :  { %v10835_v59 = vpop.f32.mrf.mxu1 }
 0xe3f   :  { %10923 = vst.msk [vmem:[%s18660_s15 + $0x68] sm:$0xff] %vm149_vm0, %v10891_v58  ;;  %v10892_v31 = vadd.f32 %v10834_v1, %v18103_v15  ;;  %v10836_v18 = vadd.f32 %v10835_v59, %v18467_v10 }
 0xe41   :  { %10924 = vst [vmem:[%s18660_s15 + $0x70] sm:$0xff] %v10892_v31  ;;  %v10893_v38 = vadd.f32 %v10836_v18, %v18099_v9 }
 0xe43   :  { %10925 = vst.msk [vmem:[%s18660_s15 + $0x78] sm:$0xff] %vm149_vm0, %v10893_v38 }
 0xe4c   :  { %v10839_v29 = vpop.f32.mrf.mxu1 }
 0xe4d   :  { %v10840_v37 = vadd.f32 %v10839_v29, %v18464_v55 }
 0xe4e   :  { %v10841_v5 = vpop.f32.mrf.mxu1 }
 0xe4f   :  { %v10894_v46 = vadd.f32 %v10840_v37, %v18121_v43  ;;  %v10842_v15 = vadd.f32 %v10841_v5, %v18467_v10 }
 0xe50   :  { %v10843_v52 = vpop.f32.mrf.mxu1 }
 0xe51   :  { %10926 = vst [vmem:[%s18660_s15 + $0x80] sm:$0xff] %v10894_v46  ;;  %v10895_v9 = vadd.f32 %v10842_v15, %v18118_v34  ;;  %v10844_v61 = vadd.f32 %v10843_v52, %v18464_v55 }
 0xe52   :  { %v10845_v57 = vpop.f32.mrf.mxu1 }
 0xe53   :  { %10927 = vst.msk [vmem:[%s18660_s15 + $0x88] sm:$0xff] %vm149_vm0, %v10895_v9  ;;  %v10896_v19 = vadd.f32 %v10844_v61, %v18135_v13  ;;  %v10846_v43 = vadd.f32 %v10845_v57, %v18467_v10 }
 0xe55   :  { %10928 = vst [vmem:[%s18660_s15 + $0x90] sm:$0xff] %v10896_v19  ;;  %v10897_v23 = vadd.f32 %v10846_v43, %v18131_v21 }
 0xe57   :  { %10929 = vst.msk [vmem:[%s18660_s15 + $0x98] sm:$0xff] %vm149_vm0, %v10897_v23 }
 0xe59   :  { %v10849_v34 = vpop.f32.mrf.mxu1 }
 0xe5a   :  { %v10850_v4 = vadd.f32 %v10849_v34, %v18464_v55 }
 0xe5b   :  { %v10851_v39 = vpop.f32.mrf.mxu1 }
 0xe5c   :  { %v10898_v63 = vadd.f32 %v10850_v4, %v18153_v44  ;;  %v10852_v13 = vadd.f32 %v10851_v39, %v18467_v10 }
 0xe5d   :  { %v10853_v6 = vpop.f32.mrf.mxu1 }
 0xe5e   :  { %10930 = vst [vmem:[%s18660_s15 + $0xa0] sm:$0xff] %v10898_v63  ;;  %v10899_v21 = vadd.f32 %v10852_v13, %v18150_v27  ;;  %v10854_v32 = vadd.f32 %v10853_v6, %v18464_v55 }
 0xe5f   :  { %v10855_v26 = vpop.f32.mrf.mxu1 }
 0xe60   :  { %10931 = vst.msk [vmem:[%s18660_s15 + $0xa8] sm:$0xff] %vm149_vm0, %v10899_v21  ;;  %v10900_v0 = vadd.f32 %v10854_v32, %v18167_v45  ;;  %v10856_v44 = vadd.f32 %v10855_v26, %v18467_v10 }
 0xe62   :  { %10932 = vst [vmem:[%s18660_s15 + $0xb0] sm:$0xff] %v10900_v0  ;;  %v10901_v53 = vadd.f32 %v10856_v44, %v18163_v24 }
 0xe64   :  { %10933 = vst.msk [vmem:[%s18660_s15 + $0xb8] sm:$0xff] %vm149_vm0, %v10901_v53 }
 0xe68   :  { %v10859_v27 = vpop.f32.mrf.mxu1 }
 0xe69   :  { %v10860_v60 = vadd.f32 %v10859_v27, %v18464_v55 }
 0xe6a   :  { %v10861_v11 = vpop.f32.mrf.mxu1 }
 0xe6b   :  { %v10902_v33 = vadd.f32 %v10860_v60, %v18188_v54  ;;  %v10862_v45 = vadd.f32 %v10861_v11, %v18467_v10 }
 0xe6c   :  { %v10863_v50 = vpop.f32.mrf.mxu1 }
 0xe6d   :  { %10934 = vst [vmem:[%s18660_s15 + $0xc0] sm:$0xff] %v10902_v33  ;;  %v10903_v24 = vadd.f32 %v10862_v45, %v18191_v25  ;;  %v10864_v28 = vadd.f32 %v10863_v50, %v18464_v55 }
 0xe6e   :  { %v10865_v35 = vpop.f32.mrf.mxu1 }
 0xe6f   :  { %10935 = vst.msk [vmem:[%s18660_s15 + $0xc8] sm:$0xff] %vm149_vm0, %v10903_v24  ;;  %v10904_v30 = vadd.f32 %v10864_v28, %v18207_v62  ;;  %v10866_v54 = vadd.f32 %v10865_v35, %v18467_v10 }
 0xe71   :  { %10936 = vst [vmem:[%s18660_s15 + $0xd0] sm:$0xff] %v10904_v30  ;;  %v10905_v7 = vadd.f32 %v10866_v54, %v18203_v3 }
 0xe73   :  { %10937 = vst.msk [vmem:[%s18660_s15 + $0xd8] sm:$0xff] %vm149_vm0, %v10905_v7 }
 0xe75   :  { %v10869_v25 = vpop.f32.mrf.mxu1 }
 0xe76   :  { %v10870_v17 = vadd.f32 %v10869_v25, %v18464_v55 }
 0xe77   :  { %v10871_v8 = vpop.f32.mrf.mxu1 }
 0xe78   :  { %v10906_v51 = vadd.f32 %v10870_v17, %v18225_v49  ;;  %v10872_v62 = vadd.f32 %v10871_v8, %v18467_v10 }
 0xe79   :  { %v10873_v2 = vpop.f32.mrf.mxu1 }
 0xe7a   :  { %10938 = vst [vmem:[%s18660_s15 + $0xe0] sm:$0xff] %v10906_v51  ;;  %v10907_v3 = vadd.f32 %v10872_v62, %v18222_v12  ;;  %v10874_v16 = vadd.f32 %v10873_v2, %v18464_v55 }
 0xe7b   :  { %v10875_v22 = vpop.f32.mrf.mxu1 }
 0xe7c   :  { %10939 = vst.msk [vmem:[%s18660_s15 + $0xe8] sm:$0xff] %vm149_vm0, %v10907_v3  ;;  %v10908_v14 = vadd.f32 %v10874_v16, %v18246_v36  ;;  %v10876_v49 = vadd.f32 %v10875_v22, %v18467_v10 }
 0xe7e   :  { %10940 = vst [vmem:[%s18660_s15 + $0xf0] sm:$0xff] %v10908_v14  ;;  %v10909_v48 = vadd.f32 %v10876_v49, %v18242_v40 }
 0xe80   :  { %10941 = vst.msk [vmem:[%s18660_s15 + $0xf8] sm:$0xff] %vm149_vm0, %v10909_v48 }

</bundles_post_ra>
